<compile_context>
chip_gen: v6e
topology: v6e:2x2x1
jax: 0.10.0
libtpu: 0.0.40
codegen_flags: <defaults>
</compile_context>

<pallas_src>
import functools
import math

import jax
import jax.numpy as jnp
from jax.experimental import pallas as pl
from jax.experimental.pallas import tpu as pltpu

_EPS_LN = 1e-5
_EPS_BN = 1e-5


# ----------------------------- small helpers (kernel + reference) ------------
def _sign(x):
    # torch.sign semantics: sign(0) == 0
    one = jnp.ones_like(x)
    return jnp.where(x > 0, one, jnp.where(x < 0, -one, jnp.zeros_like(x)))


def _gelu(x):
    # exact (erf-based) GELU, matching F.gelu default.
    # TODO(synk): tanh-approx GELU would move to the EUP slot but risks sign flips
    #             at the z3 residual; kept exact for parity with torch.
    return 0.5 * x * (1.0 + jax.lax.erf(x * (1.0 / math.sqrt(2.0))))


def _bn(z, bn):
    # reference-only: bn rows = (gamma, beta, running_mean, running_var)
    g, b, m, v = bn[0, :], bn[1, :], bn[2, :], bn[3, :]
    return (z - m) * jax.lax.rsqrt(v + _EPS_BN) * g + b


# ----------------------------- fused Pallas kernel ----------------------------
def _bnn_block_kernel(x_ref, mask_ref, ln_ref, w1_ref, bn1_ref, w2_ref, bn2_ref,
                      w3_ref, bn3_ref, w4_ref, bn4_ref, w5_ref, bn5_ref,
                      out_ref, pad_ref, *, H, W, pad_rows, binarize_first):
    """One full BNN block for one image ([HW, C] rows)."""
    HW = H * W
    P = pad_rows
    x = x_ref[...]                                           # [HW, C]  f32

    # ---- PreNorm: LayerNorm over channels -------------------------------------
    mu = jnp.mean(x, axis=-1, keepdims=True)
    xc = x - mu
    var = jnp.mean(xc * xc, axis=-1, keepdims=True)
    ln = ln_ref[...]
    y = xc * jax.lax.rsqrt(var + _EPS_LN) * ln[0, :] + ln[1, :]

    # ---- BinaryConv2d_Fusion_Increase #1 (1x1, C -> 2C) ------------------------
    if binarize_first:
        a1 = _sign(y).astype(jnp.bfloat16)
        w1 = w1_ref[...]
    else:
        a1 = y                                               # cin == 3: not binarized
        w1 = w1_ref[...].astype(jnp.float32)
    bn1 = bn1_ref[...]
    z1 = jnp.dot(a1, w1, preferred_element_type=jnp.float32)
    z1 = jnp.clip(z1 * bn1[0, :] + bn1[1, :], -1.0, 1.0)     # folded BN + Hardtanh

    # ---- BinaryConv2d_Fusion_Increase #2 (1x1, 2C -> 4C) + GELU ---------------
    a2 = _sign(z1).astype(jnp.bfloat16)
    bn2 = bn2_ref[...]
    z2 = jnp.dot(a2, w2_ref[...], preferred_element_type=jnp.float32)
    z2 = jnp.clip(z2 * bn2[0, :] + bn2[1, :], -1.0, 1.0)
    z2 = _gelu(z2)                                           # [HW, 4C]
    c4 = z2.shape[-1]

    # ---- FF_BICONV3: grouped 3x3 binconv as 9 accumulating per-tap matmuls -----
    # sign(z2) is written once into a zero-padded slab (P >= W+1 halo rows above
    # and below, sublane aligned).  Each tap reads a shifted full-height window;
    # dy out-of-image reads hit the zero halo (sign(0)=0 keeps padding exact),
    # dx out-of-image reads are zeroed by the [HW,2] column mask.
    s2 = _sign(z2)                                           # f32, values in {-1,0,1}
    pad_ref[0:P, :] = jnp.zeros((P, c4), jnp.float32)        # top halo only
    pad_ref[P + HW:2 * P + HW, :] = jnp.zeros((P, c4), jnp.float32)  # bottom halo only
    pad_ref[P:P + HW, :] = s2

    m_left = mask_ref[:, 0:1]                                # valid when reading col-1
    m_right = mask_ref[:, 1:2]                               # valid when reading col+1

    acc = jnp.zeros((HW, c4), jnp.float32)
    for dy in (-1, 0, 1):
        for dx in (-1, 0, 1):
            t = (dy + 1) * 3 + (dx + 1)                      # tap index, row-major
            start = P + dy * W + dx                          # always > 0 (P >= W+1)
            shifted = pad_ref[start:start + HW, :]           # [HW, 4C] f32
            if dx == -1:
                shifted = shifted * m_left
            elif dx == 1:
                shifted = shifted * m_right
            acc = acc + jnp.dot(shifted.astype(jnp.bfloat16), w3_ref[t],
                                preferred_element_type=jnp.float32)

    bn3 = bn3_ref[...]
    z3 = jnp.clip(acc * bn3[0, :] + bn3[1, :], -1.0, 1.0)
    z3 = _gelu(z3 + z2)                                      # residual, then GELU

    # ---- BinaryConv2d_Fusion_Decrease #1 (1x1, 4C -> 2C) ----------------------
    a4 = _sign(z3).astype(jnp.bfloat16)
    bn4 = bn4_ref[...]
    z4 = jnp.dot(a4, w4_ref[...], preferred_element_type=jnp.float32)
    z4 = jnp.clip(z4 * bn4[0, :] + bn4[1, :], -1.0, 1.0)

    # ---- BinaryConv2d_Fusion_Decrease #2 (1x1, 2C -> C) -----------------------
    a5 = _sign(z4).astype(jnp.bfloat16)
    bn5 = bn5_ref[...]
    z5 = jnp.dot(a5, w5_ref[...], preferred_element_type=jnp.float32)
    z5 = jnp.clip(z5 * bn5[0, :] + bn5[1, :], -1.0, 1.0)

    out_ref[...] = z5 + x                                    # BNN_block residual


# ----------------------------- pallas_call wrapper ----------------------------
def _vmem_limit_bytes(HW, c, c2, c4, P):
    f32, bf16 = 4, 2
    est = (
        2 * 2 * HW * c * f32                                   # x in + out (double buffered)
        + (2 * P + HW) * c4 * f32                              # padded sign(z2) scratch
        + 8 * HW * c4 * f32                                    # live activation working set
        + 2 * bf16 * (c * c2 + c2 * c4 + 9 * c4 * c4 + c4 * c2 + c2 * c)  # weights
        + 2 * f32 * (2 * (c + 2 * c2 + 2 * c4) + 2 * HW)       # ln / bn / mask
    )
    return min(56 * 1024 * 1024, max(32 * 1024 * 1024, int(est * 1.25)))


def _block_call(x_flat, mask, p, *, B, H, W):
    n, c = x_flat.shape
    HW = H * W
    assert n == B * HW
    assert HW % 8 == 0, "H*W must be a multiple of 8 for the row BlockSpec"
    c2 = p["w1"].shape[1]
    c4 = p["w2"].shape[1]
    P = ((W + 1 + 7) // 8) * 8                                 # halo rows, >= W+1, aligned

    kernel = functools.partial(_bnn_block_kernel, H=H, W=W, pad_rows=P,
                               binarize_first=(c != 3))

    def row(k):
        return pl.BlockSpec((HW, k), lambda i: (i, 0))

    def full(a):
        nd = a.ndim
        return pl.BlockSpec(a.shape, lambda i, _nd=nd: (0,) * _nd)

    return pl.pallas_call(
        kernel,
        out_shape=jax.ShapeDtypeStruct((n, c), jnp.float32),
        grid=(B,),
        in_specs=[
            row(c),              # x
            full(mask),          # [HW, 2] dx-validity mask
            full(p["ln"]),
            full(p["w1"]), full(p["bn1"]),
            full(p["w2"]), full(p["bn2"]),
            full(p["w3"]), full(p["bn3"]),
            full(p["w4"]), full(p["bn4"]),
            full(p["w5"]), full(p["bn5"]),
        ],
        out_specs=row(c),
        scratch_shapes=[
            pltpu.VMEM((2 * P + HW, c4), jnp.float32),   # zero-padded sign(z2) slab
        ],
        compiler_params=pltpu.CompilerParams(
            dimension_semantics=("parallel",),
            vmem_limit_bytes=_vmem_limit_bytes(HW, c, c2, c4, P)),
    )(x_flat, mask, p["ln"], p["w1"], p["bn1"], p["w2"], p["bn2"],
      p["w3"], p["bn3"], p["w4"], p["bn4"], p["w5"], p["bn5"])


# ----------------------------- host-side glue ---------------------------------
def _make_col_masks(H, W):
    """[HW, 2] f32 mask: col 0 -> reading pixel at ww-1 is valid, col 1 -> ww+1 valid."""
    ww = jnp.arange(H * W) % W
    left = (ww >= 1)
    right = (ww <= W - 2)
    return jnp.stack([left, right], axis=1).astype(jnp.float32)


def _densify_grouped_3x3(w, groups):
    """PyTorch grouped conv weight [Cout, Cin/g, 3, 3] -> dense [9*Cin, Cout]
    block-diagonal matrix in tap-major (ky*3+kx) row order."""
    cout, cin_g, kh, kw = w.shape
    cout_g = cout // groups
    cin = cin_g * groups
    wd = jnp.zeros((kh, kw, cin, cout), dtype=w.dtype)
    for g in range(groups):
        blk = w[g * cout_g:(g + 1) * cout_g]                 # [cout_g, cin_g, 3, 3]
        wd = wd.at[:, :, g * cin_g:(g + 1) * cin_g,
                   g * cout_g:(g + 1) * cout_g].set(jnp.transpose(blk, (2, 3, 1, 0)))
    return wd.reshape(kh * kw * cin, cout)


def _fold_bn(bn):
    """(gamma, beta, mean, var) [4,K] -> folded (scale, bias) [2,K], f32."""
    g, b, m, v = bn[0], bn[1], bn[2], bn[3]
    s = g * jax.lax.rsqrt(v + _EPS_BN)
    t = b - m * s
    return jnp.stack([s, t]).astype(jnp.float32)


def prepare_params(raw_params, dim):
    """Raw (torch-layout) params -> kernel-ready params:
    pre-binarized bf16 weight matrices + folded BatchNorm scale/bias."""
    prepared = []
    for p in raw_params:
        w3d = _densify_grouped_3x3(_sign(p["w3"]), groups=dim)       # [9*4C, 4C]
        c4 = w3d.shape[1]
        prepared.append(dict(
            ln=jnp.stack([p["ln_g"], p["ln_b"]]).astype(jnp.float32),
            w1=_sign(p["w1"][:, :, 0, 0]).T.astype(jnp.bfloat16),    # [C,  2C]
            bn1=_fold_bn(p["bn1"]),
            w2=_sign(p["w2"][:, :, 0, 0]).T.astype(jnp.bfloat16),    # [2C, 4C]
            bn2=_fold_bn(p["bn2"]),
            w3=w3d.reshape(9, c4, c4).astype(jnp.bfloat16),          # [9, 4C, 4C]
            bn3=_fold_bn(p["bn3"]),
            w4=_sign(p["w4"][:, :, 0, 0]).T.astype(jnp.bfloat16),    # [4C, 2C]
            bn4=_fold_bn(p["bn4"]),
            w5=_sign(p["w5"][:, :, 0, 0]).T.astype(jnp.bfloat16),    # [2C, C]
            bn5=_fold_bn(p["bn5"]),
        ))
    return prepared


def init_params(key, dim, num_blocks, mult=2):
    """Random torch-layout parameters for `num_blocks` PreNorm(FeedForward) blocks."""
    c, c2, c4 = dim, dim * mult, dim * mult * mult

    def bn_init(k, n):
        k1, k2, k3, k4 = jax.random.split(k, 4)
        g = jax.random.uniform(k1, (n,), minval=0.5, maxval=1.5)
        b = 0.1 * jax.random.normal(k2, (n,))
        m = 0.1 * jax.random.normal(k3, (n,))
        v = jax.random.uniform(k4, (n,), minval=0.5, maxval=1.5)
        return jnp.stack([g, b, m, v]).astype(jnp.float32)

    raw = []
    for _ in range(num_blocks):
        key, *ks = jax.random.split(key, 13)
        raw.append(dict(
            ln_g=jax.random.uniform(ks[0], (c,), minval=0.5, maxval=1.5).astype(jnp.float32),
            ln_b=(0.1 * jax.random.normal(ks[1], (c,))).astype(jnp.float32),
            w1=jax.random.normal(ks[2], (c2, c, 1, 1), dtype=jnp.float32),
            w2=jax.random.normal(ks[3], (c4, c2, 1, 1), dtype=jnp.float32),
            w3=jax.random.normal(ks[4], (c4, c4 // dim, 3, 3), dtype=jnp.float32),
            w4=jax.random.normal(ks[5], (c2, c4, 1, 1), dtype=jnp.float32),
            w5=jax.random.normal(ks[6], (c, c2, 1, 1), dtype=jnp.float32),
            bn1=bn_init(ks[7], c2), bn2=bn_init(ks[8], c4), bn3=bn_init(ks[9], c4),
            bn4=bn_init(ks[10], c2), bn5=bn_init(ks[11], c),
        ))
    return raw


def bnn_block_forward(x_nchw, params):
    """x: [B, C, H, W]  ->  out: [B, C, H, W]  (matches BNN_block.forward)."""
    B, C, H, W = x_nchw.shape
    x = jnp.transpose(x_nchw, (0, 2, 3, 1)).reshape(B * H * W, C).astype(jnp.float32)
    mask = _make_col_masks(H, W)
    for p in params:
        x = _block_call(x, mask, p, B=B, H=H, W=W)
    return jnp.transpose(x.reshape(B, H, W, C), (0, 3, 1, 2))


# ----------------------------- pure-JAX reference (sanity check) --------------
def _ref_forward(x_nchw, raw_params, dim):
    B, C, H, W = x_nchw.shape
    x = jnp.transpose(x_nchw, (0, 2, 3, 1)).reshape(B * H * W, C).astype(jnp.float32)
    for p in raw_params:
        mu = jnp.mean(x, axis=-1, keepdims=True)
        xc = x - mu
        var = jnp.mean(xc * xc, axis=-1, keepdims=True)
        y = xc * jax.lax.rsqrt(var + _EPS_LN) * p["ln_g"] + p["ln_b"]
        a1 = _sign(y) if C != 3 else y
        z1 = jnp.clip(_bn(a1 @ _sign(p["w1"][:, :, 0, 0]).T, p["bn1"]), -1.0, 1.0)
        z2 = jnp.clip(_bn(_sign(z1) @ _sign(p["w2"][:, :, 0, 0]).T, p["bn2"]), -1.0, 1.0)
        z2 = _gelu(z2)
        c4 = z2.shape[-1]
        # grouped 3x3 binary conv via lax.conv (independent of the kernel's tap math)
        z2img = _sign(z2).reshape(B, H, W, c4)
        w3 = jnp.transpose(_sign(p["w3"]), (2, 3, 1, 0))      # [3,3,cin/g,cout] HWIO
        conv = jax.lax.conv_general_dilated(
            z2img, w3, window_strides=(1, 1), padding="SAME",
            dimension_numbers=("NHWC", "HWIO", "NHWC"),
            feature_group_count=dim)
        z3 = jnp.clip(_bn(conv.reshape(B * H * W, c4), p["bn3"]), -1.0, 1.0)
        z3 = _gelu(z3 + z2)
        z4 = jnp.clip(_bn(_sign(z3) @ _sign(p["w4"][:, :, 0, 0]).T, p["bn4"]), -1.0, 1.0)
        z5 = jnp.clip(_bn(_sign(z4) @ _sign(p["w5"][:, :, 0, 0]).T, p["bn5"]), -1.0, 1.0)
        x = z5 + x
    return jnp.transpose(x.reshape(B, H, W, C), (0, 3, 1, 2))


if __name__ == "__main__":
    dim, dim_head, heads, num_blocks = 4, 16, 1, 2   # dim_head/heads unused by the module
    B, H, W = 2, 16, 16

    key = jax.random.PRNGKey(0)
    kx, kp = jax.random.split(key)
    x = jax.random.normal(kx, (B, dim, H, W), dtype=jnp.float32)

    raw_params = init_params(kp, dim, num_blocks)
    params = prepare_params(raw_params, dim)

    out = jax.block_until_ready(bnn_block_forward(x, params))
    assert out.shape == (B, dim, H, W) and out.dtype == jnp.float32

    ref = jax.block_until_ready(_ref_forward(x, raw_params, dim))
    err = float(jnp.max(jnp.abs(out - ref)))
    assert err < 1e-2, f"mismatch vs reference, max abs err = {err}"

    print("KERNEL_OK")
</pallas_src>

<mosaic_0001>
module attributes {stable_mosaic.version = 11 : i64} {
  func.func @_bnn_block_kernel(%arg0: i32, %arg1: memref<256x4xf32, #tpu.memory_space<vmem>>, %arg2: memref<256x2xf32, #tpu.memory_space<vmem>>, %arg3: memref<2x4xf32, #tpu.memory_space<vmem>>, %arg4: memref<4x8xbf16, #tpu.memory_space<vmem>>, %arg5: memref<2x8xf32, #tpu.memory_space<vmem>>, %arg6: memref<8x16xbf16, #tpu.memory_space<vmem>>, %arg7: memref<2x16xf32, #tpu.memory_space<vmem>>, %arg8: memref<9x16x16xbf16, #tpu.memory_space<vmem>>, %arg9: memref<2x16xf32, #tpu.memory_space<vmem>>, %arg10: memref<16x8xbf16, #tpu.memory_space<vmem>>, %arg11: memref<2x8xf32, #tpu.memory_space<vmem>>, %arg12: memref<8x4xbf16, #tpu.memory_space<vmem>>, %arg13: memref<2x4xf32, #tpu.memory_space<vmem>>, %arg14: memref<256x4xf32, #tpu.memory_space<vmem>>, %arg15: memref<304x16xf32, #tpu.memory_space<vmem>>) attributes {dimension_semantics = [#tpu.dimension_semantics<parallel>], iteration_bounds = array<i64: 2>, scalar_prefetch = 0 : i64, scratch_operands = 1 : i64, tpu.core_type = #tpu.core_type<tc>, window_params = [{transform_indices = @transform_0, window_bounds = array<i64: 256, 4>}, {pipeline_mode = #tpu.pipeline_mode<synchronous>, transform_indices = @transform_1, window_bounds = array<i64: 256, 2>}, {pipeline_mode = #tpu.pipeline_mode<synchronous>, transform_indices = @transform_2, window_bounds = array<i64: 2, 4>}, {pipeline_mode = #tpu.pipeline_mode<synchronous>, transform_indices = @transform_3, window_bounds = array<i64: 4, 8>}, {pipeline_mode = #tpu.pipeline_mode<synchronous>, transform_indices = @transform_4, window_bounds = array<i64: 2, 8>}, {pipeline_mode = #tpu.pipeline_mode<synchronous>, transform_indices = @transform_5, window_bounds = array<i64: 8, 16>}, {pipeline_mode = #tpu.pipeline_mode<synchronous>, transform_indices = @transform_6, window_bounds = array<i64: 2, 16>}, {pipeline_mode = #tpu.pipeline_mode<synchronous>, transform_indices = @transform_7, window_bounds = array<i64: 9, 16, 16>}, {pipeline_mode = #tpu.pipeline_mode<synchronous>, transform_indices = @transform_8, window_bounds = array<i64: 2, 16>}, {pipeline_mode = #tpu.pipeline_mode<synchronous>, transform_indices = @transform_9, window_bounds = array<i64: 16, 8>}, {pipeline_mode = #tpu.pipeline_mode<synchronous>, transform_indices = @transform_10, window_bounds = array<i64: 2, 8>}, {pipeline_mode = #tpu.pipeline_mode<synchronous>, transform_indices = @transform_11, window_bounds = array<i64: 8, 4>}, {pipeline_mode = #tpu.pipeline_mode<synchronous>, transform_indices = @transform_12, window_bounds = array<i64: 2, 4>}, {transform_indices = @transform_13, window_bounds = array<i64: 256, 4>}]} {
    %c0 = arith.constant 0 : index
    %c0_0 = arith.constant 0 : index
    %0 = vector.load %arg1[%c0, %c0_0] : memref<256x4xf32, #tpu.memory_space<vmem>>, vector<256x4xf32>
    %cst = arith.constant dense<0.000000e+00> : vector<256xf32>
    %1 = vector.multi_reduction <add>, %0, %cst [1] : vector<256x4xf32> to vector<256xf32>
    %2 = vector.shape_cast %1 : vector<256xf32> to vector<256x1xf32>
    %cst_1 = arith.constant 4.000000e+00 : f32
    %3 = vector.broadcast %cst_1 : f32 to vector<256x1xf32>
    %4 = arith.divf %2, %3 : vector<256x1xf32>
    %5 = vector.broadcast %4 : vector<256x1xf32> to vector<256x4xf32>
    %6 = arith.subf %0, %5 : vector<256x4xf32>
    %7 = arith.mulf %6, %6 : vector<256x4xf32>
    %cst_2 = arith.constant dense<0.000000e+00> : vector<256xf32>
    %8 = vector.multi_reduction <add>, %7, %cst_2 [1] : vector<256x4xf32> to vector<256xf32>
    %9 = vector.shape_cast %8 : vector<256xf32> to vector<256x1xf32>
    %cst_3 = arith.constant 4.000000e+00 : f32
    %10 = vector.broadcast %cst_3 : f32 to vector<256x1xf32>
    %11 = arith.divf %9, %10 : vector<256x1xf32>
    %c0_4 = arith.constant 0 : index
    %c0_5 = arith.constant 0 : index
    %12 = vector.load %arg3[%c0_4, %c0_5] : memref<2x4xf32, #tpu.memory_space<vmem>>, vector<2x4xf32>
    %cst_6 = arith.constant 9.99999974E-6 : f32
    %13 = vector.broadcast %cst_6 : f32 to vector<256x1xf32>
    %14 = arith.addf %11, %13 : vector<256x1xf32>
    %15 = math.rsqrt %14 : vector<256x1xf32>
    %16 = vector.broadcast %15 : vector<256x1xf32> to vector<256x4xf32>
    %17 = arith.mulf %6, %16 : vector<256x4xf32>
    %18 = vector.extract_strided_slice %12 {offsets = [0, 0], sizes = [1, 4], strides = [1, 1]} : vector<2x4xf32> to vector<1x4xf32>
    %19 = vector.shape_cast %18 : vector<1x4xf32> to vector<4xf32>
    %20 = vector.shape_cast %19 : vector<4xf32> to vector<1x4xf32>
    %21 = vector.broadcast %20 : vector<1x4xf32> to vector<256x4xf32>
    %22 = arith.mulf %17, %21 : vector<256x4xf32>
    %23 = vector.extract_strided_slice %12 {offsets = [1, 0], sizes = [1, 4], strides = [1, 1]} : vector<2x4xf32> to vector<1x4xf32>
    %24 = vector.shape_cast %23 : vector<1x4xf32> to vector<4xf32>
    %25 = vector.shape_cast %24 : vector<4xf32> to vector<1x4xf32>
    %26 = vector.broadcast %25 : vector<1x4xf32> to vector<256x4xf32>
    %27 = arith.addf %22, %26 : vector<256x4xf32>
    %cst_7 = arith.constant 1.000000e+00 : f32
    %28 = vector.broadcast %cst_7 : f32 to vector<256x4xf32>
    %cst_8 = arith.constant 0.000000e+00 : f32
    %29 = vector.broadcast %cst_8 : f32 to vector<256x4xf32>
    %30 = arith.cmpf ogt, %27, %29 : vector<256x4xf32>
    %cst_9 = arith.constant 0.000000e+00 : f32
    %31 = vector.broadcast %cst_9 : f32 to vector<256x4xf32>
    %32 = arith.cmpf olt, %27, %31 : vector<256x4xf32>
    %cst_10 = arith.constant 0.000000e+00 : f32
    %33 = vector.broadcast %cst_10 : f32 to vector<256x4xf32>
    %34 = arith.subf %33, %28 : vector<256x4xf32>
    %cst_11 = arith.constant 0.000000e+00 : f32
    %35 = vector.broadcast %cst_11 : f32 to vector<256x4xf32>
    %36 = arith.select %32, %34, %35 : vector<256x4xi1>, vector<256x4xf32>
    %37 = arith.select %30, %28, %36 : vector<256x4xi1>, vector<256x4xf32>
    %38 = arith.truncf %37 : vector<256x4xf32> to vector<256x4xbf16>
    %c0_12 = arith.constant 0 : index
    %c0_13 = arith.constant 0 : index
    %39 = vector.load %arg4[%c0_12, %c0_13] : memref<4x8xbf16, #tpu.memory_space<vmem>>, vector<4x8xbf16>
    %c0_14 = arith.constant 0 : index
    %c0_15 = arith.constant 0 : index
    %40 = vector.load %arg5[%c0_14, %c0_15] : memref<2x8xf32, #tpu.memory_space<vmem>>, vector<2x8xf32>
    %cst_16 = arith.constant dense<0.000000e+00> : vector<256x8xf32>
    %41 = tpu.matmul %38, %39, %cst_16 {dimension_numbers = #tpu.dot_dimension_numbers<[1], [0], [0], [1], [0, 0, 1, 1], [], []>} : vector<256x4xbf16>, vector<4x8xbf16>, vector<256x8xf32> -> vector<256x8xf32>
    %42 = vector.extract_strided_slice %40 {offsets = [0, 0], sizes = [1, 8], strides = [1, 1]} : vector<2x8xf32> to vector<1x8xf32>
    %43 = vector.shape_cast %42 : vector<1x8xf32> to vector<8xf32>
    %44 = vector.shape_cast %43 : vector<8xf32> to vector<1x8xf32>
    %45 = vector.broadcast %44 : vector<1x8xf32> to vector<256x8xf32>
    %46 = arith.mulf %41, %45 : vector<256x8xf32>
    %47 = vector.extract_strided_slice %40 {offsets = [1, 0], sizes = [1, 8], strides = [1, 1]} : vector<2x8xf32> to vector<1x8xf32>
    %48 = vector.shape_cast %47 : vector<1x8xf32> to vector<8xf32>
    %49 = vector.shape_cast %48 : vector<8xf32> to vector<1x8xf32>
    %50 = vector.broadcast %49 : vector<1x8xf32> to vector<256x8xf32>
    %51 = arith.addf %46, %50 : vector<256x8xf32>
    %cst_17 = arith.constant -1.000000e+00 : f32
    %cst_18 = arith.constant 1.000000e+00 : f32
    %52 = vector.broadcast %cst_17 : f32 to vector<256x8xf32>
    %53 = arith.maximumf %52, %51 : vector<256x8xf32>
    %54 = vector.broadcast %cst_18 : f32 to vector<256x8xf32>
    %55 = arith.minimumf %54, %53 : vector<256x8xf32>
    %cst_19 = arith.constant 1.000000e+00 : f32
    %56 = vector.broadcast %cst_19 : f32 to vector<256x8xf32>
    %cst_20 = arith.constant 0.000000e+00 : f32
    %57 = vector.broadcast %cst_20 : f32 to vector<256x8xf32>
    %58 = arith.cmpf ogt, %55, %57 : vector<256x8xf32>
    %cst_21 = arith.constant 0.000000e+00 : f32
    %59 = vector.broadcast %cst_21 : f32 to vector<256x8xf32>
    %60 = arith.cmpf olt, %55, %59 : vector<256x8xf32>
    %cst_22 = arith.constant 0.000000e+00 : f32
    %61 = vector.broadcast %cst_22 : f32 to vector<256x8xf32>
    %62 = arith.subf %61, %56 : vector<256x8xf32>
    %cst_23 = arith.constant 0.000000e+00 : f32
    %63 = vector.broadcast %cst_23 : f32 to vector<256x8xf32>
    %64 = arith.select %60, %62, %63 : vector<256x8xi1>, vector<256x8xf32>
    %65 = arith.select %58, %56, %64 : vector<256x8xi1>, vector<256x8xf32>
    %66 = arith.truncf %65 : vector<256x8xf32> to vector<256x8xbf16>
    %c0_24 = arith.constant 0 : index
    %c0_25 = arith.constant 0 : index
    %67 = vector.load %arg7[%c0_24, %c0_25] : memref<2x16xf32, #tpu.memory_space<vmem>>, vector<2x16xf32>
    %c0_26 = arith.constant 0 : index
    %c0_27 = arith.constant 0 : index
    %68 = vector.load %arg6[%c0_26, %c0_27] : memref<8x16xbf16, #tpu.memory_space<vmem>>, vector<8x16xbf16>
    %cst_28 = arith.constant dense<0.000000e+00> : vector<256x16xf32>
    %69 = tpu.matmul %66, %68, %cst_28 {dimension_numbers = #tpu.dot_dimension_numbers<[1], [0], [0], [1], [0, 0, 1, 1], [], []>} : vector<256x8xbf16>, vector<8x16xbf16>, vector<256x16xf32> -> vector<256x16xf32>
    %70 = vector.extract_strided_slice %67 {offsets = [0, 0], sizes = [1, 16], strides = [1, 1]} : vector<2x16xf32> to vector<1x16xf32>
    %71 = vector.shape_cast %70 : vector<1x16xf32> to vector<16xf32>
    %72 = vector.shape_cast %71 : vector<16xf32> to vector<1x16xf32>
    %73 = vector.broadcast %72 : vector<1x16xf32> to vector<256x16xf32>
    %74 = arith.mulf %69, %73 : vector<256x16xf32>
    %75 = vector.extract_strided_slice %67 {offsets = [1, 0], sizes = [1, 16], strides = [1, 1]} : vector<2x16xf32> to vector<1x16xf32>
    %76 = vector.shape_cast %75 : vector<1x16xf32> to vector<16xf32>
    %77 = vector.shape_cast %76 : vector<16xf32> to vector<1x16xf32>
    %78 = vector.broadcast %77 : vector<1x16xf32> to vector<256x16xf32>
    %79 = arith.addf %74, %78 : vector<256x16xf32>
    %cst_29 = arith.constant -1.000000e+00 : f32
    %cst_30 = arith.constant 1.000000e+00 : f32
    %80 = vector.broadcast %cst_29 : f32 to vector<256x16xf32>
    %81 = arith.maximumf %80, %79 : vector<256x16xf32>
    %82 = vector.broadcast %cst_30 : f32 to vector<256x16xf32>
    %83 = arith.minimumf %82, %81 : vector<256x16xf32>
    %cst_31 = arith.constant 5.000000e-01 : f32
    %84 = vector.broadcast %cst_31 : f32 to vector<256x16xf32>
    %85 = arith.mulf %84, %83 : vector<256x16xf32>
    %cst_32 = arith.constant 0.707106769 : f32
    %86 = vector.broadcast %cst_32 : f32 to vector<256x16xf32>
    %87 = arith.mulf %83, %86 : vector<256x16xf32>
    %88 = math.erf %87 : vector<256x16xf32>
    %cst_33 = arith.constant 1.000000e+00 : f32
    %89 = vector.broadcast %cst_33 : f32 to vector<256x16xf32>
    %90 = arith.addf %89, %88 : vector<256x16xf32>
    %91 = arith.mulf %85, %90 : vector<256x16xf32>
    %cst_34 = arith.constant 1.000000e+00 : f32
    %92 = vector.broadcast %cst_34 : f32 to vector<256x16xf32>
    %cst_35 = arith.constant 0.000000e+00 : f32
    %93 = vector.broadcast %cst_35 : f32 to vector<256x16xf32>
    %94 = arith.cmpf ogt, %91, %93 : vector<256x16xf32>
    %cst_36 = arith.constant 0.000000e+00 : f32
    %95 = vector.broadcast %cst_36 : f32 to vector<256x16xf32>
    %96 = arith.cmpf olt, %91, %95 : vector<256x16xf32>
    %cst_37 = arith.constant 0.000000e+00 : f32
    %97 = vector.broadcast %cst_37 : f32 to vector<256x16xf32>
    %98 = arith.subf %97, %92 : vector<256x16xf32>
    %cst_38 = arith.constant 0.000000e+00 : f32
    %99 = vector.broadcast %cst_38 : f32 to vector<256x16xf32>
    %100 = arith.select %96, %98, %99 : vector<256x16xi1>, vector<256x16xf32>
    %101 = arith.select %94, %92, %100 : vector<256x16xi1>, vector<256x16xf32>
    %cst_39 = arith.constant 0.000000e+00 : f32
    %102 = vector.broadcast %cst_39 : f32 to vector<24x16xf32>
    %c0_40 = arith.constant 0 : index
    %c0_41 = arith.constant 0 : index
    %103 = vector.load %arg15[%c0_40, %c0_41] : memref<304x16xf32, #tpu.memory_space<vmem>>, vector<24x16xf32>
    tpu.vector_store %arg15[%c0_40, %c0_41], %102 {strides = array<i32>} : memref<304x16xf32, #tpu.memory_space<vmem>>, vector<24x16xf32>,
    %cst_42 = arith.constant 0.000000e+00 : f32
    %104 = vector.broadcast %cst_42 : f32 to vector<24x16xf32>
    %c280 = arith.constant 280 : index
    %c0_43 = arith.constant 0 : index
    %105 = vector.load %arg15[%c280, %c0_43] : memref<304x16xf32, #tpu.memory_space<vmem>>, vector<24x16xf32>
    tpu.vector_store %arg15[%c280, %c0_43], %104 {strides = array<i32>} : memref<304x16xf32, #tpu.memory_space<vmem>>, vector<24x16xf32>,
    %c24 = arith.constant 24 : index
    %c0_44 = arith.constant 0 : index
    %106 = vector.load %arg15[%c24, %c0_44] : memref<304x16xf32, #tpu.memory_space<vmem>>, vector<256x16xf32>
    tpu.vector_store %arg15[%c24, %c0_44], %101 {strides = array<i32>} : memref<304x16xf32, #tpu.memory_space<vmem>>, vector<256x16xf32>,
    %c0_45 = arith.constant 0 : index
    %c0_46 = arith.constant 0 : index
    %107 = vector.load %arg2[%c0_45, %c0_46] : memref<256x2xf32, #tpu.memory_space<vmem>>, vector<256x1xf32>
    %c0_47 = arith.constant 0 : index
    %c1 = arith.constant 1 : index
    %108 = vector.load %arg2[%c0_47, %c1] : memref<256x2xf32, #tpu.memory_space<vmem>>, vector<256x1xf32>
    %cst_48 = arith.constant 0.000000e+00 : f32
    %109 = vector.broadcast %cst_48 : f32 to vector<256x16xf32>
    %c7 = arith.constant 7 : index
    %c0_49 = arith.constant 0 : index
    %110 = vector.load %arg15[%c7, %c0_49] : memref<304x16xf32, #tpu.memory_space<vmem>>, vector<256x16xf32>
    %111 = vector.broadcast %107 : vector<256x1xf32> to vector<256x16xf32>
    %112 = arith.mulf %110, %111 : vector<256x16xf32>
    %113 = arith.truncf %112 : vector<256x16xf32> to vector<256x16xbf16>
    %c0_50 = arith.constant 0 : index
    %c0_51 = arith.constant 0 : index
    %c0_52 = arith.constant 0 : index
    %114 = vector.load %arg8[%c0_50, %c0_51, %c0_52] : memref<9x16x16xbf16, #tpu.memory_space<vmem>>, vector<1x16x16xbf16>
    %115 = vector.shape_cast %114 : vector<1x16x16xbf16> to vector<16x16xbf16>
    %cst_53 = arith.constant dense<0.000000e+00> : vector<256x16xf32>
    %116 = tpu.matmul %113, %115, %cst_53 {dimension_numbers = #tpu.dot_dimension_numbers<[1], [0], [0], [1], [0, 0, 1, 1], [], []>} : vector<256x16xbf16>, vector<16x16xbf16>, vector<256x16xf32> -> vector<256x16xf32>
    %117 = arith.addf %109, %116 : vector<256x16xf32>
    %c8 = arith.constant 8 : index
    %c0_54 = arith.constant 0 : index
    %118 = vector.load %arg15[%c8, %c0_54] : memref<304x16xf32, #tpu.memory_space<vmem>>, vector<256x16xf32>
    %119 = arith.truncf %118 : vector<256x16xf32> to vector<256x16xbf16>
    %c1_55 = arith.constant 1 : index
    %c0_56 = arith.constant 0 : index
    %c0_57 = arith.constant 0 : index
    %120 = vector.load %arg8[%c1_55, %c0_56, %c0_57] : memref<9x16x16xbf16, #tpu.memory_space<vmem>>, vector<1x16x16xbf16>
    %121 = vector.shape_cast %120 : vector<1x16x16xbf16> to vector<16x16xbf16>
    %cst_58 = arith.constant dense<0.000000e+00> : vector<256x16xf32>
    %122 = tpu.matmul %119, %121, %cst_58 {dimension_numbers = #tpu.dot_dimension_numbers<[1], [0], [0], [1], [0, 0, 1, 1], [], []>} : vector<256x16xbf16>, vector<16x16xbf16>, vector<256x16xf32> -> vector<256x16xf32>
    %123 = arith.addf %117, %122 : vector<256x16xf32>
    %c9 = arith.constant 9 : index
    %c0_59 = arith.constant 0 : index
    %124 = vector.load %arg15[%c9, %c0_59] : memref<304x16xf32, #tpu.memory_space<vmem>>, vector<256x16xf32>
    %125 = vector.broadcast %108 : vector<256x1xf32> to vector<256x16xf32>
    %126 = arith.mulf %124, %125 : vector<256x16xf32>
    %127 = arith.truncf %126 : vector<256x16xf32> to vector<256x16xbf16>
    %c2 = arith.constant 2 : index
    %c0_60 = arith.constant 0 : index
    %c0_61 = arith.constant 0 : index
    %128 = vector.load %arg8[%c2, %c0_60, %c0_61] : memref<9x16x16xbf16, #tpu.memory_space<vmem>>, vector<1x16x16xbf16>
    %129 = vector.shape_cast %128 : vector<1x16x16xbf16> to vector<16x16xbf16>
    %cst_62 = arith.constant dense<0.000000e+00> : vector<256x16xf32>
    %130 = tpu.matmul %127, %129, %cst_62 {dimension_numbers = #tpu.dot_dimension_numbers<[1], [0], [0], [1], [0, 0, 1, 1], [], []>} : vector<256x16xbf16>, vector<16x16xbf16>, vector<256x16xf32> -> vector<256x16xf32>
    %131 = arith.addf %123, %130 : vector<256x16xf32>
    %c23 = arith.constant 23 : index
    %c0_63 = arith.constant 0 : index
    %132 = vector.load %arg15[%c23, %c0_63] : memref<304x16xf32, #tpu.memory_space<vmem>>, vector<256x16xf32>
    %133 = vector.broadcast %107 : vector<256x1xf32> to vector<256x16xf32>
    %134 = arith.mulf %132, %133 : vector<256x16xf32>
    %135 = arith.truncf %134 : vector<256x16xf32> to vector<256x16xbf16>
    %c3 = arith.constant 3 : index
    %c0_64 = arith.constant 0 : index
    %c0_65 = arith.constant 0 : index
    %136 = vector.load %arg8[%c3, %c0_64, %c0_65] : memref<9x16x16xbf16, #tpu.memory_space<vmem>>, vector<1x16x16xbf16>
    %137 = vector.shape_cast %136 : vector<1x16x16xbf16> to vector<16x16xbf16>
    %cst_66 = arith.constant dense<0.000000e+00> : vector<256x16xf32>
    %138 = tpu.matmul %135, %137, %cst_66 {dimension_numbers = #tpu.dot_dimension_numbers<[1], [0], [0], [1], [0, 0, 1, 1], [], []>} : vector<256x16xbf16>, vector<16x16xbf16>, vector<256x16xf32> -> vector<256x16xf32>
    %139 = arith.addf %131, %138 : vector<256x16xf32>
    %c24_67 = arith.constant 24 : index
    %c0_68 = arith.constant 0 : index
    %140 = vector.load %arg15[%c24_67, %c0_68] : memref<304x16xf32, #tpu.memory_space<vmem>>, vector<256x16xf32>
    %141 = arith.truncf %140 : vector<256x16xf32> to vector<256x16xbf16>
    %c4 = arith.constant 4 : index
    %c0_69 = arith.constant 0 : index
    %c0_70 = arith.constant 0 : index
    %142 = vector.load %arg8[%c4, %c0_69, %c0_70] : memref<9x16x16xbf16, #tpu.memory_space<vmem>>, vector<1x16x16xbf16>
    %143 = vector.shape_cast %142 : vector<1x16x16xbf16> to vector<16x16xbf16>
    %cst_71 = arith.constant dense<0.000000e+00> : vector<256x16xf32>
    %144 = tpu.matmul %141, %143, %cst_71 {dimension_numbers = #tpu.dot_dimension_numbers<[1], [0], [0], [1], [0, 0, 1, 1], [], []>} : vector<256x16xbf16>, vector<16x16xbf16>, vector<256x16xf32> -> vector<256x16xf32>
    %145 = arith.addf %139, %144 : vector<256x16xf32>
    %c25 = arith.constant 25 : index
    %c0_72 = arith.constant 0 : index
    %146 = vector.load %arg15[%c25, %c0_72] : memref<304x16xf32, #tpu.memory_space<vmem>>, vector<256x16xf32>
    %147 = vector.broadcast %108 : vector<256x1xf32> to vector<256x16xf32>
    %148 = arith.mulf %146, %147 : vector<256x16xf32>
    %149 = arith.truncf %148 : vector<256x16xf32> to vector<256x16xbf16>
    %c5 = arith.constant 5 : index
    %c0_73 = arith.constant 0 : index
    %c0_74 = arith.constant 0 : index
    %150 = vector.load %arg8[%c5, %c0_73, %c0_74] : memref<9x16x16xbf16, #tpu.memory_space<vmem>>, vector<1x16x16xbf16>
    %151 = vector.shape_cast %150 : vector<1x16x16xbf16> to vector<16x16xbf16>
    %cst_75 = arith.constant dense<0.000000e+00> : vector<256x16xf32>
    %152 = tpu.matmul %149, %151, %cst_75 {dimension_numbers = #tpu.dot_dimension_numbers<[1], [0], [0], [1], [0, 0, 1, 1], [], []>} : vector<256x16xbf16>, vector<16x16xbf16>, vector<256x16xf32> -> vector<256x16xf32>
    %153 = arith.addf %145, %152 : vector<256x16xf32>
    %c39 = arith.constant 39 : index
    %c0_76 = arith.constant 0 : index
    %154 = vector.load %arg15[%c39, %c0_76] : memref<304x16xf32, #tpu.memory_space<vmem>>, vector<256x16xf32>
    %155 = vector.broadcast %107 : vector<256x1xf32> to vector<256x16xf32>
    %156 = arith.mulf %154, %155 : vector<256x16xf32>
    %157 = arith.truncf %156 : vector<256x16xf32> to vector<256x16xbf16>
    %c6 = arith.constant 6 : index
    %c0_77 = arith.constant 0 : index
    %c0_78 = arith.constant 0 : index
    %158 = vector.load %arg8[%c6, %c0_77, %c0_78] : memref<9x16x16xbf16, #tpu.memory_space<vmem>>, vector<1x16x16xbf16>
    %159 = vector.shape_cast %158 : vector<1x16x16xbf16> to vector<16x16xbf16>
    %cst_79 = arith.constant dense<0.000000e+00> : vector<256x16xf32>
    %160 = tpu.matmul %157, %159, %cst_79 {dimension_numbers = #tpu.dot_dimension_numbers<[1], [0], [0], [1], [0, 0, 1, 1], [], []>} : vector<256x16xbf16>, vector<16x16xbf16>, vector<256x16xf32> -> vector<256x16xf32>
    %161 = arith.addf %153, %160 : vector<256x16xf32>
    %c40 = arith.constant 40 : index
    %c0_80 = arith.constant 0 : index
    %162 = vector.load %arg15[%c40, %c0_80] : memref<304x16xf32, #tpu.memory_space<vmem>>, vector<256x16xf32>
    %163 = arith.truncf %162 : vector<256x16xf32> to vector<256x16xbf16>
    %c7_81 = arith.constant 7 : index
    %c0_82 = arith.constant 0 : index
    %c0_83 = arith.constant 0 : index
    %164 = vector.load %arg8[%c7_81, %c0_82, %c0_83] : memref<9x16x16xbf16, #tpu.memory_space<vmem>>, vector<1x16x16xbf16>
    %165 = vector.shape_cast %164 : vector<1x16x16xbf16> to vector<16x16xbf16>
    %cst_84 = arith.constant dense<0.000000e+00> : vector<256x16xf32>
    %166 = tpu.matmul %163, %165, %cst_84 {dimension_numbers = #tpu.dot_dimension_numbers<[1], [0], [0], [1], [0, 0, 1, 1], [], []>} : vector<256x16xbf16>, vector<16x16xbf16>, vector<256x16xf32> -> vector<256x16xf32>
    %167 = arith.addf %161, %166 : vector<256x16xf32>
    %c41 = arith.constant 41 : index
    %c0_85 = arith.constant 0 : index
    %168 = vector.load %arg15[%c41, %c0_85] : memref<304x16xf32, #tpu.memory_space<vmem>>, vector<256x16xf32>
    %169 = vector.broadcast %108 : vector<256x1xf32> to vector<256x16xf32>
    %170 = arith.mulf %168, %169 : vector<256x16xf32>
    %171 = arith.truncf %170 : vector<256x16xf32> to vector<256x16xbf16>
    %c8_86 = arith.constant 8 : index
    %c0_87 = arith.constant 0 : index
    %c0_88 = arith.constant 0 : index
    %172 = vector.load %arg8[%c8_86, %c0_87, %c0_88] : memref<9x16x16xbf16, #tpu.memory_space<vmem>>, vector<1x16x16xbf16>
    %173 = vector.shape_cast %172 : vector<1x16x16xbf16> to vector<16x16xbf16>
    %cst_89 = arith.constant dense<0.000000e+00> : vector<256x16xf32>
    %174 = tpu.matmul %171, %173, %cst_89 {dimension_numbers = #tpu.dot_dimension_numbers<[1], [0], [0], [1], [0, 0, 1, 1], [], []>} : vector<256x16xbf16>, vector<16x16xbf16>, vector<256x16xf32> -> vector<256x16xf32>
    %175 = arith.addf %167, %174 : vector<256x16xf32>
    %c0_90 = arith.constant 0 : index
    %c0_91 = arith.constant 0 : index
    %176 = vector.load %arg9[%c0_90, %c0_91] : memref<2x16xf32, #tpu.memory_space<vmem>>, vector<2x16xf32>
    %177 = vector.extract_strided_slice %176 {offsets = [0, 0], sizes = [1, 16], strides = [1, 1]} : vector<2x16xf32> to vector<1x16xf32>
    %178 = vector.shape_cast %177 : vector<1x16xf32> to vector<16xf32>
    %179 = vector.shape_cast %178 : vector<16xf32> to vector<1x16xf32>
    %180 = vector.broadcast %179 : vector<1x16xf32> to vector<256x16xf32>
    %181 = arith.mulf %175, %180 : vector<256x16xf32>
    %182 = vector.extract_strided_slice %176 {offsets = [1, 0], sizes = [1, 16], strides = [1, 1]} : vector<2x16xf32> to vector<1x16xf32>
    %183 = vector.shape_cast %182 : vector<1x16xf32> to vector<16xf32>
    %184 = vector.shape_cast %183 : vector<16xf32> to vector<1x16xf32>
    %185 = vector.broadcast %184 : vector<1x16xf32> to vector<256x16xf32>
    %186 = arith.addf %181, %185 : vector<256x16xf32>
    %cst_92 = arith.constant -1.000000e+00 : f32
    %cst_93 = arith.constant 1.000000e+00 : f32
    %187 = vector.broadcast %cst_92 : f32 to vector<256x16xf32>
    %188 = arith.maximumf %187, %186 : vector<256x16xf32>
    %189 = vector.broadcast %cst_93 : f32 to vector<256x16xf32>
    %190 = arith.minimumf %189, %188 : vector<256x16xf32>
    %191 = arith.addf %190, %91 : vector<256x16xf32>
    %cst_94 = arith.constant 5.000000e-01 : f32
    %192 = vector.broadcast %cst_94 : f32 to vector<256x16xf32>
    %193 = arith.mulf %192, %191 : vector<256x16xf32>
    %cst_95 = arith.constant 0.707106769 : f32
    %194 = vector.broadcast %cst_95 : f32 to vector<256x16xf32>
    %195 = arith.mulf %191, %194 : vector<256x16xf32>
    %196 = math.erf %195 : vector<256x16xf32>
    %cst_96 = arith.constant 1.000000e+00 : f32
    %197 = vector.broadcast %cst_96 : f32 to vector<256x16xf32>
    %198 = arith.addf %197, %196 : vector<256x16xf32>
    %199 = arith.mulf %193, %198 : vector<256x16xf32>
    %cst_97 = arith.constant 1.000000e+00 : f32
    %200 = vector.broadcast %cst_97 : f32 to vector<256x16xf32>
    %cst_98 = arith.constant 0.000000e+00 : f32
    %201 = vector.broadcast %cst_98 : f32 to vector<256x16xf32>
    %202 = arith.cmpf ogt, %199, %201 : vector<256x16xf32>
    %cst_99 = arith.constant 0.000000e+00 : f32
    %203 = vector.broadcast %cst_99 : f32 to vector<256x16xf32>
    %204 = arith.cmpf olt, %199, %203 : vector<256x16xf32>
    %cst_100 = arith.constant 0.000000e+00 : f32
    %205 = vector.broadcast %cst_100 : f32 to vector<256x16xf32>
    %206 = arith.subf %205, %200 : vector<256x16xf32>
    %cst_101 = arith.constant 0.000000e+00 : f32
    %207 = vector.broadcast %cst_101 : f32 to vector<256x16xf32>
    %208 = arith.select %204, %206, %207 : vector<256x16xi1>, vector<256x16xf32>
    %209 = arith.select %202, %200, %208 : vector<256x16xi1>, vector<256x16xf32>
    %210 = arith.truncf %209 : vector<256x16xf32> to vector<256x16xbf16>
    %c0_102 = arith.constant 0 : index
    %c0_103 = arith.constant 0 : index
    %211 = vector.load %arg11[%c0_102, %c0_103] : memref<2x8xf32, #tpu.memory_space<vmem>>, vector<2x8xf32>
    %c0_104 = arith.constant 0 : index
    %c0_105 = arith.constant 0 : index
    %212 = vector.load %arg10[%c0_104, %c0_105] : memref<16x8xbf16, #tpu.memory_space<vmem>>, vector<16x8xbf16>
    %cst_106 = arith.constant dense<0.000000e+00> : vector<256x8xf32>
    %213 = tpu.matmul %210, %212, %cst_106 {dimension_numbers = #tpu.dot_dimension_numbers<[1], [0], [0], [1], [0, 0, 1, 1], [], []>} : vector<256x16xbf16>, vector<16x8xbf16>, vector<256x8xf32> -> vector<256x8xf32>
    %214 = vector.extract_strided_slice %211 {offsets = [0, 0], sizes = [1, 8], strides = [1, 1]} : vector<2x8xf32> to vector<1x8xf32>
    %215 = vector.shape_cast %214 : vector<1x8xf32> to vector<8xf32>
    %216 = vector.shape_cast %215 : vector<8xf32> to vector<1x8xf32>
    %217 = vector.broadcast %216 : vector<1x8xf32> to vector<256x8xf32>
    %218 = arith.mulf %213, %217 : vector<256x8xf32>
    %219 = vector.extract_strided_slice %211 {offsets = [1, 0], sizes = [1, 8], strides = [1, 1]} : vector<2x8xf32> to vector<1x8xf32>
    %220 = vector.shape_cast %219 : vector<1x8xf32> to vector<8xf32>
    %221 = vector.shape_cast %220 : vector<8xf32> to vector<1x8xf32>
    %222 = vector.broadcast %221 : vector<1x8xf32> to vector<256x8xf32>
    %223 = arith.addf %218, %222 : vector<256x8xf32>
    %cst_107 = arith.constant -1.000000e+00 : f32
    %cst_108 = arith.constant 1.000000e+00 : f32
    %224 = vector.broadcast %cst_107 : f32 to vector<256x8xf32>
    %225 = arith.maximumf %224, %223 : vector<256x8xf32>
    %226 = vector.broadcast %cst_108 : f32 to vector<256x8xf32>
    %227 = arith.minimumf %226, %225 : vector<256x8xf32>
    %cst_109 = arith.constant 1.000000e+00 : f32
    %228 = vector.broadcast %cst_109 : f32 to vector<256x8xf32>
    %cst_110 = arith.constant 0.000000e+00 : f32
    %229 = vector.broadcast %cst_110 : f32 to vector<256x8xf32>
    %230 = arith.cmpf ogt, %227, %229 : vector<256x8xf32>
    %cst_111 = arith.constant 0.000000e+00 : f32
    %231 = vector.broadcast %cst_111 : f32 to vector<256x8xf32>
    %232 = arith.cmpf olt, %227, %231 : vector<256x8xf32>
    %cst_112 = arith.constant 0.000000e+00 : f32
    %233 = vector.broadcast %cst_112 : f32 to vector<256x8xf32>
    %234 = arith.subf %233, %228 : vector<256x8xf32>
    %cst_113 = arith.constant 0.000000e+00 : f32
    %235 = vector.broadcast %cst_113 : f32 to vector<256x8xf32>
    %236 = arith.select %232, %234, %235 : vector<256x8xi1>, vector<256x8xf32>
    %237 = arith.select %230, %228, %236 : vector<256x8xi1>, vector<256x8xf32>
    %238 = arith.truncf %237 : vector<256x8xf32> to vector<256x8xbf16>
    %c0_114 = arith.constant 0 : index
    %c0_115 = arith.constant 0 : index
    %239 = vector.load %arg13[%c0_114, %c0_115] : memref<2x4xf32, #tpu.memory_space<vmem>>, vector<2x4xf32>
    %c0_116 = arith.constant 0 : index
    %c0_117 = arith.constant 0 : index
    %240 = vector.load %arg12[%c0_116, %c0_117] : memref<8x4xbf16, #tpu.memory_space<vmem>>, vector<8x4xbf16>
    %cst_118 = arith.constant dense<0.000000e+00> : vector<256x4xf32>
    %241 = tpu.matmul %238, %240, %cst_118 {dimension_numbers = #tpu.dot_dimension_numbers<[1], [0], [0], [1], [0, 0, 1, 1], [], []>} : vector<256x8xbf16>, vector<8x4xbf16>, vector<256x4xf32> -> vector<256x4xf32>
    %242 = vector.extract_strided_slice %239 {offsets = [0, 0], sizes = [1, 4], strides = [1, 1]} : vector<2x4xf32> to vector<1x4xf32>
    %243 = vector.shape_cast %242 : vector<1x4xf32> to vector<4xf32>
    %244 = vector.shape_cast %243 : vector<4xf32> to vector<1x4xf32>
    %245 = vector.broadcast %244 : vector<1x4xf32> to vector<256x4xf32>
    %246 = arith.mulf %241, %245 : vector<256x4xf32>
    %247 = vector.extract_strided_slice %239 {offsets = [1, 0], sizes = [1, 4], strides = [1, 1]} : vector<2x4xf32> to vector<1x4xf32>
    %248 = vector.shape_cast %247 : vector<1x4xf32> to vector<4xf32>
    %249 = vector.shape_cast %248 : vector<4xf32> to vector<1x4xf32>
    %250 = vector.broadcast %249 : vector<1x4xf32> to vector<256x4xf32>
    %251 = arith.addf %246, %250 : vector<256x4xf32>
    %cst_119 = arith.constant -1.000000e+00 : f32
    %cst_120 = arith.constant 1.000000e+00 : f32
    %252 = vector.broadcast %cst_119 : f32 to vector<256x4xf32>
    %253 = arith.maximumf %252, %251 : vector<256x4xf32>
    %254 = vector.broadcast %cst_120 : f32 to vector<256x4xf32>
    %255 = arith.minimumf %254, %253 : vector<256x4xf32>
    %256 = arith.addf %255, %0 : vector<256x4xf32>
    %c0_121 = arith.constant 0 : index
    %c0_122 = arith.constant 0 : index
    %257 = vector.load %arg14[%c0_121, %c0_122] : memref<256x4xf32, #tpu.memory_space<vmem>>, vector<256x4xf32>
    tpu.vector_store %arg14[%c0_121, %c0_122], %256 {strides = array<i32>} : memref<256x4xf32, #tpu.memory_space<vmem>>, vector<256x4xf32>,
    return
  }
  func.func @transform_0(%arg0: i32) -> (i32, i32) {
    %c0_i32 = arith.constant 0 : i32
    %c0_i32_0 = arith.constant 0 : i32
    return %arg0, %c0_i32 : i32, i32
  }
  func.func @transform_1(%arg0: i32) -> (i32, i32) {
    %c0_i32 = arith.constant 0 : i32
    %c0_i32_0 = arith.constant 0 : i32
    %c0_i32_1 = arith.constant 0 : i32
    return %c0_i32, %c0_i32_0 : i32, i32
  }
  func.func @transform_2(%arg0: i32) -> (i32, i32) {
    %c0_i32 = arith.constant 0 : i32
    %c0_i32_0 = arith.constant 0 : i32
    %c0_i32_1 = arith.constant 0 : i32
    return %c0_i32, %c0_i32_0 : i32, i32
  }
  func.func @transform_3(%arg0: i32) -> (i32, i32) {
    %c0_i32 = arith.constant 0 : i32
    %c0_i32_0 = arith.constant 0 : i32
    %c0_i32_1 = arith.constant 0 : i32
    return %c0_i32, %c0_i32_0 : i32, i32
  }
  func.func @transform_4(%arg0: i32) -> (i32, i32) {
    %c0_i32 = arith.constant 0 : i32
    %c0_i32_0 = arith.constant 0 : i32
    %c0_i32_1 = arith.constant 0 : i32
    return %c0_i32, %c0_i32_0 : i32, i32
  }
  func.func @transform_5(%arg0: i32) -> (i32, i32) {
    %c0_i32 = arith.constant 0 : i32
    %c0_i32_0 = arith.constant 0 : i32
    %c0_i32_1 = arith.constant 0 : i32
    return %c0_i32, %c0_i32_0 : i32, i32
  }
  func.func @transform_6(%arg0: i32) -> (i32, i32) {
    %c0_i32 = arith.constant 0 : i32
    %c0_i32_0 = arith.constant 0 : i32
    %c0_i32_1 = arith.constant 0 : i32
    return %c0_i32, %c0_i32_0 : i32, i32
  }
  func.func @transform_7(%arg0: i32) -> (i32, i32, i32) {
    %c0_i32 = arith.constant 0 : i32
    %c0_i32_0 = arith.constant 0 : i32
    %c0_i32_1 = arith.constant 0 : i32
    %c0_i32_2 = arith.constant 0 : i32
    return %c0_i32, %c0_i32_0, %c0_i32_1 : i32, i32, i32
  }
  func.func @transform_8(%arg0: i32) -> (i32, i32) {
    %c0_i32 = arith.constant 0 : i32
    %c0_i32_0 = arith.constant 0 : i32
    %c0_i32_1 = arith.constant 0 : i32
    return %c0_i32, %c0_i32_0 : i32, i32
  }
  func.func @transform_9(%arg0: i32) -> (i32, i32) {
    %c0_i32 = arith.constant 0 : i32
    %c0_i32_0 = arith.constant 0 : i32
    %c0_i32_1 = arith.constant 0 : i32
    return %c0_i32, %c0_i32_0 : i32, i32
  }
  func.func @transform_10(%arg0: i32) -> (i32, i32) {
    %c0_i32 = arith.constant 0 : i32
    %c0_i32_0 = arith.constant 0 : i32
    %c0_i32_1 = arith.constant 0 : i32
    return %c0_i32, %c0_i32_0 : i32, i32
  }
  func.func @transform_11(%arg0: i32) -> (i32, i32) {
    %c0_i32 = arith.constant 0 : i32
    %c0_i32_0 = arith.constant 0 : i32
    %c0_i32_1 = arith.constant 0 : i32
    return %c0_i32, %c0_i32_0 : i32, i32
  }
  func.func @transform_12(%arg0: i32) -> (i32, i32) {
    %c0_i32 = arith.constant 0 : i32
    %c0_i32_0 = arith.constant 0 : i32
    %c0_i32_1 = arith.constant 0 : i32
    return %c0_i32, %c0_i32_0 : i32, i32
  }
  func.func @transform_13(%arg0: i32) -> (i32, i32) {
    %c0_i32 = arith.constant 0 : i32
    %c0_i32_0 = arith.constant 0 : i32
    return %arg0, %c0_i32 : i32, i32
  }
}

</mosaic_0001>

<bundles_post_ra>
// kernel: tpu_custom_call.1
= control target key start
LH: loop header
LB: loop body
LE: loop exit
PB: predicated region body
PF: predicated region fallthrough
CT: control target
= control target key end

     0   :  { %s8275_s25 = smov 0   ;;  %s12371_s0 = inlined_call_operand.vmem [shape: f32[512,4], index: 0, kind: input, shape index: {}]   ;;  %s12372_s1 = inlined_call_operand.vmem [shape: f32[256,2], index: 1, kind: input, shape index: {}]   ;;  %s12373_s2 = inlined_call_operand.vmem [shape: f32[2,4], index: 2, kind: input, shape index: {}]   ;;  %s12374_s3 = inlined_call_operand.vmem [shape: bf16[4,8], index: 3, kind: input, shape index: {}]   ;;  %s12375_s4 = inlined_call_operand.vmem [shape: f32[2,8], index: 4, kind: input, shape index: {}]   ;;  %s12376_s5 = inlined_call_operand.vmem [shape: bf16[8,16], index: 5, kind: input, shape index: {}]   ;;  %s12377_s6 = inlined_call_operand.vmem [shape: f32[2,16], index: 6, kind: input, shape index: {}]   ;;  %s12378_s7 = inlined_call_operand.vmem [shape: bf16[9,16,16], index: 7, kind: input, shape index: {}]   ;;  %s12379_s8 = inlined_call_operand.vmem [shape: f32[2,16], index: 8, kind: input, shape index: {}]   ;;  %s12380_s9 = inlined_call_operand.vmem [shape: bf16[16,8], index: 9, kind: input, shape index: {}]   ;;  %s12381_s10 = inlined_call_operand.vmem [shape: f32[2,8], index: 10, kind: input, shape index: {}]   ;;  %s12382_s11 = inlined_call_operand.vmem [shape: bf16[8,4], index: 11, kind: input, shape index: {}]   ;;  %s12383_s12 = inlined_call_operand.vmem [shape: f32[2,4], index: 12, kind: input, shape index: {}]   ;;  %s12384_s13 = inlined_call_operand.vmem [shape: f32[512,4], index: 13, kind: output, shape index: {}]  }
   0x1 LB: > { %s6856_s26 = sadd.s32 4294967295, %s8200_s25   ;;  %p6860_p0 = scmp.ge.s32.totalorder %s8200_s25, 1  ;;  %s8200_s25 = sphi %s8275_s25, %s23_s25  }
   0x2   : > { %p388_p1 = scmp.lt.s32.totalorder %s8200_s25, 3 }
   0x4   : > { %p389_p2 = pnand %p6860_p0, %p388_p1 }
   0x6   : > { %392 = sbr.rel (%p389_p2) target bundleno = 1861 (0x745), region = 72 }
   0xb   : > { %s6861_s27 = sshll.u32 %s6856_s26, 5  ;;  %vm477_vm0 = vcmask 31744   ;;  %vm1162_vm1 = vcmask 1041408   ;;  %vm1658_vm2 = vcmask 1043456  }
   0xc   : > { %p433_p3 = scmp.lt.s32.totalorder %s6861_s27, 63 }
   0xe   : > { %s13107_s27 = smov (!%p433_p3, %s6861_s27), 63 }
   0xf   : > { %s6862_s28 = sshll.u32 %s13107_s27, 3 }
  0x10   : > { %s8291_s14 = scalar_lea.vmem %s12371_s0, %s6862_s28  ;;  %s12211_s15 = scalar_lea.vmem %s12384_s13, %s6862_s28 }
  0x11   : > { %v8294_v0 = vld [vmem:[%s8291_s14] sm:$0xff]  ;;  %v8297_v1 = vld [vmem:[%s8291_s14 + $0x10] sm:$0xff]  ;;  %v8300_v2 = vld [vmem:[%s8291_s14 + $0x8] sm:$0xff] }
  0x12   : > { %v478_v3 = vsel %vm477_vm0, %v8294_v0, 0.0  ;;  %v484_v4 = vsel %vm477_vm0, %v8297_v1, 0.0  ;;  %v8307_v5 = vld [vmem:[%s8291_s14 + $0x18] sm:$0xff]  ;;  %v481_v6 = vsel %vm477_vm0, %v8300_v2, 0.0  ;;  %v8314_v8 = vld [vmem:[%s8291_s14 + $0x20] sm:$0xff]  ;;  %v8317_v9 = vld [vmem:[%s8291_s14 + $0x28] sm:$0xff] }
  0x13   : > { %479 = vadd.xlane.f32.xlu0 %v478_v3  ;;  %485 = vadd.xlane.f32.xlu1 %v484_v4  ;;  %v487_v7 = vsel %vm477_vm0, %v8307_v5, 0.0  ;;  %v490_v10 = vsel %vm477_vm0, %v8314_v8, 0.0  ;;  %v493_v11 = vsel %vm477_vm0, %v8317_v9, 0.0  ;;  %v8324_v12 = vld [vmem:[%s8291_s14 + $0x30] sm:$0xff]  ;;  %v8327_v13 = vld [vmem:[%s8291_s14 + $0x38] sm:$0xff]  ;;  %v8334_v16 = vld [vmem:[%s8291_s14 + $0x40] sm:$0xff] }
  0x14   : > { %v496_v14 = vsel %vm477_vm0, %v8324_v12, 0.0  ;;  %v499_v15 = vsel %vm477_vm0, %v8327_v13, 0.0  ;;  %v8337_v17 = vld [vmem:[%s8291_s14 + $0x48] sm:$0xff]  ;;  %v502_v18 = vsel %vm477_vm0, %v8334_v16, 0.0  ;;  %v8344_v20 = vld [vmem:[%s8291_s14 + $0x50] sm:$0xff]  ;;  %v8347_v21 = vld [vmem:[%s8291_s14 + $0x58] sm:$0xff] }
  0x15   : > { %v505_v19 = vsel %vm477_vm0, %v8337_v17, 0.0  ;;  %v508_v22 = vsel %vm477_vm0, %v8344_v20, 0.0  ;;  %v511_v23 = vsel %vm477_vm0, %v8347_v21, 0.0  ;;  %v8354_v24 = vld [vmem:[%s8291_s14 + $0x60] sm:$0xff]  ;;  %v8357_v25 = vld [vmem:[%s8291_s14 + $0x68] sm:$0xff]  ;;  %v8364_v28 = vld [vmem:[%s8291_s14 + $0x70] sm:$0xff] }
  0x16   : > { %v514_v26 = vsel %vm477_vm0, %v8354_v24, 0.0  ;;  %v517_v27 = vsel %vm477_vm0, %v8357_v25, 0.0  ;;  %v8367_v29 = vld [vmem:[%s8291_s14 + $0x78] sm:$0xff]  ;;  %v520_v30 = vsel %vm477_vm0, %v8364_v28, 0.0  ;;  %v8374_v32 = vld [vmem:[%s8291_s14 + $0x80] sm:$0xff]  ;;  %v8377_v33 = vld [vmem:[%s8291_s14 + $0x88] sm:$0xff] }
  0x17   : > { %482 = vadd.xlane.f32.xlu0 %v481_v6  ;;  %488 = vadd.xlane.f32.xlu1 %v487_v7  ;;  %v523_v31 = vsel %vm477_vm0, %v8367_v29, 0.0  ;;  %v526_v34 = vsel %vm477_vm0, %v8374_v32, 0.0  ;;  %v529_v35 = vsel %vm477_vm0, %v8377_v33, 0.0  ;;  %v8384_v36 = vld [vmem:[%s8291_s14 + $0x90] sm:$0xff]  ;;  %v8387_v37 = vld [vmem:[%s8291_s14 + $0x98] sm:$0xff]  ;;  %v8394_v40 = vld [vmem:[%s8291_s14 + $0xa0] sm:$0xff] }
  0x18   : > { %v532_v38 = vsel %vm477_vm0, %v8384_v36, 0.0  ;;  %v535_v39 = vsel %vm477_vm0, %v8387_v37, 0.0  ;;  %v8397_v41 = vld [vmem:[%s8291_s14 + $0xa8] sm:$0xff]  ;;  %v538_v42 = vsel %vm477_vm0, %v8394_v40, 0.0  ;;  %v8404_v44 = vld [vmem:[%s8291_s14 + $0xb0] sm:$0xff]  ;;  %v8407_v45 = vld [vmem:[%s8291_s14 + $0xb8] sm:$0xff] }
  0x19   : > { %v541_v43 = vsel %vm477_vm0, %v8397_v41, 0.0  ;;  %v544_v46 = vsel %vm477_vm0, %v8404_v44, 0.0  ;;  %v547_v47 = vsel %vm477_vm0, %v8407_v45, 0.0  ;;  %v8414_v48 = vld [vmem:[%s8291_s14 + $0xc0] sm:$0xff]  ;;  %v8417_v49 = vld [vmem:[%s8291_s14 + $0xc8] sm:$0xff]  ;;  %v8424_v52 = vld [vmem:[%s8291_s14 + $0xd0] sm:$0xff] }
  0x1a   : > { %v550_v50 = vsel %vm477_vm0, %v8414_v48, 0.0  ;;  %v553_v51 = vsel %vm477_vm0, %v8417_v49, 0.0  ;;  %v8427_v53 = vld [vmem:[%s8291_s14 + $0xd8] sm:$0xff]  ;;  %v556_v54 = vsel %vm477_vm0, %v8424_v52, 0.0  ;;  %v8434_v56 = vld [vmem:[%s8291_s14 + $0xe0] sm:$0xff]  ;;  %v8437_v57 = vld [vmem:[%s8291_s14 + $0xe8] sm:$0xff] }
  0x1b   : > { %491 = vadd.xlane.f32.xlu0 %v490_v10  ;;  %494 = vadd.xlane.f32.xlu1 %v493_v11  ;;  %v559_v55 = vsel %vm477_vm0, %v8427_v53, 0.0  ;;  %v562_v58 = vsel %vm477_vm0, %v8434_v56, 0.0  ;;  %v565_v59 = vsel %vm477_vm0, %v8437_v57, 0.0  ;;  %v8444_v60 = vld [vmem:[%s8291_s14 + $0xf0] sm:$0xff]  ;;  %v8447_v61 = vld [vmem:[%s8291_s14 + $0xf8] sm:$0xff] }
  0x1c   : > { %v568_v62 = vsel %vm477_vm0, %v8444_v60, 0.0  ;;  %v571_v63 = vsel %vm477_vm0, %v8447_v61, 0.0 }
  0x1f   : > { %497 = vadd.xlane.f32.xlu0 %v496_v14  ;;  %500 = vadd.xlane.f32.xlu1 %v499_v15 }
  0x23   : > { %503 = vadd.xlane.f32.xlu0 %v502_v18  ;;  %506 = vadd.xlane.f32.xlu1 %v505_v19 }
  0x27   : > { %509 = vadd.xlane.f32.xlu0 %v508_v22  ;;  %512 = vadd.xlane.f32.xlu1 %v511_v23 }
  0x2b   : > { %515 = vadd.xlane.f32.xlu0 %v514_v26  ;;  %518 = vadd.xlane.f32.xlu1 %v517_v27 }
  0x2f   : > { %521 = vadd.xlane.f32.xlu0 %v520_v30  ;;  %524 = vadd.xlane.f32.xlu1 %v523_v31 }
  0x33   : > { %527 = vadd.xlane.f32.xlu0 %v526_v34  ;;  %530 = vadd.xlane.f32.xlu1 %v529_v35 }
  0x37   : > { %533 = vadd.xlane.f32.xlu0 %v532_v38  ;;  %536 = vadd.xlane.f32.xlu1 %v535_v39 }
  0x3b   : > { %539 = vadd.xlane.f32.xlu0 %v538_v42  ;;  %542 = vadd.xlane.f32.xlu1 %v541_v43 }
  0x3f   : > { %545 = vadd.xlane.f32.xlu0 %v544_v46  ;;  %548 = vadd.xlane.f32.xlu1 %v547_v47 }
  0x43   : > { %551 = vadd.xlane.f32.xlu0 %v550_v50  ;;  %554 = vadd.xlane.f32.xlu1 %v553_v51 }
  0x47   : > { %557 = vadd.xlane.f32.xlu0 %v556_v54  ;;  %560 = vadd.xlane.f32.xlu1 %v559_v55 }
  0x4b   : > { %563 = vadd.xlane.f32.xlu0 %v562_v58  ;;  %566 = vadd.xlane.f32.xlu1 %v565_v59 }
  0x4f   : > { %569 = vadd.xlane.f32.xlu0 %v568_v62  ;;  %572 = vadd.xlane.f32.xlu1 %v571_v63 }
  0x9c   : > { %v480_v3 = vpop.xlane.xlu0 %479  ;;  %v486_v4 = vpop.xlane.xlu1 %485 }
  0x9d   : > { %v575_v6 = vmul.f32 0.25, %v480_v3  ;;  %v577_v7 = vmul.f32 0.25, %v486_v4 }
  0x9f   : > { %v8454_v10 = vsub.f32 %v8294_v0, %v575_v6  ;;  %v8457_v11 = vsub.f32 %v8297_v1, %v577_v7 }
  0xa0   : > { %v483_v14 = vpop.xlane.xlu0 %482  ;;  %v489_v15 = vpop.xlane.xlu1 %488 }
  0xa1   : > { %v576_v18 = vmul.f32 0.25, %v483_v14  ;;  %v578_v19 = vmul.f32 0.25, %v489_v15  ;;  %v639_v22 = vmul.f32 %v8454_v10, %v8454_v10  ;;  %v641_v23 = vmul.f32 %v8457_v11, %v8457_v11 }
  0xa3   : > { %v8464_v26 = vsub.f32 %v8300_v2, %v576_v18  ;;  %v8467_v27 = vsub.f32 %v8307_v5, %v578_v19  ;;  %v671_v0 = vsel %vm477_vm0, %v639_v22, 0.0  ;;  %v677_v31 = vsel %vm477_vm0, %v641_v23, 0.0 }
  0xa4   : > { %672 = vadd.xlane.f32.xlu0 %v671_v0  ;;  %v492_v1 = vpop.xlane.xlu0 %491  ;;  %v495_v30 = vpop.xlane.xlu1 %494 }
  0xa5   : > { %v579_v34 = vmul.f32 0.25, %v492_v1  ;;  %v580_v35 = vmul.f32 0.25, %v495_v30  ;;  %v640_v38 = vmul.f32 %v8464_v26, %v8464_v26  ;;  %v642_v39 = vmul.f32 %v8467_v27, %v8467_v27 }
  0xa7   : > { %v8476_v2 = vsub.f32 %v8314_v8, %v579_v34  ;;  %v8479_v5 = vsub.f32 %v8317_v9, %v580_v35  ;;  %v674_v42 = vsel %vm477_vm0, %v640_v38, 0.0  ;;  %v680_v47 = vsel %vm477_vm0, %v642_v39, 0.0 }
  0xa8   : > { %678 = vadd.xlane.f32.xlu0 %v677_v31  ;;  %675 = vadd.xlane.f32.xlu1 %v674_v42  ;;  %v498_v43 = vpop.xlane.xlu0 %497  ;;  %v501_v46 = vpop.xlane.xlu1 %500 }
  0xa9   : > { %v581_v50 = vmul.f32 0.25, %v498_v43  ;;  %v582_v51 = vmul.f32 0.25, %v501_v46  ;;  %v643_v54 = vmul.f32 %v8476_v2, %v8476_v2  ;;  %v644_v8 = vmul.f32 %v8479_v5, %v8479_v5 }
  0xab   : > { %v8488_v55 = vsub.f32 %v8324_v12, %v581_v50  ;;  %v8491_v9 = vsub.f32 %v8327_v13, %v582_v51  ;;  %v683_v58 = vsel %vm477_vm0, %v643_v54, 0.0  ;;  %v686_v63 = vsel %vm477_vm0, %v644_v8, 0.0 }
  0xac   : > { %681 = vadd.xlane.f32.xlu1 %v680_v47  ;;  %684 = vadd.xlane.f32.xlu0 %v683_v58  ;;  %v504_v59 = vpop.xlane.xlu0 %503  ;;  %v507_v62 = vpop.xlane.xlu1 %506 }
  0xad   : > { %v583_v3 = vmul.f32 0.25, %v504_v59  ;;  %v584_v4 = vmul.f32 0.25, %v507_v62  ;;  %v645_v6 = vmul.f32 %v8488_v55, %v8488_v55  ;;  %v646_v12 = vmul.f32 %v8491_v9, %v8491_v9 }
  0xaf   : > { %v8500_v7 = vsub.f32 %v8334_v16, %v583_v3  ;;  %v8503_v13 = vsub.f32 %v8337_v17, %v584_v4  ;;  %v689_v14 = vsel %vm477_vm0, %v645_v6, 0.0  ;;  %v692_v19 = vsel %vm477_vm0, %v646_v12, 0.0 }
  0xb0   : > { %687 = vadd.xlane.f32.xlu1 %v686_v63  ;;  %690 = vadd.xlane.f32.xlu0 %v689_v14  ;;  %v510_v15 = vpop.xlane.xlu0 %509  ;;  %v513_v18 = vpop.xlane.xlu1 %512 }
  0xb1   : > { %v585_v22 = vmul.f32 0.25, %v510_v15  ;;  %v586_v23 = vmul.f32 0.25, %v513_v18  ;;  %v647_v0 = vmul.f32 %v8500_v7, %v8500_v7  ;;  %v648_v16 = vmul.f32 %v8503_v13, %v8503_v13 }
  0xb3   : > { %v8512_v1 = vsub.f32 %v8344_v20, %v585_v22  ;;  %v8515_v17 = vsub.f32 %v8347_v21, %v586_v23  ;;  %v695_v30 = vsel %vm477_vm0, %v647_v0, 0.0  ;;  %v698_v35 = vsel %vm477_vm0, %v648_v16, 0.0 }
  0xb4   : > { %693 = vadd.xlane.f32.xlu1 %v692_v19  ;;  %696 = vadd.xlane.f32.xlu0 %v695_v30  ;;  %v516_v31 = vpop.xlane.xlu0 %515  ;;  %v519_v34 = vpop.xlane.xlu1 %518 }
  0xb5   : > { %v587_v38 = vmul.f32 0.25, %v516_v31  ;;  %v588_v39 = vmul.f32 0.25, %v519_v34  ;;  %v649_v42 = vmul.f32 %v8512_v1, %v8512_v1  ;;  %v650_v20 = vmul.f32 %v8515_v17, %v8515_v17 }
  0xb7   : > { %v8524_v43 = vsub.f32 %v8354_v24, %v587_v38  ;;  %v8527_v21 = vsub.f32 %v8357_v25, %v588_v39  ;;  %v701_v46 = vsel %vm477_vm0, %v649_v42, 0.0  ;;  %v704_v51 = vsel %vm477_vm0, %v650_v20, 0.0 }
  0xb8   : > { %699 = vadd.xlane.f32.xlu1 %v698_v35  ;;  %702 = vadd.xlane.f32.xlu0 %v701_v46  ;;  %v522_v47 = vpop.xlane.xlu0 %521  ;;  %v525_v50 = vpop.xlane.xlu1 %524 }
  0xb9   : > { %v589_v54 = vmul.f32 0.25, %v522_v47  ;;  %v590_v8 = vmul.f32 0.25, %v525_v50  ;;  %v651_v58 = vmul.f32 %v8524_v43, %v8524_v43  ;;  %v652_v24 = vmul.f32 %v8527_v21, %v8527_v21 }
  0xbb   : > { %v8536_v59 = vsub.f32 %v8364_v28, %v589_v54  ;;  %v8539_v25 = vsub.f32 %v8367_v29, %v590_v8  ;;  %v707_v62 = vsel %vm477_vm0, %v651_v58, 0.0  ;;  %v710_v4 = vsel %vm477_vm0, %v652_v24, 0.0 }
  0xbc   : > { %705 = vadd.xlane.f32.xlu1 %v704_v51  ;;  %708 = vadd.xlane.f32.xlu0 %v707_v62  ;;  %v528_v63 = vpop.xlane.xlu0 %527  ;;  %v531_v3 = vpop.xlane.xlu1 %530 }
  0xbd   : > { %v591_v6 = vmul.f32 0.25, %v528_v63  ;;  %v592_v12 = vmul.f32 0.25, %v531_v3  ;;  %v653_v14 = vmul.f32 %v8536_v59, %v8536_v59  ;;  %v654_v28 = vmul.f32 %v8539_v25, %v8539_v25 }
  0xbf   : > { %v8548_v15 = vsub.f32 %v8374_v32, %v591_v6  ;;  %v8551_v29 = vsub.f32 %v8377_v33, %v592_v12  ;;  %v713_v18 = vsel %vm477_vm0, %v653_v14, 0.0  ;;  %v716_v23 = vsel %vm477_vm0, %v654_v28, 0.0 }
  0xc0   : > { %711 = vadd.xlane.f32.xlu1 %v710_v4  ;;  %714 = vadd.xlane.f32.xlu0 %v713_v18  ;;  %v534_v19 = vpop.xlane.xlu0 %533  ;;  %v537_v22 = vpop.xlane.xlu1 %536 }
  0xc1   : > { %v593_v0 = vmul.f32 0.25, %v534_v19  ;;  %v594_v16 = vmul.f32 0.25, %v537_v22  ;;  %v655_v30 = vmul.f32 %v8548_v15, %v8548_v15  ;;  %v656_v32 = vmul.f32 %v8551_v29, %v8551_v29 }
  0xc3   : > { %v8560_v31 = vsub.f32 %v8384_v36, %v593_v0  ;;  %v8563_v33 = vsub.f32 %v8387_v37, %v594_v16  ;;  %v719_v34 = vsel %vm477_vm0, %v655_v30, 0.0  ;;  %v722_v39 = vsel %vm477_vm0, %v656_v32, 0.0 }
  0xc4   : > { %717 = vadd.xlane.f32.xlu1 %v716_v23  ;;  %720 = vadd.xlane.f32.xlu0 %v719_v34  ;;  %v540_v35 = vpop.xlane.xlu0 %539  ;;  %v543_v38 = vpop.xlane.xlu1 %542  ;;  %v1112_v23 = vld [vmem:[%s12374_s3] sm:$0x3] }
  0xc5   : > { %v595_v42 = vmul.f32 0.25, %v540_v35  ;;  %v596_v20 = vmul.f32 0.25, %v543_v38  ;;  %v657_v46 = vmul.f32 %v8560_v31, %v8560_v31  ;;  %v658_v36 = vmul.f32 %v8563_v33, %v8563_v33  ;;  %7926 = vmatprep.subr.msk.bf16.mxu0 %vm1162_vm1, %v1112_v23  ;;  %7927 = vmatprep.subr.msk.bf16.mxu1 %vm1162_vm1, %v1112_v23 }
  0xc6   : > { %v1164_v35 = vsel %vm1162_vm1, %v1112_v23, 0 }
  0xc7   : > { %v8572_v47 = vsub.f32 %v8394_v40, %v595_v42  ;;  %v8575_v37 = vsub.f32 %v8397_v41, %v596_v20  ;;  %v725_v50 = vsel %vm477_vm0, %v657_v46, 0.0  ;;  %v728_v8 = vsel %vm477_vm0, %v658_v36, 0.0  ;;  %7483 = vmatpush3.bf16.msra.mxu0 %v1164_v35  ;;  %7925 = vmatpush3.bf16.msra.mxu1 %v1164_v35 }
  0xc8   : > { %723 = vadd.xlane.f32.xlu1 %v722_v39  ;;  %726 = vadd.xlane.f32.xlu0 %v725_v50  ;;  %v546_v51 = vpop.xlane.xlu0 %545  ;;  %v549_v54 = vpop.xlane.xlu1 %548 }
  0xc9   : > { %v597_v58 = vmul.f32 0.25, %v546_v51  ;;  %v598_v24 = vmul.f32 0.25, %v549_v54  ;;  %v659_v62 = vmul.f32 %v8572_v47, %v8572_v47  ;;  %v660_v40 = vmul.f32 %v8575_v37, %v8575_v37 }
  0xcb   : > { %v8584_v63 = vsub.f32 %v8404_v44, %v597_v58  ;;  %v8587_v41 = vsub.f32 %v8407_v45, %v598_v24  ;;  %v731_v3 = vsel %vm477_vm0, %v659_v62, 0.0  ;;  %v734_v12 = vsel %vm477_vm0, %v660_v40, 0.0 }
  0xcc   : > { %729 = vadd.xlane.f32.xlu1 %v728_v8  ;;  %732 = vadd.xlane.f32.xlu0 %v731_v3  ;;  %v552_v4 = vpop.xlane.xlu0 %551  ;;  %v555_v6 = vpop.xlane.xlu1 %554 }
  0xcd   : > { %v599_v14 = vmul.f32 0.25, %v552_v4  ;;  %v600_v28 = vmul.f32 0.25, %v555_v6  ;;  %v661_v18 = vmul.f32 %v8584_v63, %v8584_v63  ;;  %v662_v44 = vmul.f32 %v8587_v41, %v8587_v41 }
  0xcf   : > { %v8596_v19 = vsub.f32 %v8414_v48, %v599_v14  ;;  %v8599_v45 = vsub.f32 %v8417_v49, %v600_v28  ;;  %v737_v22 = vsel %vm477_vm0, %v661_v18, 0.0  ;;  %v740_v30 = vsel %vm477_vm0, %v662_v44, 0.0 }
  0xd0   : > { %735 = vadd.xlane.f32.xlu1 %v734_v12  ;;  %738 = vadd.xlane.f32.xlu0 %v737_v22  ;;  %v558_v0 = vpop.xlane.xlu0 %557  ;;  %v561_v16 = vpop.xlane.xlu1 %560 }
  0xd1   : > { %v601_v32 = vmul.f32 0.25, %v558_v0  ;;  %v602_v34 = vmul.f32 0.25, %v561_v16  ;;  %v663_v48 = vmul.f32 %v8596_v19, %v8596_v19  ;;  %v664_v49 = vmul.f32 %v8599_v45, %v8599_v45 }
  0xd3   : > { %v8611_v38 = vsub.f32 %v8424_v52, %v601_v32  ;;  %v8614_v39 = vsub.f32 %v8427_v53, %v602_v34  ;;  %v743_v42 = vsel %vm477_vm0, %v663_v48, 0.0  ;;  %v746_v36 = vsel %vm477_vm0, %v664_v49, 0.0 }
  0xd4   : > { %741 = vadd.xlane.f32.xlu1 %v740_v30  ;;  %744 = vadd.xlane.f32.xlu0 %v743_v42  ;;  %v564_v20 = vpop.xlane.xlu0 %563  ;;  %v567_v46 = vpop.xlane.xlu1 %566  ;;  %v896_v49 = vlaneseq }
  0xd5   : > { %v603_v50 = vmul.f32 0.25, %v564_v20  ;;  %v604_v51 = vmul.f32 0.25, %v567_v46  ;;  %v665_v54 = vmul.f32 %v8611_v38, %v8611_v38  ;;  %v666_v52 = vmul.f32 %v8614_v39, %v8614_v39 }
  0xd7   : > { %v8623_v53 = vsub.f32 %v8434_v56, %v603_v50  ;;  %v8626_v8 = vsub.f32 %v8437_v57, %v604_v51  ;;  %v749_v58 = vsel %vm477_vm0, %v665_v54, 0.0  ;;  %v752_v40 = vsel %vm477_vm0, %v666_v52, 0.0 }
  0xd8   : > { %747 = vadd.xlane.f32.xlu1 %v746_v36  ;;  %750 = vadd.xlane.f32.xlu0 %v749_v58  ;;  %v570_v24 = vpop.xlane.xlu0 %569  ;;  %v573_v62 = vpop.xlane.xlu1 %572  ;;  %v897_v51 = vshrl.u32 %v896_v49, 7 }
  0xd9   : > { %v605_v3 = vmul.f32 0.25, %v570_v24  ;;  %v606_v4 = vmul.f32 0.25, %v573_v62  ;;  %v667_v6 = vmul.f32 %v8623_v53, %v8623_v53  ;;  %v668_v56 = vmul.f32 %v8626_v8, %v8626_v8 }
  0xdb   : > { %v8635_v12 = vsub.f32 %v8444_v60, %v605_v3  ;;  %v8638_v57 = vsub.f32 %v8447_v61, %v606_v4  ;;  %v755_v14 = vsel %vm477_vm0, %v667_v6, 0.0  ;;  %v758_v28 = vsel %vm477_vm0, %v668_v56, 0.0  ;;  %v1608_v61 = vld [vmem:[%s12376_s5] sm:$0xf] }
  0xdc   : > { %753 = vadd.xlane.f32.xlu1 %v752_v40  ;;  %756 = vadd.xlane.f32.xlu0 %v755_v14  ;;  %v8652_v3 = vsub.s32 0, %v897_v51  ;;  %v799_v4 = vld [vmem:[%s12373_s2] sm:$0x3]  ;;  %v8657_v56 = vsub.s32 1, %v897_v51 }
  0xdd   : > { %v669_v18 = vmul.f32 %v8635_v12, %v8635_v12  ;;  %v670_v44 = vmul.f32 %v8638_v57, %v8638_v57  ;;  %7928 = vmatprep.subr.msk.bf16.mxu1 %vm1658_vm2, %v1608_v61 }
  0xde   : > { %12596 = vst [vmem:[#allocation3_spill] sm:$0xff] %v8652_v3  ;;  %12597 = vst [vmem:[#allocation4_spill] sm:$0xff] %v8657_v56 }
  0xdf   : > { %v761_v22 = vsel %vm477_vm0, %v669_v18, 0.0  ;;  %v764_v60 = vsel %vm477_vm0, %v670_v44, 0.0 }
  0xe0   : > { %759 = vadd.xlane.f32.xlu1 %v758_v28  ;;  %762 = vadd.xlane.f32.xlu0 %v761_v22 }
  0xe4   : > { %765 = vadd.xlane.f32.xlu1 %v764_v60  ;;  %v8660_v60 = vrot.slane %v799_v4, %v8652_v3 }
 0x12d   : > { %v673_v23 = vpop.xlane.xlu0 %672 }
 0x12e   : > { %v767_v0 = vmul.f32 0.25, %v673_v23 }
 0x130   : > { %v800_v16 = vadd.f32 1e-05, %v767_v0 }
 0x131   : > { %v676_v30 = vpop.xlane.xlu1 %675  ;;  %v679_v32 = vpop.xlane.xlu0 %678 }
 0x132   : > { %7970 = vrsqrt.f32 %v800_v16  ;;  %v768_v34 = vmul.f32 0.25, %v676_v30  ;;  %v769_v48 = vmul.f32 0.25, %v679_v32  ;;  %v8664_v32 = vrot.slane %v799_v4, %v8657_v56 }
 0x134   : > { %v801_v35 = vadd.f32 1e-05, %v768_v34  ;;  %v802_v42 = vadd.f32 1e-05, %v769_v48 }
 0x135   : > { %v682_v20 = vpop.xlane.xlu1 %681  ;;  %v685_v46 = vpop.xlane.xlu0 %684 }
 0x136   : > { %7972 = vrsqrt.f32 %v801_v35  ;;  %v770_v36 = vmul.f32 0.25, %v682_v20  ;;  %v771_v50 = vmul.f32 0.25, %v685_v46 }
 0x137   : > { %7974 = vrsqrt.f32 %v802_v42 }
 0x138   : > { %v803_v54 = vadd.f32 1e-05, %v770_v36  ;;  %v804_v52 = vadd.f32 1e-05, %v771_v50 }
 0x139   : > { %v688_v58 = vpop.xlane.xlu1 %687  ;;  %v691_v24 = vpop.xlane.xlu0 %690 }
 0x13a   : > { %7976 = vrsqrt.f32 %v803_v54  ;;  %v772_v62 = vmul.f32 0.25, %v688_v58  ;;  %v773_v40 = vmul.f32 0.25, %v691_v24  ;;  %v8671_v24 = vsel %vm1658_vm2, %v1608_v61, 0 }
 0x13b   : > { %7978 = vrsqrt.f32 %v804_v52 }
 0x13c   : > { %v805_v6 = vadd.f32 1e-05, %v772_v62  ;;  %v806_v14 = vadd.f32 1e-05, %v773_v40 }
 0x13d   : > { %v694_v28 = vpop.xlane.xlu1 %693  ;;  %v697_v18 = vpop.xlane.xlu0 %696 }
 0x13e   : > { %7980 = vrsqrt.f32 %v805_v6  ;;  %v774_v44 = vmul.f32 0.25, %v694_v28  ;;  %v775_v22 = vmul.f32 0.25, %v697_v18 }
 0x13f   : > { %v7971_v23 = vpop.eup %7970  ;;  %7982 = vrsqrt.f32 %v806_v14 }
 0x140   : > { %v807_v0 = vadd.f32 1e-05, %v774_v44  ;;  %v808_v16 = vadd.f32 1e-05, %v775_v22  ;;  %v864_v30 = vmul.f32 %v7971_v23, %v8454_v10 }
 0x141   : > { %v700_v34 = vpop.xlane.xlu1 %699  ;;  %v703_v48 = vpop.xlane.xlu0 %702 }
 0x142   : > { %7984 = vrsqrt.f32 %v807_v0  ;;  %v776_v49 = vmul.f32 0.25, %v700_v34  ;;  %v777_v35 = vmul.f32 0.25, %v703_v48  ;;  %v900_v42 = vmul.f32 %v8660_v60, %v864_v30 }
 0x143   : > { %v7973_v20 = vpop.eup %7972  ;;  %7986 = vrsqrt.f32 %v808_v16 }
 0x144   : > { %v7975_v46 = vpop.eup %7974  ;;  %v809_v36 = vadd.f32 1e-05, %v776_v49  ;;  %v810_v50 = vadd.f32 1e-05, %v777_v35  ;;  %v865_v51 = vmul.f32 %v7973_v20, %v8464_v26  ;;  %v936_v10 = vadd.f32 %v8664_v32, %v900_v42 }
 0x145   : > { %v706_v54 = vpop.xlane.xlu1 %705  ;;  %v709_v52 = vpop.xlane.xlu0 %708  ;;  %v866_v58 = vmul.f32 %v7975_v46, %v8457_v11  ;;  %v12394_v11 = vmov 0.0  }
 0x146   : > { %7988 = vrsqrt.f32 %v809_v36  ;;  %v778_v62 = vmul.f32 0.25, %v706_v54  ;;  %v779_v40 = vmul.f32 0.25, %v709_v52  ;;  %v901_v4 = vmul.f32 %v8660_v60, %v865_v51 }
 0x147   : > { %v7977_v6 = vpop.eup %7976  ;;  %7990 = vrsqrt.f32 %v810_v50  ;;  %vm968_vm3 = vcmp.gt.f32.partialorder %v936_v10, 0.0  ;;  %vm1000_vm4 = vcmp.lt.f32.partialorder %v936_v10, 0.0  ;;  %v902_v26 = vmul.f32 %v8660_v60, %v866_v58 }
 0x148   : > { %v7979_v14 = vpop.eup %7978  ;;  %v811_v28 = vadd.f32 1e-05, %v778_v62  ;;  %v812_v18 = vadd.f32 1e-05, %v779_v40  ;;  %v937_v44 = vadd.f32 %v8664_v32, %v901_v4  ;;  %v1032_v61 = vsel %vm1000_vm4, -1.0, %v12394_v11 }
 0x149   : > { %v712_v22 = vpop.xlane.xlu1 %711  ;;  %v715_v23 = vpop.xlane.xlu0 %714  ;;  %v1064_v0 = vsel %vm968_vm3, 1.0, %v1032_v61  ;;  %v867_v16 = vmul.f32 %v7977_v6, %v8467_v27  ;;  %v938_v30 = vadd.f32 %v8664_v32, %v902_v26  ;;  %v868_v34 = vmul.f32 %v7979_v14, %v8476_v2 }
 0x14a   : > { %7992 = vrsqrt.f32 %v811_v28  ;;  %v780_v48 = vmul.f32 0.25, %v712_v22  ;;  %v781_v49 = vmul.f32 0.25, %v715_v23  ;;  %vm969_vm5 = vcmp.gt.f32.partialorder %v937_v44, 0.0 }
 0x14b   : > { %v7981_v35 = vpop.eup %7980  ;;  %7994 = vrsqrt.f32 %v812_v18  ;;  %vm1001_vm6 = vcmp.lt.f32.partialorder %v937_v44, 0.0  ;;  %v903_v42 = vmul.f32 %v8660_v60, %v867_v16  ;;  %vm970_vm7 = vcmp.gt.f32.partialorder %v938_v30, 0.0 }
 0x14c   : > { %v813_v20 = vadd.f32 1e-05, %v780_v48  ;;  %v814_v46 = vadd.f32 1e-05, %v781_v49  ;;  %v1033_v36 = vsel %vm1001_vm6, -1.0, %v12394_v11  ;;  %vm1002_vm8 = vcmp.lt.f32.partialorder %v938_v30, 0.0  ;;  %v7983_v52 = vpop.eup %7982 }
 0x14d   : > { %v718_v27 = vpop.xlane.xlu1 %717  ;;  %v721_v50 = vpop.xlane.xlu0 %720  ;;  %v1065_v51 = vsel %vm969_vm5, 1.0, %v1033_v36  ;;  %v939_v2 = vadd.f32 %v8664_v32, %v903_v42  ;;  %v1034_v10 = vsel %vm1002_vm8, -1.0, %v12394_v11  ;;  %v869_v54 = vmul.f32 %v7981_v35, %v8479_v5 }
 0x14e   : > { %7996 = vrsqrt.f32 %v813_v20  ;;  %v782_v58 = vmul.f32 0.25, %v718_v27  ;;  %v783_v62 = vmul.f32 0.25, %v721_v50  ;;  %v1096_v40 = vpack.c.bf16 %v1065_v51, %v1064_v0 }
 0x14f   : > { %v7985_v4 = vpop.eup %7984  ;;  %7998 = vrsqrt.f32 %v814_v46  ;;  %vm971_vm9 = vcmp.gt.f32.partialorder %v939_v2, 0.0  ;;  %vm1003_vm10 = vcmp.lt.f32.partialorder %v939_v2, 0.0  ;;  %v1066_v6 = vsel %vm970_vm7, 1.0, %v1034_v10 }
 0x150   : > { %v7987_v26 = vpop.eup %7986  ;;  %v815_v14 = vadd.f32 1e-05, %v782_v58  ;;  %v816_v28 = vadd.f32 1e-05, %v783_v62  ;;  %7484 = vmatprep.mubr.msk.bf16.mxu0 %vm477_vm0, %v1096_v40  ;;  %v1035_v18 = vsel %vm1003_vm10, -1.0, %v12394_v11  ;;  %v904_v5 = vmul.f32 %v8660_v60, %v868_v34 }
 0x151   : > { %v724_v44 = vpop.xlane.xlu1 %723  ;;  %v727_v61 = vpop.xlane.xlu0 %726  ;;  %v1067_v22 = vsel %vm971_vm9, 1.0, %v1035_v18  ;;  %v905_v23 = vmul.f32 %v8660_v60, %v869_v54  ;;  %v870_v0 = vmul.f32 %v7983_v52, %v8488_v55  ;;  %v871_v16 = vmul.f32 %v7985_v4, %v8491_v9 }
 0x152   : > { %8000 = vrsqrt.f32 %v815_v14  ;;  %v784_v30 = vmul.f32 0.25, %v724_v44  ;;  %v785_v48 = vmul.f32 0.25, %v727_v61  ;;  %v1097_v49 = vpack.c.bf16 %v1067_v22, %v1066_v6 }
 0x153   : > { %v7989_v35 = vpop.eup %7988  ;;  %8002 = vrsqrt.f32 %v816_v28  ;;  %v940_v42 = vadd.f32 %v8664_v32, %v904_v5  ;;  %v941_v20 = vadd.f32 %v8664_v32, %v905_v23  ;;  %v906_v34 = vmul.f32 %v8660_v60, %v870_v0 }
 0x154   : > { %v7991_v46 = vpop.eup %7990  ;;  %v817_v36 = vadd.f32 1e-05, %v784_v30  ;;  %v818_v27 = vadd.f32 1e-05, %v785_v48  ;;  %7485 = vmatmul.mubr.msk.bf16.vlgmr.msra.gmra.mxu0 %vm477_vm0, %v1097_v49  ;;  %v907_v55 = vmul.f32 %v8660_v60, %v871_v16  ;;  %v872_v9 = vmul.f32 %v7987_v26, %v8500_v7 }
 0x155   : > { %v730_v50 = vpop.xlane.xlu1 %729  ;;  %v733_v51 = vpop.xlane.xlu0 %732  ;;  %vm972_vm11 = vcmp.gt.f32.partialorder %v940_v42, 0.0  ;;  %vm973_vm12 = vcmp.gt.f32.partialorder %v941_v20, 0.0  ;;  %vm1004_vm13 = vcmp.lt.f32.partialorder %v940_v42, 0.0  ;;  %vm1005_vm14 = vcmp.lt.f32.partialorder %v941_v20, 0.0 }
 0x156   : > { %8004 = vrsqrt.f32 %v817_v36  ;;  %v786_v2 = vmul.f32 0.25, %v730_v50  ;;  %v787_v10 = vmul.f32 0.25, %v733_v51  ;;  %v1036_v54 = vsel %vm1004_vm13, -1.0, %v12394_v11 }
 0x157   : > { %v7993_v52 = vpop.eup %7992  ;;  %8006 = vrsqrt.f32 %v818_v27  ;;  %v1037_v58 = vsel %vm1005_vm14, -1.0, %v12394_v11  ;;  %v1068_v62 = vsel %vm972_vm11, 1.0, %v1036_v54  ;;  %v942_v40 = vadd.f32 %v8664_v32, %v906_v34 }
 0x158   : > { %v8701_v4 = vpop.eup %7994  ;;  %v819_v7 = vadd.f32 1e-05, %v786_v2  ;;  %v820_v6 = vadd.f32 1e-05, %v787_v10  ;;  %v1069_v26 = vsel %vm973_vm12, 1.0, %v1037_v58  ;;  %v943_v14 = vadd.f32 %v8664_v32, %v907_v55 }
 0x159   : > { %v1098_v28 = vpack.c.bf16 %v1069_v26, %v1068_v62  ;;  %v736_v18 = vpop.xlane.xlu1 %735  ;;  %v739_v5 = vpop.xlane.xlu0 %738  ;;  %vm974_vm15 = vcmp.gt.f32.partialorder %v942_v40, 0.0  ;;  %vm1006_vm1 = vcmp.lt.f32.partialorder %v942_v40, 0.0  ;;  %v873_v44 = vmul.f32 %v7989_v35, %v8503_v13 }
 0x15a   : > { %8008 = vrsqrt.f32 %v819_v7  ;;  %v788_v61 = vmul.f32 0.25, %v736_v18  ;;  %v789_v22 = vmul.f32 0.25, %v739_v5  ;;  %vm975_vm3 = vcmp.gt.f32.partialorder %v943_v14, 0.0 }
 0x15b   : > { %v7997_v23 = vpop.eup %7996  ;;  %8010 = vrsqrt.f32 %v820_v6  ;;  %7488 = vmatprep.mubr.msk.bf16.mxu0 %vm477_vm0, %v1098_v28  ;;  %vm1007_vm4 = vcmp.lt.f32.partialorder %v943_v14, 0.0  ;;  %v1038_v0 = vsel %vm1006_vm1, -1.0, %v12394_v11  ;;  %v908_v16 = vmul.f32 %v8660_v60, %v872_v9 }
 0x15c   : > { %v8708_v30 = vpop.eup %7998  ;;  %v821_v48 = vadd.f32 1e-05, %v788_v61  ;;  %v822_v49 = vadd.f32 1e-05, %v789_v22  ;;  %v1039_v42 = vsel %vm1007_vm4, -1.0, %v12394_v11  ;;  %v1070_v13 = vsel %vm974_vm15, 1.0, %v1038_v0 }
 0x15d   : > { %v1071_v35 = vsel %vm975_vm3, 1.0, %v1039_v42  ;;  %v742_v20 = vpop.xlane.xlu1 %741  ;;  %v745_v34 = vpop.xlane.xlu0 %744  ;;  %v909_v36 = vmul.f32 %v8660_v60, %v873_v44  ;;  %v944_v27 = vadd.f32 %v8664_v32, %v908_v16  ;;  %v874_v55 = vmul.f32 %v7991_v46, %v8512_v1 }
 0x15e   : > { %8012 = vrsqrt.f32 %v821_v48  ;;  %v1099_v50 = vpack.c.bf16 %v1071_v35, %v1070_v13  ;;  %v790_v9 = vmul.f32 0.25, %v742_v20  ;;  %v791_v51 = vmul.f32 0.25, %v745_v34 }
 0x15f   : > { %v8001_v2 = vpop.eup %8000  ;;  %8014 = vrsqrt.f32 %v822_v49  ;;  %v945_v10 = vadd.f32 %v8664_v32, %v909_v36  ;;  %vm976_vm5 = vcmp.gt.f32.partialorder %v944_v27, 0.0  ;;  %vm1008_vm6 = vcmp.lt.f32.partialorder %v944_v27, 0.0 }
 0x160   : > { %v8716_v54 = vpop.eup %8002  ;;  %7489 = vmatmul.mubr.msk.bf16.gmra.mxu0 %vm477_vm0, %v1099_v50  ;;  %v823_v58 = vadd.f32 1e-05, %v790_v9  ;;  %v824_v62 = vadd.f32 1e-05, %v791_v51  ;;  %v1040_v40 = vsel %vm1008_vm6, -1.0, %v12394_v11  ;;  %v875_v1 = vmul.f32 %v7993_v52, %v8515_v17 }
 0x161   : > { %vm977_vm7 = vcmp.gt.f32.partialorder %v945_v10, 0.0  ;;  %vm1009_vm8 = vcmp.lt.f32.partialorder %v945_v10, 0.0  ;;  %v1072_v46 = vsel %vm976_vm5, 1.0, %v1040_v40  ;;  %v748_v7 = vpop.xlane.xlu1 %747  ;;  %v751_v6 = vpop.xlane.xlu0 %750  ;;  %v910_v26 = vmul.f32 %v8660_v60, %v874_v55 }
 0x162   : > { %8016 = vrsqrt.f32 %v823_v58  ;;  %v1041_v14 = vsel %vm1009_vm8, -1.0, %v12394_v11  ;;  %v792_v28 = vmul.f32 0.25, %v748_v7  ;;  %v793_v18 = vmul.f32 0.25, %v751_v6 }
 0x163   : > { %v8723_v5 = vpop.eup %8004  ;;  %8018 = vrsqrt.f32 %v824_v62  ;;  %v1073_v44 = vsel %vm977_vm7, 1.0, %v1041_v14  ;;  %v911_v61 = vmul.f32 %v8660_v60, %v875_v1  ;;  %v946_v17 = vadd.f32 %v8664_v32, %v910_v26 }
 0x164   : > { %v8727_v52 = vpop.eup %8006  ;;  %v1100_v22 = vpack.c.bf16 %v1073_v44, %v1072_v46  ;;  %v825_v0 = vadd.f32 1e-05, %v792_v28  ;;  %v826_v16 = vadd.f32 1e-05, %v793_v18  ;;  %v876_v48 = vmul.f32 %v8701_v4, %v8524_v43 }
 0x165   : > { %v947_v49 = vadd.f32 %v8664_v32, %v911_v61  ;;  %vm978_vm9 = vcmp.gt.f32.partialorder %v946_v17, 0.0  ;;  %vm1010_vm10 = vcmp.lt.f32.partialorder %v946_v17, 0.0  ;;  %v754_v42 = vpop.xlane.xlu1 %753  ;;  %v757_v13 = vpop.xlane.xlu0 %756  ;;  %v877_v35 = vmul.f32 %v7997_v23, %v8527_v21 }
 0x166   : > { %7492 = vmatprep.mubr.msk.bf16.mxu0 %vm477_vm0, %v1100_v22  ;;  %8020 = vrsqrt.f32 %v825_v0  ;;  %v1042_v20 = vsel %vm1010_vm10, -1.0, %v12394_v11  ;;  %v794_v34 = vmul.f32 0.25, %v754_v42  ;;  %v795_v36 = vmul.f32 0.25, %v757_v13 }
 0x167   : > { %v8735_v27 = vpop.eup %8008  ;;  %8022 = vrsqrt.f32 %v826_v16  ;;  %vm979_vm11 = vcmp.gt.f32.partialorder %v947_v49, 0.0  ;;  %vm1011_vm12 = vcmp.lt.f32.partialorder %v947_v49, 0.0  ;;  %v1074_v43 = vsel %vm978_vm9, 1.0, %v1042_v20 }
 0x168   : > { %v8737_v4 = vpop.eup %8010  ;;  %v1043_v55 = vsel %vm1011_vm12, -1.0, %v12394_v11  ;;  %v827_v50 = vadd.f32 1e-05, %v794_v34  ;;  %v828_v9 = vadd.f32 1e-05, %v795_v36  ;;  %v912_v21 = vmul.f32 %v8660_v60, %v876_v48 }
 0x169   : > { %v1075_v23 = vsel %vm979_vm11, 1.0, %v1043_v55  ;;  %v913_v51 = vmul.f32 %v8660_v60, %v877_v35  ;;  %v760_v10 = vpop.xlane.xlu1 %759  ;;  %v763_v58 = vpop.xlane.xlu0 %762  ;;  %v878_v62 = vmul.f32 %v8708_v30, %v8536_v59  ;;  %v879_v40 = vmul.f32 %v8001_v2, %v8539_v25 }
 0x16a   : > { %v1101_v1 = vpack.c.bf16 %v1075_v23, %v1074_v43  ;;  %8024 = vrsqrt.f32 %v827_v50  ;;  %v948_v46 = vadd.f32 %v8664_v32, %v912_v21  ;;  %v796_v7 = vmul.f32 0.25, %v760_v10 }
 0x16b   : > { %v8013_v6 = vpop.eup %8012  ;;  %8026 = vrsqrt.f32 %v828_v9  ;;  %v949_v26 = vadd.f32 %v8664_v32, %v913_v51  ;;  %v797_v14 = vmul.f32 0.25, %v763_v58  ;;  %v914_v28 = vmul.f32 %v8660_v60, %v878_v62 }
 0x16c   : > { %v8015_v18 = vpop.eup %8014  ;;  %7493 = vmatmul.mubr.msk.bf16.gmra.mxu0 %vm477_vm0, %v1101_v1  ;;  %vm980_vm13 = vcmp.gt.f32.partialorder %v948_v46, 0.0  ;;  %vm1012_vm14 = vcmp.lt.f32.partialorder %v948_v46, 0.0  ;;  %v829_v59 = vadd.f32 1e-05, %v796_v7  ;;  %v915_v25 = vmul.f32 %v8660_v60, %v879_v40 }
 0x16d   : > { %vm981_vm15 = vcmp.gt.f32.partialorder %v949_v26, 0.0  ;;  %vm1013_vm1 = vcmp.lt.f32.partialorder %v949_v26, 0.0  ;;  %v1044_v30 = vsel %vm1012_vm14, -1.0, %v12394_v11  ;;  %v830_v2 = vadd.f32 1e-05, %v797_v14  ;;  %v766_v44 = vpop.xlane.xlu1 %765 }
 0x16e   : > { %v1045_v61 = vsel %vm1013_vm1, -1.0, %v12394_v11  ;;  %v1076_v17 = vsel %vm980_vm13, 1.0, %v1044_v30  ;;  %8028 = vrsqrt.f32 %v829_v59  ;;  %v950_v22 = vadd.f32 %v8664_v32, %v914_v28 }
 0x16f   : > { %v8753_v0 = vpop.eup %8016  ;;  %v1077_v16 = vsel %vm981_vm15, 1.0, %v1045_v61  ;;  %8030 = vrsqrt.f32 %v830_v2  ;;  %v951_v48 = vadd.f32 %v8664_v32, %v915_v25  ;;  %v798_v49 = vmul.f32 0.25, %v766_v44 }
 0x170   : > { %v8756_v42 = vpop.eup %8018  ;;  %v1102_v13 = vpack.c.bf16 %v1077_v16, %v1076_v17  ;;  %vm982_vm3 = vcmp.gt.f32.partialorder %v950_v22, 0.0  ;;  %vm1014_vm4 = vcmp.lt.f32.partialorder %v950_v22, 0.0  ;;  %v880_v35 = vmul.f32 %v8716_v54, %v8548_v15 }
 0x171   : > { %vm983_vm5 = vcmp.gt.f32.partialorder %v951_v48, 0.0  ;;  %vm1015_vm6 = vcmp.lt.f32.partialorder %v951_v48, 0.0  ;;  %v1046_v20 = vsel %vm1014_vm4, -1.0, %v12394_v11  ;;  %v831_v34 = vadd.f32 1e-05, %v798_v49 }
 0x172   : > { %7496 = vmatprep.mubr.msk.bf16.mxu0 %vm477_vm0, %v1102_v13  ;;  %v1047_v36 = vsel %vm1015_vm6, -1.0, %v12394_v11  ;;  %v1078_v43 = vsel %vm982_vm3, 1.0, %v1046_v20  ;;  %v881_v55 = vmul.f32 %v8723_v5, %v8551_v29  ;;  %v916_v50 = vmul.f32 %v8660_v60, %v880_v35 }
 0x173   : > { %v8021_v9 = vpop.eup %8020  ;;  %v1079_v21 = vsel %vm983_vm5, 1.0, %v1047_v36  ;;  %8032 = vrsqrt.f32 %v831_v34  ;;  %v882_v15 = vmul.f32 %v8727_v52, %v8560_v31  ;;  %v883_v54 = vmul.f32 %v8735_v27, %v8563_v33 }
 0x174   : > { %v8023_v23 = vpop.eup %8022  ;;  %v1103_v51 = vpack.c.bf16 %v1079_v21, %v1078_v43  ;;  %v917_v10 = vmul.f32 %v8660_v60, %v881_v55  ;;  %v952_v58 = vadd.f32 %v8664_v32, %v916_v50  ;;  %v884_v29 = vmul.f32 %v8737_v4, %v8572_v47 }
 0x175   : > { %v918_v5 = vmul.f32 %v8660_v60, %v882_v15  ;;  %v919_v62 = vmul.f32 %v8660_v60, %v883_v54  ;;  %v885_v40 = vmul.f32 %v8013_v6, %v8575_v37  ;;  %v886_v31 = vmul.f32 %v8015_v18, %v8584_v63 }
 0x176   : > { %7497 = vmatmul.mubr.msk.bf16.gmra.mxu0 %vm477_vm0, %v1103_v51  ;;  %v953_v33 = vadd.f32 %v8664_v32, %v917_v10  ;;  %vm984_vm7 = vcmp.gt.f32.partialorder %v952_v58, 0.0  ;;  %vm1016_vm8 = vcmp.lt.f32.partialorder %v952_v58, 0.0  ;;  %v920_v52 = vmul.f32 %v8660_v60, %v884_v29 }
 0x177   : > { %v8025_v27 = vpop.eup %8024  ;;  %v1048_v1 = vsel %vm1016_vm8, -1.0, %v12394_v11  ;;  %v954_v47 = vadd.f32 %v8664_v32, %v918_v5  ;;  %v955_v4 = vadd.f32 %v8664_v32, %v919_v62  ;;  %v921_v46 = vmul.f32 %v8660_v60, %v885_v40 }
 0x178   : > { %v8027_v37 = vpop.eup %8026  ;;  %vm985_vm9 = vcmp.gt.f32.partialorder %v953_v33, 0.0  ;;  %vm1017_vm10 = vcmp.lt.f32.partialorder %v953_v33, 0.0  ;;  %v1080_v63 = vsel %vm984_vm7, 1.0, %v1048_v1  ;;  %v956_v7 = vadd.f32 %v8664_v32, %v920_v52 }
 0x179   : > { %v1049_v6 = vsel %vm1017_vm10, -1.0, %v12394_v11  ;;  %vm986_vm11 = vcmp.gt.f32.partialorder %v954_v47, 0.0  ;;  %vm987_vm12 = vcmp.gt.f32.partialorder %v955_v4, 0.0  ;;  %vm1018_vm13 = vcmp.lt.f32.partialorder %v954_v47, 0.0 }
 0x17a   : > { %v1081_v26 = vsel %vm985_vm9, 1.0, %v1049_v6  ;;  %vm1019_vm14 = vcmp.lt.f32.partialorder %v955_v4, 0.0  ;;  %v1050_v14 = vsel %vm1018_vm13, -1.0, %v12394_v11  ;;  %v957_v28 = vadd.f32 %v8664_v32, %v921_v46 }
 0x17b   : > { %v8029_v18 = vpop.eup %8028  ;;  %v1104_v59 = vpack.c.bf16 %v1081_v26, %v1080_v63  ;;  %v1051_v25 = vsel %vm1019_vm14, -1.0, %v12394_v11  ;;  %v1082_v30 = vsel %vm986_vm11, 1.0, %v1050_v14  ;;  %vm988_vm15 = vcmp.gt.f32.partialorder %v956_v7, 0.0 }
 0x17c   : > { %v8031_v2 = vpop.eup %8030  ;;  %v1083_v44 = vsel %vm987_vm12, 1.0, %v1051_v25  ;;  %vm989_vm1 = vcmp.gt.f32.partialorder %v957_v28, 0.0  ;;  %vm1020_vm3 = vcmp.lt.f32.partialorder %v956_v7, 0.0  ;;  %vm1021_vm4 = vcmp.lt.f32.partialorder %v957_v28, 0.0 }
 0x17d   : > { %7500 = vmatprep.mubr.msk.bf16.mxu1 %vm477_vm0, %v1104_v59  ;;  %v1105_v61 = vpack.c.bf16 %v1083_v44, %v1082_v30  ;;  %v1052_v17 = vsel %vm1020_vm3, -1.0, %v12394_v11  ;;  %v1053_v22 = vsel %vm1021_vm4, -1.0, %v12394_v11  ;;  %v887_v16 = vmul.f32 %v8753_v0, %v8587_v41 }
 0x17e   : > { %v1084_v48 = vsel %vm988_vm15, 1.0, %v1052_v17  ;;  %v1085_v49 = vsel %vm989_vm1, 1.0, %v1053_v22  ;;  %v922_v13 = vmul.f32 %v8660_v60, %v886_v31  ;;  %v888_v35 = vmul.f32 %v8756_v42, %v8596_v19  ;;  %v2288_v22 = vld [vmem:[%s12372_s1 + $0x10] sm:$0xff] }
 0x17f   : > { %7501 = vmatmul.mubr.msk.bf16.vlgmr.msra.gmra.mxu1 %vm477_vm0, %v1105_v61  ;;  %v1106_v20 = vpack.c.bf16 %v1085_v49, %v1084_v48  ;;  %v923_v34 = vmul.f32 %v8660_v60, %v887_v16  ;;  %v889_v36 = vmul.f32 %v8021_v9, %v8599_v45  ;;  %v890_v43 = vmul.f32 %v8023_v23, %v8611_v38  ;;  %v2289_v16 = vld [vmem:[%s12372_s1 + $0x18] sm:$0xff]  ;;  %v2286_v49 = vld [vmem:[%s12372_s1] sm:$0xff] }
 0x180   : > { %v8033_v55 = vpop.eup %8032  ;;  %v958_v50 = vadd.f32 %v8664_v32, %v922_v13  ;;  %v924_v41 = vmul.f32 %v8660_v60, %v888_v35  ;;  %v891_v0 = vmul.f32 %v8025_v27, %v8614_v39  ;;  %v892_v21 = vmul.f32 %v8027_v37, %v8623_v53  ;;  %7517 = vmatpush3.bf16.msra.mxu1 %v8671_v24  ;;  %v2290_v13 = vld [vmem:[%s12372_s1 + $0x20] sm:$0xff]  ;;  %v2292_v35 = vld [vmem:[%s12372_s1 + $0x30] sm:$0xff] }
 0x181   : > { %7504 = vmatprep.mubr.msk.bf16.mxu1 %vm477_vm0, %v1106_v20  ;;  %v959_v19 = vadd.f32 %v8664_v32, %v923_v34  ;;  %v925_v42 = vmul.f32 %v8660_v60, %v889_v36  ;;  %v926_v45 = vmul.f32 %v8660_v60, %v890_v43  ;;  %v893_v38 = vmul.f32 %v8029_v18, %v8626_v8  ;;  %v2291_v20 = vld [vmem:[%s12372_s1 + $0x28] sm:$0xff]  ;;  %v2293_v36 = vld [vmem:[%s12372_s1 + $0x38] sm:$0xff] }
 0x182   : > { %vm990_vm5 = vcmp.gt.f32.partialorder %v958_v50, 0.0  ;;  %vm1022_vm6 = vcmp.lt.f32.partialorder %v958_v50, 0.0  ;;  %v960_v9 = vadd.f32 %v8664_v32, %v924_v41  ;;  %v927_v39 = vmul.f32 %v8660_v60, %v891_v0  ;;  %v2295_v34 = vld [vmem:[%s12372_s1 + $0x48] sm:$0xff]  ;;  %v2296_v41 = vld [vmem:[%s12372_s1 + $0x50] sm:$0xff] }
 0x183   : > { %vm991_vm7 = vcmp.gt.f32.partialorder %v959_v19, 0.0  ;;  %vm1023_vm8 = vcmp.lt.f32.partialorder %v959_v19, 0.0  ;;  %v1054_v53 = vsel %vm1022_vm6, -1.0, %v12394_v11  ;;  %v961_v24 = vadd.f32 %v8664_v32, %v925_v42  ;;  %v2299_v43 = vld [vmem:[%s12372_s1 + $0x68] sm:$0xff]  ;;  %v2297_v19 = vld [vmem:[%s12372_s1 + $0x58] sm:$0xff]  ;;  %v2300_v42 = vld [vmem:[%s12372_s1 + $0x70] sm:$0xff] }
 0x184   : > { %v1055_v15 = vsel %vm1023_vm8, -1.0, %v12394_v11  ;;  %v1086_v54 = vsel %vm990_vm5, 1.0, %v1054_v53  ;;  %vm992_vm9 = vcmp.gt.f32.partialorder %v960_v9, 0.0  ;;  %vm1024_vm10 = vcmp.lt.f32.partialorder %v960_v9, 0.0  ;;  %v8884_v50 = vld [vmem:[%s12372_s1 + $0xa8] sm:$0xff]  ;;  %v2302_v9 = vld [vmem:[%s12372_s1 + $0x80] sm:$0xff] }
 0x185   : > { %v1087_v23 = vsel %vm991_vm7, 1.0, %v1055_v15  ;;  %vm993_vm11 = vcmp.gt.f32.partialorder %v961_v24, 0.0  ;;  %vm1025_vm12 = vcmp.lt.f32.partialorder %v961_v24, 0.0  ;;  %v1056_v8 = vsel %vm1024_vm10, -1.0, %v12394_v11  ;;  %v8893_v0 = vld [vmem:[%s12372_s1 + $0xc8] sm:$0xff]  ;;  %v2304_v53 = vld [vmem:[%s12372_s1 + $0x90] sm:$0xff] }
 0x186   : > { %v1107_v51 = vpack.c.bf16 %v1087_v23, %v1086_v54  ;;  %v1057_v10 = vsel %vm1025_vm12, -1.0, %v12394_v11  ;;  %v1088_v58 = vsel %vm992_vm9, 1.0, %v1056_v8  ;;  %v962_v29 = vadd.f32 %v8664_v32, %v926_v45  ;;  %v2298_v45 = vld [vmem:[%s12372_s1 + $0x60] sm:$0xff]  ;;  %v8949_v54 = vld [vmem:[%s12372_s1 + $0xb8] sm:$0xff] }
 0x187   : > { %v1089_v5 = vsel %vm993_vm11, 1.0, %v1057_v10  ;;  %v963_v62 = vadd.f32 %v8664_v32, %v927_v39  ;;  %v928_v40 = vmul.f32 %v8660_v60, %v892_v21  ;;  %v929_v31 = vmul.f32 %v8660_v60, %v893_v38  ;;  %v2294_v21 = vld [vmem:[%s12372_s1 + $0x40] sm:$0xff]  ;;  %v2301_v38 = vld [vmem:[%s12372_s1 + $0x78] sm:$0xff] }
 0x188   : > { %7505 = vmatmul.mubr.msk.bf16.gmra.mxu1 %vm477_vm0, %v1107_v51  ;;  %v1108_v33 = vpack.c.bf16 %v1089_v5, %v1088_v58  ;;  %vm994_vm13 = vcmp.gt.f32.partialorder %v962_v29, 0.0  ;;  %vm1026_vm14 = vcmp.lt.f32.partialorder %v962_v29, 0.0  ;;  %v894_v52 = vmul.f32 %v8031_v2, %v8635_v12  ;;  %v2305_v39 = vld [vmem:[%s12372_s1 + $0x98] sm:$0xff]  ;;  %v8940_v24 = vld [vmem:[%s12372_s1 + $0xa0] sm:$0xff] }
 0x189   : > { %vm995_vm15 = vcmp.gt.f32.partialorder %v963_v62, 0.0  ;;  %vm1027_vm1 = vcmp.lt.f32.partialorder %v963_v62, 0.0  ;;  %v1058_v27 = vsel %vm1026_vm14, -1.0, %v12394_v11  ;;  %v964_v1 = vadd.f32 %v8664_v32, %v928_v40  ;;  %v1113_v15 = vld [vmem:[%s12375_s4] sm:$0x3] }
 0x18a   : > { %7508 = vmatprep.mubr.msk.bf16.mxu1 %vm477_vm0, %v1108_v33  ;;  %v1059_v47 = vsel %vm1027_vm1, -1.0, %v12394_v11  ;;  %v1090_v4 = vsel %vm994_vm13, 1.0, %v1058_v27  ;;  %v965_v46 = vadd.f32 %v8664_v32, %v929_v31  ;;  %v895_v37 = vmul.f32 %v8033_v55, %v8638_v57  ;;  %v2303_v55 = vld [vmem:[%s12372_s1 + $0x88] sm:$0xff]  ;;  %v8962_v10 = vld [vmem:[%s12372_s1 + $0xc0] sm:$0xff]  ;;  %v8971_v31 = vld [vmem:[%s12372_s1 + $0xd8] sm:$0xff] }
 0x18b   : > { %v1091_v63 = vsel %vm995_vm15, 1.0, %v1059_v47  ;;  %vm996_vm3 = vcmp.gt.f32.partialorder %v964_v1, 0.0  ;;  %vm1028_vm4 = vcmp.lt.f32.partialorder %v964_v1, 0.0  ;;  %v930_v12 = vmul.f32 %v8660_v60, %v894_v52  ;;  %v8979_v1 = vld [vmem:[%s12372_s1 + $0xe0] sm:$0xff] }
 0x18c   : > { %v1109_v7 = vpack.c.bf16 %v1091_v63, %v1090_v4  ;;  %vm997_vm5 = vcmp.gt.f32.partialorder %v965_v46, 0.0  ;;  %vm1029_vm6 = vcmp.lt.f32.partialorder %v965_v46, 0.0  ;;  %v1060_v6 = vsel %vm1028_vm4, -1.0, %v12394_v11 }
 0x18d   : > { %v1061_v26 = vsel %vm1029_vm6, -1.0, %v12394_v11  ;;  %v931_v14 = vmul.f32 %v8660_v60, %v895_v37  ;;  %v966_v28 = vadd.f32 %v8664_v32, %v930_v12  ;;  %v1092_v18 = vsel %vm996_vm3, 1.0, %v1060_v6 }
 0x18e   : > { %v1093_v59 = vsel %vm997_vm5, 1.0, %v1061_v26  ;;  %v8203_v17 = vmov 0   ;;  %v8204_v48 = vmov 1   ;;  %vm2247_vm11 = vcmask 130048  }
 0x18f   : > { %v1110_v25 = vpack.c.bf16 %v1093_v59, %v1092_v18  ;;  %v967_v57 = vadd.f32 %v8664_v32, %v931_v14  ;;  %vm1030_vm7 = vcmp.lt.f32.partialorder %v966_v28, 0.0  ;;  %vm998_vm8 = vcmp.gt.f32.partialorder %v966_v28, 0.0  ;;  %v2287_v32 = vld [vmem:[%s12372_s1 + $0x8] sm:$0xff]  ;;  %7941 = vset.pattern.permute.xlu1 %v8203_v17  ;;  %7945 = vset.pattern.permute.xlu0 %v8204_v48  ;;  %2249 = vst.msk [vmem:[#allocation2 + $0x8] sm:$0xff] %vm2247_vm11, %v12394_v11  ;;  %v2308_v18 = vld [vmem:[%s12372_s1 + $0xb0] sm:$0xff] }
 0x190   : > { %7509 = vmatmul.mubr.msk.bf16.gmra.mxu1 %vm477_vm0, %v1109_v7  ;;  %v1062_v30 = vsel %vm1030_vm7, -1.0, %v12394_v11  ;;  %2357 = vperm.xlu1 %7941, %v2287_v32   ;;  %2250 = vst.msk [vmem:[#allocation2 + $0x10] sm:$0xff] %vm2247_vm11, %v12394_v11  ;;  %2248 = vst.msk [vmem:[#allocation2] sm:$0xff] %vm2247_vm11, %v12394_v11  ;;  %v8952_v23 = vrot.slane %v1113_v15, %v8652_v3  ;;  %v8957_v8 = vrot.slane %v1113_v15, %v8657_v56  ;;  %v8989_v7 = vld [vmem:[%s12372_s1 + $0xf8] sm:$0xff]  ;;  %vm1609_vm6 = vcmask 64512  }
 0x191   : > { %7512 = vmatprep.mubr.msk.bf16.mxu1 %vm477_vm0, %v1110_v25  ;;  %vm999_vm9 = vcmp.gt.f32.partialorder %v967_v57, 0.0  ;;  %vm1031_vm10 = vcmp.lt.f32.partialorder %v967_v57, 0.0  ;;  %v1094_v60 = vsel %vm998_vm8, 1.0, %v1062_v30  ;;  %3094 = vperm.xlu0 %7945, %v2291_v20   ;;  %2251 = vst.msk [vmem:[#allocation2 + $0x118] sm:$0xff] %vm2247_vm11, %v12394_v11  ;;  %2252 = vst.msk [vmem:[#allocation2 + $0x120] sm:$0xff] %vm2247_vm11, %v12394_v11 }
 0x192   : > { %v1063_v2 = vsel %vm1031_vm10, -1.0, %v12394_v11  ;;  %2253 = vst.msk [vmem:[#allocation2 + $0x128] sm:$0xff] %vm2247_vm11, %v12394_v11 }
 0x193   : > { %v1095_v44 = vsel %vm999_vm9, 1.0, %v1063_v2 }
 0x194   : > { %v1111_v61 = vpack.c.bf16 %v1095_v44, %v1094_v60  ;;  %2362 = vperm.xlu1 %7941, %v2288_v22  }
 0x195   : > { %3110 = vperm.xlu0 %7945, %v2295_v34  }
 0x198   : > { %7513 = vmatmul.mubr.msk.bf16.gmra.mxu1 %vm477_vm0, %v1111_v61  ;;  %2367 = vperm.xlu1 %7941, %v2289_v16  }
 0x199   : > { %3126 = vperm.xlu0 %7945, %v2299_v43  }
 0x19c   : > { %7942 = vset.pattern.permute.xlu1 %v8204_v48 }
 0x19d   : > { %3074 = vperm.xlu1 %7942, %v2286_v49   ;;  %3142 = vperm.xlu0 %7945, %v2303_v55  }
 0x1a1   : > { %3078 = vperm.xlu1 %7942, %v2287_v32   ;;  %3158 = vperm.xlu0 %7945, %v8884_v50  }
 0x1a5   : > { %3082 = vperm.xlu1 %7942, %v2288_v22   ;;  %3174 = vperm.xlu0 %7945, %v8893_v0  }
 0x1a9   : > { %3086 = vperm.xlu1 %7942, %v2289_v16   ;;  %7956 = vset.pattern.permute.xlu0 %v8203_v17 }
 0x1aa   : > { %2352 = vperm.xlu0 %7956, %v2286_v49  }
 0x1ad   : > { %7943 = vset.pattern.permute.xlu1 %v8203_v17 }
 0x1ae   : > { %2372 = vperm.xlu1 %7943, %v2290_v13   ;;  %2377 = vperm.xlu0 %7956, %v2291_v20  }
 0x1b2   : > { %2382 = vperm.xlu1 %7943, %v2292_v35   ;;  %2387 = vperm.xlu0 %7956, %v2293_v36  }
 0x1b6   : > { %7944 = vset.pattern.permute.xlu1 %v8204_v48  ;;  %2392 = vperm.xlu0 %7956, %v2294_v21  }
 0x1b7   : > { %3090 = vperm.xlu1 %7944, %v2290_v13  }
 0x1ba   : > { %2407 = vperm.xlu0 %7956, %v2297_v19  }
 0x1bb   : > { %3098 = vperm.xlu1 %7944, %v2292_v35  }
 0x1be   : > { %2412 = vperm.xlu0 %7956, %v2298_v45  }
 0x1bf   : > { %3102 = vperm.xlu1 %7944, %v2293_v36  }
 0x1c2   : > { %2427 = vperm.xlu0 %7956, %v2301_v38  }
 0x1c3   : > { %7946 = vset.pattern.permute.xlu1 %v8203_v17 }
 0x1c4   : > { %2397 = vperm.xlu1 %7946, %v2295_v34  }
 0x1c6   : > { %2432 = vperm.xlu0 %7956, %v2302_v9  }
 0x1c8   : > { %2402 = vperm.xlu1 %7946, %v2296_v41  }
 0x1ca   : > { %2447 = vperm.xlu0 %7956, %v2305_v39  }
 0x1cc   : > { %7947 = vset.pattern.permute.xlu1 %v8204_v48 }
 0x1cd   : > { %3106 = vperm.xlu1 %7947, %v2294_v21  }
 0x1ce   : > { %2452 = vperm.xlu0 %7956, %v8940_v24  }
 0x1d1   : > { %3114 = vperm.xlu1 %7947, %v2296_v41  }
 0x1d2   : > { %2467 = vperm.xlu0 %7956, %v8949_v54  }
 0x1d5   : > { %3118 = vperm.xlu1 %7947, %v2297_v19  }
 0x1d6   : > { %2472 = vperm.xlu0 %7956, %v8962_v10  }
 0x1d9   : > { %7948 = vset.pattern.permute.xlu1 %v8203_v17 }
 0x1da   : > { %2417 = vperm.xlu1 %7948, %v2299_v43   ;;  %2487 = vperm.xlu0 %7956, %v8971_v31   ;;  %v9026_v43 = vld [vmem:[%s12372_s1 + $0xe8] sm:$0xff] }
 0x1de   : > { %2422 = vperm.xlu1 %7948, %v2300_v42   ;;  %2492 = vperm.xlu0 %7956, %v8979_v1  }
 0x1e2   : > { %7949 = vset.pattern.permute.xlu1 %v8204_v48  ;;  %2507 = vperm.xlu0 %7956, %v8989_v7  }
 0x1e3   : > { %3122 = vperm.xlu1 %7949, %v2298_v45  }
 0x1e6   : > { %7959 = vset.pattern.permute.xlu0 %v8204_v48 }
 0x1e7   : > { %3130 = vperm.xlu1 %7949, %v2300_v42   ;;  %3190 = vperm.xlu0 %7959, %v9026_v43  }
 0x1eb   : > { %3134 = vperm.xlu1 %7949, %v2301_v38  }
 0x1ef   : > { %7950 = vset.pattern.permute.xlu1 %v8203_v17 }
 0x1f0   : > { %2437 = vperm.xlu1 %7950, %v2303_v55  }
 0x1f4   : > { %2442 = vperm.xlu1 %7950, %v2304_v53  }
 0x1f8   : > { %7951 = vset.pattern.permute.xlu1 %v8204_v48 }
 0x1f9   : > { %3138 = vperm.xlu1 %7951, %v2302_v9  }
 0x1fd   : > { %3146 = vperm.xlu1 %7951, %v2304_v53  }
 0x201   : > { %3150 = vperm.xlu1 %7951, %v2305_v39  }
 0x205   : > { %7952 = vset.pattern.permute.xlu1 %v8203_v17 }
 0x206   : > { %2457 = vperm.xlu1 %7952, %v8884_v50  }
 0x20a   : > { %2462 = vperm.xlu1 %7952, %v2308_v18  }
 0x20e   : > { %7953 = vset.pattern.permute.xlu1 %v8204_v48 }
 0x20f   : > { %3154 = vperm.xlu1 %7953, %v8940_v24  }
 0x213   : > { %3162 = vperm.xlu1 %7953, %v2308_v18  }
 0x214   : > { %v7486_v51 = vpop.f32.mrf.mxu0 }
 0x215   : > { %v1333_v58 = vmul.f32 %v7486_v51, %v8952_v23 }
 0x216   : > { %v1200_v29 = vpop.f32.mrf.mxu0 }
 0x217   : > { %v1369_v5 = vadd.f32 %v8957_v8, %v1333_v58  ;;  %v1331_v62 = vmul.f32 %v8952_v23, %v1200_v29  ;;  %3166 = vperm.xlu1 %7953, %v8949_v54  }
 0x218   : > { %v7487_v40 = vpop.f32.mrf.mxu0 }
 0x219   : > { %v1367_v33 = vadd.f32 %v8957_v8, %v1331_v62  ;;  %v1334_v52 = vmul.f32 %v7487_v40, %v8952_v23  ;;  %v6883_v47 = vclamps-f32 %v1369_v5, 1.0 }
 0x21a   : > { %v1203_v27 = vpop.f32.mrf.mxu0 }
 0x21b   : > { %v6881_v4 = vclamps-f32 %v1367_v33, 1.0  ;;  %v1370_v46 = vadd.f32 %v8957_v8, %v1334_v52  ;;  %v1332_v37 = vmul.f32 %v8952_v23, %v1203_v27  ;;  %vm1497_vm13 = vcmp.lt.f32.partialorder %v6883_v47, 0.0  ;;  %7954 = vset.pattern.permute.xlu1 %v8203_v17 }
 0x21c   : > { %vm9007_vm3 = vcmp.gt.f32.partialorder %v6883_v47, 0.0  ;;  %v1529_v2 = vsel %vm1497_vm13, -1.0, %v12394_v11  ;;  %2477 = vperm.xlu1 %7954, %v8893_v0  }
 0x21d   : > { %v6884_v63 = vclamps-f32 %v1370_v46, 1.0  ;;  %vm1495_vm12 = vcmp.lt.f32.partialorder %v6881_v4, 0.0  ;;  %v1368_v12 = vadd.f32 %v8957_v8, %v1332_v37  ;;  %vm9000_vm1 = vcmp.gt.f32.partialorder %v6881_v4, 0.0 }
 0x21e   : > { %v1527_v25 = vsel %vm1495_vm12, -1.0, %v12394_v11  ;;  %v1561_v35 = vsel %vm9007_vm3, 1.0, %v1529_v2  ;;  %v2312_v2 = vld [vmem:[%s12372_s1 + $0xd0] sm:$0xff] }
 0x21f   : > { %vm1498_vm14 = vcmp.lt.f32.partialorder %v6884_v63, 0.0  ;;  %vm8992_vm15 = vcmp.gt.f32.partialorder %v6884_v63, 0.0  ;;  %v6882_v14 = vclamps-f32 %v1368_v12, 1.0  ;;  %v1559_v16 = vsel %vm9000_vm1, 1.0, %v1527_v25 }
 0x220   : > { %v1530_v26 = vsel %vm1498_vm14, -1.0, %v12394_v11  ;;  %v7490_v28 = vpop.f32.mrf.mxu0  ;;  %2482 = vperm.xlu1 %7954, %v2312_v2  }
 0x221   : > { %v1337_v57 = vmul.f32 %v7490_v28, %v8952_v23  ;;  %vm1464_vm4 = vcmp.gt.f32.partialorder %v6882_v14, 0.0  ;;  %vm1496_vm5 = vcmp.lt.f32.partialorder %v6882_v14, 0.0  ;;  %v1562_v44 = vsel %vm8992_vm15, 1.0, %v1530_v26 }
 0x222   : > { %v1216_v60 = vpop.f32.mrf.mxu0  ;;  %v1528_v61 = vsel %vm1496_vm5, -1.0, %v12394_v11  ;;  %v1592_v55 = vpack.c.bf16 %v1562_v44, %v1561_v35 }
 0x223   : > { %v1373_v32 = vadd.f32 %v8957_v8, %v1337_v57  ;;  %v1335_v22 = vmul.f32 %v8952_v23, %v1216_v60  ;;  %v1560_v49 = vsel %vm1464_vm4, 1.0, %v1528_v61 }
 0x224   : > { %v7491_v13 = vpop.f32.mrf.mxu0  ;;  %v1591_v36 = vpack.c.bf16 %v1560_v49, %v1559_v16  ;;  %7955 = vset.pattern.permute.xlu1 %v8204_v48 }
 0x225   : > { %v1371_v20 = vadd.f32 %v8957_v8, %v1335_v22  ;;  %v1338_v34 = vmul.f32 %v7491_v13, %v8952_v23  ;;  %v6887_v41 = vclamps-f32 %v1373_v32, 1.0  ;;  %3170 = vperm.xlu1 %7955, %v8962_v10  }
 0x226   : > { %v1219_v50 = vpop.f32.mrf.mxu0  ;;  %7518 = vmatprep.mubr.msk.bf16.mxu1 %vm1609_vm6, %v1591_v36 }
 0x227   : > { %v6885_v21 = vclamps-f32 %v1371_v20, 1.0  ;;  %v1374_v19 = vadd.f32 %v8957_v8, %v1338_v34  ;;  %v1336_v42 = vmul.f32 %v8952_v23, %v1219_v50  ;;  %7519 = vmatmul.mubr.msk.bf16.vlgmr.msra.gmra.mxu1 %vm1609_vm6, %v1592_v55  ;;  %vm1501_vm8 = vcmp.lt.f32.partialorder %v6887_v41, 0.0 }
 0x228   : > { %vm9048_vm13 = vcmp.gt.f32.partialorder %v6887_v41, 0.0  ;;  %v1533_v5 = vsel %vm1501_vm8, -1.0, %v12394_v11 }
 0x229   : > { %v6888_v45 = vclamps-f32 %v1374_v19, 1.0  ;;  %vm1499_vm7 = vcmp.lt.f32.partialorder %v6885_v21, 0.0  ;;  %v1372_v38 = vadd.f32 %v8957_v8, %v1336_v42  ;;  %vm9042_vm12 = vcmp.gt.f32.partialorder %v6885_v21, 0.0  ;;  %3178 = vperm.xlu1 %7955, %v2312_v2  }
 0x22a   : > { %v1531_v24 = vsel %vm1499_vm7, -1.0, %v12394_v11  ;;  %v1565_v37 = vsel %vm9048_vm13, 1.0, %v1533_v5 }
 0x22b   : > { %vm1502_vm9 = vcmp.lt.f32.partialorder %v6888_v45, 0.0  ;;  %vm9037_vm10 = vcmp.gt.f32.partialorder %v6888_v45, 0.0  ;;  %v6886_v53 = vclamps-f32 %v1372_v38, 1.0  ;;  %v1563_v27 = vsel %vm9042_vm12, 1.0, %v1531_v24 }
 0x22c   : > { %v1534_v39 = vsel %vm1502_vm9, -1.0, %v12394_v11  ;;  %v7494_v15 = vpop.f32.mrf.mxu0 }
 0x22d   : > { %v1341_v58 = vmul.f32 %v7494_v15, %v8952_v23  ;;  %vm1468_vm14 = vcmp.gt.f32.partialorder %v6886_v53, 0.0  ;;  %vm1500_vm15 = vcmp.lt.f32.partialorder %v6886_v53, 0.0  ;;  %v1566_v40 = vsel %vm9037_vm10, 1.0, %v1534_v39  ;;  %3182 = vperm.xlu1 %7955, %v8971_v31  }
 0x22e   : > { %v1232_v62 = vpop.f32.mrf.mxu0  ;;  %v1532_v33 = vsel %vm1500_vm15, -1.0, %v12394_v11  ;;  %v1594_v26 = vpack.c.bf16 %v1566_v40, %v1565_v37 }
 0x22f   : > { %v1339_v52 = vmul.f32 %v8952_v23, %v1232_v62  ;;  %v1564_v47 = vsel %vm1468_vm14, 1.0, %v1532_v33  ;;  %v1377_v4 = vadd.f32 %v8957_v8, %v1341_v58 }
 0x230   : > { %v7495_v46 = vpop.f32.mrf.mxu0  ;;  %v1593_v6 = vpack.c.bf16 %v1564_v47, %v1563_v27 }
 0x231   : > { %v1375_v63 = vadd.f32 %v8957_v8, %v1339_v52  ;;  %v1342_v12 = vmul.f32 %v7495_v46, %v8952_v23  ;;  %v6891_v59 = vclamps-f32 %v1377_v4, 1.0  ;;  %7957 = vset.pattern.permute.xlu1 %v8203_v17 }
 0x232   : > { %v1235_v14 = vpop.f32.mrf.mxu0  ;;  %7522 = vmatprep.mubr.msk.bf16.mxu1 %vm1609_vm6, %v1593_v6  ;;  %2497 = vperm.xlu1 %7957, %v9026_v43  }
 0x233   : > { %v6889_v28 = vclamps-f32 %v1375_v63, 1.0  ;;  %v1378_v18 = vadd.f32 %v8957_v8, %v1342_v12  ;;  %v1340_v25 = vmul.f32 %v8952_v23, %v1235_v14  ;;  %7523 = vmatmul.mubr.msk.bf16.gmra.mxu1 %vm1609_vm6, %v1594_v26  ;;  %vm9076_vm4 = vcmp.gt.f32.partialorder %v6891_v59, 0.0 }
 0x234   : > { %vm1505_vm5 = vcmp.lt.f32.partialorder %v6891_v59, 0.0 }
 0x235   : > { %v6892_v54 = vclamps-f32 %v1378_v18, 1.0  ;;  %v1376_v57 = vadd.f32 %v8957_v8, %v1340_v25  ;;  %vm1503_vm1 = vcmp.lt.f32.partialorder %v6889_v28, 0.0  ;;  %vm9087_vm8 = vcmp.gt.f32.partialorder %v6889_v28, 0.0 }
 0x236   : > { %v7498_v30 = vpop.f32.mrf.mxu0  ;;  %v1535_v35 = vsel %vm1503_vm1, -1.0, %v12394_v11  ;;  %v1537_v36 = vsel %vm1505_vm5, -1.0, %v12394_v11 }
 0x237   : > { %vm1506_vm3 = vcmp.lt.f32.partialorder %v6892_v54, 0.0  ;;  %v1345_v60 = vmul.f32 %v7498_v30, %v8952_v23  ;;  %v6890_v61 = vclamps-f32 %v1376_v57, 1.0  ;;  %vm9080_vm7 = vcmp.gt.f32.partialorder %v6892_v54, 0.0 }
 0x238   : > { %v1248_v32 = vpop.f32.mrf.mxu0  ;;  %v1538_v22 = vsel %vm1506_vm3, -1.0, %v12394_v11  ;;  %v1567_v45 = vsel %vm9087_vm8, 1.0, %v1535_v35  ;;  %v1569_v53 = vsel %vm9076_vm4, 1.0, %v1537_v36 }
 0x239   : > { %v1381_v16 = vadd.f32 %v8957_v8, %v1345_v60  ;;  %v1343_v49 = vmul.f32 %v8952_v23, %v1248_v32  ;;  %vm9092_vm9 = vcmp.gt.f32.partialorder %v6890_v61, 0.0  ;;  %vm1504_vm10 = vcmp.lt.f32.partialorder %v6890_v61, 0.0 }
 0x23a   : > { %v7499_v34 = vpop.f32.mrf.mxu0  ;;  %v1536_v55 = vsel %vm1504_vm10, -1.0, %v12394_v11  ;;  %v1570_v21 = vsel %vm9080_vm7, 1.0, %v1538_v22 }
 0x23b   : > { %v1379_v50 = vadd.f32 %v8957_v8, %v1343_v49  ;;  %v1346_v41 = vmul.f32 %v7499_v34, %v8952_v23  ;;  %v1568_v19 = vsel %vm9092_vm9, 1.0, %v1536_v55  ;;  %v6895_v38 = vclamps-f32 %v1381_v16, 1.0  ;;  %v9165_v55 = vpop.permute.xlu0 %3094 }
 0x23c   : > { %v1251_v42 = vpop.f32.mrf.mxu0  ;;  %v1595_v51 = vpack.c.bf16 %v1568_v19, %v1567_v45  ;;  %v1596_v24 = vpack.c.bf16 %v1570_v21, %v1569_v53  ;;  %12630 = vst [vmem:[#allocation5_spill] sm:$0xff] %v9165_v55  ;;  %v2316_v19 = vld [vmem:[%s12372_s1 + $0xf0] sm:$0xff] }
 0x23d   : > { %v6893_v9 = vclamps-f32 %v1379_v50, 1.0  ;;  %v1382_v39 = vadd.f32 %v8957_v8, %v1346_v41  ;;  %v1344_v15 = vmul.f32 %v8952_v23, %v1251_v42  ;;  %vm1509_vm13 = vcmp.lt.f32.partialorder %v6895_v38, 0.0  ;;  %2502 = vperm.xlu1 %7957, %v2316_v19  }
 0x23e   : > { %7526 = vmatprep.mubr.msk.bf16.mxu1 %vm1609_vm6, %v1595_v51  ;;  %vm9128_vm3 = vcmp.gt.f32.partialorder %v6895_v38, 0.0  ;;  %v1541_v12 = vsel %vm1509_vm13, -1.0, %v12394_v11 }
 0x23f   : > { %v6896_v58 = vclamps-f32 %v1382_v39, 1.0  ;;  %v7502_v29 = vpop.f32.mrf.mxu1  ;;  %vm1507_vm12 = vcmp.lt.f32.partialorder %v6893_v9, 0.0  ;;  %v1380_v5 = vadd.f32 %v8957_v8, %v1344_v15  ;;  %7527 = vmatmul.mubr.msk.bf16.gmra.mxu1 %vm1609_vm6, %v1596_v24  ;;  %vm9123_vm1 = vcmp.gt.f32.partialorder %v6893_v9, 0.0 }
 0x240   : > { %v1349_v62 = vmul.f32 %v7502_v29, %v8952_v23  ;;  %v1539_v46 = vsel %vm1507_vm12, -1.0, %v12394_v11  ;;  %v1573_v30 = vsel %vm9128_vm3, 1.0, %v1541_v12  ;;  %v2319_v12 = vld [vmem:[#allocation2 + $0xf] sm:$0xff] }
 0x241   : > { %vm9115_vm14 = vcmp.gt.f32.partialorder %v6896_v58, 0.0  ;;  %vm1510_vm15 = vcmp.lt.f32.partialorder %v6896_v58, 0.0  ;;  %v1264_v33 = vpop.f32.mrf.mxu1  ;;  %v6894_v52 = vclamps-f32 %v1380_v5, 1.0  ;;  %v1571_v59 = vsel %vm9123_vm1, 1.0, %v1539_v46  ;;  %v9194_v5 = vpop.permute.xlu0 %3110  ;;  %7958 = vset.pattern.permute.xlu1 %v8204_v48 }
 0x242   : > { %v1542_v10 = vsel %vm1510_vm15, -1.0, %v12394_v11  ;;  %v1385_v27 = vadd.f32 %v8957_v8, %v1349_v62  ;;  %v1347_v47 = vmul.f32 %v8952_v23, %v1264_v33  ;;  %12635 = vst [vmem:[#allocation6_spill] sm:$0xff] %v9194_v5  ;;  %3186 = vperm.xlu1 %7958, %v8979_v1  }
 0x243   : > { %v7503_v37 = vpop.f32.mrf.mxu1  ;;  %vm1476_vm4 = vcmp.gt.f32.partialorder %v6894_v52, 0.0  ;;  %vm1508_vm5 = vcmp.lt.f32.partialorder %v6894_v52, 0.0  ;;  %v1574_v6 = vsel %vm9115_vm14, 1.0, %v1542_v10 }
 0x244   : > { %v1540_v26 = vsel %vm1508_vm5, -1.0, %v12394_v11  ;;  %v1383_v14 = vadd.f32 %v8957_v8, %v1347_v47  ;;  %v1350_v28 = vmul.f32 %v7503_v37, %v8952_v23  ;;  %v6899_v54 = vclamps-f32 %v1385_v27, 1.0 }
 0x245   : > { %v1267_v18 = vpop.f32.mrf.mxu1  ;;  %v1572_v25 = vsel %vm1476_vm4, 1.0, %v1540_v26  ;;  %v1598_v61 = vpack.c.bf16 %v1574_v6, %v1573_v30 }
 0x246   : > { %v1348_v57 = vmul.f32 %v8952_v23, %v1267_v18  ;;  %v6897_v2 = vclamps-f32 %v1383_v14, 1.0  ;;  %v1386_v60 = vadd.f32 %v8957_v8, %v1350_v28  ;;  %v1597_v44 = vpack.c.bf16 %v1572_v25, %v1571_v59  ;;  %v9219_v14 = vpop.permute.xlu0 %3126  ;;  %3194 = vperm.xlu1 %7958, %v2316_v19  }
 0x247   : > { %vm9148_vm8 = vcmp.lt.f32.partialorder %v6899_v54, 0.0  ;;  %vm9176_vm15 = vcmp.gt.f32.partialorder %v6899_v54, 0.0  ;;  %12644 = vst [vmem:[#allocation7_spill] sm:$0xff] %v9219_v14 }
 0x248   : > { %v1384_v32 = vadd.f32 %v8957_v8, %v1348_v57  ;;  %v7506_v0 = vpop.f32.mrf.mxu1  ;;  %vm1511_vm7 = vcmp.lt.f32.partialorder %v6897_v2, 0.0  ;;  %v6900_v22 = vclamps-f32 %v1386_v60, 1.0  ;;  %7530 = vmatprep.mubr.msk.bf16.mxu1 %vm1609_vm6, %v1597_v44  ;;  %vm9152_vm9 = vcmp.gt.f32.partialorder %v6897_v2, 0.0 }
 0x249   : > { %v1353_v16 = vmul.f32 %v7506_v0, %v8952_v23  ;;  %7531 = vmatmul.mubr.msk.bf16.gmra.mxu1 %vm1609_vm6, %v1598_v61  ;;  %v1543_v20 = vsel %vm1511_vm7, -1.0, %v12394_v11  ;;  %v1545_v43 = vsel %vm9148_vm8, -1.0, %v12394_v11 }
 0x24a   : > { %v6898_v13 = vclamps-f32 %v1384_v32, 1.0  ;;  %v1280_v35 = vpop.f32.mrf.mxu1  ;;  %vm9159_vm10 = vcmp.gt.f32.partialorder %v6900_v22, 0.0  ;;  %vm1514_vm12 = vcmp.lt.f32.partialorder %v6900_v22, 0.0  ;;  %v1575_v24 = vsel %vm9152_vm9, 1.0, %v1543_v20  ;;  %v9244_v49 = vpop.permute.xlu0 %3142  ;;  %3198 = vperm.xlu1 %7958, %v8989_v7  }
 0x24b   : > { %v1389_v36 = vadd.f32 %v8957_v8, %v1353_v16  ;;  %v1546_v50 = vsel %vm1514_vm12, -1.0, %v12394_v11  ;;  %v1351_v17 = vmul.f32 %v8952_v23, %v1280_v35  ;;  %v1577_v62 = vsel %vm9176_vm15, 1.0, %v1545_v43  ;;  %12647 = vst [vmem:[#allocation8_spill] sm:$0xff] %v9244_v49 }
 0x24c   : > { %vm9168_vm13 = vcmp.gt.f32.partialorder %v6898_v13, 0.0  ;;  %vm1512_vm14 = vcmp.lt.f32.partialorder %v6898_v13, 0.0  ;;  %v7507_v21 = vpop.f32.mrf.mxu1  ;;  %v1578_v9 = vsel %vm9159_vm10, 1.0, %v1546_v50 }
 0x24d   : > { %v1544_v45 = vsel %vm1512_vm14, -1.0, %v12394_v11  ;;  %v1354_v38 = vmul.f32 %v7507_v21, %v8952_v23  ;;  %v6903_v53 = vclamps-f32 %v1389_v36, 1.0  ;;  %v1387_v15 = vadd.f32 %v8957_v8, %v1351_v17  ;;  %v2561_v17 = vld [vmem:[#allocation2 + $0x10] sm:$0xff] }
 0x24e   : > { %v1576_v39 = vsel %vm9168_vm13, 1.0, %v1544_v45  ;;  %v1283_v51 = vpop.f32.mrf.mxu1  ;;  %v1600_v52 = vpack.c.bf16 %v1578_v9, %v1577_v62 }
 0x24f   : > { %v1390_v58 = vadd.f32 %v8957_v8, %v1354_v38  ;;  %v1352_v29 = vmul.f32 %v8952_v23, %v1283_v51  ;;  %v6901_v40 = vclamps-f32 %v1387_v15, 1.0  ;;  %v1599_v10 = vpack.c.bf16 %v1576_v39, %v1575_v24  ;;  %v9268_v38 = vpop.permute.xlu0 %3158 }
 0x250   : > { %v7510_v33 = vpop.f32.mrf.mxu1  ;;  %vm9200_vm1 = vcmp.gt.f32.partialorder %v6903_v53, 0.0  ;;  %vm9204_vm3 = vcmp.lt.f32.partialorder %v6903_v53, 0.0  ;;  %12656 = vst [vmem:[#allocation9_spill] sm:$0xff] %v9268_v38 }
 0x251   : > { %v6904_v27 = vclamps-f32 %v1390_v58, 1.0  ;;  %v1388_v47 = vadd.f32 %v8957_v8, %v1352_v29  ;;  %v1357_v4 = vmul.f32 %v7510_v33, %v8952_v23  ;;  %vm1515_vm4 = vcmp.lt.f32.partialorder %v6901_v40, 0.0  ;;  %7534 = vmatprep.mubr.msk.bf16.mxu1 %vm1609_vm6, %v1599_v10 }
 0x252   : > { %v1296_v63 = vpop.f32.mrf.mxu1  ;;  %vm9209_vm5 = vcmp.gt.f32.partialorder %v6901_v40, 0.0  ;;  %7535 = vmatmul.mubr.msk.bf16.gmra.mxu1 %vm1609_vm6, %v1600_v52  ;;  %v1547_v28 = vsel %vm1515_vm4, -1.0, %v12394_v11  ;;  %v1549_v57 = vsel %vm9204_vm3, -1.0, %v12394_v11 }
 0x253   : > { %vm9213_vm7 = vcmp.gt.f32.partialorder %v6904_v27, 0.0  ;;  %vm1518_vm8 = vcmp.lt.f32.partialorder %v6904_v27, 0.0  ;;  %v6902_v26 = vclamps-f32 %v1388_v47, 1.0  ;;  %v1393_v59 = vadd.f32 %v8957_v8, %v1357_v4  ;;  %v9287_v4 = vpop.permute.xlu0 %3174 }
 0x254   : > { %v1550_v18 = vsel %vm1518_vm8, -1.0, %v12394_v11  ;;  %v1355_v25 = vmul.f32 %v8952_v23, %v1296_v63  ;;  %v7511_v54 = vpop.f32.mrf.mxu1  ;;  %v1579_v32 = vsel %vm9209_vm5, 1.0, %v1547_v28  ;;  %v1581_v31 = vsel %vm9200_vm1, 1.0, %v1549_v57  ;;  %12657 = vst [vmem:[#allocation10_spill] sm:$0xff] %v9287_v4 }
 0x255   : > { %vm9229_vm9 = vcmp.gt.f32.partialorder %v6902_v26, 0.0  ;;  %vm1516_vm10 = vcmp.lt.f32.partialorder %v6902_v26, 0.0  ;;  %v1358_v48 = vmul.f32 %v7511_v54, %v8952_v23  ;;  %v1582_v2 = vsel %vm9213_vm7, 1.0, %v1550_v18  ;;  %v9293_v18 = vpop.permute.xlu1 %2357 }
 0x256   : > { %v1548_v60 = vsel %vm1516_vm10, -1.0, %v12394_v11  ;;  %v6907_v44 = vclamps-f32 %v1393_v59, 1.0  ;;  %v1391_v61 = vadd.f32 %v8957_v8, %v1355_v25  ;;  %v1299_v1 = vpop.f32.mrf.mxu1  ;;  %v1602_v34 = vpack.c.bf16 %v1582_v2, %v1581_v31  ;;  %v2318_v59 = vld [vmem:[#allocation2 + $0x7] sm:$0xff] }
 0x257   : > { %v1580_v0 = vsel %vm9229_vm9, 1.0, %v1548_v60  ;;  %v1394_v22 = vadd.f32 %v8957_v8, %v1358_v48  ;;  %v1356_v16 = vmul.f32 %v8952_v23, %v1299_v1  ;;  %v2511_v54 = vmul.f32 %v9293_v18, %v2319_v12  ;;  %v9307_v48 = vpop.permute.xlu0 %2352 }
 0x258   : > { %v6905_v13 = vclamps-f32 %v1391_v61, 1.0  ;;  %v7514_v35 = vpop.f32.mrf.mxu1  ;;  %v1601_v20 = vpack.c.bf16 %v1580_v0, %v1579_v32  ;;  %vm9250_vm12 = vcmp.gt.f32.partialorder %v6907_v44, 0.0  ;;  %vm9254_vm13 = vcmp.lt.f32.partialorder %v6907_v44, 0.0 }
 0x259   : > { %v6908_v36 = vclamps-f32 %v1394_v22, 1.0  ;;  %v1392_v50 = vadd.f32 %v8957_v8, %v1356_v16  ;;  %v1361_v41 = vmul.f32 %v7514_v35, %v8952_v23  ;;  %v1553_v24 = vsel %vm9254_vm13, -1.0, %v12394_v11  ;;  %v9322_v35 = vpop.permute.xlu1 %2362 }
 0x25a   : > { %vm1519_vm14 = vcmp.lt.f32.partialorder %v6905_v13, 0.0  ;;  %v1312_v42 = vpop.f32.mrf.mxu1  ;;  %7538 = vmatprep.mubr.msk.bf16.mxu1 %vm1609_vm6, %v1601_v20  ;;  %vm9259_vm15 = vcmp.gt.f32.partialorder %v6905_v13, 0.0  ;;  %v1585_v46 = vsel %vm9250_vm12, 1.0, %v1553_v24  ;;  %v2510_v60 = vmul.f32 %v9307_v48, %v2318_v59  ;;  %v7960_v13 = vld [vmem:[%s12378_s7 + $0x8] sm:$0xff]   ;;  %12662 = vst [vmem:[#allocation11_spill] sm:$0xff] %v9322_v35 }
 0x25b   : > { %vm9263_vm1 = vcmp.gt.f32.partialorder %v6908_v36, 0.0  ;;  %vm1522_vm3 = vcmp.lt.f32.partialorder %v6908_v36, 0.0  ;;  %v6906_v45 = vclamps-f32 %v1392_v50, 1.0  ;;  %7539 = vmatmul.mubr.msk.bf16.gmra.mxu1 %vm1609_vm6, %v1602_v34  ;;  %v1551_v9 = vsel %vm1519_vm14, -1.0, %v12394_v11  ;;  %7550 = vmatprep.subr.bf16.mxu0 %v7960_v13  ;;  %v7961_v36 = vld [vmem:[%s12378_s7] sm:$0xff]  }
 0x25c   : > { %v1554_v39 = vsel %vm1522_vm3, -1.0, %v12394_v11  ;;  %v1397_v53 = vadd.f32 %v8957_v8, %v1361_v41  ;;  %v1359_v15 = vmul.f32 %v8952_v23, %v1312_v42  ;;  %v7515_v51 = vpop.f32.mrf.mxu1  ;;  %v1583_v7 = vsel %vm9259_vm15, 1.0, %v1551_v9  ;;  %7551 = vmatpush3.bf16.msra.mxu0 %v7960_v13  ;;  %7584 = vmatprep.subr.bf16.mxu1 %v7961_v36  ;;  %v2560_v41 = vld [vmem:[#allocation2 + $0x8] sm:$0xff]  ;;  %v1607_v24 = vld [vmem:[%s12377_s6] sm:$0x3] }
 0x25d   : > { %vm1488_vm4 = vcmp.gt.f32.partialorder %v6906_v45, 0.0  ;;  %vm1520_vm5 = vcmp.lt.f32.partialorder %v6906_v45, 0.0  ;;  %v1362_v58 = vmul.f32 %v7515_v51, %v8952_v23  ;;  %v1586_v29 = vsel %vm9263_vm1, 1.0, %v1554_v39  ;;  %v9324_v20 = vpop.permute.xlu1 %2367  ;;  %7585 = vmatpush3.bf16.msra.mxu1 %v7961_v36  ;;  %v9347_v39 = vld [vmem:[%s12378_s7 + $0x10] sm:$0xff]  }
 0x25e   : > { %v1552_v62 = vsel %vm1520_vm5, -1.0, %v12394_v11  ;;  %v6911_v40 = vclamps-f32 %v1397_v53, 1.0  ;;  %v1395_v33 = vadd.f32 %v8957_v8, %v1359_v15  ;;  %v1315_v10 = vpop.f32.mrf.mxu1  ;;  %v1604_v6 = vpack.c.bf16 %v1586_v29, %v1585_v46  ;;  %12663 = vst [vmem:[#allocation12_spill] sm:$0xff] %v9324_v20  ;;  %7618 = vmatprep.subr.bf16.mxu0 %v9347_v39 }
 0x25f   : > { %v1584_v52 = vsel %vm1488_vm4, 1.0, %v1552_v62  ;;  %v1398_v27 = vadd.f32 %v8957_v8, %v1362_v58  ;;  %v1360_v47 = vmul.f32 %v8952_v23, %v1315_v10  ;;  %v2542_v16 = vpack.c.bf16 %v2511_v54, %v2510_v60 }
 0x260   : > { %v6909_v37 = vclamps-f32 %v1395_v33, 1.0  ;;  %v1603_v63 = vpack.c.bf16 %v1584_v52, %v1583_v7  ;;  %vm1525_vm7 = vcmp.lt.f32.partialorder %v6911_v40, 0.0  ;;  %vm9301_vm12 = vcmp.gt.f32.partialorder %v6911_v40, 0.0 }
 0x261   : > { %v6912_v26 = vclamps-f32 %v1398_v27, 1.0  ;;  %v1396_v28 = vadd.f32 %v8957_v8, %v1360_v47  ;;  %v1557_v2 = vsel %vm1525_vm7, -1.0, %v12394_v11  ;;  %v9326_v34 = vpop.permute.xlu1 %3074  ;;  %v2592_v21 = vpack.c.bf16 %v2561_v17, %v2560_v41 }
 0x262   : > { %vm1523_vm8 = vcmp.lt.f32.partialorder %v6909_v37, 0.0  ;;  %7542 = vmatprep.mubr.msk.bf16.mxu1 %vm1609_vm6, %v1603_v63  ;;  %vm1491_vm13 = vcmp.gt.f32.partialorder %v6909_v37, 0.0  ;;  %v1589_v0 = vsel %vm9301_vm12, 1.0, %v1557_v2  ;;  %v9360_v58 = vrot.slane %v1607_v24, %v8652_v3 }
 0x263   : > { %vm9295_vm9 = vcmp.gt.f32.partialorder %v6912_v26, 0.0  ;;  %vm1526_vm10 = vcmp.lt.f32.partialorder %v6912_v26, 0.0  ;;  %v6910_v25 = vclamps-f32 %v1396_v28, 1.0  ;;  %7543 = vmatmul.mubr.msk.bf16.gmra.mxu1 %vm1609_vm6, %v1604_v6  ;;  %v1555_v8 = vsel %vm1523_vm8, -1.0, %v12394_v11  ;;  %7552 = vmatprep.mubr.msk.bf16.mxu0 %vm2247_vm11, %v2592_v21 }
 0x264   : > { %v1558_v30 = vsel %vm1526_vm10, -1.0, %v12394_v11  ;;  %v1587_v1 = vsel %vm1491_vm13, 1.0, %v1555_v8  ;;  %v9365_v62 = vrot.slane %v1607_v24, %v8657_v56 }
 0x265   : > { %vm1492_vm14 = vcmp.gt.f32.partialorder %v6910_v25, 0.0  ;;  %vm1524_vm15 = vcmp.lt.f32.partialorder %v6910_v25, 0.0  ;;  %v1590_v44 = vsel %vm9295_vm9, 1.0, %v1558_v30  ;;  %v9331_v50 = vpop.permute.xlu1 %3078 }
 0x266   : > { %v1556_v61 = vsel %vm1524_vm15, -1.0, %v12394_v11  ;;  %v1606_v31 = vpack.c.bf16 %v1590_v44, %v1589_v0 }
 0x267   : > { %v1588_v32 = vsel %vm1492_vm14, 1.0, %v1556_v61 }
 0x268   : > { %v1605_v22 = vpack.c.bf16 %v1588_v32, %v1587_v1 }
 0x269   : > { %v9333_v42 = vpop.permute.xlu1 %3082 }
 0x26a   : > { %7546 = vmatprep.mubr.msk.bf16.mxu1 %vm1609_vm6, %v1605_v22  ;;  %12664 = vst [vmem:[#allocation13_spill] sm:$0xff] %v9333_v42 }
 0x26b   : > { %7547 = vmatmul.mubr.msk.bf16.gmra.mxu1 %vm1609_vm6, %v1606_v31 }
 0x26c   : > { %7586 = vmatprep.mubr.msk.bf16.mxu1 %vm2247_vm11, %v2542_v16 }
 0x26d   : > { %v9336_v19 = vpop.permute.xlu1 %3086 }
 0x271   : > { %v9338_v43 = vpop.permute.xlu1 %2372 }
 0x275   : > { %v9340_v45 = vpop.permute.xlu1 %2382 }
 0x279   : > { %v9342_v9 = vpop.permute.xlu1 %3090 }
 0x27d   : > { %v9349_v53 = vpop.permute.xlu1 %3098 }
 0x281   : > { %v9352_v15 = vpop.permute.xlu1 %3102 }
 0x285   : > { %v9354_v51 = vpop.permute.xlu1 %2397 }
 0x289   : > { %v9362_v29 = vpop.permute.xlu1 %2402 }
 0x28d   : > { %v9370_v27 = vpop.permute.xlu1 %3106 }
 0x28e   : > { %12665 = vst [vmem:[#allocation14_spill] sm:$0xff] %v9370_v27 }
 0x291   : > { %v9376_v54 = vpop.permute.xlu1 %3114 }
 0x292   : > { %12666 = vst [vmem:[#allocation15_spill] sm:$0xff] %v9376_v54 }
 0x295   : > { %v9384_v0 = vpop.permute.xlu1 %3118 }
 0x296   : > { %12667 = vst [vmem:[#allocation16_spill] sm:$0xff] %v9384_v0 }
 0x2e7   : > { %v7520_v40 = vpop.f32.mrf.mxu1 }
 0x2e8   : > { %v1829_v33 = vmul.f32 %v7520_v40, %v9360_v58 }
 0x2e9   : > { %v1696_v10 = vpop.f32.mrf.mxu1 }
 0x2ea   : > { %v1865_v7 = vadd.f32 %v9365_v62, %v1829_v33  ;;  %v1827_v52 = vmul.f32 %v9360_v58, %v1696_v10 }
 0x2eb   : > { %v7521_v47 = vpop.f32.mrf.mxu1 }
 0x2ec   : > { %v6931_v46 = vclamps-f32 %v1865_v7, 1.0  ;;  %v1863_v37 = vadd.f32 %v9365_v62, %v1827_v52  ;;  %v1830_v63 = vmul.f32 %v7521_v47, %v9360_v58  ;;  %v9401_v7 = vpop.permute.xlu1 %2417 }
 0x2ed   : > { %v1699_v12 = vpop.f32.mrf.mxu1 }
 0x2ee   : > { %v1993_v6 = vmul.f32 0.70710677, %v6931_v46  ;;  %v6929_v26 = vclamps-f32 %v1863_v37, 1.0  ;;  %v1866_v28 = vadd.f32 %v9365_v62, %v1830_v63  ;;  %v1828_v59 = vmul.f32 %v9360_v58, %v1699_v12 }
 0x2ef   : > { %v1961_v47 = vmul.f32 0.5, %v6931_v46 }
 0x2f0   : > { %8034 = verf.f32 %v1993_v6  ;;  %v1991_v23 = vmul.f32 0.70710677, %v6929_v26  ;;  %v6932_v25 = vclamps-f32 %v1866_v28, 1.0  ;;  %v1864_v57 = vadd.f32 %v9365_v62, %v1828_v59 }
 0x2f1   : > { %v1959_v59 = vmul.f32 0.5, %v6929_v26 }
 0x2f2   : > { %8036 = verf.f32 %v1991_v23  ;;  %v1994_v8 = vmul.f32 0.70710677, %v6932_v25  ;;  %v6930_v30 = vclamps-f32 %v1864_v57, 1.0 }
 0x2f3   : > { %v7524_v2 = vpop.f32.mrf.mxu1 }
 0x2f4   : > { %8038 = verf.f32 %v1994_v8  ;;  %v1833_v60 = vmul.f32 %v7524_v2, %v9360_v58  ;;  %v1992_v44 = vmul.f32 0.70710677, %v6930_v30  ;;  %v1962_v2 = vmul.f32 0.5, %v6932_v25 }
 0x2f5   : > { %v1712_v61 = vpop.f32.mrf.mxu1 }
 0x2f6   : > { %v9381_v1 = vadd.f32 %v9365_v62, %v1833_v60  ;;  %v1831_v32 = vmul.f32 %v9360_v58, %v1712_v61  ;;  %8040 = verf.f32 %v1992_v44  ;;  %v1960_v60 = vmul.f32 0.5, %v6930_v30 }
 0x2f7   : > { %v7525_v22 = vpop.f32.mrf.mxu1 }
 0x2f8   : > { %v6935_v16 = vclamps-f32 %v9381_v1, 1.0  ;;  %v9388_v31 = vadd.f32 %v9365_v62, %v1831_v32  ;;  %v1834_v13 = vmul.f32 %v7525_v22, %v9360_v58 }
 0x2f9   : > { %v1715_v36 = vpop.f32.mrf.mxu1 }
 0x2fa   : > { %v1997_v41 = vmul.f32 0.70710677, %v6935_v16  ;;  %v6933_v17 = vclamps-f32 %v9388_v31, 1.0  ;;  %v9395_v21 = vadd.f32 %v9365_v62, %v1834_v13  ;;  %v1832_v24 = vmul.f32 %v9360_v58, %v1715_v36  ;;  %v9419_v13 = vpop.permute.xlu1 %2422 }
 0x2fc   : > { %8042 = verf.f32 %v1997_v41  ;;  %v1995_v40 = vmul.f32 0.70710677, %v6933_v17  ;;  %v6936_v33 = vclamps-f32 %v9395_v21, 1.0  ;;  %v9404_v52 = vadd.f32 %v9365_v62, %v1832_v24 }
 0x2fd   : > { %v8035_v10 = vpop.eup %8034 }
 0x2fe   : > { %v2057_v37 = vadd.f32 1.0, %v8035_v10  ;;  %8044 = verf.f32 %v1995_v40  ;;  %v1998_v63 = vmul.f32 0.70710677, %v6936_v33  ;;  %v6934_v6 = vclamps-f32 %v9404_v52, 1.0 }
 0x2ff   : > { %v8037_v12 = vpop.eup %8036  ;;  %v7528_v57 = vpop.f32.mrf.mxu1  ;;  %v1966_v31 = vmul.f32 0.5, %v6936_v33 }
 0x300   : > { %v9409_v28 = vmul.f32 %v2057_v37, %v1961_v47  ;;  %v2055_v23 = vadd.f32 1.0, %v8037_v12  ;;  %8046 = verf.f32 %v1998_v63  ;;  %v1996_v46 = vmul.f32 0.70710677, %v6934_v6 }
 0x301   : > { %v8039_v8 = vpop.eup %8038  ;;  %v1837_v44 = vmul.f32 %v7528_v57, %v9360_v58  ;;  %v1728_v22 = vpop.f32.mrf.mxu1 }
 0x302   : > { %12668 = vst [vmem:[#allocation17_spill] sm:$0xff] %v9409_v28  ;;  %vm2121_vm1 = vcmp.gt.f32.partialorder %v9409_v28, 0.0  ;;  %vm2153_vm3 = vcmp.lt.f32.partialorder %v9409_v28, 0.0  ;;  %v9416_v61 = vmul.f32 %v2055_v23, %v1959_v59  ;;  %v2058_v32 = vadd.f32 1.0, %v8039_v8 }
 0x303   : > { %v2185_v26 = vsel %vm2153_vm3, -1.0, %v12394_v11  ;;  %8048 = verf.f32 %v1996_v46  ;;  %v9422_v25 = vadd.f32 %v9365_v62, %v1837_v44  ;;  %v1835_v30 = vmul.f32 %v9360_v58, %v1728_v22  ;;  %v8041_v36 = vpop.eup %8040  ;;  %v7529_v40 = vpop.f32.mrf.mxu1 }
 0x304   : > { %12669 = vst [vmem:[#allocation18_spill] sm:$0xff] %v9416_v61  ;;  %v2217_v41 = vsel %vm2121_vm1, 1.0, %v2185_v26  ;;  %vm2119_vm4 = vcmp.gt.f32.partialorder %v9416_v61, 0.0  ;;  %vm2151_vm5 = vcmp.lt.f32.partialorder %v9416_v61, 0.0  ;;  %v9427_v24 = vmul.f32 %v2058_v32, %v1962_v2 }
 0x305   : > { %2256 = vst.msk [vmem:[#allocation2 + $0x28] sm:$0xff] %vm2247_vm11, %v2217_v41  ;;  %v2183_v10 = vsel %vm2151_vm5, -1.0, %v12394_v11  ;;  %v2056_v47 = vadd.f32 1.0, %v8041_v36  ;;  %v12388_v37 = vclamps-f32 %v9422_v25, 1.0  ;;  %v9433_v63 = vadd.f32 %v9365_v62, %v1835_v30  ;;  %v1731_v23 = vpop.f32.mrf.mxu1  ;;  %v9454_v30 = vpop.permute.xlu1 %3122 }
 0x306   : > { %12670 = vst [vmem:[#allocation19_spill] sm:$0xff] %v9427_v24  ;;  %v2215_v12 = vsel %vm2119_vm4, 1.0, %v2183_v10  ;;  %vm2122_vm7 = vcmp.gt.f32.partialorder %v9427_v24, 0.0  ;;  %vm2154_vm8 = vcmp.lt.f32.partialorder %v9427_v24, 0.0  ;;  %v1838_v59 = vmul.f32 %v7529_v40, %v9360_v58  ;;  %12672 = vst [vmem:[#allocation21_spill] sm:$0xff] %v9454_v30 }
 0x307   : > { %2254 = vst.msk [vmem:[#allocation2 + $0x18] sm:$0xff] %vm2247_vm11, %v2215_v12  ;;  %v2186_v57 = vsel %vm2154_vm8, -1.0, %v12394_v11  ;;  %v9440_v8 = vmul.f32 %v2056_v47, %v1960_v60  ;;  %v2001_v2 = vmul.f32 0.70710677, %v12388_v37  ;;  %v12385_v44 = vclamps-f32 %v9433_v63, 1.0 }
 0x308   : > { %v2218_v46 = vsel %vm2122_vm7, 1.0, %v2186_v57  ;;  %v9446_v32 = vadd.f32 %v9365_v62, %v1838_v59  ;;  %v1836_v22 = vmul.f32 %v9360_v58, %v1731_v23  ;;  %v1965_v60 = vmul.f32 0.5, %v6935_v16 }
 0x309   : > { %12671 = vst [vmem:[#allocation20_spill] sm:$0xff] %v9440_v8  ;;  %v8043_v26 = vpop.eup %8042  ;;  %2257 = vst.msk [vmem:[#allocation2 + $0x30] sm:$0xff] %vm2247_vm11, %v2218_v46  ;;  %vm2120_vm9 = vcmp.gt.f32.partialorder %v9440_v8, 0.0  ;;  %vm2152_vm10 = vcmp.lt.f32.partialorder %v9440_v8, 0.0  ;;  %8050 = verf.f32 %v2001_v2  ;;  %v7532_v36 = vpop.f32.mrf.mxu1  ;;  %v1963_v10 = vmul.f32 0.5, %v6933_v17 }
 0x30a   : > { %v2184_v41 = vsel %vm2152_vm10, -1.0, %v12394_v11  ;;  %v2061_v40 = vadd.f32 1.0, %v8043_v26  ;;  %v1999_v47 = vmul.f32 0.70710677, %v12385_v44  ;;  %v12387_v23 = vclamps-f32 %v9446_v32, 1.0 }
 0x30b   : > { %v8045_v12 = vpop.eup %8044  ;;  %v2216_v59 = vsel %vm2120_vm9, 1.0, %v2184_v41  ;;  %v9463_v1 = vadd.f32 %v9365_v62, %v1836_v22  ;;  %v1841_v16 = vmul.f32 %v7532_v36, %v9360_v58  ;;  %v1744_v57 = vpop.f32.mrf.mxu1 }
 0x30c   : > { %2255 = vst.msk [vmem:[#allocation2 + $0x20] sm:$0xff] %vm2247_vm11, %v2216_v59  ;;  %v9467_v2 = vmul.f32 %v2061_v40, %v1965_v60  ;;  %v2059_v46 = vadd.f32 1.0, %v8045_v12  ;;  %8052 = verf.f32 %v1999_v47  ;;  %v2002_v26 = vmul.f32 0.70710677, %v12387_v23  ;;  %v9483_v40 = vpop.permute.xlu1 %3130  ;;  %v2564_v14 = vld [vmem:[#allocation2 + $0x28] sm:$0xff] }
 0x30d   : > { %v8047_v17 = vpop.eup %8046  ;;  %v12386_v41 = vclamps-f32 %v9463_v1, 1.0  ;;  %v9475_v22 = vadd.f32 %v9365_v62, %v1841_v16  ;;  %v1839_v36 = vmul.f32 %v9360_v58, %v1744_v57  ;;  %v7533_v44 = vpop.f32.mrf.mxu1  ;;  %12675 = vst [vmem:[#allocation24_spill] sm:$0xff] %v9483_v40  ;;  %v1964_v47 = vmul.f32 0.5, %v6934_v6  ;;  %v9492_v16 = vld [vmem:[%s12378_s7 + $0x18] sm:$0xff]  }
 0x30e   : > { %12673 = vst [vmem:[#allocation22_spill] sm:$0xff] %v9467_v2  ;;  %vm2125_vm12 = vcmp.gt.f32.partialorder %v9467_v2, 0.0  ;;  %vm2157_vm13 = vcmp.lt.f32.partialorder %v9467_v2, 0.0  ;;  %v9480_v60 = vmul.f32 %v2059_v46, %v1963_v10  ;;  %v2062_v21 = vadd.f32 1.0, %v8047_v17  ;;  %7652 = vmatprep.subr.bf16.mxu1 %v9492_v16 }
 0x30f   : > { %v2189_v33 = vsel %vm2157_vm13, -1.0, %v12394_v11  ;;  %8054 = verf.f32 %v2002_v26  ;;  %v2000_v12 = vmul.f32 0.70710677, %v12386_v41  ;;  %v1747_v59 = vpop.f32.mrf.mxu1  ;;  %v12389_v17 = vclamps-f32 %v9475_v22, 1.0 }
 0x310   : > { %12674 = vst [vmem:[#allocation23_spill] sm:$0xff] %v9480_v60  ;;  %v8049_v10 = vpop.eup %8048  ;;  %v2221_v57 = vsel %vm2125_vm12, 1.0, %v2189_v33  ;;  %vm2123_vm14 = vcmp.gt.f32.partialorder %v9480_v60, 0.0  ;;  %vm2155_vm15 = vcmp.lt.f32.partialorder %v9480_v60, 0.0  ;;  %v9496_v46 = vmul.f32 %v2062_v21, %v1966_v31 }
 0x311   : > { %2260 = vst.msk [vmem:[#allocation2 + $0x48] sm:$0xff] %vm2247_vm11, %v2221_v57  ;;  %v2187_v52 = vsel %vm2155_vm15, -1.0, %v12394_v11  ;;  %v2060_v6 = vadd.f32 1.0, %v8049_v10  ;;  %8056 = verf.f32 %v2000_v12  ;;  %v9505_v33 = vadd.f32 %v9365_v62, %v1839_v36  ;;  %v9519_v36 = vpop.permute.xlu1 %3134 }
 0x312   : > { %12676 = vst [vmem:[#allocation25_spill] sm:$0xff] %v9496_v46  ;;  %v2219_v26 = vsel %vm2123_vm14, 1.0, %v2187_v52  ;;  %vm2126_vm1 = vcmp.gt.f32.partialorder %v9496_v46, 0.0  ;;  %vm2158_vm3 = vcmp.lt.f32.partialorder %v9496_v46, 0.0  ;;  %v7536_v31 = vpop.f32.mrf.mxu1  ;;  %v2005_v12 = vmul.f32 0.70710677, %v12389_v17 }
 0x313   : > { %2258 = vst.msk [vmem:[#allocation2 + $0x38] sm:$0xff] %vm2247_vm11, %v2219_v26  ;;  %v2190_v21 = vsel %vm2158_vm3, -1.0, %v12394_v11  ;;  %v9509_v57 = vmul.f32 %v2060_v6, %v1964_v47  ;;  %v12393_v52 = vclamps-f32 %v9505_v33, 1.0  ;;  %v1842_v41 = vmul.f32 %v7533_v44, %v9360_v58  ;;  %12678 = vst [vmem:[#allocation27_spill] sm:$0xff] %v9519_v36 }
 0x314   : > { %v2222_v10 = vsel %vm2126_vm1, 1.0, %v2190_v21  ;;  %v1840_v23 = vmul.f32 %v9360_v58, %v1747_v59  ;;  %v1760_v37 = vpop.f32.mrf.mxu1  ;;  %8058 = verf.f32 %v2005_v12  ;;  %v1845_v47 = vmul.f32 %v7536_v31, %v9360_v58 }
 0x315   : > { %12677 = vst [vmem:[#allocation26_spill] sm:$0xff] %v9509_v57  ;;  %2261 = vst.msk [vmem:[#allocation2 + $0x50] sm:$0xff] %vm2247_vm11, %v2222_v10  ;;  %vm2124_vm4 = vcmp.gt.f32.partialorder %v9509_v57, 0.0  ;;  %vm2156_vm5 = vcmp.lt.f32.partialorder %v9509_v57, 0.0  ;;  %v12679_v21 = vclamps-f32 %v9422_v25, 1.0  ;;  %v9528_v10 = vadd.f32 %v9365_v62, %v1842_v41 }
 0x316   : > { %v8051_v6 = vpop.eup %8050  ;;  %v2188_v26 = vsel %vm2156_vm5, -1.0, %v12394_v11  ;;  %v2003_v59 = vmul.f32 0.70710677, %v12393_v52  ;;  %v7537_v17 = vpop.f32.mrf.mxu1  ;;  %v9531_v60 = vadd.f32 %v9365_v62, %v1840_v23  ;;  %v9534_v31 = vadd.f32 %v9365_v62, %v1845_v47 }
 0x317   : > { %v1969_v44 = vmul.f32 0.5, %v12679_v21  ;;  %v2220_v46 = vsel %vm2124_vm4, 1.0, %v2188_v26  ;;  %v2065_v57 = vadd.f32 1.0, %v8051_v6  ;;  %v12680_v25 = vclamps-f32 %v9433_v63, 1.0 }
 0x318   : > { %2259 = vst.msk [vmem:[#allocation2 + $0x40] sm:$0xff] %vm2247_vm11, %v2220_v46  ;;  %8060 = verf.f32 %v2003_v59  ;;  %v12397_v21 = vclamps-f32 %v9528_v10, 1.0  ;;  %v1843_v41 = vmul.f32 %v9360_v58, %v1760_v37  ;;  %v12682_v6 = vclamps-f32 %v9446_v32, 1.0  ;;  %v1763_v2 = vpop.f32.mrf.mxu1  ;;  %v9555_v32 = vpop.permute.xlu1 %2437 }
 0x319   : > { %v1967_v12 = vmul.f32 0.5, %v12680_v25  ;;  %v8053_v52 = vpop.eup %8052  ;;  %v9541_v11 = vmul.f32 %v2065_v57, %v1969_v44  ;;  %v12404_v26 = vclamps-f32 %v9531_v60, 1.0  ;;  %v1846_v37 = vmul.f32 %v7537_v17, %v9360_v58 }
 0x31a   : > { %v1970_v23 = vmul.f32 0.5, %v12682_v6  ;;  %v2063_v46 = vadd.f32 1.0, %v8053_v52  ;;  %v2006_v63 = vmul.f32 0.70710677, %v12397_v21  ;;  %v9550_v59 = vadd.f32 %v9365_v62, %v1843_v41 }
 0x31b   : > { %12681 = vst [vmem:[#allocation28_spill] sm:$0xff] %v9541_v11  ;;  %vm2129_vm7 = vcmp.gt.f32.partialorder %v9541_v11, 0.0  ;;  %vm2161_vm8 = vcmp.lt.f32.partialorder %v9541_v11, 0.0  ;;  %v12683_v57 = vclamps-f32 %v9463_v1, 1.0  ;;  %v2004_v52 = vmul.f32 0.70710677, %v12404_v26 }
 0x31c   : > { %v8055_v25 = vpop.eup %8054  ;;  %v12684_v6 = vmov 0.0   ;;  %v9562_v47 = vmul.f32 %v2063_v46, %v1967_v12  ;;  %8062 = verf.f32 %v2006_v63  ;;  %v1844_v17 = vmul.f32 %v9360_v58, %v1763_v2 }
 0x31d   : > { %v1968_v44 = vmul.f32 0.5, %v12683_v57  ;;  %v2193_v21 = vsel %vm2161_vm8, -1.0, %v12684_v6  ;;  %v2066_v8 = vadd.f32 1.0, %v8055_v25  ;;  %8064 = verf.f32 %v2004_v52  ;;  %v9585_v52 = vpop.permute.xlu1 %2442 }
 0x31e   : > { %12685 = vst [vmem:[#allocation29_spill] sm:$0xff] %v9562_v47  ;;  %v2225_v41 = vsel %vm2129_vm7, 1.0, %v2193_v21  ;;  %v12686_v11 = vclamps-f32 %v9534_v31, 1.0  ;;  %v8057_v24 = vpop.eup %8056  ;;  %vm2127_vm9 = vcmp.gt.f32.partialorder %v9562_v47, 0.0  ;;  %vm2159_vm10 = vcmp.lt.f32.partialorder %v9562_v47, 0.0  ;;  %12689 = vst [vmem:[#allocation32_spill] sm:$0xff] %v9585_v52 }
 0x31f   : > { %2264 = vst.msk [vmem:[#allocation2 + $0x68] sm:$0xff] %vm2247_vm11, %v2225_v41  ;;  %v12403_v1 = vclamps-f32 %v9550_v59, 1.0  ;;  %v9572_v12 = vadd.f32 %v9365_v62, %v1846_v37  ;;  %v2191_v2 = vsel %vm2159_vm10, -1.0, %v12684_v6  ;;  %v9575_v21 = vmul.f32 %v2066_v8, %v1970_v23 }
 0x320   : > { %v2009_v61 = vmul.f32 0.70710677, %v12686_v11  ;;  %v2064_v46 = vadd.f32 1.0, %v8057_v24  ;;  %v2223_v63 = vsel %vm2127_vm9, 1.0, %v2191_v2  ;;  %v9588_v8 = vadd.f32 %v9365_v62, %v1844_v17  ;;  %v9595_v2 = vld [vmem:[#allocation2 + $0x47] sm:$0xff]  ;;  %v9599_v17 = vld [vmem:[#allocation2 + $0x37] sm:$0xff] }
 0x321   : > { %12687 = vst [vmem:[#allocation30_spill] sm:$0xff] %v9575_v21  ;;  %v2007_v11 = vmul.f32 0.70710677, %v12403_v1  ;;  %v12402_v57 = vclamps-f32 %v9572_v12, 1.0  ;;  %2262 = vst.msk [vmem:[#allocation2 + $0x58] sm:$0xff] %vm2247_vm11, %v2223_v63  ;;  %vm2130_vm12 = vcmp.gt.f32.partialorder %v9575_v21, 0.0  ;;  %v9623_v28 = vmul.f32 %v9599_v17, %v9338_v43 }
 0x322   : > { %8066 = verf.f32 %v2009_v61  ;;  %vm2162_vm13 = vcmp.lt.f32.partialorder %v9575_v21, 0.0  ;;  %v9583_v37 = vmul.f32 %v2064_v46, %v1968_v44  ;;  %v8059_v61 = vpop.eup %8058  ;;  %v12690_v23 = vclamps-f32 %v9475_v22, 1.0  ;;  %v7540_v46 = vpop.f32.mrf.mxu1  ;;  %v9606_v1 = vld [vmem:[#allocation2 + $0x3f] sm:$0xff] }
 0x323   : > { %v2194_v24 = vsel %vm2162_vm13, -1.0, %v12684_v6  ;;  %8068 = verf.f32 %v2007_v11  ;;  %v2010_v41 = vmul.f32 0.70710677, %v12402_v57  ;;  %v2069_v44 = vadd.f32 1.0, %v8059_v61 }
 0x324   : > { %12688 = vst [vmem:[#allocation31_spill] sm:$0xff] %v9583_v37  ;;  %v1973_v25 = vmul.f32 0.5, %v12690_v23  ;;  %v2226_v63 = vsel %vm2130_vm12, 1.0, %v2194_v24  ;;  %vm2128_vm14 = vcmp.gt.f32.partialorder %v9583_v37, 0.0  ;;  %vm2160_vm15 = vcmp.lt.f32.partialorder %v9583_v37, 0.0  ;;  %v9608_v24 = vld [vmem:[#allocation2 + $0x4f] sm:$0xff] }
 0x325   : > { %2265 = vst.msk [vmem:[#allocation2 + $0x70] sm:$0xff] %vm2247_vm11, %v2226_v63  ;;  %v2192_v22 = vsel %vm2160_vm15, -1.0, %v12684_v6  ;;  %v12691_v11 = vclamps-f32 %v9505_v33, 1.0  ;;  %8070 = verf.f32 %v2010_v41  ;;  %v6946_v57 = vclamps-f32 %v9588_v8, 1.0  ;;  %v8061_v26 = vpop.eup %8060 }
 0x326   : > { %v2224_v37 = vsel %vm2128_vm14, 1.0, %v2192_v22  ;;  %v9610_v61 = vmul.f32 %v2069_v44, %v1973_v25  ;;  %v12693_v21 = vclamps-f32 %v9528_v10, 1.0  ;;  %v9616_v63 = vmul.f32 %v9595_v2, %v9338_v43  ;;  %v2378_v25 = vpop.permute.xlu0 %2377  ;;  %v9627_v10 = vpop.permute.xlu1 %3138 }
 0x327   : > { %v1971_v23 = vmul.f32 0.5, %v12691_v11  ;;  %2263 = vst.msk [vmem:[#allocation2 + $0x60] sm:$0xff] %vm2247_vm11, %v2224_v37  ;;  %v2067_v33 = vadd.f32 1.0, %v8061_v26  ;;  %v12695_v8 = vclamps-f32 %v9531_v60, 1.0  ;;  %v2008_v11 = vmul.f32 0.70710677, %v6946_v57  ;;  %v1776_v60 = vpop.f32.mrf.mxu1 }
 0x328   : > { %12692 = vst [vmem:[#allocation33_spill] sm:$0xff] %v9610_v61  ;;  %v1974_v47 = vmul.f32 0.5, %v12693_v21  ;;  %12694 = vst [vmem:[#allocation34_spill] sm:$0xff] %v9616_v63  ;;  %vm2133_vm1 = vcmp.gt.f32.partialorder %v9610_v61, 0.0  ;;  %vm2165_vm3 = vcmp.lt.f32.partialorder %v9610_v61, 0.0  ;;  %v9630_v21 = vmul.f32 %v9606_v1, %v2378_v25 }
 0x329   : > { %v1972_v41 = vmul.f32 0.5, %v12695_v8  ;;  %12696 = vst [vmem:[#allocation35_spill] sm:$0xff] %v9627_v10  ;;  %v9633_v26 = vmul.f32 %v9608_v24, %v2378_v25  ;;  %v2197_v37 = vsel %vm2165_vm3, -1.0, %v12684_v6  ;;  %v9636_v44 = vmul.f32 %v2067_v33, %v1971_v23  ;;  %v8063_v56 = vpop.eup %8062  ;;  %v2322_v23 = vld [vmem:[#allocation2 + $0x27] sm:$0xff] }
 0x32a   : > { %v12699_v22 = vclamps-f32 %v9534_v31, 1.0  ;;  %8072 = verf.f32 %v2008_v11  ;;  %v2229_v3 = vsel %vm2133_vm1, 1.0, %v2197_v37  ;;  %v1849_v49 = vmul.f32 %v7540_v46, %v9360_v58  ;;  %v8065_v10 = vpop.eup %8064 }
 0x32b   : > { %12697 = vst [vmem:[#allocation36_spill] sm:$0xff] %v9633_v26  ;;  %12698 = vst [vmem:[#allocation37_spill] sm:$0xff] %v9636_v44  ;;  %vm2131_vm4 = vcmp.gt.f32.partialorder %v9636_v44, 0.0  ;;  %vm2163_vm5 = vcmp.lt.f32.partialorder %v9636_v44, 0.0  ;;  %v2070_v31 = vadd.f32 1.0, %v8063_v56  ;;  %v1847_v33 = vmul.f32 %v9360_v58, %v1776_v60 }
 0x32c   : > { %v1977_v8 = vmul.f32 0.5, %v12699_v22  ;;  %2268 = vst.msk [vmem:[#allocation2 + $0x88] sm:$0xff] %vm2247_vm11, %v2229_v3  ;;  %v2195_v11 = vsel %vm2163_vm5, -1.0, %v12684_v6  ;;  %v2068_v37 = vadd.f32 1.0, %v8065_v10  ;;  %v12700_v22 = vclamps-f32 %v9550_v59, 1.0  ;;  %v9665_v59 = vpop.permute.xlu1 %3146 }
 0x32d   : > { %v9653_v38 = vadd.f32 %v9365_v62, %v1849_v49  ;;  %v2227_v63 = vsel %vm2131_vm4, 1.0, %v2195_v11  ;;  %v9655_v3 = vmul.f32 %v2070_v31, %v1974_v47  ;;  %v12702_v26 = vclamps-f32 %v9572_v12, 1.0  ;;  %12704 = vst [vmem:[#allocation40_spill] sm:$0xff] %v9665_v59  ;;  %v7541_v31 = vpop.f32.mrf.mxu1 }
 0x32e   : > { %v1975_v61 = vmul.f32 0.5, %v12700_v22  ;;  %v9660_v56 = vadd.f32 %v9365_v62, %v1847_v33  ;;  %2266 = vst.msk [vmem:[#allocation2 + $0x78] sm:$0xff] %vm2247_vm11, %v2227_v63  ;;  %v9663_v60 = vmul.f32 %v2068_v37, %v1972_v41  ;;  %v2323_v22 = vld [vmem:[#allocation2 + $0x2f] sm:$0xff]  ;;  %v9668_v49 = vmul.f32 %v9338_v43, %v2322_v23 }
 0x32f   : > { %v8067_v46 = vpop.eup %8066  ;;  %12701 = vst [vmem:[#allocation38_spill] sm:$0xff] %v9655_v3  ;;  %v1978_v44 = vmul.f32 0.5, %v12702_v26  ;;  %v12421_v47 = vclamps-f32 %v9653_v38, 1.0  ;;  %vm2134_vm7 = vcmp.gt.f32.partialorder %v9655_v3, 0.0  ;;  %vm2166_vm8 = vcmp.lt.f32.partialorder %v9655_v3, 0.0 }
 0x330   : > { %12703 = vst [vmem:[#allocation39_spill] sm:$0xff] %v9663_v60  ;;  %v2073_v10 = vadd.f32 1.0, %v8067_v46  ;;  %v1976_v12 = vmul.f32 0.5, %v6946_v57  ;;  %v8069_v63 = vpop.eup %8068  ;;  %v2198_v41 = vsel %vm2166_vm8, -1.0, %v12684_v6  ;;  %vm2132_vm9 = vcmp.gt.f32.partialorder %v9663_v60, 0.0  ;;  %v9682_v46 = vld [vmem:[#allocation2 + $0x57] sm:$0xff] }
 0x331   : > { %vm2164_vm10 = vcmp.lt.f32.partialorder %v9663_v60, 0.0  ;;  %v2230_v43 = vsel %vm2134_vm7, 1.0, %v2198_v41  ;;  %v2071_v11 = vadd.f32 1.0, %v8069_v63  ;;  %v9680_v37 = vmul.f32 %v2378_v25, %v2323_v22  ;;  %v9699_v60 = vpop.permute.xlu1 %3150 }
 0x332   : > { %v9677_v33 = vmul.f32 %v2073_v10, %v1977_v8  ;;  %v2196_v23 = vsel %vm2164_vm10, -1.0, %v12684_v6  ;;  %v8071_v57 = vpop.eup %8070  ;;  %2269 = vst.msk [vmem:[#allocation2 + $0x90] sm:$0xff] %vm2247_vm11, %v2230_v43  ;;  %v2013_v8 = vmul.f32 0.70710677, %v12421_v47  ;;  %v1779_v10 = vpop.f32.mrf.mxu1  ;;  %v9695_v41 = vmul.f32 %v9595_v2, %v9340_v45  ;;  %v9697_v43 = vld [vmem:[#allocation2 + $0x5f] sm:$0xff]  ;;  %12707 = vst [vmem:[#allocation43_spill] sm:$0xff] %v9699_v60 }
 0x333   : > { %v2228_v26 = vsel %vm2132_vm9, 1.0, %v2196_v23  ;;  %v9691_v25 = vmul.f32 %v2071_v11, %v1975_v61  ;;  %v2074_v22 = vadd.f32 1.0, %v8071_v57  ;;  %v12708_v47 = vclamps-f32 %v9660_v56, 1.0  ;;  %v2388_v61 = vpop.permute.xlu0 %2387  ;;  %v2563_v60 = vld [vmem:[#allocation2 + $0x20] sm:$0xff] }
 0x334   : > { %12705 = vst [vmem:[#allocation41_spill] sm:$0xff] %v9677_v33  ;;  %vm2137_vm12 = vcmp.gt.f32.partialorder %v9677_v33, 0.0  ;;  %vm2169_vm13 = vcmp.lt.f32.partialorder %v9677_v33, 0.0  ;;  %2267 = vst.msk [vmem:[#allocation2 + $0x80] sm:$0xff] %vm2247_vm11, %v2228_v26  ;;  %8074 = verf.f32 %v2013_v8  ;;  %v9705_v26 = vmul.f32 %v9682_v46, %v9340_v45 }
 0x335   : > { %v2201_v63 = vsel %vm2169_vm13, -1.0, %v12684_v6  ;;  %12706 = vst [vmem:[#allocation42_spill] sm:$0xff] %v9691_v25  ;;  %v2011_v33 = vmul.f32 0.70710677, %v12708_v47  ;;  %vm2135_vm14 = vcmp.gt.f32.partialorder %v9691_v25, 0.0  ;;  %vm2167_vm15 = vcmp.lt.f32.partialorder %v9691_v25, 0.0 }
 0x336   : > { %v2233_v23 = vsel %vm2137_vm12, 1.0, %v2201_v63  ;;  %12709 = vst [vmem:[#allocation44_spill] sm:$0xff] %v9705_v26  ;;  %v9710_v11 = vmul.f32 %v2074_v22, %v1978_v44  ;;  %v9713_v57 = vmul.f32 %v9608_v24, %v2388_v61  ;;  %v2199_v63 = vsel %vm2167_vm15, -1.0, %v12684_v6  ;;  %v2565_v22 = vld [vmem:[#allocation2 + $0x30] sm:$0xff] }
 0x337   : > { %2272 = vst.msk [vmem:[#allocation2 + $0xa8] sm:$0xff] %vm2247_vm11, %v2233_v23  ;;  %v8073_v8 = vpop.eup %8072  ;;  %8076 = verf.f32 %v2011_v33  ;;  %v9717_v47 = vmul.f32 %v9697_v43, %v2388_v61  ;;  %v1850_v3 = vmul.f32 %v7541_v31, %v9360_v58  ;;  %v7544_v23 = vpop.f32.mrf.mxu1  ;;  %v2231_v59 = vsel %vm2135_vm14, 1.0, %v2199_v63  ;;  %v2562_v63 = vld [vmem:[#allocation2 + $0x18] sm:$0xff] }
 0x338   : > { %12710 = vst [vmem:[#allocation45_spill] sm:$0xff] %v9710_v11  ;;  %vm2138_vm1 = vcmp.gt.f32.partialorder %v9710_v11, 0.0  ;;  %vm2170_vm3 = vcmp.lt.f32.partialorder %v9710_v11, 0.0  ;;  %v2072_v44 = vadd.f32 1.0, %v8073_v8  ;;  %2270 = vst.msk [vmem:[#allocation2 + $0x98] sm:$0xff] %vm2247_vm11, %v2231_v59  ;;  %v1848_v8 = vmul.f32 %v9360_v58, %v1779_v10  ;;  %v9737_v59 = vld [vmem:[%s12378_s7 + $0x20] sm:$0xff]  }
 0x339   : > { %12711 = vst [vmem:[#allocation46_spill] sm:$0xff] %v9717_v47  ;;  %v2202_v25 = vsel %vm2170_vm3, -1.0, %v12684_v6  ;;  %v9729_v31 = vadd.f32 %v9365_v62, %v1850_v3  ;;  %v2593_v11 = vpack.c.bf16 %v2563_v60, %v2562_v63  ;;  %12713 = vst [vmem:[#allocation48_spill] sm:$0xff] %v9737_v59  ;;  %v9742_v3 = vpop.permute.xlu1 %2457  ;;  %v9753_v10 = vld [vmem:[#allocation2 + $0x67] sm:$0xff]  ;;  %v9755_v63 = vld [vmem:[#allocation2 + $0x6f] sm:$0xff]  ;;  %v12720_v54 = vclamps-f32 %v9660_v56, 1.0 }
 0x33a   : > { %v2234_v40 = vsel %vm2138_vm1, 1.0, %v2202_v25  ;;  %v9731_v30 = vmul.f32 %v2072_v44, %v1976_v12  ;;  %12714 = vst [vmem:[#allocation49_spill] sm:$0xff] %v9742_v3  ;;  %v2594_v12 = vpack.c.bf16 %v2565_v22, %v2564_v14  ;;  %v1792_v44 = vpop.f32.mrf.mxu1  ;;  %v1884_v60 = vadd.f32 %v9365_v62, %v1848_v8  ;;  %v9767_v33 = vld [vmem:[#allocation2 + $0x17] sm:$0xff] }
 0x33b   : > { %2273 = vst.msk [vmem:[#allocation2 + $0xb0] sm:$0xff] %vm2247_vm11, %v2234_v40  ;;  %v6952_v25 = vclamps-f32 %v9729_v31, 1.0  ;;  %7553 = vmatmul.mubr.msk.bf16.vlgmr.msra.gmra.mxu0 %vm2247_vm11, %v2593_v11  ;;  %v9751_v40 = vmul.f32 %v9697_v43, %v9354_v51  ;;  %v9760_v14 = vmul.f32 %v9599_v17, %v9340_v45  ;;  %v9763_v22 = vmul.f32 %v9606_v1, %v2388_v61  ;;  %v2393_v11 = vpop.permute.xlu0 %2392  ;;  %v9774_v45 = vld [vmem:[#allocation2 + $0x1f] sm:$0xff] }
 0x33c   : > { %12712 = vst [vmem:[#allocation47_spill] sm:$0xff] %v9731_v30  ;;  %vm2136_vm4 = vcmp.gt.f32.partialorder %v9731_v30, 0.0  ;;  %vm2168_vm5 = vcmp.lt.f32.partialorder %v9731_v30, 0.0  ;;  %7619 = vmatpush3.bf16.msra.mxu0 %v9347_v39  ;;  %7556 = vmatprep.mubr.msk.bf16.mxu0 %vm2247_vm11, %v2594_v12  ;;  %v12716_v30 = vclamps-f32 %v9653_v38, 1.0  ;;  %v6950_v47 = vclamps-f32 %v1884_v60, 1.0  ;;  %v9818_v56 = vld [vmem:[#allocation2 + $0x7f] sm:$0xff] }
 0x33d   : > { %12715 = vst [vmem:[#allocation50_spill] sm:$0xff] %v9751_v40  ;;  %v2200_v31 = vsel %vm2168_vm5, -1.0, %v12684_v6  ;;  %v2014_v8 = vmul.f32 0.70710677, %v6952_v25  ;;  %v9772_v0 = vmul.f32 %v9682_v46, %v2393_v11  ;;  %7686 = vmatprep.subr.bf16.mxu0 %v9737_v59  ;;  %v9780_v39 = vmul.f32 %v9755_v63, %v9354_v51  ;;  %v9793_v60 = vpop.permute.xlu1 %2462 }
 0x33e   : > { %v2232_v36 = vsel %vm2136_vm4, 1.0, %v2200_v31  ;;  %v1981_v26 = vmul.f32 0.5, %v12716_v30  ;;  %v9783_v1 = vmul.f32 %v9753_v10, %v2393_v11  ;;  %v1853_v38 = vmul.f32 %v7544_v23, %v9360_v58  ;;  %v7545_v30 = vpop.f32.mrf.mxu1 }
 0x33f   : > { %12717 = vst [vmem:[#allocation51_spill] sm:$0xff] %v9772_v0  ;;  %2271 = vst.msk [vmem:[#allocation2 + $0xa0] sm:$0xff] %vm2247_vm11, %v2232_v36  ;;  %8078 = verf.f32 %v2014_v8  ;;  %v2012_v17 = vmul.f32 0.70710677, %v6950_v47  ;;  %v9787_v61 = vmul.f32 %v9595_v2, %v2393_v11  ;;  %v2512_v36 = vmul.f32 %v9322_v35, %v9767_v33 }
 0x340   : > { %12718 = vst [vmem:[#allocation52_spill] sm:$0xff] %v9780_v39  ;;  %12719 = vst [vmem:[#allocation53_spill] sm:$0xff] %v9783_v1  ;;  %v9798_v8 = vadd.f32 %v9365_v62, %v1853_v38  ;;  %v2513_v23 = vmul.f32 %v9324_v20, %v9774_v45  ;;  %v1851_v2 = vmul.f32 %v9360_v58, %v1792_v44  ;;  %v1979_v12 = vmul.f32 0.5, %v12720_v54  ;;  %v9816_v39 = vld [vmem:[#allocation2 + $0x77] sm:$0xff]  ;;  %v2408_v54 = vpop.permute.xlu0 %2407  ;;  %v1795_v40 = vpop.f32.mrf.mxu1 }
 0x341   : > { %v8075_v11 = vpop.eup %8074  ;;  %8080 = verf.f32 %v2012_v17  ;;  %v9809_v0 = vmul.f32 %v9753_v10, %v9362_v29  ;;  %v9813_v38 = vmul.f32 %v9608_v24, %v9354_v51  ;;  %v9820_v17 = vmul.f32 0.5, %v6952_v25 }
 0x342   : > { %v2077_v31 = vadd.f32 1.0, %v8075_v11  ;;  %v12444_v1 = vclamps-f32 %v9798_v8, 1.0  ;;  %v2543_v44 = vpack.c.bf16 %v2513_v23, %v2512_v36  ;;  %v9822_v5 = vmul.f32 0.5, %v6950_v47 }
 0x343   : > { %v9825_v11 = vadd.f32 %v9365_v62, %v1851_v2  ;;  %v9828_v51 = vmul.f32 %v9755_v63, %v2408_v54  ;;  %v2546_v23 = vpack.c.bf16 %v9813_v38, %v9787_v61  ;;  %v12722_v47 = vpack.c.bf16 %v9680_v37, %v9668_v49  ;;  %v9856_v37 = vpop.permute.xlu1 %3154  ;;  %v7548_v2 = vpop.f32.mrf.mxu1 }
 0x344   : > { %v8077_v27 = vpop.eup %8076  ;;  %v9830_v24 = vmul.f32 %v2077_v31, %v1981_v26  ;;  %v2017_v59 = vmul.f32 0.70710677, %v12444_v1  ;;  %7587 = vmatmul.mubr.msk.bf16.vlgmr.msra.gmra.mxu1 %vm2247_vm11, %v2543_v44  ;;  %v9844_v26 = vmul.f32 %v9816_v39, %v9362_v29  ;;  %v9849_v61 = vmul.f32 %v9818_v56, %v2408_v54  ;;  %12726 = vst [vmem:[#allocation58_spill] sm:$0xff] %v9856_v37  ;;  %v2567_v31 = vld [vmem:[#allocation2 + $0x40] sm:$0xff]  ;;  %v2413_v1 = vpop.permute.xlu0 %2412 }
 0x345   : > { %v2075_v36 = vadd.f32 1.0, %v8077_v27  ;;  %7590 = vmatprep.mubr.msk.bf16.mxu1 %vm2247_vm11, %v12722_v47  ;;  %v12445_v25 = vclamps-f32 %v9825_v11, 1.0  ;;  %7653 = vmatpush3.bf16.msra.mxu1 %v9492_v16  ;;  %v9863_v47 = vmul.f32 %v9682_v46, %v9362_v29  ;;  %v2569_v27 = vld [vmem:[#allocation2 + $0x50] sm:$0xff]  ;;  %v1852_v29 = vmul.f32 %v9360_v58, %v1795_v40  ;;  %v2568_v16 = vld [vmem:[#allocation2 + $0x48] sm:$0xff] }
 0x346   : > { %12721 = vst [vmem:[#allocation54_spill] sm:$0xff] %v9830_v24  ;;  %12723 = vst [vmem:[#allocation55_spill] sm:$0xff] %v9844_v26  ;;  %vm2141_vm7 = vcmp.gt.f32.partialorder %v9830_v24, 0.0  ;;  %vm2173_vm8 = vcmp.lt.f32.partialorder %v9830_v24, 0.0  ;;  %8082 = verf.f32 %v2017_v59  ;;  %v1854_v59 = vmul.f32 %v7545_v30, %v9360_v58  ;;  %v9875_v24 = vld [vmem:[#allocation2 + $0x87] sm:$0xff] }
 0x347   : > { %12724 = vst [vmem:[#allocation56_spill] sm:$0xff] %v9849_v61  ;;  %v9854_v49 = vmul.f32 %v2075_v36, %v1979_v12  ;;  %v2205_v38 = vsel %vm2173_vm8, -1.0, %v12684_v6  ;;  %v2015_v44 = vmul.f32 0.70710677, %v12445_v25  ;;  %v2566_v36 = vld [vmem:[#allocation2 + $0x38] sm:$0xff]  ;;  %v2521_v26 = vmul.f32 %v9697_v43, %v2408_v54  ;;  %v9883_v61 = vld [vmem:[#allocation2 + $0x8f] sm:$0xff] }
 0x348   : > { %v2237_v12 = vsel %vm2141_vm7, 1.0, %v2205_v38  ;;  %v9873_v46 = vpack.c.bf16 %v2567_v31, %v2566_v36  ;;  %v9881_v30 = vpack.c.bf16 %v2569_v27, %v2568_v16  ;;  %v9887_v40 = vadd.f32 %v9365_v62, %v1852_v29 }
 0x349   : > { %12725 = vst [vmem:[#allocation57_spill] sm:$0xff] %v9854_v49  ;;  %vm2139_vm9 = vcmp.gt.f32.partialorder %v9854_v49, 0.0  ;;  %vm2171_vm10 = vcmp.lt.f32.partialorder %v9854_v49, 0.0  ;;  %2276 = vst.msk [vmem:[#allocation2 + $0xc8] sm:$0xff] %vm2247_vm11, %v2237_v12  ;;  %8084 = verf.f32 %v2015_v44  ;;  %v9879_v49 = vadd.f32 %v9365_v62, %v1854_v59  ;;  %v1808_v12 = vpop.f32.mrf.mxu1  ;;  %v9899_v44 = vpop.permute.xlu1 %3162 }
 0x34a   : > { %v2203_v25 = vsel %vm2171_vm10, -1.0, %v12684_v6  ;;  %12727 = vst [vmem:[#allocation59_spill] sm:$0xff] %v9873_v46  ;;  %12728 = vst [vmem:[#allocation60_spill] sm:$0xff] %v9881_v30  ;;  %7557 = vmatmul.mubr.msk.bf16.gmra.mxu0 %vm2247_vm11, %v9873_v46  ;;  %v2523_v43 = vmul.f32 %v9755_v63, %v9401_v7  ;;  %v9895_v54 = vmul.f32 %v9818_v56, %v9401_v7 }
 0x34b   : > { %v2235_v38 = vsel %vm2139_vm9, 1.0, %v2203_v25  ;;  %v2522_v25 = vmul.f32 %v9753_v10, %v2413_v1  ;;  %v12452_v31 = vclamps-f32 %v9879_v49, 1.0  ;;  %12729 = vst [vmem:[#allocation61_spill] sm:$0xff] %v9899_v44  ;;  %7560 = vmatprep.mubr.msk.bf16.mxu0 %vm2247_vm11, %v9881_v30  ;;  %v9904_v16 = vmul.f32 %v9816_v39, %v2413_v1 }
 0x34c   : > { %v8079_v37 = vpop.eup %8078  ;;  %2274 = vst.msk [vmem:[#allocation2 + $0xb8] sm:$0xff] %vm2247_vm11, %v2235_v38  ;;  %v9907_v59 = vmul.f32 %v9875_v24, %v2413_v1  ;;  %v12731_v63 = vpack.c.bf16 %v9763_v22, %v9760_v14  ;;  %v1857_v36 = vmul.f32 %v7548_v2, %v9360_v58  ;;  %v1855_v29 = vmul.f32 %v9360_v58, %v1808_v12 }
 0x34d   : > { %v2078_v27 = vadd.f32 1.0, %v8079_v37  ;;  %v9916_v37 = vmul.f32 %v9883_v61, %v9401_v7  ;;  %v2547_v14 = vpack.c.bf16 %v2521_v26, %v9863_v47  ;;  %v2018_v22 = vmul.f32 0.70710677, %v12452_v31  ;;  %v2428_v7 = vpop.permute.xlu0 %2427  ;;  %v9941_v26 = vld [vmem:[%s12378_s7 + $0x28] sm:$0xff]  }
 0x34e   : > { %12730 = vst [vmem:[#allocation62_spill] sm:$0xff] %v9907_v59  ;;  %7591 = vmatmul.mubr.msk.bf16.gmra.mxu1 %vm2247_vm11, %v12731_v63  ;;  %v8081_v38 = vpop.eup %8080  ;;  %v12734_v2 = vclamps-f32 %v9887_v40, 1.0  ;;  %7720 = vmatprep.subr.bf16.mxu1 %v9941_v26  ;;  %v9964_v12 = vmul.f32 %v9875_v24, %v9419_v13  ;;  %v9966_v63 = vld [vmem:[#allocation2 + $0x97] sm:$0xff] }
 0x34f   : > { %12732 = vst [vmem:[#allocation63_spill] sm:$0xff] %v9916_v37  ;;  %7594 = vmatprep.mubr.msk.bf16.mxu1 %vm2247_vm11, %v2546_v23  ;;  %v9922_v1 = vmul.f32 %v2078_v27, %v9820_v17  ;;  %v2076_v10 = vadd.f32 1.0, %v8081_v38  ;;  %v2548_v23 = vpack.c.bf16 %v2523_v43, %v2522_v25  ;;  %8086 = verf.f32 %v2018_v22  ;;  %v9951_v22 = vpop.permute.xlu1 %3166 }
 0x350   : > { %v2016_v30 = vmul.f32 0.70710677, %v12734_v2  ;;  %v9936_v17 = vadd.f32 %v9365_v62, %v1857_v36  ;;  %v9948_v25 = vadd.f32 %v9365_v62, %v1855_v29  ;;  %12736 = vst [vmem:[#allocation66_spill] sm:$0xff] %v9951_v22  ;;  %12738 = vst [vmem:[#allocation67_spill] sm:$0xff] %v9964_v12  ;;  %v2525_v37 = vmul.f32 %v9818_v56, %v2428_v7 }
 0x351   : > { %12733 = vst [vmem:[#allocation64_spill] sm:$0xff] %v9922_v1  ;;  %vm2142_vm12 = vcmp.gt.f32.partialorder %v9922_v1, 0.0  ;;  %vm2174_vm13 = vcmp.lt.f32.partialorder %v9922_v1, 0.0  ;;  %v9945_v43 = vmul.f32 %v2076_v10, %v9822_v5  ;;  %v12737_v5 = vclamps-f32 %v9798_v8, 1.0  ;;  %v7549_v10 = vpop.f32.mrf.mxu1  ;;  %v9970_v31 = vpop.permute.xlu0 %2432 }
 0x352   : > { %v2206_v47 = vsel %vm2174_vm13, -1.0, %v12684_v6  ;;  %8088 = verf.f32 %v2016_v30  ;;  %v12454_v38 = vclamps-f32 %v9936_v17, 1.0  ;;  %v1858_v46 = vmul.f32 %v7549_v10, %v9360_v58 }
 0x353   : > { %12735 = vst [vmem:[#allocation65_spill] sm:$0xff] %v9945_v43  ;;  %v2238_v27 = vsel %vm2142_vm12, 1.0, %v2206_v47  ;;  %v8083_v36 = vpop.eup %8082  ;;  %vm2140_vm14 = vcmp.gt.f32.partialorder %v9945_v43, 0.0  ;;  %vm2172_vm15 = vcmp.lt.f32.partialorder %v9945_v43, 0.0  ;;  %v1985_v30 = vmul.f32 0.5, %v12737_v5 }
 0x354   : > { %2277 = vst.msk [vmem:[#allocation2 + $0xd0] sm:$0xff] %vm2247_vm11, %v2238_v27  ;;  %v2204_v29 = vsel %vm2172_vm15, -1.0, %v12684_v6  ;;  %v2081_v2 = vadd.f32 1.0, %v8083_v36  ;;  %v2021_v47 = vmul.f32 0.70710677, %v12454_v38  ;;  %v9968_v27 = vld [vmem:[#allocation2 + $0x9f] sm:$0xff]  ;;  %v2524_v38 = vmul.f32 %v9816_v39, %v9419_v13 }
 0x355   : > { %v2236_v8 = vsel %vm2140_vm14, 1.0, %v2204_v29  ;;  %v12739_v5 = vclamps-f32 %v9825_v11, 1.0  ;;  %v12458_v36 = vclamps-f32 %v9948_v25, 1.0  ;;  %v9990_v39 = vmul.f32 %v9966_v63, %v9419_v13 }
 0x356   : > { %7595 = vmatmul.mubr.msk.bf16.gmra.mxu1 %vm2247_vm11, %v2547_v14  ;;  %v8085_v1 = vpop.eup %8084  ;;  %2275 = vst.msk [vmem:[#allocation2 + $0xc0] sm:$0xff] %vm2247_vm11, %v2236_v8  ;;  %v9980_v59 = vmul.f32 %v2081_v2, %v1985_v30  ;;  %8090 = verf.f32 %v2021_v47  ;;  %v9984_v14 = vmul.f32 %v9883_v61, %v2428_v7  ;;  %v1811_v8 = vpop.f32.mrf.mxu1  ;;  %v2571_v30 = vld [vmem:[#allocation2 + $0x60] sm:$0xff]  ;;  %v2549_v56 = vpack.c.bf16 %v2525_v37, %v2524_v38  ;;  %v2573_v38 = vld [vmem:[#allocation2 + $0x70] sm:$0xff] }
 0x357   : > { %v1983_v43 = vmul.f32 0.5, %v12739_v5  ;;  %7598 = vmatprep.mubr.msk.bf16.mxu1 %vm2247_vm11, %v2548_v23  ;;  %v2079_v11 = vadd.f32 1.0, %v8085_v1  ;;  %v2019_v29 = vmul.f32 0.70710677, %v12458_v36  ;;  %12741 = vst [vmem:[#allocation69_spill] sm:$0xff] %v9990_v39  ;;  %v9993_v23 = vmul.f32 %v9968_v27, %v2428_v7  ;;  %v9999_v2 = vpop.permute.xlu1 %2477  ;;  %v2570_v7 = vld [vmem:[#allocation2 + $0x58] sm:$0xff]  ;;  %v10010_v1 = vpop.permute.xlu0 %2447 }
 0x358   : > { %12740 = vst [vmem:[#allocation68_spill] sm:$0xff] %v9980_v59  ;;  %vm2145_vm1 = vcmp.gt.f32.partialorder %v9980_v59, 0.0  ;;  %vm2177_vm3 = vcmp.lt.f32.partialorder %v9980_v59, 0.0  ;;  %v1856_v59 = vmul.f32 %v9360_v58, %v1811_v8  ;;  %v10008_v37 = vpack.c.bf16 %v2571_v30, %v2570_v7  ;;  %12745 = vst [vmem:[#allocation73_spill] sm:$0xff] %v10010_v1  ;;  %v2572_v58 = vld [vmem:[#allocation2 + $0x68] sm:$0xff] }
 0x359   : > { %12742 = vst [vmem:[#allocation70_spill] sm:$0xff] %v9993_v23  ;;  %v2209_v47 = vsel %vm2177_vm3, -1.0, %v12684_v6  ;;  %v10002_v5 = vmul.f32 %v2079_v11, %v1983_v43  ;;  %8092 = verf.f32 %v2019_v29  ;;  %v10017_v11 = vadd.f32 %v9365_v62, %v1858_v46 }
 0x35a   : > { %v2241_v36 = vsel %vm2145_vm1, 1.0, %v2209_v47  ;;  %12744 = vst [vmem:[#allocation72_spill] sm:$0xff] %v10008_v37  ;;  %v10020_v10 = vadd.f32 %v9365_v62, %v1856_v59  ;;  %7561 = vmatmul.mubr.msk.bf16.gmra.mxu0 %vm2247_vm11, %v10008_v37  ;;  %v10025_v8 = vpack.c.bf16 %v2573_v38, %v2572_v58  ;;  %v12747_v47 = vclamps-f32 %v9879_v49, 1.0  ;;  %v2576_v37 = vld [vmem:[#allocation2 + $0x88] sm:$0xff] }
 0x35b   : > { %12743 = vst [vmem:[#allocation71_spill] sm:$0xff] %v10002_v5  ;;  %2280 = vst.msk [vmem:[#allocation2 + $0xe8] sm:$0xff] %vm2247_vm11, %v2241_v36  ;;  %vm2143_vm4 = vcmp.gt.f32.partialorder %v10002_v5, 0.0  ;;  %vm2175_vm5 = vcmp.lt.f32.partialorder %v10002_v5, 0.0  ;;  %v10030_v13 = vpop.permute.xlu1 %2482  ;;  %v12748_v62 = vclamps-f32 %v9887_v40, 1.0  ;;  %v12464_v39 = vclamps-f32 %v10017_v11, 1.0 }
 0x35c   : > { %v2207_v43 = vsel %vm2175_vm5, -1.0, %v12684_v6  ;;  %v8087_v29 = vpop.eup %8086  ;;  %12746 = vst [vmem:[#allocation74_spill] sm:$0xff] %v10025_v8  ;;  %v1986_v46 = vmul.f32 0.5, %v12747_v47  ;;  %7564 = vmatprep.mubr.msk.bf16.mxu0 %vm2247_vm11, %v10025_v8  ;;  %v12752_v58 = vclamps-f32 %v9936_v17, 1.0  ;;  %v10058_v17 = vld [vmem:[#allocation2 + $0xa7] sm:$0xff] }
 0x35d   : > { %v2239_v36 = vsel %vm2143_vm4, 1.0, %v2207_v43  ;;  %v2082_v7 = vadd.f32 1.0, %v8087_v29  ;;  %v1984_v59 = vmul.f32 0.5, %v12748_v62  ;;  %v10040_v43 = vpop.permute.xlu0 %2452  ;;  %v2022_v40 = vmul.f32 0.70710677, %v12464_v39 }
 0x35e   : > { %7599 = vmatmul.mubr.msk.bf16.gmra.mxu1 %vm2247_vm11, %v2549_v56  ;;  %2278 = vst.msk [vmem:[#allocation2 + $0xd8] sm:$0xff] %vm2247_vm11, %v2239_v36  ;;  %v12463_v56 = vclamps-f32 %v10020_v10, 1.0  ;;  %12750 = vst [vmem:[#allocation76_spill] sm:$0xff] %v10040_v43  ;;  %v1989_v29 = vmul.f32 0.5, %v12752_v58  ;;  %v2526_v36 = vmul.f32 %v9875_v24, %v9970_v31 }
 0x35f   : > { %v8089_v30 = vpop.eup %8088  ;;  %v10038_v38 = vmul.f32 %v2082_v7, %v1986_v46  ;;  %8094 = verf.f32 %v2022_v40  ;;  %v10064_v58 = vpop.permute.xlu1 %3170 }
 0x360   : > { %v2080_v5 = vadd.f32 1.0, %v8089_v30  ;;  %v10050_v30 = vld [vmem:[#allocation2 + $0xaf] sm:$0xff]  ;;  %v2020_v47 = vmul.f32 0.70710677, %v12463_v56  ;;  %12754 = vst [vmem:[#allocation79_spill] sm:$0xff] %v10064_v58 }
 0x361   : > { %12749 = vst [vmem:[#allocation75_spill] sm:$0xff] %v10038_v38  ;;  %12753 = vst [vmem:[#allocation78_spill] sm:$0xff] %v10050_v30  ;;  %vm2146_vm7 = vcmp.gt.f32.partialorder %v10038_v38, 0.0  ;;  %vm2178_vm8 = vcmp.lt.f32.partialorder %v10038_v38, 0.0  ;;  %v10069_v56 = vmul.f32 %v9555_v32, %v10050_v30  ;;  %v10073_v38 = vmul.f32 %v10058_v17, %v9970_v31 }
 0x362   : > { %v10042_v49 = vmul.f32 %v2080_v5, %v1984_v59  ;;  %v2527_v5 = vmul.f32 %v9883_v61, %v9555_v32  ;;  %v2210_v7 = vsel %vm2178_vm8, -1.0, %v12684_v6  ;;  %8096 = verf.f32 %v2020_v47  ;;  %v10078_v47 = vpop.permute.xlu0 %2467 }
 0x363   : > { %v8091_v46 = vpop.eup %8090  ;;  %v2242_v24 = vsel %vm2146_vm7, 1.0, %v2210_v7  ;;  %12755 = vst [vmem:[#allocation80_spill] sm:$0xff] %v10069_v56  ;;  %12756 = vst [vmem:[#allocation81_spill] sm:$0xff] %v10073_v38  ;;  %v10106_v38 = vpop.permute.xlu1 %3178  ;;  %v10112_v56 = vld [vmem:[#allocation2 + $0xcf] sm:$0xff] }
 0x364   : > { %12751 = vst [vmem:[#allocation77_spill] sm:$0xff] %v10042_v49  ;;  %vm2144_vm9 = vcmp.gt.f32.partialorder %v10042_v49, 0.0  ;;  %vm2176_vm10 = vcmp.lt.f32.partialorder %v10042_v49, 0.0  ;;  %v2085_v59 = vadd.f32 1.0, %v8091_v46  ;;  %2281 = vst.msk [vmem:[#allocation2 + $0xf0] sm:$0xff] %vm2247_vm11, %v2242_v24  ;;  %v2550_v39 = vpack.c.bf16 %v2527_v5, %v2526_v36  ;;  %v10080_v46 = vld [vmem:[#allocation2 + $0xb7] sm:$0xff] }
 0x365   : > { %v2208_v62 = vsel %vm2176_vm10, -1.0, %v12684_v6  ;;  %v12758_v24 = vclamps-f32 %v9948_v25, 1.0  ;;  %v10086_v5 = vld [vmem:[#allocation2 + $0xbf] sm:$0xff]  ;;  %v2528_v25 = vmul.f32 %v9966_v63, %v9585_v52  ;;  %v10100_v36 = vmul.f32 %v9585_v52, %v10080_v46  ;;  %12762 = vst [vmem:[#allocation86_spill] sm:$0xff] %v10106_v38 }
 0x366   : > { %v2240_v61 = vsel %vm2144_vm9, 1.0, %v2208_v62  ;;  %v8093_v40 = vpop.eup %8092  ;;  %v10076_v7 = vmul.f32 %v2085_v59, %v1989_v29  ;;  %7602 = vmatprep.mubr.msk.bf16.mxu1 %vm2247_vm11, %v2550_v39  ;;  %v10104_v39 = vmul.f32 %v10086_v5, %v10010_v1 }
 0x367   : > { %2279 = vst.msk [vmem:[#allocation2 + $0xe0] sm:$0xff] %vm2247_vm11, %v2240_v61  ;;  %v1987_v62 = vmul.f32 0.5, %v12758_v24  ;;  %v2083_v49 = vadd.f32 1.0, %v8093_v40  ;;  %v2529_v61 = vmul.f32 %v9968_v27, %v10010_v1  ;;  %v2575_v40 = vld [vmem:[#allocation2 + $0x80] sm:$0xff]  ;;  %12760 = vst [vmem:[#allocation84_spill] sm:$0xff] %v10100_v36  ;;  %v10118_v1 = vpop.permute.xlu0 %2472  ;;  %v10156_v23 = vpop.permute.xlu1 %3182 }
 0x368   : > { %12757 = vst [vmem:[#allocation82_spill] sm:$0xff] %v10076_v7  ;;  %vm2149_vm12 = vcmp.gt.f32.partialorder %v10076_v7, 0.0  ;;  %vm2181_vm13 = vcmp.lt.f32.partialorder %v10076_v7, 0.0  ;;  %12761 = vst [vmem:[#allocation85_spill] sm:$0xff] %v10104_v39  ;;  %v2577_v7 = vld [vmem:[#allocation2 + $0x90] sm:$0xff]  ;;  %v12773_v39 = vclamps-f32 %v10017_v11, 1.0 }
 0x369   : > { %v2213_v29 = vsel %vm2181_vm13, -1.0, %v12684_v6  ;;  %v10092_v59 = vmul.f32 %v2083_v49, %v1987_v62  ;;  %v2551_v49 = vpack.c.bf16 %v2529_v61, %v2528_v25  ;;  %v2574_v62 = vld [vmem:[#allocation2 + $0x78] sm:$0xff]  ;;  %12764 = vst [vmem:[#allocation88_spill] sm:$0xff] %v10118_v1  ;;  %v10126_v25 = vld [vmem:[#allocation2 + $0xc7] sm:$0xff]  ;;  %12772 = vst [vmem:[#allocation96_spill] sm:$0xff] %v10156_v23 }
 0x36a   : > { %v2245_v24 = vsel %vm2149_vm12, 1.0, %v2213_v29  ;;  %v10116_v8 = vpack.c.bf16 %v2575_v40, %v2574_v62  ;;  %v10148_v62 = vmul.f32 %v9742_v3, %v10112_v56  ;;  %v10172_v11 = vld [vmem:[#allocation2 + $0xd7] sm:$0xff] }
 0x36b   : > { %12759 = vst [vmem:[#allocation83_spill] sm:$0xff] %v10092_v59  ;;  %2284 = vst.msk [vmem:[#allocation2 + $0x108] sm:$0xff] %vm2247_vm11, %v2245_v24  ;;  %vm2147_vm14 = vcmp.gt.f32.partialorder %v10092_v59, 0.0  ;;  %vm2179_vm15 = vcmp.lt.f32.partialorder %v10092_v59, 0.0  ;;  %v10124_v59 = vpack.c.bf16 %v2577_v7, %v2576_v37  ;;  %7603 = vmatmul.mubr.msk.bf16.gmra.mxu1 %vm2247_vm11, %v2551_v49  ;;  %v2531_v37 = vmul.f32 %v9742_v3, %v10050_v30 }
 0x36c   : > { %v2211_v29 = vsel %vm2179_vm15, -1.0, %v12684_v6  ;;  %12763 = vst [vmem:[#allocation87_spill] sm:$0xff] %v10116_v8  ;;  %7565 = vmatmul.mubr.msk.bf16.gmra.mxu0 %vm2247_vm11, %v10116_v8  ;;  %v8095_v7 = vpop.eup %8094  ;;  %12770 = vst [vmem:[#allocation94_spill] sm:$0xff] %v10148_v62  ;;  %v12774_v49 = vclamps-f32 %v10020_v10, 1.0  ;;  %v2532_v30 = vmul.f32 %v9793_v60, %v10080_v46  ;;  %v2535_v62 = vmul.f32 %v9999_v2, %v10112_v56 }
 0x36d   : > { %v2243_v12 = vsel %vm2147_vm14, 1.0, %v2211_v29  ;;  %12767 = vst [vmem:[#allocation91_spill] sm:$0xff] %v10124_v59  ;;  %7568 = vmatprep.mubr.msk.bf16.mxu0 %vm2247_vm11, %v10124_v59  ;;  %v10154_v29 = vmul.f32 %v10126_v25, %v10040_v43  ;;  %v1990_v59 = vmul.f32 0.5, %v12773_v39  ;;  %v2086_v8 = vadd.f32 1.0, %v8095_v7  ;;  %v2578_v7 = vld [vmem:[#allocation2 + $0x98] sm:$0xff] }
 0x36e   : > { %v10120_v52 = vld [vmem:[#allocation2 + $0xd9] sm:$0xff]  ;;  %v10122_v24 = vld [vmem:[#allocation2 + $0xe1] sm:$0xff]  ;;  %2282 = vst.msk [vmem:[#allocation2 + $0xf8] sm:$0xff] %vm2247_vm11, %v2243_v12  ;;  %v2530_v12 = vmul.f32 %v10058_v17, %v10040_v43  ;;  %v10166_v43 = vpop.permute.xlu0 %2487  ;;  %v2533_v39 = vmul.f32 %v10086_v5, %v10078_v47 }
 0x36f   : > { %12765 = vst [vmem:[#allocation89_spill] sm:$0xff] %v10120_v52  ;;  %12766 = vst [vmem:[#allocation90_spill] sm:$0xff] %v10122_v24  ;;  %v10131_v61 = vmul.f32 %v10120_v52, %v9899_v44  ;;  %v10135_v40 = vmul.f32 %v10122_v24, %v9951_v22  ;;  %v8097_v36 = vpop.eup %8096  ;;  %v10160_v24 = vld [vmem:[#allocation2 + $0xdf] sm:$0xff]  ;;  %v10170_v3 = vmul.f32 %v2086_v8, %v1990_v59 }
 0x370   : > { %12771 = vst [vmem:[#allocation95_spill] sm:$0xff] %v10154_v29  ;;  %v2552_v52 = vpack.c.bf16 %v2531_v37, %v2530_v12  ;;  %v2579_v44 = vld [vmem:[#allocation2 + $0xa0] sm:$0xff]  ;;  %12775 = vst [vmem:[#allocation97_spill] sm:$0xff] %v10166_v43  ;;  %v10182_v37 = vmul.f32 %v10160_v24, %v10078_v47  ;;  %v2553_v59 = vpack.c.bf16 %v2533_v39, %v2532_v30  ;;  %v10198_v12 = vpop.permute.xlu1 %2497 }
 0x371   : > { %12768 = vst [vmem:[#allocation92_spill] sm:$0xff] %v10131_v61  ;;  %12769 = vst [vmem:[#allocation93_spill] sm:$0xff] %v10135_v40  ;;  %v1988_v61 = vmul.f32 0.5, %v12774_v49  ;;  %v2084_v40 = vadd.f32 1.0, %v8097_v36  ;;  %v10178_v36 = vld [vmem:[#allocation2 + $0xe9] sm:$0xff]  ;;  %vm2150_vm1 = vcmp.gt.f32.partialorder %v10170_v3, 0.0  ;;  %v10189_v49 = vpack.c.bf16 %v2579_v44, %v2578_v7 }
 0x372   : > { %12776 = vst [vmem:[#allocation98_spill] sm:$0xff] %v10170_v3  ;;  %12778 = vst [vmem:[#allocation100_spill] sm:$0xff] %v10178_v36  ;;  %7606 = vmatprep.mubr.msk.bf16.mxu1 %vm2247_vm11, %v2552_v52  ;;  %vm2182_vm3 = vcmp.lt.f32.partialorder %v10170_v3, 0.0  ;;  %v2581_v52 = vld [vmem:[#allocation2 + $0xb0] sm:$0xff]  ;;  %v10203_v44 = vld [vmem:[#allocation2 + $0xe7] sm:$0xff]  ;;  %v10207_v39 = vmul.f32 %v10178_v36, %v10064_v58  ;;  %v10219_v29 = vpop.permute.xlu0 %2492 }
 0x373   : > { %v10176_v10 = vmul.f32 %v2084_v40, %v1988_v61  ;;  %12779 = vst [vmem:[#allocation101_spill] sm:$0xff] %v10182_v37  ;;  %12781 = vst [vmem:[#allocation103_spill] sm:$0xff] %v10189_v49  ;;  %v2214_v61 = vsel %vm2182_vm3, -1.0, %v12684_v6  ;;  %v10196_v40 = vmul.f32 %v9793_v60, %v10172_v11  ;;  %v10200_v3 = vld [vmem:[#allocation2 + $0xef] sm:$0xff]  ;;  %7607 = vmatmul.mubr.msk.bf16.gmra.mxu1 %vm2247_vm11, %v2553_v59  ;;  %v2583_v59 = vld [vmem:[#allocation2 + $0xc0] sm:$0xff] }
 0x374   : > { %v2246_v22 = vsel %vm2150_vm1, 1.0, %v2214_v61  ;;  %12783 = vst [vmem:[#allocation105_spill] sm:$0xff] %v10200_v3  ;;  %12784 = vst [vmem:[#allocation106_spill] sm:$0xff] %v10207_v39  ;;  %7569 = vmatmul.mubr.msk.bf16.gmra.mxu0 %vm2247_vm11, %v10189_v49  ;;  %v2585_v36 = vld [vmem:[#allocation2 + $0xd0] sm:$0xff]  ;;  %v10246_v37 = vpop.permute.xlu1 %2502  ;;  %v2539_v58 = vmul.f32 %v10200_v3, %v10198_v12 }
 0x375   : > { %12777 = vst [vmem:[#allocation99_spill] sm:$0xff] %v10176_v10  ;;  %v10187_v8 = vld [vmem:[#allocation2 + $0xf1] sm:$0xff]  ;;  %vm2148_vm4 = vcmp.gt.f32.partialorder %v10176_v10, 0.0  ;;  %vm2180_vm5 = vcmp.lt.f32.partialorder %v10176_v10, 0.0  ;;  %12782 = vst [vmem:[#allocation104_spill] sm:$0xff] %v10196_v40  ;;  %v2536_v10 = vmul.f32 %v10030_v13, %v10172_v11  ;;  %v10238_v40 = vmul.f32 %v10203_v44, %v10118_v1 }
 0x376   : > { %12780 = vst [vmem:[#allocation102_spill] sm:$0xff] %v10187_v8  ;;  %v2212_v30 = vsel %vm2180_vm5, -1.0, %v12684_v6  ;;  %v10211_v7 = vmul.f32 %v10187_v8, %v9287_v4  ;;  %2285 = vst.msk [vmem:[#allocation2 + $0x110] sm:$0xff] %vm2247_vm11, %v2246_v22  ;;  %v2580_v6 = vld [vmem:[#allocation2 + $0xa8] sm:$0xff]  ;;  %v2534_v22 = vmul.f32 %v10126_v25, %v10118_v1  ;;  %v2538_v1 = vmul.f32 %v10203_v44, %v10219_v29 }
 0x377   : > { %v2244_v61 = vsel %vm2148_vm4, 1.0, %v2212_v30  ;;  %12786 = vst [vmem:[#allocation108_spill] sm:$0xff] %v10219_v29  ;;  %v10226_v49 = vpack.c.bf16 %v2581_v52, %v2580_v6  ;;  %v10232_v30 = vmul.f32 %v10200_v3, %v9999_v2  ;;  %12789 = vst [vmem:[#allocation111_spill] sm:$0xff] %v10238_v40  ;;  %v2582_v52 = vld [vmem:[#allocation2 + $0xb8] sm:$0xff]  ;;  %v2584_v4 = vld [vmem:[#allocation2 + $0xc8] sm:$0xff] }
 0x378   : > { %12785 = vst [vmem:[#allocation107_spill] sm:$0xff] %v10211_v7  ;;  %2283 = vst.msk [vmem:[#allocation2 + $0x100] sm:$0xff] %vm2247_vm11, %v2244_v61  ;;  %v2537_v61 = vmul.f32 %v10160_v24, %v10166_v43  ;;  %v2554_v6 = vpack.c.bf16 %v2535_v62, %v2534_v22  ;;  %v10248_v8 = vpack.c.bf16 %v2583_v59, %v2582_v52  ;;  %v10255_v62 = vld [vmem:[#allocation2 + $0xf7] sm:$0xff]  ;;  %v2587_v52 = vld [vmem:[#allocation2 + $0xe0] sm:$0xff] }
 0x379   : > { %12787 = vst [vmem:[#allocation109_spill] sm:$0xff] %v10226_v49  ;;  %12788 = vst [vmem:[#allocation110_spill] sm:$0xff] %v10232_v30  ;;  %7572 = vmatprep.mubr.msk.bf16.mxu0 %vm2247_vm11, %v10226_v49  ;;  %v10257_v22 = vpack.c.bf16 %v2585_v36, %v2584_v4  ;;  %v10259_v49 = vpop.permute.xlu0 %2507  ;;  %v2556_v59 = vpack.c.bf16 %v2539_v58, %v2538_v1  ;;  %v10278_v4 = vmul.f32 %v10255_v62, %v10030_v13 }
 0x37a   : > { %v2555_v7 = vpack.c.bf16 %v2537_v61, %v2536_v10  ;;  %12790 = vst [vmem:[#allocation112_spill] sm:$0xff] %v10246_v37  ;;  %12791 = vst [vmem:[#allocation113_spill] sm:$0xff] %v10248_v8  ;;  %7610 = vmatprep.mubr.msk.bf16.mxu1 %vm2247_vm11, %v2554_v6 }
 0x37b   : > { %12792 = vst [vmem:[#allocation114_spill] sm:$0xff] %v10255_v62  ;;  %12793 = vst [vmem:[#allocation115_spill] sm:$0xff] %v10257_v22 }
 0x37c   : > { %12794 = vst [vmem:[#allocation116_spill] sm:$0xff] %v10259_v49  ;;  %7573 = vmatmul.mubr.msk.bf16.gmra.mxu0 %vm2247_vm11, %v10248_v8  ;;  %7611 = vmatmul.mubr.msk.bf16.gmra.mxu1 %vm2247_vm11, %v2555_v7  ;;  %12799 = vst [vmem:[#allocation121_spill] sm:$0xff] %v10278_v4 }
 0x37d   : > { %v10261_v10 = vld [vmem:[#allocation2 + $0x10f] sm:$0xff]  ;;  %7576 = vmatprep.mubr.msk.bf16.mxu0 %vm2247_vm11, %v10257_v22  ;;  %7614 = vmatprep.mubr.msk.bf16.mxu1 %vm2247_vm11, %v2556_v59  ;;  %v2540_v22 = vmul.f32 %v10255_v62, %v10246_v37  ;;  %v10323_v3 = vpop.permute.xlu0 %3190 }
 0x37e   : > { %12795 = vst [vmem:[#allocation117_spill] sm:$0xff] %v10261_v10  ;;  %v10265_v61 = vld [vmem:[#allocation2 + $0x109] sm:$0xff]  ;;  %v10297_v30 = vmul.f32 %v10261_v10, %v10198_v12 }
 0x37f   : > { %12796 = vst [vmem:[#allocation118_spill] sm:$0xff] %v10265_v61  ;;  %v10268_v39 = vld [vmem:[#allocation2 + $0xf9] sm:$0xff]  ;;  %v10270_v6 = vld [vmem:[#allocation2 + $0x101] sm:$0xff]  ;;  %v2589_v62 = vld [vmem:[#allocation2 + $0xf0] sm:$0xff] }
 0x380   : > { %12797 = vst [vmem:[#allocation119_spill] sm:$0xff] %v10268_v39  ;;  %12798 = vst [vmem:[#allocation120_spill] sm:$0xff] %v10270_v6  ;;  %v10272_v40 = vld [vmem:[#allocation2 + $0xff] sm:$0xff]  ;;  %v10282_v1 = vmul.f32 %v10268_v39, %v10106_v38  ;;  %v10286_v58 = vmul.f32 %v10270_v6, %v10156_v23  ;;  %v10292_v7 = vld [vmem:[#allocation2 + $0x107] sm:$0xff]  ;;  %v10305_v6 = vpop.permute.xlu1 %3186 }
 0x381   : > { %v10290_v36 = vmul.f32 %v10272_v40, %v10166_v43  ;;  %12803 = vst [vmem:[#allocation125_spill] sm:$0xff] %v10292_v7  ;;  %12804 = vst [vmem:[#allocation126_spill] sm:$0xff] %v10297_v30  ;;  %v10303_v8 = vmul.f32 %v10292_v7, %v10219_v29  ;;  %v2541_v39 = vmul.f32 %v10272_v40, %v10259_v49  ;;  %v2586_v23 = vld [vmem:[#allocation2 + $0xd8] sm:$0xff]  ;;  %v2588_v43 = vld [vmem:[#allocation2 + $0xe8] sm:$0xff] }
 0x382   : > { %12800 = vst [vmem:[#allocation122_spill] sm:$0xff] %v10282_v1  ;;  %12801 = vst [vmem:[#allocation123_spill] sm:$0xff] %v10286_v58  ;;  %v10309_v38 = vld [vmem:[#allocation2 + $0x111] sm:$0xff]  ;;  %v10317_v37 = vmul.f32 %v10265_v61, %v10305_v6  ;;  %v10319_v7 = vpack.c.bf16 %v2587_v52, %v2586_v23  ;;  %v10329_v1 = vpack.c.bf16 %v2589_v62, %v2588_v43  ;;  %v3501_v29 = vld [vmem:[#allocation2 + $0x27] sm:$0xff] }
 0x383   : > { %12802 = vst [vmem:[#allocation124_spill] sm:$0xff] %v10290_v36  ;;  %12805 = vst [vmem:[#allocation127_spill] sm:$0xff] %v10303_v8  ;;  %v2557_v49 = vpack.c.bf16 %v2541_v39, %v2540_v22  ;;  %v10327_v59 = vmul.f32 %v10309_v38, %v10323_v3  ;;  %v3042_v52 = vld [vmem:[#allocation2 + $0x11] sm:$0xff]  ;;  %v2591_v39 = vld [vmem:[#allocation2 + $0x100] sm:$0xff]  ;;  %v3531_v22 = vmul.f32 %v9307_v48, %v9767_v33 }
 0x384   : > { %12806 = vst [vmem:[#allocation128_spill] sm:$0xff] %v10305_v6  ;;  %12807 = vst [vmem:[#allocation129_spill] sm:$0xff] %v10309_v38  ;;  %7577 = vmatmul.mubr.msk.bf16.gmra.mxu0 %vm2247_vm11, %v10319_v7  ;;  %v3532_v43 = vmul.f32 %v9293_v18, %v9774_v45  ;;  %v3502_v62 = vld [vmem:[#allocation2 + $0x2f] sm:$0xff]  ;;  %v2590_v58 = vld [vmem:[#allocation2 + $0xf8] sm:$0xff]  ;;  %v3202_v8 = vmul.f32 %v9331_v50, %v3042_v52 }
 0x385   : > { %12808 = vst [vmem:[#allocation130_spill] sm:$0xff] %v10317_v37  ;;  %12809 = vst [vmem:[#allocation131_spill] sm:$0xff] %v10319_v7  ;;  %7615 = vmatmul.mubr.msk.bf16.gmra.mxu1 %vm2247_vm11, %v2557_v49  ;;  %7580 = vmatprep.mubr.msk.bf16.mxu0 %vm2247_vm11, %v10329_v1  ;;  %v3041_v10 = vld [vmem:[#allocation2 + $0x9] sm:$0xff]  ;;  %v3533_v37 = vmul.f32 %v3501_v29, %v9322_v35  ;;  %v10344_v49 = vpack.c.bf16 %v2591_v39, %v2590_v58  ;;  %v10349_v36 = vld [vmem:[#allocation2 + $0x19] sm:$0xff] }
 0x386   : > { %12810 = vst [vmem:[#allocation132_spill] sm:$0xff] %v10327_v59  ;;  %12811 = vst [vmem:[#allocation133_spill] sm:$0xff] %v10329_v1  ;;  %v3563_v23 = vpack.c.bf16 %v3532_v43, %v3531_v22  ;;  %v3534_v59 = vmul.f32 %v3502_v62, %v9324_v20  ;;  %v3201_v30 = vmul.f32 %v9326_v34, %v3041_v10  ;;  %v10351_v45 = vld [vmem:[#allocation2 + $0x21] sm:$0xff]  ;;  %v10355_v52 = vld [vmem:[#allocation2 + $0x31] sm:$0xff] }
 0x387   : > { %12812 = vst [vmem:[#allocation134_spill] sm:$0xff] %v10344_v49  ;;  %v12813_v10 = vpack.c.bf16 %v9630_v21, %v9623_v28  ;;  %v10372_v58 = vld [vmem:[#allocation2 + $0x29] sm:$0xff]  ;;  %v3206_v28 = vmul.f32 %v9165_v55, %v10355_v52  ;;  %v10384_v39 = vld [vmem:[#allocation2 + $0x51] sm:$0xff]  ;;  %v10408_v35 = vld [vmem:[#allocation2 + $0x61] sm:$0xff] }
 0x388   : > { %7654 = vmatprep.mubr.msk.bf16.mxu1 %vm2247_vm11, %v3563_v23  ;;  %v3564_v33 = vpack.c.bf16 %v3534_v59, %v3533_v37  ;;  %v3233_v4 = vpack.c.bf16 %v3202_v8, %v3201_v30  ;;  %v10366_v37 = vld [vmem:[%s12378_s7 + $0x38] sm:$0xff]   ;;  %v3203_v8 = vmul.f32 %v9333_v42, %v10349_v36  ;;  %v3204_v30 = vmul.f32 %v9336_v19, %v10351_v45  ;;  %v10382_v59 = vld [vmem:[#allocation2 + $0x41] sm:$0xff]  ;;  %v10389_v22 = vld [vmem:[%s12378_s7 + $0x30] sm:$0xff]  }
 0x389   : > { %12814 = vst [vmem:[#allocation135_spill] sm:$0xff] %v10366_v37  ;;  %12815 = vst [vmem:[#allocation136_spill] sm:$0xff] %v10372_v58  ;;  %v3205_v21 = vmul.f32 %v9342_v9, %v10372_v58  ;;  %v12825_v20 = vld [vmem:[#allocation50_spill] sm:$0xff]  ;;  %v10414_v38 = vld [vmem:[#allocation2 + $0x71] sm:$0xff] }
 0x38a   : > { %12816 = vst [vmem:[#allocation137_spill] sm:$0xff] %v10382_v59  ;;  %v3234_v23 = vpack.c.bf16 %v3204_v30, %v3203_v8  ;;  %12817 = vst [vmem:[#allocation138_spill] sm:$0xff] %v10384_v39  ;;  %v12820_v8 = vpack.c.bf16 %v9713_v57, %v9695_v41  ;;  %v12821_v30 = vld [vmem:[#allocation48_spill] sm:$0xff]  ;;  %v12828_v41 = vld [vmem:[#allocation14_spill] sm:$0xff] }
 0x38b   : > { %12818 = vst [vmem:[#allocation139_spill] sm:$0xff] %v10389_v22  ;;  %v12833_v6 = vld [vmem:[#allocation7_spill] sm:$0xff] }
 0x38c   : > { %7581 = vmatmul.mubr.msk.bf16.gmra.mxu0 %vm2247_vm11, %v10344_v49  ;;  %v12826_v49 = vld [vmem:[#allocation51_spill] sm:$0xff] }
 0x38d   : > { %7655 = vmatmul.mubr.msk.bf16.vlgmr.msra.gmra.mxu1 %vm2247_vm11, %v3564_v33  ;;  %7620 = vmatprep.mubr.msk.bf16.mxu0 %vm2247_vm11, %v3233_v4  ;;  %v10380_v4 = vld [vmem:[#allocation2 + $0x39] sm:$0xff]  ;;  %v3208_v33 = vmul.f32 %v9352_v15, %v10382_v59  ;;  %v12827_v1 = vpack.c.bf16 %v12825_v20, %v12826_v49  ;;  %v12831_v20 = vld [vmem:[#allocation15_spill] sm:$0xff] }
 0x38e   : > { %7658 = vmatprep.mubr.msk.bf16.mxu1 %vm2247_vm11, %v12813_v10  ;;  %7721 = vmatpush3.bf16.msra.mxu1 %v9941_v26  ;;  %v3235_v26 = vpack.c.bf16 %v3206_v28, %v3205_v21  ;;  %v3207_v43 = vmul.f32 %v9349_v53, %v10380_v4  ;;  %v10396_v10 = vld [vmem:[#allocation2 + $0x49] sm:$0xff]  ;;  %v12832_v49 = vld [vmem:[#allocation16_spill] sm:$0xff] }
 0x38f   : > { %7788 = vmatprep.subr.bf16.mxu1 %v10366_v37  ;;  %12819 = vst [vmem:[#allocation140_spill] sm:$0xff] %v10396_v10  ;;  %v12822_v28 = vld [vmem:[#allocation6_spill] sm:$0xff]  ;;  %v3209_v57 = vmul.f32 %v12828_v41, %v10396_v10  ;;  %v3212_v7 = vmul.f32 %v12832_v49, %v10408_v35 }
 0x390   : > { %v3210_v21 = vmul.f32 %v12822_v28, %v10384_v39  ;;  %12824 = vst [vmem:[#allocation6_spill] sm:$0xff] %v10408_v35  ;;  %v3236_v61 = vpack.c.bf16 %v3208_v33, %v3207_v43  ;;  %v10451_v43 = vmul.f32 %v9333_v42, %v10380_v4  ;;  %v10455_v33 = vmul.f32 %v9336_v19, %v10382_v59 }
 0x391   : > { %v12845_v59 = vpack.c.bf16 %v9828_v51, %v9809_v0  ;;  %v12848_v0 = vpack.c.bf16 %v9895_v54, %v9904_v16  ;;  %v12850_v54 = vld [vmem:[#allocation21_spill] sm:$0xff] }
 0x392   : > { %v3237_v37 = vpack.c.bf16 %v3210_v21, %v3209_v57  ;;  %12836 = vst [vmem:[#allocation141_spill] sm:$0xff] %v10451_v43  ;;  %12837 = vst [vmem:[#allocation142_spill] sm:$0xff] %v10455_v33  ;;  %v10459_v21 = vmul.f32 %v9342_v9, %v10396_v10  ;;  %v10461_v57 = vld [vmem:[#allocation2 + $0x91] sm:$0xff]  ;;  %v3547_v33 = vmul.f32 %v9966_v63, %v9970_v31  ;;  %v3057_v31 = vld [vmem:[#allocation2 + $0x89] sm:$0xff] }
 0x393   : > { %v12863_v63 = vld [vmem:[#allocation32_spill] sm:$0xff] }
 0x394   : > { %7621 = vmatmul.mubr.msk.bf16.vlgmr.msra.gmra.mxu0 %vm2247_vm11, %v3234_v23  ;;  %v10406_v23 = vld [vmem:[#allocation2 + $0x59] sm:$0xff]  ;;  %12838 = vst [vmem:[#allocation143_spill] sm:$0xff] %v10459_v21 }
 0x395   : > { %7659 = vmatmul.mubr.msk.bf16.gmra.mxu1 %vm2247_vm11, %v12820_v8  ;;  %7687 = vmatpush3.bf16.msra.mxu0 %v12821_v30  ;;  %12823 = vst [vmem:[#allocation48_spill] sm:$0xff] %v10406_v23  ;;  %v10423_v8 = vmul.f32 %v3502_v62, %v9293_v18  ;;  %v3548_v30 = vmul.f32 %v9968_v27, %v9555_v32  ;;  %v10441_v32 = vld [vmem:[#allocation2 + $0x79] sm:$0xff]  ;;  %v10443_v27 = vld [vmem:[#allocation2 + $0x81] sm:$0xff]  ;;  %v10463_v18 = vld [vmem:[#allocation2 + $0x89] sm:$0xff] }
 0x396   : > { %7624 = vmatprep.mubr.msk.bf16.mxu0 %vm2247_vm11, %v3235_v26  ;;  %7662 = vmatprep.mubr.msk.bf16.mxu1 %vm2247_vm11, %v12827_v1  ;;  %v10420_v26 = vmul.f32 %v3501_v29, %v9307_v48  ;;  %v3211_v1 = vmul.f32 %v12831_v20, %v10406_v23  ;;  %v3214_v48 = vmul.f32 %v12833_v6, %v10414_v38 }
 0x397   : > { %7754 = vmatprep.subr.bf16.mxu0 %v10389_v22  ;;  %12830 = vst [vmem:[#allocation51_spill] sm:$0xff] %v10423_v8  ;;  %v10431_v22 = vld [vmem:[#allocation2 + $0x69] sm:$0xff]  ;;  %v10439_v29 = vmul.f32 %v9326_v34, %v10372_v58  ;;  %v10447_v62 = vmul.f32 %v9331_v50, %v10355_v52  ;;  %12839 = vst [vmem:[#allocation144_spill] sm:$0xff] %v10463_v18  ;;  %v10469_v8 = vmul.f32 %v9165_v55, %v10384_v39  ;;  %v10488_v39 = vld [vmem:[#allocation2 + $0x99] sm:$0xff] }
 0x398   : > { %12829 = vst [vmem:[#allocation50_spill] sm:$0xff] %v10420_v26  ;;  %v10465_v26 = vld [vmem:[#allocation2 + $0xa9] sm:$0xff]  ;;  %v10473_v42 = vmul.f32 %v9349_v53, %v10406_v23  ;;  %v10477_v58 = vmul.f32 %v9352_v15, %v10408_v35  ;;  %v10481_v10 = vmul.f32 %v12828_v41, %v10431_v22  ;;  %v10490_v55 = vld [vmem:[#allocation2 + $0xa1] sm:$0xff]  ;;  %v10492_v23 = vld [vmem:[#allocation2 + $0xb1] sm:$0xff]  ;;  %v10513_v41 = vmul.f32 %v12831_v20, %v10441_v32 }
 0x399   : > { %12834 = vst [vmem:[#allocation16_spill] sm:$0xff] %v10439_v29  ;;  %12835 = vst [vmem:[#allocation7_spill] sm:$0xff] %v10447_v62  ;;  %v10523_v16 = vmul.f32 %v10463_v18, %v12850_v54  ;;  %v12857_v35 = vld [vmem:[#allocation35_spill] sm:$0xff]  ;;  %v3213_v29 = vmul.f32 %v12850_v54, %v10431_v22  ;;  %v3571_v18 = vpack.c.bf16 %v3548_v30, %v3547_v33 }
 0x39a   : > { %12840 = vst [vmem:[#allocation145_spill] sm:$0xff] %v10465_v26  ;;  %12841 = vst [vmem:[#allocation146_spill] sm:$0xff] %v10469_v8  ;;  %v12861_v8 = vld [vmem:[#allocation67_spill] sm:$0xff]  ;;  %v3549_v62 = vmul.f32 %v10058_v17, %v12863_v63 }
 0x39b   : > { %12842 = vst [vmem:[#allocation147_spill] sm:$0xff] %v10473_v42  ;;  %12843 = vst [vmem:[#allocation148_spill] sm:$0xff] %v10477_v58  ;;  %v12855_v42 = vld [vmem:[#allocation27_spill] sm:$0xff]  ;;  %v3239_v20 = vpack.c.bf16 %v3214_v48, %v3213_v29  ;;  %v12862_v43 = vpack.c.bf16 %v9984_v14, %v12861_v8  ;;  %v12865_v8 = vld [vmem:[#allocation78_spill] sm:$0xff] }
 0x39c   : > { %12844 = vst [vmem:[#allocation149_spill] sm:$0xff] %v10481_v10  ;;  %7625 = vmatmul.mubr.msk.bf16.gmra.mxu0 %vm2247_vm11, %v3236_v61  ;;  %12846 = vst [vmem:[#allocation150_spill] sm:$0xff] %v10492_v23  ;;  %v10500_v61 = vmul.f32 %v12822_v28, %v10414_v38  ;;  %v10535_v58 = vmul.f32 %v12855_v42, %v10490_v55  ;;  %v10539_v10 = vmul.f32 %v10465_v26, %v12857_v35  ;;  %v12867_v29 = vld [vmem:[#allocation76_spill] sm:$0xff] }
 0x39d   : > { %7663 = vmatmul.mubr.msk.bf16.gmra.mxu1 %vm2247_vm11, %v12845_v59  ;;  %7628 = vmatprep.mubr.msk.bf16.mxu0 %vm2247_vm11, %v3237_v37  ;;  %12849 = vst [vmem:[#allocation152_spill] sm:$0xff] %v10513_v41  ;;  %v10519_v37 = vmul.f32 %v12832_v49, %v10443_v27  ;;  %12851 = vst [vmem:[#allocation21_spill] sm:$0xff] %v10523_v16  ;;  %v12853_v59 = vld [vmem:[#allocation24_spill] sm:$0xff]  ;;  %v3216_v30 = vmul.f32 %v12855_v42, %v10443_v27 }
 0x39e   : > { %12847 = vst [vmem:[#allocation151_spill] sm:$0xff] %v10500_v61  ;;  %7666 = vmatprep.mubr.msk.bf16.mxu1 %vm2247_vm11, %v12848_v0  ;;  %v10527_v0 = vmul.f32 %v12833_v6, %v10461_v57  ;;  %v10531_v51 = vmul.f32 %v12853_v59, %v10488_v39  ;;  %12856 = vst [vmem:[#allocation27_spill] sm:$0xff] %v10535_v58  ;;  %v12859_v61 = vld [vmem:[#allocation8_spill] sm:$0xff]  ;;  %v3551_v17 = vmul.f32 %v12867_v29, %v10080_v46 }
 0x39f   : > { %12858 = vst [vmem:[#allocation35_spill] sm:$0xff] %v10539_v10  ;;  %v10543_v21 = vmul.f32 %v10492_v23, %v12859_v61  ;;  %v3238_v23 = vpack.c.bf16 %v3212_v7, %v3211_v1  ;;  %v3215_v7 = vmul.f32 %v12853_v59, %v10441_v32  ;;  %v3218_v14 = vmul.f32 %v12859_v61, %v10461_v57  ;;  %v3062_v10 = vld [vmem:[#allocation2 + $0xb1] sm:$0xff] }
 0x3a0   : > { %12852 = vst [vmem:[#allocation153_spill] sm:$0xff] %v10527_v0  ;;  %12854 = vst [vmem:[#allocation24_spill] sm:$0xff] %v10531_v51  ;;  %v12885_v51 = vld [vmem:[#allocation112_spill] sm:$0xff] }
 0x3a1   : > { %12860 = vst [vmem:[#allocation8_spill] sm:$0xff] %v10543_v21  ;;  %v3240_v33 = vpack.c.bf16 %v3216_v30, %v3215_v7  ;;  %v12870_v30 = vld [vmem:[#allocation9_spill] sm:$0xff] }
 0x3a4   : > { %7629 = vmatmul.mubr.msk.bf16.gmra.mxu0 %vm2247_vm11, %v3238_v23  ;;  %v12864_v23 = vld [vmem:[#allocation49_spill] sm:$0xff] }
 0x3a5   : > { %7667 = vmatmul.mubr.msk.bf16.gmra.mxu1 %vm2247_vm11, %v12862_v43  ;;  %7632 = vmatprep.mubr.msk.bf16.mxu0 %vm2247_vm11, %v3239_v20  ;;  %v3552_v1 = vmul.f32 %v10086_v5, %v12864_v23  ;;  %v12866_v20 = vld [vmem:[#allocation73_spill] sm:$0xff]  ;;  %v3061_v5 = vld [vmem:[#allocation2 + $0xa9] sm:$0xff]  ;;  %v12868_v23 = vld [vmem:[#allocation40_spill] sm:$0xff] }
 0x3a6   : > { %7670 = vmatprep.mubr.msk.bf16.mxu1 %vm2247_vm11, %v3571_v18  ;;  %v3550_v48 = vmul.f32 %v12866_v20, %v12865_v8  ;;  %v3217_v18 = vmul.f32 %v12857_v35, %v3057_v31  ;;  %v3553_v31 = vmul.f32 %v10126_v25, %v9793_v60  ;;  %v3219_v46 = vmul.f32 %v12868_v23, %v10488_v39  ;;  %v12871_v8 = vld [vmem:[#allocation58_spill] sm:$0xff] }
 0x3a7   : > { %v3573_v63 = vpack.c.bf16 %v3552_v1, %v3551_v17  ;;  %v3222_v1 = vmul.f32 %v12870_v30, %v3062_v10  ;;  %v3221_v20 = vmul.f32 %v12871_v8, %v3061_v5  ;;  %v10597_v17 = vld [vmem:[#allocation2 + $0xb9] sm:$0xff]  ;;  %v10601_v10 = vld [vmem:[#allocation2 + $0xd1] sm:$0xff]  ;;  %v12875_v5 = vld [vmem:[#allocation10_spill] sm:$0xff] }
 0x3a8   : > { %v3572_v43 = vpack.c.bf16 %v3550_v48, %v3549_v62  ;;  %v3241_v26 = vpack.c.bf16 %v3218_v14, %v3217_v18  ;;  %v12869_v62 = vld [vmem:[#allocation43_spill] sm:$0xff]  ;;  %v3556_v14 = vmul.f32 %v10160_v24, %v9999_v2  ;;  %v12872_v48 = vld [vmem:[#allocation88_spill] sm:$0xff]  ;;  %v12874_v24 = vld [vmem:[#allocation66_spill] sm:$0xff] }
 0x3a9   : > { %v3220_v7 = vmul.f32 %v12869_v62, %v10490_v55  ;;  %v3555_v18 = vmul.f32 %v12872_v48, %v10172_v11  ;;  %v3243_v29 = vpack.c.bf16 %v3222_v1, %v3221_v20  ;;  %v10607_v2 = vld [vmem:[#allocation2 + $0xc9] sm:$0xff]  ;;  %v12877_v1 = vld [vmem:[#allocation105_spill] sm:$0xff]  ;;  %v12879_v48 = vld [vmem:[#allocation108_spill] sm:$0xff] }
 0x3ab   : > { %v3242_v25 = vpack.c.bf16 %v3220_v7, %v3219_v46  ;;  %v3560_v46 = vmul.f32 %v10272_v40, %v10198_v12  ;;  %v12876_v7 = vld [vmem:[#allocation97_spill] sm:$0xff] }
 0x3ac   : > { %7633 = vmatmul.mubr.msk.bf16.gmra.mxu0 %vm2247_vm11, %v3240_v33  ;;  %v3575_v33 = vpack.c.bf16 %v3556_v14, %v3555_v18  ;;  %v3558_v14 = vmul.f32 %v12877_v1, %v12876_v7  ;;  %v12880_v18 = vld [vmem:[#allocation114_spill] sm:$0xff]  ;;  %v12882_v40 = vld [vmem:[#allocation89_spill] sm:$0xff] }
 0x3ad   : > { %7671 = vmatmul.mubr.msk.bf16.gmra.mxu1 %vm2247_vm11, %v3572_v43  ;;  %7636 = vmatprep.mubr.msk.bf16.mxu0 %vm2247_vm11, %v3241_v26  ;;  %v3554_v26 = vmul.f32 %v10078_v47, %v10112_v56  ;;  %v10599_v43 = vld [vmem:[#allocation2 + $0xc1] sm:$0xff] }
 0x3ae   : > { %7674 = vmatprep.mubr.msk.bf16.mxu1 %vm2247_vm11, %v3573_v63  ;;  %v12873_v56 = vld [vmem:[#allocation61_spill] sm:$0xff]  ;;  %v3224_v11 = vmul.f32 %v10599_v43, %v12874_v24  ;;  %v3557_v63 = vmul.f32 %v10203_v44, %v10030_v13  ;;  %v12881_v13 = vld [vmem:[#allocation86_spill] sm:$0xff]  ;;  %v12883_v44 = vld [vmem:[#allocation96_spill] sm:$0xff] }
 0x3af   : > { %v3574_v60 = vpack.c.bf16 %v3554_v26, %v3553_v31  ;;  %v3223_v47 = vmul.f32 %v10597_v17, %v12873_v56  ;;  %v3226_v31 = vmul.f32 %v10601_v10, %v12875_v5  ;;  %v12878_v26 = vld [vmem:[#allocation79_spill] sm:$0xff]  ;;  %v3227_v12 = vmul.f32 %v12882_v40, %v12881_v13  ;;  %v12884_v7 = vld [vmem:[#allocation90_spill] sm:$0xff] }
 0x3b0   : > { %v3225_v20 = vmul.f32 %v10607_v2, %v12878_v26  ;;  %v3228_v1 = vmul.f32 %v12884_v7, %v12883_v44 }
 0x3b4   : > { %7637 = vmatmul.mubr.msk.bf16.gmra.mxu0 %vm2247_vm11, %v3242_v25  ;;  %v3244_v25 = vpack.c.bf16 %v3224_v11, %v3223_v47  ;;  %v10635_v11 = vpop.permute.xlu1 %3194 }
 0x3b5   : > { %7675 = vmatmul.mubr.msk.bf16.gmra.mxu1 %vm2247_vm11, %v3574_v60  ;;  %7640 = vmatprep.mubr.msk.bf16.mxu0 %vm2247_vm11, %v3243_v29  ;;  %v3559_v60 = vmul.f32 %v12880_v18, %v12879_v48  ;;  %v3576_v29 = vpack.c.bf16 %v3558_v14, %v3557_v63  ;;  %v12886_v48 = vld [vmem:[#allocation125_spill] sm:$0xff]  ;;  %v12887_v63 = vld [vmem:[#allocation102_spill] sm:$0xff]  ;;  %v12888_v14 = vld [vmem:[#allocation116_spill] sm:$0xff] }
 0x3b6   : > { %7678 = vmatprep.mubr.msk.bf16.mxu1 %vm2247_vm11, %v3575_v33  ;;  %v3245_v33 = vpack.c.bf16 %v3226_v31, %v3225_v20  ;;  %v3561_v47 = vmul.f32 %v12886_v48, %v12885_v51  ;;  %v3230_v31 = vmul.f32 %v12887_v63, %v10323_v3  ;;  %v12889_v20 = vld [vmem:[#allocation117_spill] sm:$0xff] }
 0x3b7   : > { %v3577_v21 = vpack.c.bf16 %v3560_v46, %v3559_v60  ;;  %v4159_v46 = vmul.f32 %v9326_v34, %v10349_v36  ;;  %v3562_v18 = vmul.f32 %v12889_v20, %v12888_v14  ;;  %v12890_v60 = vld [vmem:[#allocation128_spill] sm:$0xff]  ;;  %v12892_v34 = vld [vmem:[#allocation119_spill] sm:$0xff]  ;;  %v12897_v20 = vld [vmem:[#allocation13_spill] sm:$0xff] }
 0x3b8   : > { %v10649_v0 = vpop.permute.xlu1 %3198  ;;  %v12893_v36 = vld [vmem:[#allocation120_spill] sm:$0xff] }
 0x3b9   : > { %v3578_v58 = vpack.c.bf16 %v3562_v18, %v3561_v47  ;;  %v12894_v47 = vld [vmem:[#allocation137_spill] sm:$0xff] }
 0x3bc   : > { %7641 = vmatmul.mubr.msk.bf16.gmra.mxu0 %vm2247_vm11, %v3244_v25  ;;  %v12891_v25 = vld [vmem:[#allocation100_spill] sm:$0xff] }
 0x3bd   : > { %7679 = vmatmul.mubr.msk.bf16.gmra.mxu1 %vm2247_vm11, %v3576_v29  ;;  %7644 = vmatprep.mubr.msk.bf16.mxu0 %vm2247_vm11, %v3245_v33  ;;  %v3229_v29 = vmul.f32 %v12891_v25, %v12890_v60  ;;  %v3246_v33 = vpack.c.bf16 %v3228_v1, %v3227_v12  ;;  %v4162_v12 = vmul.f32 %v9336_v19, %v10355_v52  ;;  %v12898_v19 = vld [vmem:[#allocation138_spill] sm:$0xff]  ;;  %v12899_v52 = vld [vmem:[#allocation135_spill] sm:$0xff] }
 0x3be   : > { %7682 = vmatprep.mubr.msk.bf16.mxu1 %vm2247_vm11, %v3577_v21  ;;  %v4160_v21 = vmul.f32 %v9331_v50, %v10351_v45  ;;  %v3231_v50 = vmul.f32 %v12892_v34, %v10635_v11  ;;  %v3232_v45 = vmul.f32 %v12893_v36, %v10649_v0  ;;  %v4163_v1 = vmul.f32 %v9342_v9, %v10380_v4  ;;  %v3832_v4 = vld [vmem:[#allocation2 + $0x30] sm:$0xff] }
 0x3bf   : > { %v3247_v48 = vpack.c.bf16 %v3230_v31, %v3229_v29  ;;  %v3829_v29 = vld [vmem:[#allocation2 + $0x18] sm:$0xff]  ;;  %v4166_v9 = vmul.f32 %v9352_v15, %v12898_v19  ;;  %v10683_v15 = vld [vmem:[%s12378_s7 + $0x40] sm:$0xff]  }
 0x3c0   : > { %v4191_v16 = vpack.c.bf16 %v4160_v21, %v4159_v46  ;;  %v3830_v46 = vld [vmem:[#allocation2 + $0x20] sm:$0xff]  ;;  %v12896_v21 = vld [vmem:[#allocation136_spill] sm:$0xff] }
 0x3c1   : > { %v4161_v18 = vmul.f32 %v12897_v20, %v12896_v21 }
 0x3c4   : > { %7645 = vmatmul.mubr.msk.bf16.gmra.mxu0 %vm2247_vm11, %v3246_v33  ;;  %v4192_v33 = vpack.c.bf16 %v4162_v12, %v4161_v18  ;;  %v12902_v12 = vld [vmem:[#allocation14_spill] sm:$0xff]  ;;  %v12905_v18 = vld [vmem:[#allocation59_spill] sm:$0xff] }
 0x3c5   : > { %7683 = vmatmul.mubr.msk.bf16.gmra.mxu1 %vm2247_vm11, %v3578_v58  ;;  %7648 = vmatprep.mubr.msk.bf16.mxu0 %vm2247_vm11, %v3247_v48  ;;  %v12895_v58 = vld [vmem:[#allocation5_spill] sm:$0xff]  ;;  %v3861_v48 = vpack.c.bf16 %v3830_v46, %v3829_v29  ;;  %v3831_v46 = vld [vmem:[#allocation2 + $0x28] sm:$0xff]  ;;  %v4172_v29 = vmul.f32 %v12833_v6, %v10443_v27  ;;  %v4175_v6 = vmul.f32 %v12857_v35, %v10488_v39 }
 0x3c6   : > { %7722 = vmatprep.mubr.msk.bf16.mxu1 %vm2247_vm11, %v4191_v16  ;;  %v4164_v31 = vmul.f32 %v12895_v58, %v12894_v47  ;;  %v3248_v16 = vpack.c.bf16 %v3232_v45, %v3231_v50  ;;  %v12900_v47 = vld [vmem:[#allocation140_spill] sm:$0xff]  ;;  %v12903_v58 = vld [vmem:[#allocation6_spill] sm:$0xff]  ;;  %v10678_v21 = vpack.c.bf16 %v3832_v4, %v3831_v46  ;;  %v4180_v39 = vmul.f32 %v10599_v43, %v12870_v30 }
 0x3c7   : > { %v4165_v50 = vmul.f32 %v9349_v53, %v12900_v47  ;;  %v12901_v45 = vld [vmem:[#allocation48_spill] sm:$0xff]  ;;  %v12910_v47 = vld [vmem:[#allocation74_spill] sm:$0xff]  ;;  %v4183_v43 = vmul.f32 %v12882_v40, %v12878_v26 }
 0x3c8   : > { %v4193_v41 = vpack.c.bf16 %v4164_v31, %v4163_v1  ;;  %v4167_v1 = vmul.f32 %v12902_v12, %v12901_v45  ;;  %v4168_v31 = vmul.f32 %v12822_v28, %v12903_v58  ;;  %v4170_v28 = vmul.f32 %v12832_v49, %v10414_v38  ;;  %v12908_v4 = vld [vmem:[#allocation72_spill] sm:$0xff]  ;;  %v12912_v35 = vld [vmem:[#allocation150_spill] sm:$0xff]  ;;  %v12914_v12 = vld [vmem:[#allocation91_spill] sm:$0xff] }
 0x3c9   : > { %v4194_v20 = vpack.c.bf16 %v4166_v9, %v4165_v50  ;;  %v4174_v38 = vmul.f32 %v12855_v42, %v10461_v57  ;;  %v12909_v49 = vld [vmem:[#allocation144_spill] sm:$0xff]  ;;  %v12911_v50 = vld [vmem:[#allocation87_spill] sm:$0xff]  ;;  %v4178_v42 = vmul.f32 %v12912_v35, %v12869_v62  ;;  %v12913_v57 = vld [vmem:[#allocation145_spill] sm:$0xff]  ;;  %v4184_v58 = vmul.f32 %v12884_v7, %v12875_v5 }
 0x3ca   : > { %v4195_v53 = vpack.c.bf16 %v4168_v31, %v4167_v1  ;;  %v12915_v1 = vld [vmem:[#allocation103_spill] sm:$0xff]  ;;  %v4181_v31 = vmul.f32 %v10607_v2, %v12873_v56  ;;  %v4188_v56 = vmul.f32 %v12893_v36, %v10323_v3  ;;  %v4185_v5 = vmul.f32 %v12891_v25, %v12881_v13 }
 0x3cc   : > { %7649 = vmatmul.mubr.msk.bf16.gmra.mxu0 %vm2247_vm11, %v3248_v16  ;;  %v4171_v16 = vmul.f32 %v12850_v54, %v10441_v32  ;;  %v4173_v32 = vmul.f32 %v12909_v49, %v12853_v59  ;;  %v4792_v49 = vld [vmem:[#allocation2 + $0x50] sm:$0xff] }
 0x3cd   : > { %7723 = vmatmul.mubr.msk.bf16.vlgmr.msra.gmra.mxu1 %vm2247_vm11, %v4192_v33  ;;  %7688 = vmatprep.mubr.msk.bf16.mxu0 %vm2247_vm11, %v3861_v48  ;;  %v12906_v33 = vld [vmem:[#allocation15_spill] sm:$0xff] }
 0x3ce   : > { %7726 = vmatprep.mubr.msk.bf16.mxu1 %vm2247_vm11, %v4193_v41  ;;  %7789 = vmatpush3.bf16.msra.mxu1 %v12899_v52  ;;  %v12904_v41 = vld [vmem:[#allocation139_spill] sm:$0xff]  ;;  %v4169_v48 = vmul.f32 %v12906_v33, %v10431_v22  ;;  %v4197_v9 = vpack.c.bf16 %v4172_v29, %v4171_v16  ;;  %v12907_v52 = vld [vmem:[#allocation60_spill] sm:$0xff]  ;;  %v4176_v22 = vmul.f32 %v12859_v61, %v10490_v55  ;;  %v12922_v33 = vld [vmem:[#allocation133_spill] sm:$0xff] }
 0x3cf   : > { %v4198_v27 = vpack.c.bf16 %v4174_v38, %v4173_v32  ;;  %v4179_v55 = vmul.f32 %v10597_v17, %v12871_v8  ;;  %v4177_v61 = vmul.f32 %v12913_v57, %v12868_v23  ;;  %v4182_v17 = vmul.f32 %v10601_v10, %v12874_v24  ;;  %v12919_v16 = vld [vmem:[#allocation131_spill] sm:$0xff] }
 0x3d0   : > { %v4196_v19 = vpack.c.bf16 %v4170_v28, %v4169_v48  ;;  %v4199_v54 = vpack.c.bf16 %v4176_v22, %v4175_v6  ;;  %v4186_v10 = vmul.f32 %v12887_v63, %v12883_v44  ;;  %v4187_v24 = vmul.f32 %v12892_v34, %v12890_v60  ;;  %v12920_v44 = vld [vmem:[#allocation118_spill] sm:$0xff]  ;;  %v12921_v63 = vld [vmem:[#allocation129_spill] sm:$0xff]  ;;  %v3860_v38 = vld [vmem:[#allocation2 + $0x110] sm:$0xff] }
 0x3d1   : > { %v4200_v59 = vpack.c.bf16 %v4178_v42, %v4177_v61  ;;  %v4201_v45 = vpack.c.bf16 %v4180_v39, %v4179_v55  ;;  %v4202_v46 = vpack.c.bf16 %v4182_v17, %v4181_v31  ;;  %v4189_v3 = vmul.f32 %v12920_v44, %v10635_v11  ;;  %v4790_v6 = vld [vmem:[#allocation2 + $0x40] sm:$0xff]  ;;  %v4791_v39 = vld [vmem:[#allocation2 + $0x48] sm:$0xff] }
 0x3d2   : > { %v4204_v40 = vpack.c.bf16 %v4186_v10, %v4185_v5  ;;  %v4205_v7 = vpack.c.bf16 %v4188_v56, %v4187_v24  ;;  %v4190_v13 = vmul.f32 %v12921_v63, %v10649_v0  ;;  %v12925_v31 = vld [vmem:[#allocation50_spill] sm:$0xff]  ;;  %v12927_v24 = vld [vmem:[#allocation12_spill] sm:$0xff] }
 0x3d3   : > { %v4793_v63 = vld [vmem:[#allocation2 + $0x58] sm:$0xff] }
 0x3d4   : > { %7689 = vmatmul.mubr.msk.bf16.vlgmr.msra.gmra.mxu0 %vm2247_vm11, %v10678_v21  ;;  %v4206_v34 = vpack.c.bf16 %v4190_v13, %v4189_v3  ;;  %v4796_v13 = vld [vmem:[#allocation2 + $0x70] sm:$0xff] }
 0x3d5   : > { %7727 = vmatmul.mubr.msk.bf16.gmra.mxu1 %vm2247_vm11, %v4194_v20  ;;  %7755 = vmatpush3.bf16.msra.mxu0 %v12904_v41  ;;  %v4203_v20 = vpack.c.bf16 %v4184_v58, %v4183_v43  ;;  %v12917_v41 = vld [vmem:[#allocation113_spill] sm:$0xff]  ;;  %v12924_v58 = vld [vmem:[#allocation51_spill] sm:$0xff] }
 0x3d6   : > { %7692 = vmatprep.mubr.msk.bf16.mxu0 %vm2247_vm11, %v12905_v18  ;;  %7730 = vmatprep.mubr.msk.bf16.mxu1 %vm2247_vm11, %v4195_v53  ;;  %v12916_v53 = vld [vmem:[#allocation109_spill] sm:$0xff]  ;;  %v12918_v18 = vld [vmem:[#allocation115_spill] sm:$0xff] }
 0x3d7   : > { %7822 = vmatprep.subr.bf16.mxu0 %v10683_v15 }
 0x3dc   : > { %7693 = vmatmul.mubr.msk.bf16.gmra.mxu0 %vm2247_vm11, %v12907_v52 }
 0x3dd   : > { %7731 = vmatmul.mubr.msk.bf16.gmra.mxu1 %vm2247_vm11, %v4196_v19  ;;  %7696 = vmatprep.mubr.msk.bf16.mxu0 %vm2247_vm11, %v12908_v4 }
 0x3de   : > { %7734 = vmatprep.mubr.msk.bf16.mxu1 %vm2247_vm11, %v4197_v9  ;;  %v12923_v9 = vld [vmem:[#allocation134_spill] sm:$0xff] }
 0x3e4   : > { %7697 = vmatmul.mubr.msk.bf16.gmra.mxu0 %vm2247_vm11, %v12910_v47  ;;  %v4789_v47 = vld [vmem:[#allocation2 + $0x38] sm:$0xff] }
 0x3e5   : > { %7735 = vmatmul.mubr.msk.bf16.gmra.mxu1 %vm2247_vm11, %v4198_v27  ;;  %7700 = vmatprep.mubr.msk.bf16.mxu0 %vm2247_vm11, %v12911_v50  ;;  %v4820_v55 = vpack.c.bf16 %v4790_v6, %v4789_v47  ;;  %v12930_v6 = vld [vmem:[#allocation34_spill] sm:$0xff] }
 0x3e6   : > { %7738 = vmatprep.mubr.msk.bf16.mxu1 %vm2247_vm11, %v4199_v54  ;;  %v3859_v54 = vld [vmem:[#allocation2 + $0x108] sm:$0xff] }
 0x3e7   : > { %v10782_v42 = vpack.c.bf16 %v3860_v38, %v3859_v54  ;;  %v12929_v38 = vld [vmem:[#allocation36_spill] sm:$0xff] }
 0x3ec   : > { %7701 = vmatmul.mubr.msk.bf16.gmra.mxu0 %vm2247_vm11, %v12914_v12 }
 0x3ed   : > { %7739 = vmatmul.mubr.msk.bf16.gmra.mxu1 %vm2247_vm11, %v4200_v59  ;;  %7704 = vmatprep.mubr.msk.bf16.mxu0 %vm2247_vm11, %v12915_v1  ;;  %v4821_v59 = vpack.c.bf16 %v4792_v49, %v4791_v39  ;;  %v12932_v39 = vld [vmem:[#allocation46_spill] sm:$0xff] }
 0x3ee   : > { %7742 = vmatprep.mubr.msk.bf16.mxu1 %vm2247_vm11, %v4201_v45 }
 0x3f4   : > { %7705 = vmatmul.mubr.msk.bf16.gmra.mxu0 %vm2247_vm11, %v12916_v53 }
 0x3f5   : > { %7743 = vmatmul.mubr.msk.bf16.gmra.mxu1 %vm2247_vm11, %v4202_v46  ;;  %7708 = vmatprep.mubr.msk.bf16.mxu0 %vm2247_vm11, %v12917_v41  ;;  %v12926_v46 = vpack.c.bf16 %v12924_v58, %v12925_v31 }
 0x3f6   : > { %7746 = vmatprep.mubr.msk.bf16.mxu1 %vm2247_vm11, %v4203_v20  ;;  %v4459_v20 = vld [vmem:[#allocation2 + $0x37] sm:$0xff] }
 0x3fb   : > { %v7554_v26 = vpop.f32.mrf.mxu0 }
 0x3fc   : > { %7709 = vmatmul.mubr.msk.bf16.gmra.mxu0 %vm2247_vm11, %v12918_v18 }
 0x3fd   : > { %7747 = vmatmul.mubr.msk.bf16.gmra.mxu1 %vm2247_vm11, %v4204_v40  ;;  %v2699_v28 = vpop.f32.mrf.mxu0  ;;  %7712 = vmatprep.mubr.msk.bf16.mxu0 %vm2247_vm11, %v12919_v16 }
 0x3fe   : > { %7750 = vmatprep.mubr.msk.bf16.mxu1 %vm2247_vm11, %v4205_v7 }
 0x3ff   : > { %v7555_v60 = vpop.f32.mrf.mxu0 }
 0x401   : > { %v2702_v19 = vpop.f32.mrf.mxu0 }
 0x404   : > { %v7588_v25 = vpop.f32.mrf.mxu1  ;;  %7713 = vmatmul.mubr.msk.bf16.gmra.mxu0 %vm2247_vm11, %v12922_v33 }
 0x405   : > { %v10767_v36 = vadd.f32 %v7588_v25, %v7554_v26  ;;  %7751 = vmatmul.mubr.msk.bf16.gmra.mxu1 %vm2247_vm11, %v4206_v34  ;;  %7716 = vmatprep.mubr.msk.bf16.mxu0 %vm2247_vm11, %v12923_v9  ;;  %v4794_v26 = vld [vmem:[#allocation2 + $0x60] sm:$0xff] }
 0x406   : > { %v2914_v29 = vpop.f32.mrf.mxu1  ;;  %7790 = vmatprep.mubr.msk.bf16.mxu1 %vm2247_vm11, %v10678_v21  ;;  %v4460_v21 = vld [vmem:[#allocation2 + $0x3f] sm:$0xff]  ;;  %v4822_v34 = vpack.c.bf16 %v4794_v26, %v4793_v63 }
 0x407   : > { %v10772_v48 = vadd.f32 %v2914_v29, %v2699_v28  ;;  %v4492_v56 = vmul.f32 %v4460_v21, %v12927_v24  ;;  %v12928_v28 = vld [vmem:[#allocation11_spill] sm:$0xff]  ;;  %v4795_v29 = vld [vmem:[#allocation2 + $0x68] sm:$0xff] }
 0x408   : > { %v7589_v52 = vpop.f32.mrf.mxu1  ;;  %v4491_v44 = vmul.f32 %v4459_v20, %v12928_v28 }
 0x409   : > { %v10778_v4 = vadd.f32 %v7589_v52, %v7555_v60  ;;  %v4823_v52 = vpack.c.bf16 %v4796_v13, %v4795_v29  ;;  %v12944_v13 = vld [vmem:[#allocation70_spill] sm:$0xff]  ;;  %v12947_v29 = vld [vmem:[#allocation80_spill] sm:$0xff] }
 0x40a   : > { %v2917_v22 = vpop.f32.mrf.mxu1  ;;  %v7558_v32 = vpop.f32.mrf.mxu0  ;;  %v4522_v25 = vpack.c.bf16 %v4492_v56, %v4491_v44  ;;  %v12938_v56 = vld [vmem:[#allocation56_spill] sm:$0xff] }
 0x40b   : > { %v10780_v27 = vadd.f32 %v2917_v22, %v2702_v19  ;;  %v12931_v22 = vpack.c.bf16 %v12929_v38, %v12930_v6 }
 0x40c   : > { %v2715_v57 = vpop.f32.mrf.mxu0  ;;  %7717 = vmatmul.mubr.msk.bf16.gmra.mxu0 %vm2247_vm11, %v10782_v42 }
 0x40d   : > { %7791 = vmatmul.mubr.msk.bf16.vlgmr.msra.gmra.mxu1 %vm2247_vm11, %v4820_v55  ;;  %7756 = vmatprep.mubr.msk.bf16.mxu0 %vm2247_vm11, %v12926_v46 }
 0x40e   : > { %v7592_v35 = vpop.f32.mrf.mxu1  ;;  %v7559_v17 = vpop.f32.mrf.mxu0  ;;  %7794 = vmatprep.mubr.msk.bf16.mxu1 %vm2247_vm11, %v4821_v59  ;;  %v12935_v59 = vld [vmem:[#allocation52_spill] sm:$0xff] }
 0x40f   : > { %v10784_v61 = vadd.f32 %v7592_v35, %v7558_v32 }
 0x410   : > { %v2930_v45 = vpop.f32.mrf.mxu1  ;;  %v2718_v40 = vpop.f32.mrf.mxu0 }
 0x411   : > { %v10789_v43 = vadd.f32 %v2930_v45, %v2715_v57  ;;  %v12933_v57 = vld [vmem:[#allocation44_spill] sm:$0xff]  ;;  %v12936_v45 = vld [vmem:[#allocation53_spill] sm:$0xff] }
 0x412   : > { %v7593_v10 = vpop.f32.mrf.mxu1  ;;  %v12934_v21 = vpack.c.bf16 %v12932_v39, %v12933_v57  ;;  %v12951_v39 = vld [vmem:[#allocation84_spill] sm:$0xff] }
 0x413   : > { %v10797_v5 = vadd.f32 %v7593_v10, %v7559_v17  ;;  %v12937_v17 = vpack.c.bf16 %v12935_v59, %v12936_v45  ;;  %v12954_v59 = vld [vmem:[#allocation95_spill] sm:$0xff] }
 0x414   : > { %v2933_v7 = vpop.f32.mrf.mxu1  ;;  %7757 = vmatmul.mubr.msk.bf16.vlgmr.msra.gmra.mxu0 %vm2247_vm11, %v4522_v25 }
 0x415   : > { %v10800_v3 = vadd.f32 %v2933_v7, %v2718_v40  ;;  %7795 = vmatmul.mubr.msk.bf16.gmra.mxu1 %vm2247_vm11, %v4822_v34  ;;  %7823 = vmatpush3.bf16.msra.mxu0 %v10683_v15  ;;  %v12941_v40 = vld [vmem:[#allocation63_spill] sm:$0xff]  ;;  %v12942_v7 = vld [vmem:[#allocation62_spill] sm:$0xff] }
 0x416   : > { %v7596_v60 = vpop.f32.mrf.mxu1  ;;  %7760 = vmatprep.mubr.msk.bf16.mxu0 %vm2247_vm11, %v12931_v22  ;;  %7798 = vmatprep.mubr.msk.bf16.mxu1 %vm2247_vm11, %v4823_v52  ;;  %v12943_v28 = vpack.c.bf16 %v12941_v40, %v12942_v7  ;;  %v12956_v7 = vld [vmem:[#allocation101_spill] sm:$0xff] }
 0x418   : > { %v2946_v19 = vpop.f32.mrf.mxu1 }
 0x41a   : > { %v7597_v49 = vpop.f32.mrf.mxu1  ;;  %v7562_v54 = vpop.f32.mrf.mxu0 }
 0x41b   : > { %v10810_v47 = vadd.f32 %v7596_v60, %v7562_v54  ;;  %v12945_v60 = vld [vmem:[#allocation69_spill] sm:$0xff] }
 0x41c   : > { %v2949_v32 = vpop.f32.mrf.mxu1  ;;  %v2731_v55 = vpop.f32.mrf.mxu0  ;;  %7761 = vmatmul.mubr.msk.bf16.gmra.mxu0 %vm2247_vm11, %v12934_v21  ;;  %v12946_v25 = vpack.c.bf16 %v12944_v13, %v12945_v60 }
 0x41d   : > { %7799 = vmatmul.mubr.msk.bf16.gmra.mxu1 %vm2247_vm11, %v12911_v50  ;;  %v10818_v15 = vadd.f32 %v2946_v19, %v2731_v55  ;;  %7764 = vmatprep.mubr.msk.bf16.mxu0 %vm2247_vm11, %v12937_v17  ;;  %v12939_v50 = vld [vmem:[#allocation55_spill] sm:$0xff]  ;;  %v12948_v19 = vld [vmem:[#allocation81_spill] sm:$0xff] }
 0x41e   : > { %v7600_v35 = vpop.f32.mrf.mxu1  ;;  %7802 = vmatprep.mubr.msk.bf16.mxu1 %vm2247_vm11, %v12914_v12  ;;  %v7563_v58 = vpop.f32.mrf.mxu0  ;;  %v12940_v26 = vpack.c.bf16 %v12938_v56, %v12939_v50  ;;  %v12949_v52 = vpack.c.bf16 %v12947_v29, %v12948_v19  ;;  %v12950_v55 = vld [vmem:[#allocation85_spill] sm:$0xff] }
 0x41f   : > { %v10826_v31 = vadd.f32 %v7597_v49, %v7563_v58  ;;  %v12952_v57 = vpack.c.bf16 %v12950_v55, %v12951_v39  ;;  %v4487_v55 = vld [vmem:[#allocation2 + $0x117] sm:$0xff]  ;;  %v4488_v39 = vld [vmem:[#allocation2 + $0x11f] sm:$0xff] }
 0x420   : > { %v2962_v46 = vpop.f32.mrf.mxu1  ;;  %v2734_v20 = vpop.f32.mrf.mxu0 }
 0x421   : > { %v10828_v10 = vadd.f32 %v2949_v32, %v2734_v20 }
 0x422   : > { %v7601_v24 = vpop.f32.mrf.mxu1 }
 0x424   : > { %7765 = vmatmul.mubr.msk.bf16.gmra.mxu0 %vm2247_vm11, %v12940_v26  ;;  %v2965_v12 = vpop.f32.mrf.mxu1 }
 0x425   : > { %7803 = vmatmul.mubr.msk.bf16.gmra.mxu1 %vm2247_vm11, %v12915_v1  ;;  %7768 = vmatprep.mubr.msk.bf16.mxu0 %vm2247_vm11, %v12943_v28  ;;  %v12957_v28 = vld [vmem:[#allocation104_spill] sm:$0xff] }
 0x426   : > { %7806 = vmatprep.mubr.msk.bf16.mxu1 %vm2247_vm11, %v12916_v53 }
 0x42b   : > { %v7604_v44 = vpop.f32.mrf.mxu1 }
 0x42c   : > { %v7566_v63 = vpop.f32.mrf.mxu0  ;;  %7769 = vmatmul.mubr.msk.bf16.gmra.mxu0 %vm2247_vm11, %v12946_v25  ;;  %v4817_v25 = vld [vmem:[#allocation2 + $0x118] sm:$0xff] }
 0x42d   : > { %v10846_v34 = vadd.f32 %v7600_v35, %v7566_v63  ;;  %7807 = vmatmul.mubr.msk.bf16.gmra.mxu1 %vm2247_vm11, %v12917_v41  ;;  %v2978_v1 = vpop.f32.mrf.mxu1  ;;  %7772 = vmatprep.mubr.msk.bf16.mxu0 %vm2247_vm11, %v12949_v52  ;;  %v12960_v63 = vld [vmem:[#allocation111_spill] sm:$0xff] }
 0x42e   : > { %v2747_v53 = vpop.f32.mrf.mxu0  ;;  %7810 = vmatprep.mubr.msk.bf16.mxu1 %vm2247_vm11, %v12918_v18  ;;  %v12953_v18 = vld [vmem:[#allocation94_spill] sm:$0xff] }
 0x42f   : > { %v10856_v38 = vadd.f32 %v2962_v46, %v2747_v53  ;;  %v7605_v6 = vpop.f32.mrf.mxu1  ;;  %v12955_v45 = vpack.c.bf16 %v12953_v18, %v12954_v59 }
 0x430   : > { %v7567_v22 = vpop.f32.mrf.mxu0 }
 0x431   : > { %v10858_v49 = vadd.f32 %v7601_v24, %v7567_v22  ;;  %v10860_v32 = vpop.f32.mrf.mxu1 }
 0x432   : > { %v2750_v54 = vpop.f32.mrf.mxu0 }
 0x433   : > { %v10862_v41 = vadd.f32 %v2965_v12, %v2750_v54  ;;  %v7608_v21 = vpop.f32.mrf.mxu1  ;;  %v12958_v12 = vpack.c.bf16 %v12956_v7, %v12957_v28 }
 0x434   : > { %v7570_v35 = vpop.f32.mrf.mxu0  ;;  %7773 = vmatmul.mubr.msk.bf16.gmra.mxu0 %vm2247_vm11, %v12952_v57 }
 0x435   : > { %7811 = vmatmul.mubr.msk.bf16.gmra.mxu1 %vm2247_vm11, %v12919_v16  ;;  %7776 = vmatprep.mubr.msk.bf16.mxu0 %vm2247_vm11, %v12955_v45  ;;  %v10874_v17 = vadd.f32 %v7604_v44, %v7570_v35  ;;  %v2994_v46 = vpop.f32.mrf.mxu1  ;;  %v12965_v45 = vld [vmem:[#allocation126_spill] sm:$0xff] }
 0x436   : > { %7814 = vmatprep.mubr.msk.bf16.mxu1 %vm2247_vm11, %v12922_v33  ;;  %v2763_v58 = vpop.f32.mrf.mxu0  ;;  %v12959_v33 = vld [vmem:[#allocation110_spill] sm:$0xff] }
 0x437   : > { %v10878_v20 = vadd.f32 %v2978_v1, %v2763_v58  ;;  %v7609_v56 = vpop.f32.mrf.mxu1  ;;  %v12961_v13 = vpack.c.bf16 %v12959_v33, %v12960_v63  ;;  %v4818_v1 = vld [vmem:[#allocation2 + $0x120] sm:$0xff]  ;;  %v12966_v58 = vld [vmem:[#allocation127_spill] sm:$0xff] }
 0x438   : > { %v7571_v24 = vpop.f32.mrf.mxu0  ;;  %v4834_v22 = vpack.c.bf16 %v4818_v1, %v4817_v25 }
 0x439   : > { %v10880_v50 = vadd.f32 %v7605_v6, %v7571_v24  ;;  %v10884_v16 = vpop.f32.mrf.mxu1 }
 0x43a   : > { %v10882_v26 = vpop.f32.mrf.mxu0 }
 0x43c   : > { %v7574_v40 = vpop.f32.mrf.mxu0  ;;  %7777 = vmatmul.mubr.msk.bf16.gmra.mxu0 %vm2247_vm11, %v12958_v12  ;;  %v7612_v44 = vpop.f32.mrf.mxu1 }
 0x43d   : > { %7815 = vmatmul.mubr.msk.bf16.gmra.mxu1 %vm2247_vm11, %v12923_v9  ;;  %7780 = vmatprep.mubr.msk.bf16.mxu0 %vm2247_vm11, %v12961_v13  ;;  %v10896_v60 = vadd.f32 %v7608_v21, %v7574_v40  ;;  %v12962_v21 = vld [vmem:[#allocation124_spill] sm:$0xff]  ;;  %v4520_v40 = vmul.f32 %v4488_v39, %v12888_v14 }
 0x43e   : > { %7818 = vmatprep.mubr.msk.bf16.mxu1 %vm2247_vm11, %v10782_v42  ;;  %v2779_v29 = vpop.f32.mrf.mxu0  ;;  %v3010_v19 = vpop.f32.mrf.mxu1  ;;  %v12963_v42 = vld [vmem:[#allocation121_spill] sm:$0xff] }
 0x43f   : > { %v10900_v52 = vadd.f32 %v2994_v46, %v2779_v29  ;;  %v12964_v18 = vpack.c.bf16 %v12962_v21, %v12963_v42  ;;  %v12967_v46 = vpack.c.bf16 %v12965_v45, %v12966_v58 }
 0x440   : > { %v7575_v53 = vpop.f32.mrf.mxu0  ;;  %v7613_v6 = vpop.f32.mrf.mxu1 }
 0x441   : > { %v10902_v9 = vadd.f32 %v7609_v56, %v7575_v53  ;;  %v4519_v56 = vmul.f32 %v4487_v55, %v12885_v51  ;;  %v12968_v51 = vld [vmem:[#allocation7_spill] sm:$0xff] }
 0x442   : > { %v10904_v54 = vpop.f32.mrf.mxu0  ;;  %v10906_v35 = vpop.f32.mrf.mxu1 }
 0x443   : > { %v4536_v25 = vpack.c.bf16 %v4520_v40, %v4519_v56  ;;  %v12973_v56 = vld [vmem:[#allocation141_spill] sm:$0xff] }
 0x444   : > { %v7578_v57 = vpop.f32.mrf.mxu0  ;;  %7781 = vmatmul.mubr.msk.bf16.gmra.mxu0 %vm2247_vm11, %v12964_v18 }
 0x445   : > { %v7616_v59 = vpop.f32.mrf.mxu1  ;;  %7819 = vmatmul.mubr.msk.bf16.gmra.mxu1 %vm2247_vm11, %v4834_v22  ;;  %7784 = vmatprep.mubr.msk.bf16.mxu0 %vm2247_vm11, %v12967_v46  ;;  %v10917_v24 = vadd.f32 %v7612_v44, %v7578_v57  ;;  %v12969_v22 = vld [vmem:[#allocation16_spill] sm:$0xff]  ;;  %v12972_v46 = vld [vmem:[#allocation142_spill] sm:$0xff] }
 0x446   : > { %v2795_v7 = vpop.f32.mrf.mxu0  ;;  %v12970_v14 = vpack.c.bf16 %v12968_v51, %v12969_v22  ;;  %v12974_v40 = vpack.c.bf16 %v12972_v46, %v12973_v56 }
 0x447   : > { %v3026_v28 = vpop.f32.mrf.mxu1  ;;  %v10921_v12 = vadd.f32 %v3010_v19, %v2795_v7 }
 0x448   : > { %v7579_v33 = vpop.f32.mrf.mxu0 }
 0x449   : > { %v7617_v63 = vpop.f32.mrf.mxu1  ;;  %v10923_v13 = vadd.f32 %v7613_v6, %v7579_v33  ;;  %v12975_v33 = vld [vmem:[#allocation146_spill] sm:$0xff] }
 0x44a   : > { %v10925_v1 = vpop.f32.mrf.mxu0 }
 0x44b   : > { %v10927_v29 = vpop.f32.mrf.mxu1 }
 0x44c   : > { %v7582_v53 = vpop.f32.mrf.mxu0  ;;  %7785 = vmatmul.mubr.msk.bf16.gmra.mxu0 %vm2247_vm11, %v4536_v25 }
 0x44d   : > { %v7656_v44 = vpop.f32.mrf.mxu1  ;;  %7824 = vmatprep.mubr.msk.bf16.mxu0 %vm2247_vm11, %v12970_v14  ;;  %v10934_v19 = vadd.f32 %v7616_v59, %v7582_v53 }
 0x44e   : > { %v2811_v55 = vpop.f32.mrf.mxu0 }
 0x44f   : > { %v3670_v39 = vpop.f32.mrf.mxu1  ;;  %v10936_v6 = vadd.f32 %v3026_v28, %v2811_v55  ;;  %v12976_v28 = vld [vmem:[#allocation143_spill] sm:$0xff] }
 0x450   : > { %v7583_v57 = vpop.f32.mrf.mxu0  ;;  %v12977_v25 = vpack.c.bf16 %v12975_v33, %v12976_v28  ;;  %v12979_v28 = vld [vmem:[#allocation148_spill] sm:$0xff] }
 0x451   : > { %v7657_v21 = vpop.f32.mrf.mxu1  ;;  %v10938_v42 = vadd.f32 %v7617_v63, %v7583_v57 }
 0x452   : > { %v10940_v18 = vpop.f32.mrf.mxu0 }
 0x453   : > { %v10942_v45 = vpop.f32.mrf.mxu1 }
 0x454   : > { %12971 = vst [vmem:[#allocation67_spill] sm:$0xff] %v10942_v45  ;;  %v7622_v58 = vpop.f32.mrf.mxu0  ;;  %7825 = vmatmul.mubr.msk.bf16.vlgmr.msra.gmra.mxu0 %vm2247_vm11, %v12974_v40 }
 0x455   : > { %v7660_v59 = vpop.f32.mrf.mxu1  ;;  %v3469_v7 = vadd.f32 %v7622_v58, %v10767_v36  ;;  %7828 = vmatprep.mubr.msk.bf16.mxu0 %vm2247_vm11, %v12977_v25  ;;  %v12980_v25 = vld [vmem:[#allocation147_spill] sm:$0xff] }
 0x456   : > { %v3340_v63 = vpop.f32.mrf.mxu0 }
 0x457   : > { %v3686_v53 = vpop.f32.mrf.mxu1  ;;  %v3467_v51 = vadd.f32 %v3340_v63, %v10772_v48  ;;  %v10954_v22 = vadd.f32 %v7656_v44, %v3469_v7  ;;  %v12981_v48 = vpack.c.bf16 %v12979_v28, %v12980_v25 }
 0x458   : > { %v7623_v14 = vpop.f32.mrf.mxu0 }
 0x459   : > { %v7661_v55 = vpop.f32.mrf.mxu1  ;;  %v3470_v57 = vadd.f32 %v7623_v14, %v10778_v4  ;;  %v10957_v46 = vadd.f32 %v3670_v39, %v3467_v51  ;;  %v12982_v4 = vld [vmem:[#allocation151_spill] sm:$0xff]  ;;  %v12983_v39 = vld [vmem:[#allocation149_spill] sm:$0xff] }
 0x45a   : > { %v3343_v56 = vpop.f32.mrf.mxu0  ;;  %v12984_v63 = vpack.c.bf16 %v12982_v4, %v12983_v39  ;;  %v12985_v39 = vld [vmem:[#allocation152_spill] sm:$0xff] }
 0x45b   : > { %v10959_v40 = vpop.f32.mrf.mxu1  ;;  %v10962_v36 = vadd.f32 %v3343_v56, %v10780_v27  ;;  %v10964_v58 = vadd.f32 %v7657_v21, %v3470_v57 }
 0x45c   : > { %v7626_v33 = vpop.f32.mrf.mxu0  ;;  %7829 = vmatmul.mubr.msk.bf16.gmra.mxu0 %vm2247_vm11, %v12981_v48 }
 0x45d   : > { %12978 = vst [vmem:[#allocation32_spill] sm:$0xff] %v10962_v36  ;;  %v7664_v44 = vpop.f32.mrf.mxu1  ;;  %v3473_v7 = vadd.f32 %v7626_v33, %v10784_v61  ;;  %7832 = vmatprep.mubr.msk.bf16.mxu0 %vm2247_vm11, %v12984_v63 }
 0x45e   : > { %v3356_v51 = vpop.f32.mrf.mxu0 }
 0x45f   : > { %v3702_v14 = vpop.f32.mrf.mxu1  ;;  %v3471_v27 = vadd.f32 %v3356_v51, %v10789_v43  ;;  %v10976_v21 = vadd.f32 %v7660_v59, %v3473_v7  ;;  %v12986_v43 = vpack.c.bf16 %v10519_v37, %v12985_v39 }
 0x460   : > { %v7627_v57 = vpop.f32.mrf.mxu0 }
 0x461   : > { %v7665_v56 = vpop.f32.mrf.mxu1  ;;  %v3474_v28 = vadd.f32 %v7627_v57, %v10797_v5  ;;  %v10979_v25 = vadd.f32 %v3686_v53, %v3471_v27  ;;  %v12987_v5 = vld [vmem:[#allocation153_spill] sm:$0xff] }
 0x462   : > { %v3359_v48 = vpop.f32.mrf.mxu0  ;;  %v12988_v53 = vld [vmem:[#allocation21_spill] sm:$0xff] }
 0x463   : > { %v10981_v45 = vpop.f32.mrf.mxu1  ;;  %v10984_v61 = vadd.f32 %v3359_v48, %v10800_v3  ;;  %v10986_v33 = vadd.f32 %v7661_v55, %v3474_v28  ;;  %v12989_v63 = vpack.c.bf16 %v12987_v5, %v12988_v53  ;;  %v5103_v5 = vld [vmem:[#allocation2 + $0xb9] sm:$0xff]  ;;  %v5104_v53 = vld [vmem:[#allocation2 + $0xc1] sm:$0xff] }
 0x464   : > { %v7630_v4 = vpop.f32.mrf.mxu0  ;;  %7833 = vmatmul.mubr.msk.bf16.gmra.mxu0 %vm2247_vm11, %v12986_v43 }
 0x465   : > { %v7668_v59 = vpop.f32.mrf.mxu1  ;;  %v3477_v7 = vadd.f32 %v7630_v4, %v10810_v47  ;;  %7836 = vmatprep.mubr.msk.bf16.mxu0 %vm2247_vm11, %v12989_v63 }
 0x466   : > { %v3372_v51 = vpop.f32.mrf.mxu0 }
 0x467   : > { %v3718_v27 = vpop.f32.mrf.mxu1  ;;  %v3475_v3 = vadd.f32 %v3372_v51, %v10818_v15  ;;  %v10998_v55 = vadd.f32 %v7664_v44, %v3477_v7  ;;  %v12992_v15 = vld [vmem:[#allocation27_spill] sm:$0xff]  ;;  %v12993_v44 = vld [vmem:[#allocation24_spill] sm:$0xff] }
 0x468   : > { %v7631_v57 = vpop.f32.mrf.mxu0  ;;  %v12994_v7 = vpack.c.bf16 %v12992_v15, %v12993_v44  ;;  %v5106_v51 = vld [vmem:[#allocation2 + $0xd1] sm:$0xff] }
 0x469   : > { %v7669_v28 = vpop.f32.mrf.mxu1  ;;  %v3478_v37 = vadd.f32 %v7631_v57, %v10826_v31  ;;  %v11001_v48 = vadd.f32 %v3702_v14, %v3475_v3  ;;  %v12995_v3 = vld [vmem:[#allocation8_spill] sm:$0xff]  ;;  %v12996_v57 = vld [vmem:[#allocation35_spill] sm:$0xff]  ;;  %v5138_v44 = vmul.f32 %v5106_v51, %v12870_v30 }
 0x46a   : > { %v3375_v39 = vpop.f32.mrf.mxu0  ;;  %v12997_v36 = vpack.c.bf16 %v12995_v3, %v12996_v57 }
 0x46b   : > { %v11003_v43 = vpop.f32.mrf.mxu1  ;;  %v11006_v47 = vadd.f32 %v3375_v39, %v10828_v10  ;;  %v11008_v4 = vadd.f32 %v7665_v56, %v3478_v37  ;;  %v5135_v56 = vmul.f32 %v5103_v5, %v12868_v23  ;;  %v5136_v37 = vmul.f32 %v5104_v53, %v12869_v62 }
 0x46c   : > { %12990 = vst [vmem:[#allocation49_spill] sm:$0xff] %v11003_v43  ;;  %v7634_v63 = vpop.f32.mrf.mxu0  ;;  %7837 = vmatmul.mubr.msk.bf16.gmra.mxu0 %vm2247_vm11, %v12994_v7 }
 0x46d   : > { %12991 = vst [vmem:[#allocation78_spill] sm:$0xff] %v11008_v4  ;;  %v7672_v31 = vpop.f32.mrf.mxu1  ;;  %v3481_v14 = vadd.f32 %v7634_v63, %v10846_v34  ;;  %7840 = vmatprep.mubr.msk.bf16.mxu0 %vm2247_vm11, %v12997_v36  ;;  %v5137_v34 = vmul.f32 %v10607_v2, %v12871_v8  ;;  %v5158_v23 = vpack.c.bf16 %v5136_v37, %v5135_v56 }
 0x46e   : > { %v3388_v10 = vpop.f32.mrf.mxu0 }
 0x46f   : > { %v3734_v39 = vpop.f32.mrf.mxu1  ;;  %v3479_v43 = vadd.f32 %v3388_v10, %v10856_v38  ;;  %v11022_v15 = vadd.f32 %v7668_v59, %v3481_v14  ;;  %v5159_v59 = vpack.c.bf16 %v5138_v44, %v5137_v34  ;;  %v12999_v34 = vld [vmem:[#allocation92_spill] sm:$0xff] }
 0x470   : > { %v7635_v7 = vpop.f32.mrf.mxu0 }
 0x471   : > { %v7673_v4 = vpop.f32.mrf.mxu1  ;;  %v3482_v63 = vadd.f32 %v7635_v7, %v10858_v49  ;;  %v11028_v36 = vadd.f32 %v3718_v27, %v3479_v43  ;;  %v12998_v7 = vld [vmem:[#allocation93_spill] sm:$0xff] }
 0x472   : > { %v3391_v3 = vpop.f32.mrf.mxu0 }
 0x473   : > { %v3737_v5 = vpop.f32.mrf.mxu1  ;;  %v11031_v62 = vadd.f32 %v3391_v3, %v10862_v41  ;;  %v11033_v38 = vadd.f32 %v7669_v28, %v3482_v63  ;;  %v2982_v28 = vadd.f32 %v10860_v32, %v10882_v26  ;;  %v13001_v32 = vld [vmem:[#allocation107_spill] sm:$0xff] }
 0x474   : > { %v7638_v53 = vpop.f32.mrf.mxu0  ;;  %7841 = vmatmul.mubr.msk.bf16.gmra.mxu0 %vm2247_vm11, %v5158_v23 }
 0x475   : > { %v7676_v30 = vpop.f32.mrf.mxu1  ;;  %v3485_v51 = vadd.f32 %v7638_v53, %v10874_v17  ;;  %7844 = vmatprep.mubr.msk.bf16.mxu0 %vm2247_vm11, %v5159_v59  ;;  %v7969_v53 = vld [vmem:[%s12380_s9] sm:$0xff]  }
 0x476   : > { %v3404_v8 = vpop.f32.mrf.mxu0  ;;  %7856 = vmatprep.subr.bf16.mxu1 %v7969_v53 }
 0x477   : > { %v3750_v2 = vpop.f32.mrf.mxu1  ;;  %v3483_v49 = vadd.f32 %v3404_v8, %v10878_v20  ;;  %v11039_v27 = vadd.f32 %v7672_v31, %v3485_v51  ;;  %v13000_v20 = vpack.c.bf16 %v12998_v7, %v12999_v34  ;;  %7857 = vmatpush3.bf16.msra.mxu1 %v7969_v53  ;;  %v13005_v7 = vld [vmem:[#allocation122_spill] sm:$0xff] }
 0x478   : > { %v7639_v43 = vpop.f32.mrf.mxu0 }
 0x479   : > { %v7677_v41 = vpop.f32.mrf.mxu1  ;;  %v3486_v14 = vadd.f32 %v7639_v43, %v10880_v50  ;;  %v11044_v57 = vadd.f32 %v3734_v39, %v3483_v49  ;;  %v13002_v50 = vld [vmem:[#allocation106_spill] sm:$0xff] }
 0x47a   : > { %v3407_v10 = vpop.f32.mrf.mxu0  ;;  %v13003_v26 = vpack.c.bf16 %v13001_v32, %v13002_v50 }
 0x47b   : > { %v3753_v56 = vpop.f32.mrf.mxu1  ;;  %v3484_v17 = vadd.f32 %v3407_v10, %v2982_v28  ;;  %v11046_v37 = vadd.f32 %v7673_v4, %v3486_v14 }
 0x47c   : > { %v7642_v44 = vpop.f32.mrf.mxu0  ;;  %7845 = vmatmul.mubr.msk.bf16.gmra.mxu0 %vm2247_vm11, %v13000_v20  ;;  %v13008_v20 = vld [vmem:[#allocation130_spill] sm:$0xff] }
 0x47d   : > { %v7680_v31 = vpop.f32.mrf.mxu1  ;;  %v3489_v63 = vadd.f32 %v7642_v44, %v10896_v60  ;;  %v11053_v3 = vadd.f32 %v3737_v5, %v3484_v17  ;;  %7848 = vmatprep.mubr.msk.bf16.mxu0 %vm2247_vm11, %v13003_v26  ;;  %v2998_v60 = vadd.f32 %v10884_v16, %v10904_v54  ;;  %v13004_v44 = vld [vmem:[#allocation123_spill] sm:$0xff] }
 0x47e   : > { %v3420_v39 = vpop.f32.mrf.mxu0  ;;  %v13006_v34 = vpack.c.bf16 %v13004_v44, %v13005_v7 }
 0x47f   : > { %v3766_v23 = vpop.f32.mrf.mxu1  ;;  %v3487_v4 = vadd.f32 %v3420_v39, %v10900_v52  ;;  %v11060_v59 = vadd.f32 %v7676_v30, %v3489_v63  ;;  %v5115_v52 = vld [vmem:[#allocation2 + $0x119] sm:$0xff]  ;;  %v5116_v30 = vld [vmem:[#allocation2 + $0x121] sm:$0xff] }
 0x480   : > { %v7643_v51 = vpop.f32.mrf.mxu0  ;;  %v5147_v32 = vmul.f32 %v5115_v52, %v10635_v11 }
 0x481   : > { %v7681_v8 = vpop.f32.mrf.mxu1  ;;  %v3490_v5 = vadd.f32 %v7643_v51, %v10902_v9  ;;  %v11068_v49 = vadd.f32 %v3750_v2, %v3487_v4  ;;  %v13007_v2 = vld [vmem:[#allocation132_spill] sm:$0xff] }
 0x482   : > { %v3423_v43 = vpop.f32.mrf.mxu0  ;;  %v13009_v63 = vpack.c.bf16 %v13007_v2, %v13008_v20 }
 0x483   : > { %v3769_v28 = vpop.f32.mrf.mxu1  ;;  %v3488_v14 = vadd.f32 %v3423_v43, %v2998_v60  ;;  %v11070_v10 = vadd.f32 %v7677_v41, %v3490_v5  ;;  %v5148_v41 = vmul.f32 %v5116_v30, %v10649_v0 }
 0x484   : > { %v7646_v17 = vpop.f32.mrf.mxu0  ;;  %7849 = vmatmul.mubr.msk.bf16.gmra.mxu0 %vm2247_vm11, %v13006_v34 }
 0x485   : > { %v7684_v16 = vpop.f32.mrf.mxu1  ;;  %v3493_v9 = vadd.f32 %v7646_v17, %v10917_v24  ;;  %v11077_v54 = vadd.f32 %v3753_v56, %v3488_v14  ;;  %7852 = vmatprep.mubr.msk.bf16.mxu0 %vm2247_vm11, %v13009_v63  ;;  %v3014_v24 = vadd.f32 %v10906_v35, %v10925_v1  ;;  %v5164_v5 = vpack.c.bf16 %v5148_v41, %v5147_v32 }
 0x486   : > { %v3436_v50 = vpop.f32.mrf.mxu0 }
 0x487   : > { %v3782_v26 = vpop.f32.mrf.mxu1  ;;  %v3491_v39 = vadd.f32 %v3436_v50, %v10921_v12  ;;  %v11086_v4 = vadd.f32 %v7680_v31, %v3493_v9 }
 0x488   : > { %v7647_v53 = vpop.f32.mrf.mxu0 }
 0x489   : > { %v7685_v51 = vpop.f32.mrf.mxu1  ;;  %v3494_v56 = vadd.f32 %v7647_v53, %v10923_v13  ;;  %v11091_v60 = vadd.f32 %v3766_v23, %v3491_v39 }
 0x48a   : > { %v3439_v43 = vpop.f32.mrf.mxu0 }
 0x48b   : > { %v3785_v11 = vpop.f32.mrf.mxu1  ;;  %v3492_v52 = vadd.f32 %v3439_v43, %v3014_v24  ;;  %v11093_v0 = vadd.f32 %v7681_v8, %v3494_v56  ;;  %v3030_v8 = vadd.f32 %v10927_v29, %v10940_v18 }
 0x48c   : > { %v7650_v30 = vpop.f32.mrf.mxu0  ;;  %7853 = vmatmul.mubr.msk.bf16.gmra.mxu0 %vm2247_vm11, %v5164_v5 }
 0x48d   : > { %v7724_v12 = vpop.f32.mrf.mxu1  ;;  %v3497_v31 = vadd.f32 %v7650_v30, %v10934_v19  ;;  %v11097_v14 = vadd.f32 %v3769_v28, %v3492_v52 }
 0x48e   : > { %v3452_v17 = vpop.f32.mrf.mxu0 }
 0x48f   : > { %v4298_v35 = vpop.f32.mrf.mxu1  ;;  %v3495_v13 = vadd.f32 %v3452_v17, %v10936_v6  ;;  %v11100_v1 = vadd.f32 %v7684_v16, %v3497_v31 }
 0x490   : > { %v7651_v23 = vpop.f32.mrf.mxu0 }
 0x491   : > { %v11102_v44 = vpop.f32.mrf.mxu1  ;;  %v3498_v7 = vadd.f32 %v7651_v23, %v10938_v42  ;;  %v11107_v34 = vadd.f32 %v3782_v26, %v3495_v13 }
 0x492   : > { %v3455_v9 = vpop.f32.mrf.mxu0 }
 0x493   : > { %v11109_v19 = vpop.f32.mrf.mxu1  ;;  %v3496_v28 = vadd.f32 %v3455_v9, %v3030_v8  ;;  %v11111_v2 = vadd.f32 %v7685_v51, %v3498_v7 }
 0x494   : > { %v7690_v20 = vpop.f32.mrf.mxu0 }
 0x495   : > { %v7728_v6 = vpop.f32.mrf.mxu1  ;;  %v11113_v16 = vadd.f32 %v3785_v11, %v3496_v28  ;;  %v4097_v63 = vadd.f32 %v7690_v20, %v10954_v22 }
 0x496   : > { %v3968_v32 = vpop.f32.mrf.mxu0 }
 0x497   : > { %v4314_v41 = vpop.f32.mrf.mxu1  ;;  %v4095_v29 = vadd.f32 %v3968_v32, %v10957_v46  ;;  %v11117_v18 = vadd.f32 %v7724_v12, %v4097_v63  ;;  %v13010_v63 = vld [vmem:[#allocation78_spill] sm:$0xff] }
 0x498   : > { %v7691_v42 = vpop.f32.mrf.mxu0 }
 0x499   : > { %v7729_v50 = vpop.f32.mrf.mxu1  ;;  %v11120_v26 = vadd.f32 %v7691_v42, %v10964_v58  ;;  %v11122_v39 = vadd.f32 %v4298_v35, %v4095_v29  ;;  %v3802_v58 = vadd.f32 %v10959_v40, %v10984_v61 }
 0x49a   : > { %v11124_v53 = vpop.f32.mrf.mxu0 }
 0x49b   : > { %v4317_v51 = vpop.f32.mrf.mxu1 }
 0x49c   : > { %v7694_v24 = vpop.f32.mrf.mxu0 }
 0x49d   : > { %v7732_v56 = vpop.f32.mrf.mxu1  ;;  %v4101_v22 = vadd.f32 %v7694_v24, %v10976_v21 }
 0x49e   : > { %v3984_v5 = vpop.f32.mrf.mxu0 }
 0x49f   : > { %v4330_v43 = vpop.f32.mrf.mxu1  ;;  %v4099_v46 = vadd.f32 %v3984_v5, %v10979_v25  ;;  %v11128_v11 = vadd.f32 %v7728_v6, %v4101_v22  ;;  %v3806_v6 = vadd.f32 %v10981_v45, %v11006_v47 }
 0x4a0   : > { %v7695_v52 = vpop.f32.mrf.mxu0 }
 0x4a1   : > { %v7733_v30 = vpop.f32.mrf.mxu1  ;;  %v4102_v12 = vadd.f32 %v7695_v52, %v10986_v33  ;;  %v11133_v31 = vadd.f32 %v4314_v41, %v4099_v46  ;;  %v13011_v52 = vld [vmem:[#allocation49_spill] sm:$0xff] }
 0x4a2   : > { %v3987_v17 = vpop.f32.mrf.mxu0 }
 0x4a3   : > { %v4333_v35 = vpop.f32.mrf.mxu1  ;;  %v4100_v13 = vadd.f32 %v3987_v17, %v3802_v58  ;;  %v11135_v23 = vadd.f32 %v7729_v50, %v4102_v12  ;;  %v3810_v58 = vadd.f32 %v13011_v52, %v11031_v62 }
 0x4a4   : > { %v7698_v21 = vpop.f32.mrf.mxu0 }
 0x4a5   : > { %v7736_v8 = vpop.f32.mrf.mxu1  ;;  %v4105_v25 = vadd.f32 %v7698_v21, %v10998_v55  ;;  %v11138_v7 = vadd.f32 %v4317_v51, %v4100_v13 }
 0x4a6   : > { %v4000_v9 = vpop.f32.mrf.mxu0 }
 0x4a7   : > { %v4346_v28 = vpop.f32.mrf.mxu1  ;;  %v4103_v20 = vadd.f32 %v4000_v9, %v11001_v48  ;;  %v11141_v40 = vadd.f32 %v7732_v56, %v4105_v25 }
 0x4a8   : > { %v7699_v61 = vpop.f32.mrf.mxu0 }
 0x4a9   : > { %v7737_v33 = vpop.f32.mrf.mxu1  ;;  %v4106_v32 = vadd.f32 %v7699_v61, %v13010_v63  ;;  %v11146_v41 = vadd.f32 %v4330_v43, %v4103_v20 }
 0x4aa   : > { %v4003_v29 = vpop.f32.mrf.mxu0 }
 0x4ab   : > { %v4349_v42 = vpop.f32.mrf.mxu1  ;;  %v4104_v55 = vadd.f32 %v4003_v29, %v3806_v6  ;;  %v11148_v50 = vadd.f32 %v7733_v30, %v4106_v32 }
 0x4ac   : > { %v7702_v51 = vpop.f32.mrf.mxu0 }
 0x4ad   : > { %v7740_v24 = vpop.f32.mrf.mxu1  ;;  %v4109_v48 = vadd.f32 %v7702_v51, %v11022_v15  ;;  %v11151_v56 = vadd.f32 %v4333_v35, %v4104_v55 }
 0x4ae   : > { %v4016_v22 = vpop.f32.mrf.mxu0 }
 0x4af   : > { %v4362_v5 = vpop.f32.mrf.mxu1  ;;  %v4107_v46 = vadd.f32 %v4016_v22, %v11028_v36  ;;  %v11154_v45 = vadd.f32 %v7736_v8, %v4109_v48 }
 0x4b0   : > { %v7703_v47 = vpop.f32.mrf.mxu0 }
 0x4b1   : > { %v7741_v43 = vpop.f32.mrf.mxu1  ;;  %v4110_v30 = vadd.f32 %v7703_v47, %v11033_v38  ;;  %v11159_v12 = vadd.f32 %v4346_v28, %v4107_v46 }
 0x4b2   : > { %v4019_v17 = vpop.f32.mrf.mxu0 }
 0x4b3   : > { %v4365_v13 = vpop.f32.mrf.mxu1  ;;  %v4108_v15 = vadd.f32 %v4019_v17, %v3810_v58  ;;  %v11161_v35 = vadd.f32 %v7737_v33, %v4110_v30 }
 0x4b4   : > { %v7706_v21 = vpop.f32.mrf.mxu0 }
 0x4b5   : > { %v7744_v25 = vpop.f32.mrf.mxu1  ;;  %v4113_v36 = vadd.f32 %v7706_v21, %v11039_v27  ;;  %v11164_v8 = vadd.f32 %v4349_v42, %v4108_v15 }
 0x4b6   : > { %v4032_v9 = vpop.f32.mrf.mxu0 }
 0x4b7   : > { %v4378_v20 = vpop.f32.mrf.mxu1  ;;  %v4111_v61 = vadd.f32 %v4032_v9, %v11044_v57  ;;  %v11167_v62 = vadd.f32 %v7740_v24, %v4113_v36 }
 0x4b8   : > { %v7707_v38 = vpop.f32.mrf.mxu0 }
 0x4b9   : > { %v7745_v28 = vpop.f32.mrf.mxu1  ;;  %v4114_v6 = vadd.f32 %v7707_v38, %v11046_v37  ;;  %v11170_v63 = vadd.f32 %v4362_v5, %v4111_v61 }
 0x4ba   : > { %v4035_v33 = vpop.f32.mrf.mxu0 }
 0x4bb   : > { %v4381_v32 = vpop.f32.mrf.mxu1  ;;  %v4112_v29 = vadd.f32 %v4035_v33, %v11053_v3  ;;  %v11173_v55 = vadd.f32 %v7741_v43, %v4114_v6 }
 0x4bc   : > { %v7710_v27 = vpop.f32.mrf.mxu0 }
 0x4bd   : > { %v7748_v42 = vpop.f32.mrf.mxu1  ;;  %v4117_v51 = vadd.f32 %v7710_v27, %v11060_v59  ;;  %v11176_v48 = vadd.f32 %v4365_v13, %v4112_v29 }
 0x4be   : > { %v4048_v57 = vpop.f32.mrf.mxu0 }
 0x4bf   : > { %v4394_v24 = vpop.f32.mrf.mxu1  ;;  %v4115_v22 = vadd.f32 %v4048_v57, %v11068_v49  ;;  %v11179_v46 = vadd.f32 %v7744_v25, %v4117_v51 }
 0x4c0   : > { %v7711_v37 = vpop.f32.mrf.mxu0 }
 0x4c1   : > { %v7749_v5 = vpop.f32.mrf.mxu1  ;;  %v4118_v47 = vadd.f32 %v7711_v37, %v11070_v10  ;;  %v11182_v52 = vadd.f32 %v4378_v20, %v4115_v22 }
 0x4c2   : > { %v4051_v3 = vpop.f32.mrf.mxu0 }
 0x4c3   : > { %v4397_v43 = vpop.f32.mrf.mxu1  ;;  %v4116_v58 = vadd.f32 %v4051_v3, %v11077_v54  ;;  %v11185_v30 = vadd.f32 %v7745_v28, %v4118_v47 }
 0x4c4   : > { %v7714_v59 = vpop.f32.mrf.mxu0 }
 0x4c5   : > { %v7752_v17 = vpop.f32.mrf.mxu1  ;;  %v4121_v13 = vadd.f32 %v7714_v59, %v11086_v4  ;;  %v11188_v15 = vadd.f32 %v4381_v32, %v4116_v58 }
 0x4c6   : > { %v4064_v49 = vpop.f32.mrf.mxu0 }
 0x4c7   : > { %v4410_v21 = vpop.f32.mrf.mxu1  ;;  %v4119_v25 = vadd.f32 %v4064_v49, %v11091_v60  ;;  %v11191_v36 = vadd.f32 %v7748_v42, %v4121_v13 }
 0x4c8   : > { %v7715_v10 = vpop.f32.mrf.mxu0 }
 0x4c9   : > { %v7753_v9 = vpop.f32.mrf.mxu1  ;;  %v4122_v20 = vadd.f32 %v7715_v10, %v11093_v0  ;;  %v11194_v61 = vadd.f32 %v4394_v24, %v4119_v25 }
 0x4ca   : > { %v4067_v54 = vpop.f32.mrf.mxu0 }
 0x4cb   : > { %v4413_v38 = vpop.f32.mrf.mxu1  ;;  %v4120_v28 = vadd.f32 %v4067_v54, %v11097_v14  ;;  %v11197_v6 = vadd.f32 %v7749_v5, %v4122_v20 }
 0x4cc   : > { %v7718_v4 = vpop.f32.mrf.mxu0 }
 0x4cd   : > { %v11199_v33 = vpop.f32.mrf.mxu1  ;;  %v4125_v32 = vadd.f32 %v7718_v4, %v11100_v1  ;;  %v11202_v60 = vadd.f32 %v4397_v43, %v4120_v28 }
 0x4ce   : > { %v4080_v29 = vpop.f32.mrf.mxu0 }
 0x4cf   : > { %v11204_v27 = vpop.f32.mrf.mxu1  ;;  %v4123_v0 = vadd.f32 %v4080_v29, %v11107_v34  ;;  %v11207_v42 = vadd.f32 %v7752_v17, %v4125_v32 }
 0x4d0   : > { %v7719_v51 = vpop.f32.mrf.mxu0 }
 0x4d1   : > { %v11209_v57 = vpop.f32.mrf.mxu1  ;;  %v4126_v14 = vadd.f32 %v7719_v51, %v11111_v2  ;;  %v11212_v24 = vadd.f32 %v4410_v21, %v4123_v0 }
 0x4d2   : > { %v4083_v22 = vpop.f32.mrf.mxu0 }
 0x4d3   : > { %v11214_v37 = vpop.f32.mrf.mxu1  ;;  %v4124_v1 = vadd.f32 %v4083_v22, %v11113_v16  ;;  %v11217_v5 = vadd.f32 %v7753_v9, %v4126_v14 }
 0x4d4   : > { %v7758_v47 = vpop.f32.mrf.mxu0 }
 0x4d5   : > { %v11219_v3 = vpop.f32.mrf.mxu1  ;;  %v11221_v34 = vadd.f32 %v4413_v38, %v4124_v1  ;;  %v11224_v43 = vadd.f32 %v7758_v47, %v11117_v18 }
 0x4d6   : > { %v4628_v58 = vpop.f32.mrf.mxu0 }
 0x4d7   : > { %v11226_v59 = vpop.f32.mrf.mxu1  ;;  %v11229_v2 = vadd.f32 %v4628_v58, %v11122_v39 }
 0x4d8   : > { %v11231_v17 = vpop.f32.mrf.mxu0 }
 0x4d9   : > { %v11233_v13 = vpop.f32.mrf.mxu1 }
 0x4da   : > { %v11235_v16 = vpop.f32.mrf.mxu0 }
 0x4db   : > { %v11237_v49 = vpop.f32.mrf.mxu1 }
 0x4dc   : > { %v7762_v21 = vpop.f32.mrf.mxu0 }
 0x4dd   : > { %v11239_v25 = vpop.f32.mrf.mxu1  ;;  %v11242_v18 = vadd.f32 %v7762_v21, %v11128_v11 }
 0x4de   : > { %v4644_v10 = vpop.f32.mrf.mxu0 }
 0x4df   : > { %v11245_v9 = vadd.f32 %v4644_v10, %v11133_v31  ;;  %v11247_v20 = vpop.f32.mrf.mxu1 }
 0x4e0   : > { %v7763_v39 = vpop.f32.mrf.mxu0 }
 0x4e1   : > { %v11250_v54 = vadd.f32 %v7763_v39, %v11135_v23  ;;  %v11255_v32 = vpop.f32.mrf.mxu1 }
 0x4e2   : > { %v4647_v38 = vpop.f32.mrf.mxu0 }
 0x4e3   : > { %v11253_v28 = vadd.f32 %v4647_v38, %v11138_v7  ;;  %v11263_v51 = vpop.f32.mrf.mxu1 }
 0x4e4   : > { %v7766_v4 = vpop.f32.mrf.mxu0 }
 0x4e5   : > { %v11258_v11 = vadd.f32 %v7766_v4, %v11141_v40  ;;  %v11271_v1 = vpop.f32.mrf.mxu1 }
 0x4e6   : > { %v4660_v29 = vpop.f32.mrf.mxu0 }
 0x4e7   : > { %v11261_v31 = vadd.f32 %v4660_v29, %v11146_v41  ;;  %v11279_v21 = vpop.f32.mrf.mxu1 }
 0x4e8   : > { %v7767_v0 = vpop.f32.mrf.mxu0 }
 0x4e9   : > { %v11266_v23 = vadd.f32 %v7767_v0, %v11148_v50  ;;  %v11287_v39 = vpop.f32.mrf.mxu1 }
 0x4ea   : > { %v4663_v14 = vpop.f32.mrf.mxu0 }
 0x4eb   : > { %v11269_v7 = vadd.f32 %v4663_v14, %v11151_v56  ;;  %v11295_v29 = vpop.f32.mrf.mxu1 }
 0x4ec   : > { %v7770_v22 = vpop.f32.mrf.mxu0 }
 0x4ed   : > { %v11274_v40 = vadd.f32 %v7770_v22, %v11154_v45  ;;  %v11303_v22 = vpop.f32.mrf.mxu1 }
 0x4ee   : > { %v4676_v47 = vpop.f32.mrf.mxu0 }
 0x4ef   : > { %v11277_v41 = vadd.f32 %v4676_v47, %v11159_v12 }
 0x4f0   : > { %v7771_v58 = vpop.f32.mrf.mxu0 }
 0x4f1   : > { %v11282_v50 = vadd.f32 %v7771_v58, %v11161_v35 }
 0x4f2   : > { %v4679_v10 = vpop.f32.mrf.mxu0 }
 0x4f3   : > { %v11285_v56 = vadd.f32 %v4679_v10, %v11164_v8  ;;  %v11311_v10 = vpop.f32.mrf.mxu1 }
 0x4f4   : > { %v7774_v38 = vpop.f32.mrf.mxu0 }
 0x4f5   : > { %v11290_v45 = vadd.f32 %v7774_v38, %v11167_v62 }
 0x4f6   : > { %v4692_v4 = vpop.f32.mrf.mxu0 }
 0x4f7   : > { %v11293_v12 = vadd.f32 %v4692_v4, %v11170_v63 }
 0x4f8   : > { %v7775_v0 = vpop.f32.mrf.mxu0 }
 0x4f9   : > { %v11298_v35 = vadd.f32 %v7775_v0, %v11173_v55  ;;  %v11319_v0 = vpop.f32.mrf.mxu1 }
 0x4fa   : > { %v4695_v14 = vpop.f32.mrf.mxu0 }
 0x4fb   : > { %v11301_v8 = vadd.f32 %v4695_v14, %v11176_v48 }
 0x4fc   : > { %v7778_v47 = vpop.f32.mrf.mxu0 }
 0x4fd   : > { %v11306_v62 = vadd.f32 %v7778_v47, %v11179_v46 }
 0x4fe   : > { %v4708_v58 = vpop.f32.mrf.mxu0 }
 0x4ff   : > { %v11309_v63 = vadd.f32 %v4708_v58, %v11182_v52  ;;  %v11327_v58 = vpop.f32.mrf.mxu1 }
 0x500   : > { %v7779_v38 = vpop.f32.mrf.mxu0 }
 0x501   : > { %13012 = vst [vmem:[#allocation73_spill] sm:$0xff] %v11309_v63  ;;  %v11314_v55 = vadd.f32 %v7779_v38, %v11185_v30 }
 0x502   : > { %v4711_v4 = vpop.f32.mrf.mxu0 }
 0x503   : > { %13013 = vst [vmem:[#allocation76_spill] sm:$0xff] %v11314_v55  ;;  %v11317_v48 = vadd.f32 %v4711_v4, %v11188_v15  ;;  %v11335_v4 = vpop.f32.mrf.mxu1  ;;  %v13017_v55 = vld [vmem:[#allocation32_spill] sm:$0xff] }
 0x504   : > { %v7782_v14 = vpop.f32.mrf.mxu0 }
 0x505   : > { %13014 = vst [vmem:[#allocation40_spill] sm:$0xff] %v11317_v48  ;;  %v11322_v46 = vadd.f32 %v7782_v14, %v11191_v36  ;;  %v13018_v36 = vld [vmem:[#allocation67_spill] sm:$0xff] }
 0x506   : > { %v4724_v47 = vpop.f32.mrf.mxu0  ;;  %v3798_v14 = vadd.f32 %v13018_v36, %v13017_v55 }
 0x507   : > { %13015 = vst [vmem:[#allocation43_spill] sm:$0xff] %v11322_v46  ;;  %v11325_v52 = vadd.f32 %v4724_v47, %v11194_v61 }
 0x508   : > { %v7783_v63 = vpop.f32.mrf.mxu0  ;;  %v4096_v47 = vadd.f32 %v11124_v53, %v3798_v14 }
 0x509   : > { %13016 = vst [vmem:[#allocation9_spill] sm:$0xff] %v11325_v52  ;;  %v11330_v30 = vadd.f32 %v7783_v63, %v11197_v6  ;;  %v5415_v6 = vld [vmem:[%s12379_s8] sm:$0x3] }
 0x50a   : > { %v4727_v38 = vpop.f32.mrf.mxu0  ;;  %v4426_v53 = vadd.f32 %v11109_v19, %v4096_v47 }
 0x50b   : > { %v11333_v15 = vadd.f32 %v4727_v38, %v11202_v60  ;;  %v11349_v60 = vpop.f32.mrf.mxu1  ;;  %v4428_v38 = vadd.f32 %v11102_v44, %v11120_v26  ;;  %v5053_v26 = vadd.f32 %v11204_v27, %v11229_v2 }
 0x50c   : > { %v7786_v48 = vpop.f32.mrf.mxu0 }
 0x50d   : > { %v11340_v46 = vadd.f32 %v7786_v48, %v11207_v42  ;;  %v13021_v48 = vld [vmem:[#allocation3_spill] sm:$0xff]  ;;  %v4758_v14 = vadd.f32 %v11231_v17, %v4428_v38 }
 0x50e   : > { %v4740_v61 = vpop.f32.mrf.mxu0  ;;  %v11357_v36 = vrot.slane %v5415_v6, %v13021_v48  ;;  %v13022_v48 = vld [vmem:[#allocation4_spill] sm:$0xff] }
 0x50f   : > { %v11344_v52 = vadd.f32 %v4740_v61, %v11212_v24  ;;  %v5055_v24 = vadd.f32 %v11199_v33, %v11224_v43  ;;  %v5056_v33 = vadd.f32 %v11209_v57, %v4758_v14  ;;  %v5059_v57 = vadd.f32 %v11219_v3, %v11242_v18  ;;  %v6387_v18 = vld [vmem:[%s12382_s11] sm:$0xf] }
 0x510   : > { %v7787_v63 = vpop.f32.mrf.mxu0  ;;  %7929 = vmatprep.subr.msk.bf16.mxu0 %vm1658_vm2, %v6387_v18 }
 0x511   : > { %13019 = vst [vmem:[#allocation58_spill] sm:$0xff] %v11344_v52  ;;  %v11354_v55 = vadd.f32 %v7787_v63, %v11217_v5  ;;  %v11366_v52 = vpop.f32.mrf.mxu1  ;;  %v4756_v5 = vadd.f32 %v11235_v16, %v4426_v53 }
 0x512   : > { %v4743_v42 = vpop.f32.mrf.mxu0 }
 0x513   : > { %13020 = vst [vmem:[#allocation88_spill] sm:$0xff] %v11354_v55  ;;  %v11364_v61 = vadd.f32 %v4743_v42, %v11221_v34  ;;  %v11372_v55 = vrot.slane %v5415_v6, %v13022_v48  ;;  %v11376_v34 = vpop.f32.mrf.mxu1  ;;  %v5054_v38 = vadd.f32 %v11214_v37, %v4756_v5  ;;  %v5057_v5 = vadd.f32 %v11226_v59, %v11245_v9 }
 0x514   : > { %v7826_v44 = vpop.f32.mrf.mxu0 }
 0x515   : > { %v5385_v63 = vadd.f32 %v7826_v44, %v5055_v24  ;;  %v11384_v14 = vpop.f32.mrf.mxu1 }
 0x516   : > { %v5256_v19 = vpop.f32.mrf.mxu0 }
 0x517   : > { %v5422_v43 = vmul.f32 %v11357_v36, %v5385_v63  ;;  %v5383_v17 = vadd.f32 %v5256_v19, %v5053_v26  ;;  %v13023_v26 = vld [vmem:[#allocation17_spill] sm:$0xff] }
 0x518   : > { %v7827_v47 = vpop.f32.mrf.mxu0 }
 0x519   : > { %v5458_v42 = vadd.f32 %v11372_v55, %v5422_v43  ;;  %v5386_v27 = vadd.f32 %v7827_v47, %v5056_v33  ;;  %v5420_v53 = vmul.f32 %v11357_v36, %v5383_v17 }
 0x51a   : > { %v5259_v2 = vpop.f32.mrf.mxu0 }
 0x51b   : > { %v7132_v16 = vclamps-f32 %v5458_v42, 1.0  ;;  %v5423_v6 = vmul.f32 %v11357_v36, %v5386_v27  ;;  %v5384_v24 = vadd.f32 %v5259_v2, %v5054_v38  ;;  %v5456_v47 = vadd.f32 %v11372_v55, %v5420_v53  ;;  %v11400_v42 = vpop.f32.mrf.mxu1 }
 0x51c   : > { %v7830_v44 = vpop.f32.mrf.mxu0  ;;  %v5060_v38 = vadd.f32 %v11233_v13, %v11250_v54  ;;  %v6437_v2 = vsel %vm1658_vm2, %v6387_v18, 0  ;;  %v5063_v53 = vadd.f32 %v11239_v25, %v11258_v11  ;;  %v5061_v13 = vadd.f32 %v11247_v20, %v11261_v31 }
 0x51d   : > { %v11387_v63 = vadd.f32 %v7132_v16, %v13023_v26  ;;  %v5459_v37 = vadd.f32 %v11372_v55, %v5423_v6  ;;  %v5421_v19 = vmul.f32 %v11357_v36, %v5384_v24  ;;  %v5389_v33 = vadd.f32 %v7830_v44, %v5059_v57  ;;  %v13024_v6 = vld [vmem:[#allocation19_spill] sm:$0xff]  ;;  %7891 = vmatpush3.bf16.msra.mxu0 %v6437_v2  ;;  %v7817_v20 = vpop.f32.mrf.mxu1 }
 0x51e   : > { %v5272_v43 = vpop.f32.mrf.mxu0  ;;  %v5058_v16 = vadd.f32 %v11237_v49, %v11253_v28  ;;  %v5064_v49 = vadd.f32 %v11255_v32, %v11266_v23  ;;  %v7130_v28 = vclamps-f32 %v5456_v47, 1.0  ;;  %v11439_v47 = vadd.f32 %v11303_v22, %v11290_v45 }
 0x51f   : > { %v5618_v17 = vmul.f32 0.70710677, %v11387_v63  ;;  %v7133_v3 = vclamps-f32 %v5459_v37, 1.0  ;;  %v5426_v59 = vmul.f32 %v11357_v36, %v5389_v33  ;;  %v5387_v9 = vadd.f32 %v5272_v43, %v5057_v5 }
 0x520   : > { %v7831_v27 = vpop.f32.mrf.mxu0  ;;  %v5457_v54 = vadd.f32 %v11372_v55, %v5421_v19  ;;  %v5062_v37 = vadd.f32 %v11263_v51, %v11269_v7  ;;  %v5067_v5 = vadd.f32 %v11271_v1, %v11274_v40  ;;  %v11431_v51 = vadd.f32 %v11287_v39, %v11282_v50 }
 0x521   : > { %8098 = verf.f32 %v5618_v17  ;;  %v11410_v24 = vadd.f32 %v7133_v3, %v13024_v6  ;;  %v5424_v57 = vmul.f32 %v11357_v36, %v5387_v9  ;;  %v5390_v44 = vadd.f32 %v7831_v27, %v5060_v38  ;;  %v13025_v3 = vld [vmem:[#allocation18_spill] sm:$0xff] }
 0x522   : > { %v5275_v26 = vpop.f32.mrf.mxu0  ;;  %v5462_v31 = vadd.f32 %v11372_v55, %v5426_v59  ;;  %v5065_v17 = vadd.f32 %v11279_v21, %v11277_v41  ;;  %v11435_v7 = vadd.f32 %v11295_v29, %v11285_v56  ;;  %v7131_v1 = vclamps-f32 %v5457_v54, 1.0  ;;  %v5025_v56 = vpop.f32.mrf.mxu1  ;;  %v13030_v54 = vld [vmem:[#allocation22_spill] sm:$0xff] }
 0x523   : > { %v5619_v25 = vmul.f32 0.70710677, %v11410_v24  ;;  %v5388_v11 = vadd.f32 %v5275_v26, %v5058_v16  ;;  %v5427_v19 = vmul.f32 %v11357_v36, %v5390_v44  ;;  %v5460_v43 = vadd.f32 %v11372_v55, %v5424_v57 }
 0x524   : > { %v7834_v33 = vpop.f32.mrf.mxu0  ;;  %v11442_v18 = vadd.f32 %v7130_v28, %v13025_v3  ;;  %v11447_v21 = vadd.f32 %v11311_v10, %v11293_v12  ;;  %v11451_v50 = vadd.f32 %v11319_v0, %v11298_v35  ;;  %v7136_v39 = vclamps-f32 %v5462_v31, 1.0  ;;  %v13026_v10 = vld [vmem:[#allocation73_spill] sm:$0xff]  ;;  %v13027_v0 = vld [vmem:[#allocation20_spill] sm:$0xff]  ;;  %v13033_v31 = vld [vmem:[#allocation23_spill] sm:$0xff] }
 0x525   : > { %8100 = verf.f32 %v5619_v25  ;;  %v5425_v32 = vmul.f32 %v11357_v36, %v5388_v11  ;;  %v5393_v23 = vadd.f32 %v7834_v33, %v5063_v53  ;;  %v5463_v38 = vadd.f32 %v11372_v55, %v5427_v19  ;;  %v13031_v25 = vld [vmem:[#allocation43_spill] sm:$0xff]  ;;  %v13032_v11 = vld [vmem:[#allocation9_spill] sm:$0xff] }
 0x526   : > { %v5288_v40 = vpop.f32.mrf.mxu0  ;;  %v11456_v22 = vadd.f32 %v11327_v58, %v11301_v8  ;;  %v11460_v59 = vadd.f32 %v11335_v4, %v11306_v62  ;;  %v7134_v9 = vclamps-f32 %v5460_v43, 1.0  ;;  %v11465_v35 = vadd.f32 %v11349_v60, %v13026_v10  ;;  %v13028_v8 = vld [vmem:[#allocation76_spill] sm:$0xff]  ;;  %v7820_v60 = vpop.f32.mrf.mxu1  ;;  %v13034_v3 = vld [vmem:[#allocation25_spill] sm:$0xff] }
 0x527   : > { %v5391_v41 = vadd.f32 %v5288_v40, %v5061_v13  ;;  %v5461_v29 = vadd.f32 %v11372_v55, %v5425_v32  ;;  %v5430_v12 = vmul.f32 %v11357_v36, %v5393_v23  ;;  %v11468_v27 = vadd.f32 %v7131_v1, %v13027_v0  ;;  %v13029_v62 = vld [vmem:[#allocation40_spill] sm:$0xff] }
 0x528   : > { %v7835_v45 = vpop.f32.mrf.mxu0  ;;  %v11473_v58 = vadd.f32 %v11366_v52, %v13028_v8  ;;  %v11477_v4 = vadd.f32 %v11376_v34, %v13029_v62  ;;  %v5616_v6 = vmul.f32 0.70710677, %v11442_v18  ;;  %v7137_v13 = vclamps-f32 %v5463_v38, 1.0 }
 0x529   : > { %v5428_v2 = vmul.f32 %v11357_v36, %v5391_v41  ;;  %v5394_v16 = vadd.f32 %v7835_v45, %v5064_v49  ;;  %v11481_v57 = vadd.f32 %v7136_v39, %v13030_v54  ;;  %v7135_v44 = vclamps-f32 %v5461_v29, 1.0  ;;  %v5038_v39 = vpop.f32.mrf.mxu1 }
 0x52a   : > { %v5291_v53 = vpop.f32.mrf.mxu0  ;;  %v11486_v52 = vadd.f32 %v11384_v14, %v13031_v25  ;;  %v11490_v34 = vadd.f32 %v11400_v42, %v13032_v11  ;;  %v11493_v19 = vadd.f32 %v7134_v9, %v13033_v31  ;;  %v5466_v33 = vadd.f32 %v11372_v55, %v5430_v12  ;;  %v13036_v25 = vld [vmem:[#allocation28_spill] sm:$0xff] }
 0x52b   : > { %v5431_v26 = vmul.f32 %v11357_v36, %v5394_v16  ;;  %v5392_v49 = vadd.f32 %v5291_v53, %v5062_v37  ;;  %v11497_v32 = vadd.f32 %v7817_v20, %v11330_v30  ;;  %v5586_v37 = vmul.f32 0.5, %v11387_v63  ;;  %v13035_v30 = vld [vmem:[#allocation26_spill] sm:$0xff] }
 0x52c   : > { %v7838_v28 = vpop.f32.mrf.mxu0  ;;  %v5617_v23 = vmul.f32 0.70710677, %v11468_v27  ;;  %v5464_v14 = vadd.f32 %v11372_v55, %v5428_v2  ;;  %v11503_v42 = vadd.f32 %v7137_v13, %v13034_v3  ;;  %8102 = verf.f32 %v5616_v6 }
 0x52d   : > { %v5467_v38 = vadd.f32 %v11372_v55, %v5431_v26  ;;  %v5397_v41 = vadd.f32 %v7838_v28, %v5067_v5  ;;  %v5622_v29 = vmul.f32 0.70710677, %v11481_v57  ;;  %v11508_v20 = vadd.f32 %v7135_v44, %v13035_v30  ;;  %v7821_v44 = vpop.f32.mrf.mxu1 }
 0x52e   : > { %v8099_v43 = vpop.eup %8098  ;;  %v5304_v1 = vpop.f32.mrf.mxu0  ;;  %v5429_v63 = vmul.f32 %v11357_v36, %v5392_v49  ;;  %v5587_v12 = vmul.f32 0.5, %v11410_v24  ;;  %v5620_v10 = vmul.f32 0.70710677, %v11493_v19  ;;  %v7140_v0 = vclamps-f32 %v5466_v33, 1.0 }
 0x52f   : > { %v5682_v40 = vadd.f32 1.0, %v8099_v43  ;;  %8104 = verf.f32 %v5617_v23  ;;  %v7138_v16 = vclamps-f32 %v5464_v14, 1.0  ;;  %v5434_v5 = vmul.f32 %v11357_v36, %v5397_v41  ;;  %v13038_v43 = vld [vmem:[#allocation29_spill] sm:$0xff]  ;;  %v13039_v23 = vld [vmem:[#allocation30_spill] sm:$0xff] }
 0x530   : > { %v7839_v45 = vpop.f32.mrf.mxu0  ;;  %v5395_v53 = vadd.f32 %v5304_v1, %v5065_v17  ;;  %v5623_v6 = vmul.f32 0.70710677, %v11503_v42  ;;  %v7141_v13 = vclamps-f32 %v5467_v38, 1.0  ;;  %v11516_v54 = vadd.f32 %v5025_v56, %v11333_v15 }
 0x531   : > { %v5714_v9 = vmul.f32 %v5682_v40, %v5586_v37  ;;  %8106 = verf.f32 %v5622_v29  ;;  %v5621_v24 = vmul.f32 0.70710677, %v11508_v20  ;;  %v5465_v26 = vadd.f32 %v11372_v55, %v5429_v63  ;;  %v5041_v40 = vpop.f32.mrf.mxu1 }
 0x532   : > { %v8101_v2 = vpop.eup %8100  ;;  %v5307_v8 = vpop.f32.mrf.mxu0  ;;  %8108 = verf.f32 %v5620_v10  ;;  %v5562_v17 = vadd.f32 %v7140_v0, %v13036_v25  ;;  %v5470_v11 = vadd.f32 %v11372_v55, %v5434_v5  ;;  %v13037_v31 = vmov 0.0  }
 0x533   : > { %vm5778_vm2 = vcmp.lt.f32.partialorder %v5714_v9, 0.0  ;;  %v5683_v62 = vadd.f32 1.0, %v8101_v2  ;;  %vm5746_vm7 = vcmp.gt.f32.partialorder %v5714_v9, 0.0  ;;  %v11524_v37 = vadd.f32 %v7138_v16, %v13038_v43  ;;  %v13041_v2 = vld [vmem:[#allocation88_spill] sm:$0xff] }
 0x534   : > { %v7842_v49 = vpop.f32.mrf.mxu0  ;;  %v5810_v33 = vsel %vm5778_vm2, -1.0, %v13037_v31  ;;  %v5432_v15 = vmul.f32 %v11357_v36, %v5395_v53  ;;  %8110 = verf.f32 %v5623_v6  ;;  %v11528_v14 = vadd.f32 %v7141_v13, %v13039_v23 }
 0x535   : > { %v5715_v28 = vmul.f32 %v5683_v62, %v5587_v12  ;;  %v11531_v1 = vadd.f32 %v7820_v60, %v11340_v46  ;;  %8112 = verf.f32 %v5621_v24  ;;  %v7139_v38 = vclamps-f32 %v5465_v26, 1.0  ;;  %v13040_v12 = vld [vmem:[#allocation58_spill] sm:$0xff]  ;;  %v13042_v26 = vld [vmem:[#allocation31_spill] sm:$0xff] }
 0x536   : > { %v5320_v56 = vpop.f32.mrf.mxu0  ;;  %v11534_v29 = vsel %vm5746_vm7, 1.0, %v5810_v33  ;;  %v5626_v63 = vmul.f32 0.70710677, %v5562_v17  ;;  %v7144_v9 = vclamps-f32 %v5470_v11, 1.0  ;;  %v11539_v10 = vadd.f32 %v5038_v39, %v13040_v12 }
 0x537   : > { %vm5747_vm8 = vcmp.gt.f32.partialorder %v5715_v28, 0.0  ;;  %vm5779_vm9 = vcmp.lt.f32.partialorder %v5715_v28, 0.0  ;;  %v5624_v46 = vmul.f32 0.70710677, %v11524_v37  ;;  %v5468_v60 = vadd.f32 %v11372_v55, %v5432_v15 }
 0x538   : > { %v5811_v3 = vsel %vm5779_vm9, -1.0, %v13037_v31  ;;  %v7843_v41 = vpop.f32.mrf.mxu0  ;;  %v11546_v16 = vadd.f32 %v7821_v44, %v13041_v2  ;;  %v11549_v5 = vadd.f32 %v5041_v40, %v11364_v61  ;;  %v5627_v53 = vmul.f32 0.70710677, %v11528_v14  ;;  %v13043_v44 = vld [vmem:[#allocation33_spill] sm:$0xff] }
 0x539   : > { %v11536_v30 = vsel %vm5747_vm8, 1.0, %v5811_v3  ;;  %v5398_v62 = vadd.f32 %v7839_v45, %v11431_v51  ;;  %v5584_v39 = vmul.f32 0.5, %v11442_v18  ;;  %v5585_v13 = vmul.f32 0.5, %v11468_v27  ;;  %v8103_v25 = vpop.eup %8102 }
 0x53a   : > { %v5873_v0 = vpack.c.bf16 %v11536_v30, %v11534_v29  ;;  %v5323_v6 = vpop.f32.mrf.mxu0  ;;  %v11556_v24 = vmul.f32 0.5, %v11481_v57  ;;  %v5561_v28 = vadd.f32 %v7139_v38, %v13042_v26  ;;  %8114 = verf.f32 %v5626_v63 }
 0x53b   : > { %v11560_v11 = vadd.f32 %v7144_v9, %v13043_v44  ;;  %v5435_v61 = vmul.f32 %v11357_v36, %v5398_v62  ;;  %v5396_v33 = vadd.f32 %v5307_v8, %v11435_v7  ;;  %v11565_v51 = vmul.f32 0.5, %v11493_v19 }
 0x53c   : > { %8116 = verf.f32 %v5624_v46  ;;  %v7142_v18 = vclamps-f32 %v5468_v60, 1.0  ;;  %v5401_v27 = vadd.f32 %v7842_v49, %v11439_v47  ;;  %v8105_v57 = vpop.eup %8104  ;;  %v5399_v15 = vadd.f32 %v5320_v56, %v11447_v21  ;;  %v7846_v23 = vpop.f32.mrf.mxu0  ;;  %v13044_v21 = vld [vmem:[#allocation37_spill] sm:$0xff]  ;;  %v13045_v46 = vld [vmem:[#allocation38_spill] sm:$0xff] }
 0x53d   : > { %8118 = verf.f32 %v5627_v53  ;;  %v5471_v45 = vadd.f32 %v11372_v55, %v5435_v61  ;;  %v5433_v43 = vmul.f32 %v11357_v36, %v5396_v33  ;;  %v11572_v40 = vmul.f32 0.5, %v11503_v42 }
 0x53e   : > { %v11575_v7 = vmul.f32 0.5, %v11508_v20  ;;  %v5625_v19 = vmul.f32 0.70710677, %v5561_v28  ;;  %v5438_v8 = vmul.f32 %v11357_v36, %v5401_v27  ;;  %v8107_v3 = vpop.eup %8106  ;;  %v5680_v47 = vadd.f32 1.0, %v8103_v25  ;;  %v5336_v26 = vpop.f32.mrf.mxu0 }
 0x53f   : > { %v5630_v49 = vmul.f32 0.70710677, %v11560_v11  ;;  %v7145_v38 = vclamps-f32 %v5471_v45, 1.0  ;;  %v5469_v63 = vadd.f32 %v11372_v55, %v5433_v43  ;;  %v8109_v9 = vpop.eup %8108  ;;  %v11580_v12 = vmul.f32 0.5, %v5562_v17 }
 0x540   : > { %v5564_v56 = vadd.f32 %v7142_v18, %v13044_v21  ;;  %v5474_v42 = vadd.f32 %v11372_v55, %v5438_v8  ;;  %v5436_v20 = vmul.f32 %v11357_v36, %v5399_v15  ;;  %v5402_v53 = vadd.f32 %v7843_v41, %v11451_v50  ;;  %v13046_v15 = vld [vmem:[#allocation39_spill] sm:$0xff]  ;;  %v7847_v8 = vpop.f32.mrf.mxu0 }
 0x541   : > { %v11586_v60 = vadd.f32 %v7145_v38, %v13045_v46  ;;  %v7143_v2 = vclamps-f32 %v5469_v63, 1.0  ;;  %v5400_v62 = vadd.f32 %v5323_v6, %v11456_v22  ;;  %v8111_v25 = vpop.eup %8110  ;;  %v5681_v44 = vadd.f32 1.0, %v8105_v57  ;;  %v13047_v57 = vld [vmem:[#allocation41_spill] sm:$0xff] }
 0x542   : > { %v11591_v17 = vmul.f32 0.5, %v11524_v37  ;;  %8120 = verf.f32 %v5625_v19  ;;  %v7148_v61 = vclamps-f32 %v5474_v42, 1.0  ;;  %v8113_v33 = vpop.eup %8112  ;;  %v11593_v18 = vmul.f32 %v5680_v47, %v5584_v39  ;;  %v13048_v42 = vld [vmem:[#allocation42_spill] sm:$0xff] }
 0x543   : > { %v5686_v27 = vadd.f32 1.0, %v8107_v3  ;;  %8122 = verf.f32 %v5630_v49  ;;  %v5472_v45 = vadd.f32 %v11372_v55, %v5436_v20  ;;  %v5628_v43 = vmul.f32 0.70710677, %v5564_v56 }
 0x544   : > { %v11597_v50 = vadd.f32 %v7143_v2, %v13046_v15  ;;  %v5439_v22 = vmul.f32 %v11357_v36, %v5402_v53  ;;  %v5437_v41 = vmul.f32 %v11357_v36, %v5400_v62  ;;  %v11602_v37 = vmul.f32 0.5, %v11528_v14 }
 0x545   : > { %v5631_v6 = vmul.f32 0.70710677, %v11586_v60  ;;  %v11606_v39 = vadd.f32 %v7148_v61, %v13047_v57  ;;  %v7146_v19 = vclamps-f32 %v5472_v45, 1.0  ;;  %v5713_v3 = vmul.f32 %v5681_v44, %v5585_v13  ;;  %v5339_v44 = vpop.f32.mrf.mxu0 }
 0x546   : > { %v5684_v47 = vadd.f32 1.0, %v8109_v9  ;;  %v11608_v49 = vmul.f32 0.5, %v5561_v28  ;;  %v5475_v38 = vadd.f32 %v11372_v55, %v5439_v22  ;;  %v5687_v63 = vadd.f32 1.0, %v8111_v25 }
 0x547   : > { %v5685_v21 = vadd.f32 1.0, %v8113_v33  ;;  %v11612_v20 = vadd.f32 %v7146_v19, %v13048_v42  ;;  %v5473_v14 = vadd.f32 %v11372_v55, %v5437_v41  ;;  %v8115_v46 = vpop.eup %8114  ;;  %v11616_v2 = vmul.f32 %v5686_v27, %v11556_v24  ;;  %v13049_v33 = vld [vmem:[#allocation45_spill] sm:$0xff] }
 0x548   : > { %8124 = verf.f32 %v5628_v43  ;;  %v5629_v53 = vmul.f32 0.70710677, %v11597_v50  ;;  %v7149_v13 = vclamps-f32 %v5475_v38, 1.0  ;;  %v11620_v28 = vmul.f32 0.5, %v11560_v11 }
 0x549   : > { %v8117_v9 = vpop.eup %8116  ;;  %8126 = verf.f32 %v5631_v6  ;;  %v5634_v62 = vmul.f32 0.70710677, %v11606_v39  ;;  %v5632_v25 = vmul.f32 0.70710677, %v11612_v20  ;;  %v7147_v24 = vclamps-f32 %v5473_v14, 1.0 }
 0x54a   : > { %v8119_v61 = vpop.eup %8118  ;;  %v11625_v45 = vadd.f32 %v7149_v13, %v13049_v33  ;;  %v5405_v27 = vadd.f32 %v7846_v23, %v11460_v59  ;;  %v5403_v43 = vadd.f32 %v5336_v26, %v11465_v35  ;;  %v11630_v15 = vmul.f32 %v5684_v47, %v11565_v51  ;;  %v7850_v51 = vpop.f32.mrf.mxu0  ;;  %v13050_v23 = vld [vmem:[#allocation47_spill] sm:$0xff] }
 0x54b   : > { %v11633_v11 = vmul.f32 %v5687_v63, %v11572_v40  ;;  %v11636_v22 = vmul.f32 %v5685_v21, %v11575_v7  ;;  %v11638_v41 = vmul.f32 0.5, %v5564_v56  ;;  %v5690_v6 = vadd.f32 1.0, %v8115_v46 }
 0x54c   : > { %v5688_v57 = vadd.f32 1.0, %v8117_v9  ;;  %8128 = verf.f32 %v5629_v53  ;;  %v5635_v19 = vmul.f32 0.70710677, %v11625_v45  ;;  %v5691_v38 = vadd.f32 1.0, %v8119_v61  ;;  %v5352_v9 = vpop.f32.mrf.mxu0 }
 0x54d   : > { %8130 = verf.f32 %v5634_v62  ;;  %v5442_v59 = vmul.f32 %v11357_v36, %v5405_v27  ;;  %v5440_v35 = vmul.f32 %v11357_v36, %v5403_v43  ;;  %v11644_v40 = vadd.f32 %v7147_v24, %v13050_v23  ;;  %v13051_v24 = vld [vmem:[#allocation54_spill] sm:$0xff]  ;;  %v13052_v43 = vld [vmem:[#allocation57_spill] sm:$0xff] }
 0x54e   : > { %8132 = verf.f32 %v5632_v25  ;;  %vm5744_vm10 = vcmp.gt.f32.partialorder %v11593_v18, 0.0  ;;  %vm5745_vm12 = vcmp.gt.f32.partialorder %v5713_v3, 0.0  ;;  %vm5776_vm13 = vcmp.lt.f32.partialorder %v11593_v18, 0.0 }
 0x54f   : > { %v8121_v7 = vpop.eup %8120  ;;  %v5478_v56 = vadd.f32 %v11372_v55, %v5442_v59  ;;  %v5476_v26 = vadd.f32 %v11372_v55, %v5440_v35  ;;  %vm5777_vm14 = vcmp.lt.f32.partialorder %v5713_v3, 0.0  ;;  %8134 = verf.f32 %v5635_v19 }
 0x550   : > { %v8123_v47 = vpop.eup %8122  ;;  %v5808_v63 = vsel %vm5776_vm13, -1.0, %v13037_v31  ;;  %v5809_v21 = vsel %vm5777_vm14, -1.0, %v13037_v31  ;;  %v5406_v42 = vadd.f32 %v7847_v8, %v11473_v58  ;;  %v5404_v61 = vadd.f32 %v5339_v44, %v11477_v4 }
 0x551   : > { %v7152_v14 = vclamps-f32 %v5478_v56, 1.0  ;;  %v7150_v46 = vclamps-f32 %v5476_v26, 1.0  ;;  %v5840_v53 = vsel %vm5744_vm10, 1.0, %v5808_v63  ;;  %v5841_v13 = vsel %vm5745_vm12, 1.0, %v5809_v21 }
 0x552   : > { %v5872_v62 = vpack.c.bf16 %v5841_v13, %v5840_v53  ;;  %v5443_v25 = vmul.f32 %v11357_v36, %v5406_v42  ;;  %v5409_v18 = vadd.f32 %v7850_v51, %v11486_v52  ;;  %v5689_v3 = vadd.f32 1.0, %v8121_v7  ;;  %v11677_v51 = vpop.f32.mrf.mxu0 }
 0x553   : > { %v5633_v33 = vmul.f32 0.70710677, %v11644_v40  ;;  %v5574_v27 = vadd.f32 %v7152_v14, %v13051_v24  ;;  %v11659_v19 = vadd.f32 %v7150_v46, %v13052_v43  ;;  %v11662_v58 = vmul.f32 %v5690_v6, %v11580_v12 }
 0x554   : > { %v5694_v8 = vadd.f32 1.0, %v8123_v47  ;;  %7858 = vmatprep.mubr.msk.bf16.mxu1 %vm2247_vm11, %v5872_v62  ;;  %v5479_v59 = vadd.f32 %v11372_v55, %v5443_v25  ;;  %v5441_v4 = vmul.f32 %v11357_v36, %v5404_v61  ;;  %v11668_v52 = vmul.f32 %v5688_v57, %v11591_v17  ;;  %v5355_v21 = vpop.f32.mrf.mxu0  ;;  %v13054_v62 = vld [vmem:[#allocation65_spill] sm:$0xff]  ;;  %v13055_v61 = vld [vmem:[#allocation68_spill] sm:$0xff] }
 0x555   : > { %v8125_v44 = vpop.eup %8124  ;;  %v5599_v35 = vmul.f32 0.5, %v11586_v60  ;;  %7859 = vmatmul.mubr.msk.bf16.vlgmr.msra.gmra.mxu1 %vm2247_vm11, %v5873_v0  ;;  %v5446_v12 = vmul.f32 %v11357_v36, %v5409_v18  ;;  %v5407_v6 = vadd.f32 %v5352_v9, %v11490_v34  ;;  %vm5782_vm15 = vcmp.lt.f32.partialorder %v11616_v2, 0.0 }
 0x556   : > { %v8127_v23 = vpop.eup %8126  ;;  %vm5783_vm1 = vcmp.lt.f32.partialorder %v11633_v11, 0.0  ;;  %v11682_v17 = vmul.f32 %v5691_v38, %v11602_v37  ;;  %v5597_v60 = vmul.f32 0.5, %v11597_v50  ;;  %v5638_v57 = vmul.f32 0.70710677, %v5574_v27  ;;  %v13053_v38 = vld [vmem:[#allocation64_spill] sm:$0xff]  ;;  %v7854_v24 = vpop.f32.mrf.mxu0 }
 0x557   : > { %v7153_v29 = vclamps-f32 %v5479_v59, 1.0  ;;  %v11686_v30 = vmul.f32 %v5689_v3, %v11608_v49  ;;  %v11689_v0 = vmul.f32 0.5, %v11606_v39  ;;  %8136 = verf.f32 %v5633_v33 }
 0x558   : > { %v5636_v34 = vmul.f32 0.70710677, %v11659_v19  ;;  %vm5750_vm3 = vcmp.gt.f32.partialorder %v11616_v2, 0.0  ;;  %vm5751_vm4 = vcmp.gt.f32.partialorder %v11633_v11, 0.0  ;;  %v11695_v37 = vmul.f32 %v5694_v8, %v11620_v28 }
 0x559   : > { %v11698_v50 = vmul.f32 0.5, %v11612_v20  ;;  %v11701_v7 = vadd.f32 %v7153_v29, %v13053_v38  ;;  %v5477_v49 = vadd.f32 %v11372_v55, %v5441_v4  ;;  %v8129_v39 = vpop.eup %8128  ;;  %v5692_v56 = vadd.f32 1.0, %v8125_v44  ;;  %v13056_v29 = vld [vmem:[#allocation71_spill] sm:$0xff] }
 0x55a   : > { %v11705_v26 = vmul.f32 0.5, %v11625_v45  ;;  %v5482_v47 = vadd.f32 %v11372_v55, %v5446_v12  ;;  %v5444_v63 = vmul.f32 %v11357_v36, %v5407_v6  ;;  %v8131_v28 = vpop.eup %8130  ;;  %v5695_v42 = vadd.f32 1.0, %v8127_v23 }
 0x55b   : > { %8138 = verf.f32 %v5638_v57  ;;  %v5639_v20 = vmul.f32 0.70710677, %v11701_v7  ;;  %vm5748_vm5 = vcmp.gt.f32.partialorder %v11630_v15, 0.0  ;;  %v8133_v14 = vpop.eup %8132  ;;  %v7151_v46 = vclamps-f32 %v5477_v49, 1.0 }
 0x55c   : > { %8140 = verf.f32 %v5636_v34  ;;  %v7156_v53 = vclamps-f32 %v5482_v47, 1.0  ;;  %v5480_v13 = vadd.f32 %v11372_v55, %v5444_v63  ;;  %v5693_v45 = vadd.f32 1.0, %v8129_v39  ;;  %v8135_v9 = vpop.eup %8134 }
 0x55d   : > { %8142 = verf.f32 %v5639_v20  ;;  %vm5780_vm2 = vcmp.lt.f32.partialorder %v11630_v15, 0.0  ;;  %vm5781_vm7 = vcmp.lt.f32.partialorder %v11636_v22, 0.0  ;;  %v5573_v25 = vadd.f32 %v7151_v46, %v13054_v62 }
 0x55e   : > { %v11716_v18 = vadd.f32 %v7156_v53, %v13055_v61  ;;  %v7154_v3 = vclamps-f32 %v5480_v13, 1.0  ;;  %v5812_v33 = vsel %vm5780_vm2, -1.0, %v13037_v31  ;;  %v11720_v43 = vmul.f32 %v5692_v56, %v11638_v41 }
 0x55f   : > { %v11723_v8 = vmul.f32 0.5, %v11644_v40  ;;  %vm5749_vm8 = vcmp.gt.f32.partialorder %v11636_v22, 0.0  ;;  %v5813_v59 = vsel %vm5781_vm7, -1.0, %v13037_v31  ;;  %v11727_v4 = vmul.f32 %v5695_v42, %v5599_v35 }
 0x560   : > { %v5698_v44 = vadd.f32 1.0, %v8131_v28  ;;  %v11729_v12 = vmul.f32 0.5, %v5574_v27  ;;  %v5642_v6 = vmul.f32 0.70710677, %v11716_v18  ;;  %v11732_v23 = vmul.f32 %v5693_v45, %v5597_v60  ;;  %v5368_v60 = vpop.f32.mrf.mxu0 }
 0x561   : > { %v11735_v57 = vmul.f32 0.5, %v11659_v19  ;;  %v5637_v41 = vmul.f32 0.70710677, %v5573_v25  ;;  %v5844_v40 = vsel %vm5748_vm5, 1.0, %v5812_v33  ;;  %v11740_v22 = vadd.f32 %v7154_v3, %v13056_v29  ;;  %v13059_v29 = vld [vmem:[#allocation82_spill] sm:$0xff] }
 0x562   : > { %v5845_v34 = vsel %vm5749_vm8, 1.0, %v5813_v59  ;;  %v5814_v27 = vsel %vm5782_vm15, -1.0, %v13037_v31  ;;  %v5815_v35 = vsel %vm5783_vm1, -1.0, %v13037_v31  ;;  %v5696_v38 = vadd.f32 1.0, %v8133_v14 }
 0x563   : > { %v5699_v19 = vadd.f32 1.0, %v8135_v9  ;;  %8144 = verf.f32 %v5642_v6  ;;  %v5874_v49 = vpack.c.bf16 %v5845_v34, %v5844_v40  ;;  %v5846_v15 = vsel %vm5750_vm3, 1.0, %v5814_v27  ;;  %v13060_v27 = vld [vmem:[#allocation83_spill] sm:$0xff] }
 0x564   : > { %v5847_v39 = vsel %vm5751_vm4, 1.0, %v5815_v35  ;;  %v5410_v56 = vadd.f32 %v11677_v51, %v11497_v32  ;;  %v5408_v47 = vadd.f32 %v5355_v21, %v11516_v54  ;;  %v8137_v63 = vpop.eup %8136  ;;  %8146 = verf.f32 %v5637_v41 }
 0x565   : > { %7862 = vmatprep.mubr.msk.bf16.mxu1 %vm2247_vm11, %v5874_v49  ;;  %v5875_v28 = vpack.c.bf16 %v5847_v39, %v5846_v15  ;;  %v5413_v42 = vadd.f32 %v7854_v24, %v11531_v1  ;;  %v5411_v20 = vadd.f32 %v5368_v60, %v11539_v10  ;;  %vm5786_vm9 = vcmp.lt.f32.partialorder %v11662_v58, 0.0 }
 0x566   : > { %v11760_v2 = vmul.f32 %v5698_v44, %v11689_v0  ;;  %v5640_v11 = vmul.f32 0.70710677, %v11740_v22  ;;  %v5447_v32 = vmul.f32 %v11357_v36, %v5410_v56  ;;  %v5445_v54 = vmul.f32 %v11357_v36, %v5408_v47  ;;  %v13058_v44 = vld [vmem:[#allocation77_spill] sm:$0xff] }
 0x567   : > { %vm5787_vm10 = vcmp.lt.f32.partialorder %v11682_v17, 0.0  ;;  %v11767_v51 = vmul.f32 %v5696_v38, %v11698_v50  ;;  %v5607_v1 = vmul.f32 0.5, %v11701_v7  ;;  %7863 = vmatmul.mubr.msk.bf16.gmra.mxu1 %vm2247_vm11, %v5875_v28  ;;  %v5450_v10 = vmul.f32 %v11357_v36, %v5413_v42  ;;  %v7855_v38 = vpop.f32.mrf.mxu0 }
 0x568   : > { %v5448_v0 = vmul.f32 %v11357_v36, %v5411_v20  ;;  %v8139_v21 = vpop.eup %8138  ;;  %vm5754_vm12 = vcmp.gt.f32.partialorder %v11662_v58, 0.0  ;;  %vm5755_vm13 = vcmp.gt.f32.partialorder %v11682_v17, 0.0  ;;  %v11776_v14 = vmul.f32 %v5699_v19, %v11705_v26 }
 0x569   : > { %v5697_v46 = vadd.f32 1.0, %v8137_v63  ;;  %v5483_v50 = vadd.f32 %v11372_v55, %v5447_v32  ;;  %v5481_v53 = vadd.f32 %v11372_v55, %v5445_v54  ;;  %v8141_v7 = vpop.eup %8140  ;;  %v11780_v13 = vmul.f32 0.5, %v5573_v25  ;;  %v13057_v25 = vld [vmem:[#allocation75_spill] sm:$0xff]  ;;  %v5371_v32 = vpop.f32.mrf.mxu0 }
 0x56a   : > { %v5486_v45 = vadd.f32 %v11372_v55, %v5450_v10  ;;  %v5484_v9 = vadd.f32 %v11372_v55, %v5448_v0  ;;  %vm5785_vm14 = vcmp.lt.f32.partialorder %v11686_v30, 0.0  ;;  %v8143_v62 = vpop.eup %8142  ;;  %8148 = verf.f32 %v5640_v11 }
 0x56b   : > { %v7157_v61 = vclamps-f32 %v5483_v50, 1.0  ;;  %v7155_v3 = vclamps-f32 %v5481_v53, 1.0  ;;  %vm5784_vm15 = vcmp.lt.f32.partialorder %v11668_v52, 0.0  ;;  %v5702_v26 = vadd.f32 1.0, %v8139_v21 }
 0x56c   : > { %v7160_v33 = vclamps-f32 %v5486_v45, 1.0  ;;  %v7158_v24 = vclamps-f32 %v5484_v9, 1.0  ;;  %vm5753_vm1 = vcmp.gt.f32.partialorder %v11686_v30, 0.0  ;;  %vm5790_vm3 = vcmp.lt.f32.partialorder %v11695_v37, 0.0 }
 0x56d   : > { %vm5791_vm4 = vcmp.lt.f32.partialorder %v11727_v4, 0.0  ;;  %v5579_v59 = vadd.f32 %v7157_v61, %v13057_v25  ;;  %v5577_v6 = vadd.f32 %v7155_v3, %v13058_v44  ;;  %vm5752_vm5 = vcmp.gt.f32.partialorder %v11668_v52, 0.0 }
 0x56e   : > { %v5817_v41 = vsel %vm5785_vm14, -1.0, %v13037_v31  ;;  %v5700_v40 = vadd.f32 1.0, %v8141_v7  ;;  %v11794_v34 = vadd.f32 %v7160_v33, %v13059_v29  ;;  %v11797_v35 = vadd.f32 %v7158_v24, %v13060_v27 }
 0x56f   : > { %v5816_v60 = vsel %vm5784_vm15, -1.0, %v13037_v31  ;;  %vm5758_vm2 = vcmp.gt.f32.partialorder %v11695_v37, 0.0  ;;  %vm5759_vm7 = vcmp.gt.f32.partialorder %v11727_v4, 0.0  ;;  %v5703_v19 = vadd.f32 1.0, %v8143_v62  ;;  %v13061_v4 = vld [vmem:[#allocation98_spill] sm:$0xff] }
 0x570   : > { %v5643_v49 = vmul.f32 0.70710677, %v5579_v59  ;;  %v5641_v15 = vmul.f32 0.70710677, %v5577_v6  ;;  %v5849_v39 = vsel %vm5753_vm1, 1.0, %v5817_v41  ;;  %v11805_v56 = vmul.f32 %v5697_v46, %v11723_v8  ;;  %v8145_v42 = vpop.eup %8144  ;;  %v13062_v41 = vld [vmem:[#allocation99_spill] sm:$0xff] }
 0x571   : > { %v5610_v47 = vmul.f32 0.5, %v11716_v18  ;;  %v11809_v63 = vmul.f32 0.5, %v11740_v22  ;;  %v5646_v28 = vmul.f32 0.70710677, %v11794_v34  ;;  %vm5794_vm8 = vcmp.lt.f32.partialorder %v11760_v2, 0.0  ;;  %v8147_v54 = vpop.eup %8146 }
 0x572   : > { %vm5795_vm14 = vcmp.lt.f32.partialorder %v11776_v14, 0.0  ;;  %v11815_v20 = vmul.f32 %v5702_v26, %v11729_v12  ;;  %8150 = verf.f32 %v5643_v49  ;;  %v5644_v30 = vmul.f32 0.70710677, %v11797_v35 }
 0x573   : > { %v5848_v8 = vsel %vm5752_vm5, 1.0, %v5816_v60  ;;  %v5706_v18 = vadd.f32 1.0, %v8145_v42  ;;  %8152 = verf.f32 %v5641_v15  ;;  %v5818_v11 = vsel %vm5786_vm9, -1.0, %v13037_v31 }
 0x574   : > { %v5876_v22 = vpack.c.bf16 %v5849_v39, %v5848_v8  ;;  %vm5763_vm15 = vcmp.gt.f32.partialorder %v11776_v14, 0.0  ;;  %v11825_v12 = vmul.f32 %v5700_v40, %v11735_v57  ;;  %v11827_v10 = vmul.f32 %v5703_v19, %v5607_v1 }
 0x575   : > { %8154 = verf.f32 %v5646_v28  ;;  %v5819_v52 = vsel %vm5787_vm10, -1.0, %v13037_v31  ;;  %vm5762_vm1 = vcmp.gt.f32.partialorder %v11760_v2, 0.0  ;;  %v11833_v0 = vmul.f32 0.5, %v5579_v59 }
 0x576   : > { %8156 = verf.f32 %v5644_v30  ;;  %7866 = vmatprep.mubr.msk.bf16.mxu1 %vm2247_vm11, %v5876_v22  ;;  %v5850_v21 = vsel %vm5754_vm12, 1.0, %v5818_v11  ;;  %v5851_v57 = vsel %vm5755_vm13, 1.0, %v5819_v52  ;;  %v11840_v1 = vmul.f32 0.5, %v5577_v6 }
 0x577   : > { %v5877_v46 = vpack.c.bf16 %v5851_v57, %v5850_v21  ;;  %v5414_v50 = vadd.f32 %v7855_v38, %v11546_v16  ;;  %v5412_v53 = vadd.f32 %v5371_v32, %v11549_v5  ;;  %v5701_v7 = vadd.f32 1.0, %v8147_v54  ;;  %v8149_v16 = vpop.eup %8148 }
 0x578   : > { %v11844_v45 = vmul.f32 %v5706_v18, %v5610_v47  ;;  %vm5756_vm9 = vcmp.gt.f32.partialorder %v11720_v43, 0.0  ;;  %vm5757_vm10 = vcmp.gt.f32.partialorder %v11732_v23, 0.0  ;;  %vm5788_vm12 = vcmp.lt.f32.partialorder %v11720_v43, 0.0 }
 0x579   : > { %7867 = vmatmul.mubr.msk.bf16.gmra.mxu1 %vm2247_vm11, %v5877_v46  ;;  %v5451_v58 = vmul.f32 %v11357_v36, %v5414_v50  ;;  %v5449_v17 = vmul.f32 %v11357_v36, %v5412_v53  ;;  %vm5789_vm13 = vcmp.lt.f32.partialorder %v11732_v23, 0.0  ;;  %v5820_v5 = vsel %vm5788_vm12, -1.0, %v13037_v31 }
 0x57a   : > { %v5821_v9 = vsel %vm5789_vm13, -1.0, %v13037_v31  ;;  %v5822_v62 = vsel %vm5790_vm3, -1.0, %v13037_v31  ;;  %v5823_v61 = vsel %vm5791_vm4, -1.0, %v13037_v31  ;;  %vm5798_vm5 = vcmp.lt.f32.partialorder %v11815_v20, 0.0 }
 0x57b   : > { %v5487_v36 = vadd.f32 %v11372_v55, %v5451_v58  ;;  %v5485_v43 = vadd.f32 %v11372_v55, %v5449_v17  ;;  %v5852_v23 = vsel %vm5756_vm9, 1.0, %v5820_v5  ;;  %v5853_v3 = vsel %vm5757_vm10, 1.0, %v5821_v9 }
 0x57c   : > { %v5878_v26 = vpack.c.bf16 %v5853_v3, %v5852_v23  ;;  %v5854_v33 = vsel %vm5758_vm2, 1.0, %v5822_v62  ;;  %v5855_v24 = vsel %vm5759_vm7, 1.0, %v5823_v61  ;;  %vm5760_vm3 = vcmp.gt.f32.partialorder %v11767_v51, 0.0 }
 0x57d   : > { %vm5766_vm12 = vcmp.gt.f32.partialorder %v11815_v20, 0.0  ;;  %v7161_v25 = vclamps-f32 %v5487_v36, 1.0  ;;  %v7159_v59 = vclamps-f32 %v5485_v43, 1.0  ;;  %v5879_v44 = vpack.c.bf16 %v5855_v24, %v5854_v33 }
 0x57e   : > { %vm5761_vm4 = vcmp.gt.f32.partialorder %v11805_v56, 0.0  ;;  %vm5767_vm13 = vcmp.gt.f32.partialorder %v11827_v10, 0.0  ;;  %7870 = vmatprep.mubr.msk.bf16.mxu1 %vm2247_vm11, %v5878_v26  ;;  %vm5792_vm9 = vcmp.lt.f32.partialorder %v11767_v51, 0.0  ;;  %vm5793_vm2 = vcmp.lt.f32.partialorder %v11805_v56, 0.0 }
 0x57f   : > { %v5826_v55 = vsel %vm5794_vm8, -1.0, %v13037_v31  ;;  %v5827_v37 = vsel %vm5795_vm14, -1.0, %v13037_v31  ;;  %v11882_v6 = vadd.f32 %v7161_v25, %v13061_v4  ;;  %v11885_v40 = vadd.f32 %v7159_v59, %v13062_v41  ;;  %v8151_v60 = vpop.eup %8150 }
 0x580   : > { %v5824_v29 = vsel %vm5792_vm9, -1.0, %v13037_v31  ;;  %v5825_v27 = vsel %vm5793_vm2, -1.0, %v13037_v31  ;;  %v5733_v38 = vmul.f32 %v5701_v7, %v11780_v13  ;;  %v5704_v19 = vadd.f32 1.0, %v8149_v16  ;;  %v8153_v39 = vpop.eup %8152 }
 0x581   : > { %v5857_v49 = vsel %vm5761_vm4, 1.0, %v5825_v27  ;;  %v5859_v15 = vsel %vm5763_vm15, 1.0, %v5827_v37  ;;  %v5707_v56 = vadd.f32 1.0, %v8151_v60  ;;  %v5647_v47 = vmul.f32 0.70710677, %v11882_v6  ;;  %7871 = vmatmul.mubr.msk.bf16.gmra.mxu1 %vm2247_vm11, %v5879_v44 }
 0x582   : > { %v5856_v28 = vsel %vm5760_vm3, 1.0, %v5824_v29  ;;  %v5858_v42 = vsel %vm5762_vm1, 1.0, %v5826_v55  ;;  %v8155_v30 = vpop.eup %8154  ;;  %v5705_v8 = vadd.f32 1.0, %v8153_v39  ;;  %v5645_v13 = vmul.f32 0.70710677, %v11885_v40 }
 0x583   : > { %v5880_v18 = vpack.c.bf16 %v5857_v49, %v5856_v28  ;;  %v5881_v22 = vpack.c.bf16 %v5859_v15, %v5858_v42  ;;  %v8157_v14 = vpop.eup %8156  ;;  %vm5799_vm7 = vcmp.lt.f32.partialorder %v11827_v10, 0.0  ;;  %vm5770_vm8 = vcmp.gt.f32.partialorder %v11844_v45, 0.0 }
 0x584   : > { %v5739_v11 = vmul.f32 %v5707_v56, %v11833_v0  ;;  %8158 = verf.f32 %v5647_v47  ;;  %vm5802_vm14 = vcmp.lt.f32.partialorder %v11844_v45, 0.0  ;;  %v5736_v51 = vmul.f32 %v5704_v19, %v11809_v63  ;;  %v13063_v19 = vld [vmem:[#allocation3_spill] sm:$0xff] }
 0x585   : > { %8160 = verf.f32 %v5645_v13  ;;  %7874 = vmatprep.mubr.msk.bf16.mxu1 %vm2247_vm11, %v5880_v18  ;;  %vm5764_vm15 = vcmp.gt.f32.partialorder %v11825_v12, 0.0  ;;  %v5737_v2 = vmul.f32 %v5705_v8, %v11840_v1  ;;  %v5710_v32 = vadd.f32 1.0, %v8155_v30 }
 0x586   : > { %vm5765_vm1 = vcmp.gt.f32.partialorder %v5733_v38, 0.0  ;;  %vm5796_vm10 = vcmp.lt.f32.partialorder %v11825_v12, 0.0  ;;  %v5708_v54 = vadd.f32 1.0, %v8157_v14  ;;  %vm5797_vm3 = vcmp.lt.f32.partialorder %v5733_v38, 0.0  ;;  %v5888_v38 = vld [vmem:[%s12381_s10] sm:$0x3] }
 0x587   : > { %v5828_v52 = vsel %vm5796_vm10, -1.0, %v13037_v31  ;;  %v5830_v0 = vsel %vm5798_vm5, -1.0, %v13037_v31  ;;  %vm5771_vm4 = vcmp.gt.f32.partialorder %v5739_v11, 0.0  ;;  %vm5803_vm9 = vcmp.lt.f32.partialorder %v5739_v11, 0.0 }
 0x588   : > { %v5829_v63 = vsel %vm5797_vm3, -1.0, %v13037_v31  ;;  %v5860_v21 = vsel %vm5764_vm15, 1.0, %v5828_v52  ;;  %v5831_v1 = vsel %vm5799_vm7, -1.0, %v13037_v31  ;;  %v5862_v12 = vsel %vm5766_vm12, 1.0, %v5830_v0 }
 0x589   : > { %v5861_v57 = vsel %vm5765_vm1, 1.0, %v5829_v63  ;;  %vm5768_vm2 = vcmp.gt.f32.partialorder %v5736_v51, 0.0  ;;  %7875 = vmatmul.mubr.msk.bf16.gmra.mxu1 %vm2247_vm11, %v5881_v22  ;;  %v5863_v50 = vsel %vm5767_vm13, 1.0, %v5831_v1  ;;  %vm5769_vm5 = vcmp.gt.f32.partialorder %v5737_v2, 0.0 }
 0x58a   : > { %v5882_v46 = vpack.c.bf16 %v5861_v57, %v5860_v21  ;;  %vm5800_vm10 = vcmp.lt.f32.partialorder %v5736_v51, 0.0  ;;  %v5883_v53 = vpack.c.bf16 %v5863_v50, %v5862_v12  ;;  %vm5801_vm3 = vcmp.lt.f32.partialorder %v5737_v2, 0.0 }
 0x58b   : > { %v5832_v7 = vsel %vm5800_vm10, -1.0, %v13037_v31  ;;  %v5834_v58 = vsel %vm5802_vm14, -1.0, %v13037_v31  ;;  %v5614_v20 = vmul.f32 0.5, %v11794_v34  ;;  %v5612_v17 = vmul.f32 0.5, %v11797_v35 }
 0x58c   : > { %7878 = vmatprep.mubr.msk.bf16.mxu1 %vm2247_vm11, %v5882_v46  ;;  %v5833_v16 = vsel %vm5801_vm3, -1.0, %v13037_v31  ;;  %v5835_v10 = vsel %vm5803_vm9, -1.0, %v13037_v31  ;;  %v5864_v5 = vsel %vm5768_vm2, 1.0, %v5832_v7  ;;  %v5866_v62 = vsel %vm5770_vm8, 1.0, %v5834_v58 }
 0x58d   : > { %v5865_v9 = vsel %vm5769_vm5, 1.0, %v5833_v16  ;;  %v5867_v61 = vsel %vm5771_vm4, 1.0, %v5835_v10  ;;  %v5742_v36 = vmul.f32 %v5710_v32, %v5614_v20  ;;  %v5740_v34 = vmul.f32 %v5708_v54, %v5612_v17 }
 0x58e   : > { %v5884_v43 = vpack.c.bf16 %v5865_v9, %v5864_v5  ;;  %v5885_v23 = vpack.c.bf16 %v5867_v61, %v5866_v62  ;;  %v5615_v26 = vmul.f32 0.5, %v11882_v6  ;;  %v5613_v24 = vmul.f32 0.5, %v11885_v40 }
 0x58f   : > { %vm5806_vm12 = vcmp.lt.f32.partialorder %v5742_v36, 0.0  ;;  %vm5804_vm13 = vcmp.lt.f32.partialorder %v5740_v34, 0.0  ;;  %vm5774_vm7 = vcmp.gt.f32.partialorder %v5742_v36, 0.0  ;;  %vm5772_vm15 = vcmp.gt.f32.partialorder %v5740_v34, 0.0 }
 0x590   : > { %v5838_v44 = vsel %vm5806_vm12, -1.0, %v13037_v31  ;;  %v5836_v55 = vsel %vm5804_vm13, -1.0, %v13037_v31  ;;  %v11949_v49 = vrot.slane %v5888_v38, %v13063_v19  ;;  %v11952_v15 = vrot.slane %v5888_v38, %v13022_v48 }
 0x591   : > { %v8159_v3 = vpop.eup %8158  ;;  %7879 = vmatmul.mubr.msk.bf16.gmra.mxu1 %vm2247_vm11, %v5883_v53  ;;  %v5870_v6 = vsel %vm5774_vm7, 1.0, %v5838_v44  ;;  %v5868_v40 = vsel %vm5772_vm15, 1.0, %v5836_v55 }
 0x592   : > { %v8161_v35 = vpop.eup %8160  ;;  %v5711_v33 = vadd.f32 1.0, %v8159_v3  ;;  %7882 = vmatprep.mubr.msk.bf16.mxu1 %vm2247_vm11, %v5884_v43 }
 0x593   : > { %v5709_v25 = vadd.f32 1.0, %v8161_v35 }
 0x594   : > { %v5743_v45 = vmul.f32 %v5711_v33, %v5615_v26 }
 0x595   : > { %v5741_v59 = vmul.f32 %v5709_v25, %v5613_v24 }
 0x596   : > { %vm5775_vm8 = vcmp.gt.f32.partialorder %v5743_v45, 0.0  ;;  %vm5807_vm14 = vcmp.lt.f32.partialorder %v5743_v45, 0.0 }
 0x597   : > { %vm5773_vm1 = vcmp.gt.f32.partialorder %v5741_v59, 0.0  ;;  %vm5805_vm4 = vcmp.lt.f32.partialorder %v5741_v59, 0.0  ;;  %v5839_v37 = vsel %vm5807_vm14, -1.0, %v13037_v31 }
 0x598   : > { %v5837_v4 = vsel %vm5805_vm4, -1.0, %v13037_v31  ;;  %v5871_v41 = vsel %vm5775_vm8, 1.0, %v5839_v37 }
 0x599   : > { %v5869_v29 = vsel %vm5773_vm1, 1.0, %v5837_v4  ;;  %v5887_v27 = vpack.c.bf16 %v5871_v41, %v5870_v6  ;;  %7883 = vmatmul.mubr.msk.bf16.gmra.mxu1 %vm2247_vm11, %v5885_v23 }
 0x59a   : > { %v5886_v60 = vpack.c.bf16 %v5869_v29, %v5868_v40 }
 0x59c   : > { %7886 = vmatprep.mubr.msk.bf16.mxu1 %vm2247_vm11, %v5886_v60 }
 0x5a1   : > { %7887 = vmatmul.mubr.msk.bf16.gmra.mxu1 %vm2247_vm11, %v5887_v27 }
 0x615   : > { %v7860_v39 = vpop.f32.mrf.mxu1 }
 0x616   : > { %v6112_v56 = vmul.f32 %v7860_v39, %v11949_v49 }
 0x617   : > { %v5979_v47 = vpop.f32.mrf.mxu1 }
 0x618   : > { %v6148_v28 = vadd.f32 %v11952_v15, %v6112_v56  ;;  %v6110_v42 = vmul.f32 %v11949_v49, %v5979_v47 }
 0x619   : > { %v7861_v30 = vpop.f32.mrf.mxu1 }
 0x61a   : > { %v6146_v8 = vadd.f32 %v11952_v15, %v6110_v42  ;;  %v6113_v13 = vmul.f32 %v7861_v30, %v11949_v49  ;;  %v7181_v22 = vclamps-f32 %v6148_v28, 1.0 }
 0x61b   : > { %v5982_v18 = vpop.f32.mrf.mxu1 }
 0x61c   : > { %v7179_v14 = vclamps-f32 %v6146_v8, 1.0  ;;  %v6149_v11 = vadd.f32 %v11952_v15, %v6113_v13  ;;  %v6111_v51 = vmul.f32 %v11949_v49, %v5982_v18  ;;  %vm6276_vm9 = vcmp.lt.f32.partialorder %v7181_v22, 0.0 }
 0x61d   : > { %vm6244_vm3 = vcmp.gt.f32.partialorder %v7181_v22, 0.0  ;;  %v6308_v21 = vsel %vm6276_vm9, -1.0, %v13037_v31 }
 0x61e   : > { %v7182_v2 = vclamps-f32 %v6149_v11, 1.0  ;;  %vm6274_vm11 = vcmp.lt.f32.partialorder %v7179_v14, 0.0  ;;  %v6147_v32 = vadd.f32 %v11952_v15, %v6111_v51  ;;  %vm6242_vm10 = vcmp.gt.f32.partialorder %v7179_v14, 0.0 }
 0x61f   : > { %v6306_v63 = vsel %vm6274_vm11, -1.0, %v13037_v31  ;;  %v6340_v50 = vsel %vm6244_vm3, 1.0, %v6308_v21 }
 0x620   : > { %vm6277_vm2 = vcmp.lt.f32.partialorder %v7182_v2, 0.0  ;;  %vm11962_vm5 = vcmp.gt.f32.partialorder %v7182_v2, 0.0  ;;  %v7180_v0 = vclamps-f32 %v6147_v32, 1.0  ;;  %v6338_v12 = vsel %vm6242_vm10, 1.0, %v6306_v63  ;;  %v8165_v2 = vld [vmem:[%s8291_s14 + $0x8] sm:$0xff] }
 0x621   : > { %v6309_v52 = vsel %vm6277_vm2, -1.0, %v13037_v31 }
 0x622   : > { %vm6243_vm12 = vcmp.gt.f32.partialorder %v7180_v0, 0.0  ;;  %vm6275_vm13 = vcmp.lt.f32.partialorder %v7180_v0, 0.0  ;;  %v6341_v57 = vsel %vm11962_vm5, 1.0, %v6309_v52 }
 0x623   : > { %v6307_v1 = vsel %vm6275_vm13, -1.0, %v13037_v31  ;;  %v6371_v58 = vpack.c.bf16 %v6341_v57, %v6340_v50 }
 0x624   : > { %v6339_v46 = vsel %vm6243_vm12, 1.0, %v6307_v1 }
 0x625   : > { %v6370_v53 = vpack.c.bf16 %v6339_v46, %v6338_v12 }
 0x627   : > { %v7864_v7 = vpop.f32.mrf.mxu1  ;;  %7892 = vmatprep.mubr.msk.bf16.mxu0 %vm1609_vm6, %v6370_v53 }
 0x628   : > { %v6116_v20 = vmul.f32 %v7864_v7, %v11949_v49  ;;  %7893 = vmatmul.mubr.msk.bf16.vlgmr.msra.gmra.mxu0 %vm1609_vm6, %v6371_v58 }
 0x629   : > { %v5995_v17 = vpop.f32.mrf.mxu1 }
 0x62a   : > { %v6152_v16 = vadd.f32 %v11952_v15, %v6116_v20  ;;  %v6114_v10 = vmul.f32 %v11949_v49, %v5995_v17 }
 0x62b   : > { %v7865_v5 = vpop.f32.mrf.mxu1 }
 0x62c   : > { %v6150_v9 = vadd.f32 %v11952_v15, %v6114_v10  ;;  %v6117_v62 = vmul.f32 %v7865_v5, %v11949_v49  ;;  %v7185_v36 = vclamps-f32 %v6152_v16, 1.0 }
 0x62d   : > { %v5998_v61 = vpop.f32.mrf.mxu1 }
 0x62e   : > { %v7183_v43 = vclamps-f32 %v6150_v9, 1.0  ;;  %v6153_v23 = vadd.f32 %v11952_v15, %v6117_v62  ;;  %v6115_v34 = vmul.f32 %v11949_v49, %v5998_v61  ;;  %vm6280_vm8 = vcmp.lt.f32.partialorder %v7185_v36, 0.0 }
 0x62f   : > { %vm6248_vm4 = vcmp.gt.f32.partialorder %v7185_v36, 0.0  ;;  %v6312_v45 = vsel %vm6280_vm8, -1.0, %v13037_v31 }
 0x630   : > { %v7186_v3 = vclamps-f32 %v6153_v23, 1.0  ;;  %vm6278_vm7 = vcmp.lt.f32.partialorder %v7183_v43, 0.0  ;;  %v6151_v35 = vadd.f32 %v11952_v15, %v6115_v34  ;;  %vm6246_vm1 = vcmp.gt.f32.partialorder %v7183_v43, 0.0 }
 0x631   : > { %v6310_v25 = vsel %vm6278_vm7, -1.0, %v13037_v31  ;;  %v6344_v41 = vsel %vm6248_vm4, 1.0, %v6312_v45 }
 0x632   : > { %vm6281_vm14 = vcmp.lt.f32.partialorder %v7186_v3, 0.0  ;;  %vm11982_vm15 = vcmp.gt.f32.partialorder %v7186_v3, 0.0  ;;  %v7184_v24 = vclamps-f32 %v6151_v35, 1.0  ;;  %v6342_v37 = vsel %vm6246_vm1, 1.0, %v6310_v25 }
 0x633   : > { %v6313_v33 = vsel %vm6281_vm14, -1.0, %v13037_v31 }
 0x634   : > { %vm6247_vm11 = vcmp.gt.f32.partialorder %v7184_v24, 0.0  ;;  %vm6279_vm9 = vcmp.lt.f32.partialorder %v7184_v24, 0.0  ;;  %v6345_v59 = vsel %vm11982_vm15, 1.0, %v6313_v33 }
 0x635   : > { %v6311_v44 = vsel %vm6279_vm9, -1.0, %v13037_v31  ;;  %v6373_v27 = vpack.c.bf16 %v6345_v59, %v6344_v41 }
 0x636   : > { %v6343_v4 = vsel %vm6247_vm11, 1.0, %v6311_v44 }
 0x637   : > { %v6372_v40 = vpack.c.bf16 %v6343_v4, %v6342_v37 }
 0x639   : > { %v7868_v55 = vpop.f32.mrf.mxu1  ;;  %7896 = vmatprep.mubr.msk.bf16.mxu0 %vm1609_vm6, %v6372_v40 }
 0x63a   : > { %v6120_v6 = vmul.f32 %v7868_v55, %v11949_v49  ;;  %7897 = vmatmul.mubr.msk.bf16.gmra.mxu0 %vm1609_vm6, %v6373_v27 }
 0x63b   : > { %v6011_v29 = vpop.f32.mrf.mxu1 }
 0x63c   : > { %v6156_v60 = vadd.f32 %v11952_v15, %v6120_v6  ;;  %v6118_v38 = vmul.f32 %v11949_v49, %v6011_v29 }
 0x63d   : > { %v7869_v39 = vpop.f32.mrf.mxu1 }
 0x63e   : > { %v7189_v56 = vclamps-f32 %v6156_v60, 1.0  ;;  %v6154_v47 = vadd.f32 %v11952_v15, %v6118_v38  ;;  %v6121_v28 = vmul.f32 %v7869_v39, %v11949_v49 }
 0x63f   : > { %v6014_v42 = vpop.f32.mrf.mxu1 }
 0x640   : > { %v7187_v30 = vclamps-f32 %v6154_v47, 1.0  ;;  %v6157_v8 = vadd.f32 %v11952_v15, %v6121_v28  ;;  %v6119_v13 = vmul.f32 %v11949_v49, %v6014_v42  ;;  %vm6284_vm2 = vcmp.lt.f32.partialorder %v7189_v56, 0.0 }
 0x641   : > { %v7872_v18 = vpop.f32.mrf.mxu1  ;;  %vm12003_vm10 = vcmp.gt.f32.partialorder %v7189_v56, 0.0  ;;  %v6316_v52 = vsel %vm6284_vm2, -1.0, %v13037_v31 }
 0x642   : > { %v7190_v22 = vclamps-f32 %v6157_v8, 1.0  ;;  %vm6282_vm5 = vcmp.lt.f32.partialorder %v7187_v30, 0.0  ;;  %v6155_v14 = vadd.f32 %v11952_v15, %v6119_v13  ;;  %v6124_v11 = vmul.f32 %v7872_v18, %v11949_v49 }
 0x643   : > { %v6027_v51 = vpop.f32.mrf.mxu1  ;;  %vm12015_vm13 = vcmp.gt.f32.partialorder %v7187_v30, 0.0  ;;  %v6314_v12 = vsel %vm6282_vm5, -1.0, %v13037_v31  ;;  %v6348_v61 = vsel %vm12003_vm10, 1.0, %v6316_v52 }
 0x644   : > { %vm12007_vm3 = vcmp.gt.f32.partialorder %v7190_v22, 0.0  ;;  %vm6285_vm12 = vcmp.lt.f32.partialorder %v7190_v22, 0.0  ;;  %v6122_v54 = vmul.f32 %v11949_v49, %v6027_v51  ;;  %v7188_v63 = vclamps-f32 %v6155_v14, 1.0 }
 0x645   : > { %v6317_v0 = vsel %vm6285_vm12, -1.0, %v13037_v31  ;;  %v6160_v21 = vadd.f32 %v11952_v15, %v6124_v11  ;;  %v7873_v57 = vpop.f32.mrf.mxu1  ;;  %v6346_v5 = vsel %vm12015_vm13, 1.0, %v6314_v12 }
 0x646   : > { %v6158_v46 = vadd.f32 %v11952_v15, %v6122_v54  ;;  %v6125_v50 = vmul.f32 %v7873_v57, %v11949_v49  ;;  %v6349_v53 = vsel %vm12007_vm3, 1.0, %v6317_v0  ;;  %vm6251_vm7 = vcmp.gt.f32.partialorder %v7188_v63, 0.0 }
 0x647   : > { %vm6283_vm8 = vcmp.lt.f32.partialorder %v7188_v63, 0.0  ;;  %v7193_v7 = vclamps-f32 %v6160_v21, 1.0  ;;  %v6030_v58 = vpop.f32.mrf.mxu1  ;;  %v6375_v43 = vpack.c.bf16 %v6349_v53, %v6348_v61 }
 0x648   : > { %v6315_v20 = vsel %vm6283_vm8, -1.0, %v13037_v31  ;;  %v7191_v17 = vclamps-f32 %v6158_v46, 1.0  ;;  %v6161_v16 = vadd.f32 %v11952_v15, %v6125_v50  ;;  %v6123_v10 = vmul.f32 %v11949_v49, %v6030_v58 }
 0x649   : > { %v6347_v9 = vsel %vm6251_vm7, 1.0, %v6315_v20  ;;  %v7876_v62 = vpop.f32.mrf.mxu1  ;;  %vm12032_vm15 = vcmp.lt.f32.partialorder %v7193_v7, 0.0  ;;  %vm12053_vm9 = vcmp.gt.f32.partialorder %v7193_v7, 0.0 }
 0x64a   : > { %v6374_v36 = vpack.c.bf16 %v6347_v9, %v6346_v5  ;;  %vm6286_vm14 = vcmp.lt.f32.partialorder %v7191_v17, 0.0  ;;  %v7194_v23 = vclamps-f32 %v6161_v16, 1.0  ;;  %v6159_v34 = vadd.f32 %v11952_v15, %v6123_v10 }
 0x64b   : > { %v6043_v3 = vpop.f32.mrf.mxu1  ;;  %vm12036_vm1 = vcmp.gt.f32.partialorder %v7191_v17, 0.0  ;;  %v6128_v33 = vmul.f32 %v7876_v62, %v11949_v49  ;;  %v6318_v25 = vsel %vm6286_vm14, -1.0, %v13037_v31  ;;  %v6320_v40 = vsel %vm12032_vm15, -1.0, %v13037_v31 }
 0x64c   : > { %v6126_v24 = vmul.f32 %v11949_v49, %v6043_v3  ;;  %7900 = vmatprep.mubr.msk.bf16.mxu0 %vm1609_vm6, %v6374_v36  ;;  %vm12044_vm4 = vcmp.gt.f32.partialorder %v7194_v23, 0.0  ;;  %vm6289_vm11 = vcmp.lt.f32.partialorder %v7194_v23, 0.0  ;;  %v7192_v59 = vclamps-f32 %v6159_v34, 1.0 }
 0x64d   : > { %7901 = vmatmul.mubr.msk.bf16.gmra.mxu0 %vm1609_vm6, %v6375_v43  ;;  %v7877_v44 = vpop.f32.mrf.mxu1  ;;  %v6321_v55 = vsel %vm6289_vm11, -1.0, %v13037_v31  ;;  %v6164_v37 = vadd.f32 %v11952_v15, %v6128_v33  ;;  %v6350_v56 = vsel %vm12036_vm1, 1.0, %v6318_v25  ;;  %v6352_v8 = vsel %vm12053_vm9, 1.0, %v6320_v40 }
 0x64e   : > { %v6162_v4 = vadd.f32 %v11952_v15, %v6126_v24  ;;  %v6129_v6 = vmul.f32 %v7877_v44, %v11949_v49  ;;  %vm6255_vm2 = vcmp.gt.f32.partialorder %v7192_v59, 0.0  ;;  %vm6287_vm5 = vcmp.lt.f32.partialorder %v7192_v59, 0.0 }
 0x64f   : > { %v6046_v29 = vpop.f32.mrf.mxu1  ;;  %v6353_v27 = vsel %vm12044_vm4, 1.0, %v6321_v55  ;;  %v6319_v60 = vsel %vm6287_vm5, -1.0, %v13037_v31  ;;  %v7197_v38 = vclamps-f32 %v6164_v37, 1.0 }
 0x650   : > { %v7195_v39 = vclamps-f32 %v6162_v4, 1.0  ;;  %v6351_v47 = vsel %vm6255_vm2, 1.0, %v6319_v60  ;;  %v6165_v28 = vadd.f32 %v11952_v15, %v6129_v6  ;;  %v6127_v42 = vmul.f32 %v11949_v49, %v6046_v29 }
 0x651   : > { %v7880_v30 = vpop.f32.mrf.mxu1  ;;  %v6376_v13 = vpack.c.bf16 %v6351_v47, %v6350_v56  ;;  %v6377_v18 = vpack.c.bf16 %v6353_v27, %v6352_v8  ;;  %vm12070_vm3 = vcmp.lt.f32.partialorder %v7197_v38, 0.0  ;;  %vm12091_vm8 = vcmp.gt.f32.partialorder %v7197_v38, 0.0 }
 0x652   : > { %vm6290_vm10 = vcmp.lt.f32.partialorder %v7195_v39, 0.0  ;;  %v7198_v22 = vclamps-f32 %v6165_v28, 1.0  ;;  %v6163_v14 = vadd.f32 %v11952_v15, %v6127_v42  ;;  %vm12074_vm12 = vcmp.gt.f32.partialorder %v7195_v39, 0.0 }
 0x653   : > { %v6059_v11 = vpop.f32.mrf.mxu1  ;;  %v6132_v32 = vmul.f32 %v7880_v30, %v11949_v49  ;;  %7904 = vmatprep.mubr.msk.bf16.mxu0 %vm1609_vm6, %v6376_v13  ;;  %v6322_v52 = vsel %vm6290_vm10, -1.0, %v13037_v31  ;;  %v6324_v53 = vsel %vm12070_vm3, -1.0, %v13037_v31 }
 0x654   : > { %v6130_v54 = vmul.f32 %v11949_v49, %v6059_v11  ;;  %vm12082_vm13 = vcmp.gt.f32.partialorder %v7198_v22, 0.0  ;;  %vm6293_vm7 = vcmp.lt.f32.partialorder %v7198_v22, 0.0  ;;  %v7196_v63 = vclamps-f32 %v6163_v14, 1.0 }
 0x655   : > { %7905 = vmatmul.mubr.msk.bf16.gmra.mxu0 %vm1609_vm6, %v6377_v18  ;;  %v7881_v21 = vpop.f32.mrf.mxu1  ;;  %v6325_v57 = vsel %vm6293_vm7, -1.0, %v13037_v31  ;;  %v6168_v1 = vadd.f32 %v11952_v15, %v6132_v32  ;;  %v6354_v10 = vsel %vm12074_vm12, 1.0, %v6322_v52  ;;  %v6356_v36 = vsel %vm12091_vm8, 1.0, %v6324_v53 }
 0x656   : > { %v6166_v12 = vadd.f32 %v11952_v15, %v6130_v54  ;;  %v6133_v46 = vmul.f32 %v7881_v21, %v11949_v49  ;;  %vm6259_vm14 = vcmp.gt.f32.partialorder %v7196_v63, 0.0  ;;  %vm6291_vm15 = vcmp.lt.f32.partialorder %v7196_v63, 0.0 }
 0x657   : > { %v6062_v7 = vpop.f32.mrf.mxu1  ;;  %v6357_v58 = vsel %vm12082_vm13, 1.0, %v6325_v57  ;;  %v6323_v20 = vsel %vm6291_vm15, -1.0, %v13037_v31  ;;  %v7201_v17 = vclamps-f32 %v6168_v1, 1.0 }
 0x658   : > { %v7199_v16 = vclamps-f32 %v6166_v12, 1.0  ;;  %v6355_v5 = vsel %vm6259_vm14, 1.0, %v6323_v20  ;;  %v6169_v9 = vadd.f32 %v11952_v15, %v6133_v46  ;;  %v6131_v62 = vmul.f32 %v11949_v49, %v6062_v7 }
 0x659   : > { %v7884_v61 = vpop.f32.mrf.mxu1  ;;  %v6378_v43 = vpack.c.bf16 %v6355_v5, %v6354_v10  ;;  %v6379_v23 = vpack.c.bf16 %v6357_v58, %v6356_v36  ;;  %vm12108_vm4 = vcmp.lt.f32.partialorder %v7201_v17, 0.0  ;;  %vm12129_vm5 = vcmp.gt.f32.partialorder %v7201_v17, 0.0 }
 0x65a   : > { %vm6294_vm1 = vcmp.lt.f32.partialorder %v7199_v16, 0.0  ;;  %v7202_v34 = vclamps-f32 %v6169_v9, 1.0  ;;  %v6167_v3 = vadd.f32 %v11952_v15, %v6131_v62  ;;  %vm12112_vm11 = vcmp.gt.f32.partialorder %v7199_v16, 0.0 }
 0x65b   : > { %v6075_v35 = vpop.f32.mrf.mxu1  ;;  %v6136_v24 = vmul.f32 %v7884_v61, %v11949_v49  ;;  %7908 = vmatprep.mubr.msk.bf16.mxu0 %vm1609_vm6, %v6378_v43  ;;  %v6326_v45 = vsel %vm6294_vm1, -1.0, %v13037_v31  ;;  %v6328_v29 = vsel %vm12108_vm4, -1.0, %v13037_v31 }
 0x65c   : > { %v6134_v25 = vmul.f32 %v11949_v49, %v6075_v35  ;;  %vm12120_vm9 = vcmp.gt.f32.partialorder %v7202_v34, 0.0  ;;  %vm6297_vm2 = vcmp.lt.f32.partialorder %v7202_v34, 0.0  ;;  %v7200_v44 = vclamps-f32 %v6167_v3, 1.0 }
 0x65d   : > { %7909 = vmatmul.mubr.msk.bf16.gmra.mxu0 %vm1609_vm6, %v6379_v23  ;;  %v7885_v55 = vpop.f32.mrf.mxu1  ;;  %v6329_v37 = vsel %vm6297_vm2, -1.0, %v13037_v31  ;;  %v6172_v4 = vadd.f32 %v11952_v15, %v6136_v24  ;;  %v6358_v47 = vsel %vm12112_vm11, 1.0, %v6326_v45  ;;  %v6360_v13 = vsel %vm12129_vm5, 1.0, %v6328_v29 }
 0x65e   : > { %v6170_v6 = vadd.f32 %v11952_v15, %v6134_v25  ;;  %v6137_v41 = vmul.f32 %v7885_v55, %v11949_v49  ;;  %vm6263_vm10 = vcmp.gt.f32.partialorder %v7200_v44, 0.0  ;;  %vm6295_vm3 = vcmp.lt.f32.partialorder %v7200_v44, 0.0 }
 0x65f   : > { %v6078_v27 = vpop.f32.mrf.mxu1  ;;  %v6361_v60 = vsel %vm12120_vm9, 1.0, %v6329_v37  ;;  %v6327_v38 = vsel %vm6295_vm3, -1.0, %v13037_v31  ;;  %v7205_v39 = vclamps-f32 %v6172_v4, 1.0  ;;  %v6386_v37 = vld [vmem:[%s12383_s12] sm:$0x3] }
 0x660   : > { %v7203_v56 = vclamps-f32 %v6170_v6, 1.0  ;;  %v6359_v28 = vsel %vm6263_vm10, 1.0, %v6327_v38  ;;  %v6173_v42 = vadd.f32 %v11952_v15, %v6137_v41  ;;  %v6135_v30 = vmul.f32 %v11949_v49, %v6078_v27 }
 0x661   : > { %v7888_v8 = vpop.f32.mrf.mxu1  ;;  %v6380_v18 = vpack.c.bf16 %v6359_v28, %v6358_v47  ;;  %v6381_v22 = vpack.c.bf16 %v6361_v60, %v6360_v13  ;;  %vm12146_vm13 = vcmp.lt.f32.partialorder %v7205_v39, 0.0  ;;  %vm6268_vm15 = vcmp.gt.f32.partialorder %v7205_v39, 0.0 }
 0x662   : > { %vm6298_vm12 = vcmp.lt.f32.partialorder %v7203_v56, 0.0  ;;  %v7206_v14 = vclamps-f32 %v6173_v42, 1.0  ;;  %v6171_v11 = vadd.f32 %v11952_v15, %v6135_v30  ;;  %vm12150_vm7 = vcmp.gt.f32.partialorder %v7203_v56, 0.0  ;;  %v8162_v56 = vld [vmem:[%s8291_s14 + $0x10] sm:$0xff] }
 0x663   : > { %v6091_v51 = vpop.f32.mrf.mxu1  ;;  %v6140_v54 = vmul.f32 %v7888_v8, %v11949_v49  ;;  %7912 = vmatprep.mubr.msk.bf16.mxu0 %vm1609_vm6, %v6380_v18  ;;  %v6330_v0 = vsel %vm6298_vm12, -1.0, %v13037_v31  ;;  %v6332_v53 = vsel %vm12146_vm13, -1.0, %v13037_v31  ;;  %v12196_v4 = vrot.slane %v6386_v37, %v13063_v19  ;;  %v8163_v8 = vld [vmem:[%s8291_s14] sm:$0xff] }
 0x664   : > { %v6138_v52 = vmul.f32 %v11949_v49, %v6091_v51  ;;  %vm12158_vm8 = vcmp.gt.f32.partialorder %v7206_v14, 0.0  ;;  %vm6301_vm14 = vcmp.lt.f32.partialorder %v7206_v14, 0.0  ;;  %v7204_v21 = vclamps-f32 %v6171_v11, 1.0  ;;  %v8164_v14 = vld [vmem:[%s8291_s14 + $0x18] sm:$0xff] }
 0x665   : > { %7913 = vmatmul.mubr.msk.bf16.gmra.mxu0 %vm1609_vm6, %v6381_v22  ;;  %v7889_v57 = vpop.f32.mrf.mxu1  ;;  %v6333_v1 = vsel %vm6301_vm14, -1.0, %v13037_v31  ;;  %v6176_v12 = vadd.f32 %v11952_v15, %v6140_v54  ;;  %v6362_v10 = vsel %vm12150_vm7, 1.0, %v6330_v0  ;;  %v6364_v61 = vsel %vm6268_vm15, 1.0, %v6332_v53  ;;  %v8166_v53 = vld [vmem:[%s8291_s14 + $0x30] sm:$0xff] }
 0x666   : > { %v6174_v46 = vadd.f32 %v11952_v15, %v6138_v52  ;;  %v6141_v50 = vmul.f32 %v7889_v57, %v11949_v49  ;;  %vm6267_vm1 = vcmp.gt.f32.partialorder %v7204_v21, 0.0  ;;  %vm6299_vm4 = vcmp.lt.f32.partialorder %v7204_v21, 0.0 }
 0x667   : > { %v6094_v7 = vpop.f32.mrf.mxu1  ;;  %v6365_v58 = vsel %vm12158_vm8, 1.0, %v6333_v1  ;;  %v6331_v20 = vsel %vm6299_vm4, -1.0, %v13037_v31  ;;  %v7209_v17 = vclamps-f32 %v6176_v12, 1.0 }
 0x668   : > { %v7207_v16 = vclamps-f32 %v6174_v46, 1.0  ;;  %v6363_v5 = vsel %vm6267_vm1, 1.0, %v6331_v20  ;;  %v6177_v9 = vadd.f32 %v11952_v15, %v6141_v50  ;;  %v6139_v62 = vmul.f32 %v11949_v49, %v6094_v7 }
 0x669   : > { %v6382_v36 = vpack.c.bf16 %v6363_v5, %v6362_v10  ;;  %v6383_v43 = vpack.c.bf16 %v6365_v58, %v6364_v61  ;;  %vm6304_vm9 = vcmp.lt.f32.partialorder %v7209_v17, 0.0  ;;  %vm6272_vm3 = vcmp.gt.f32.partialorder %v7209_v17, 0.0 }
 0x66a   : > { %vm6302_vm11 = vcmp.lt.f32.partialorder %v7207_v16, 0.0  ;;  %v7210_v23 = vclamps-f32 %v6177_v9, 1.0  ;;  %v6175_v34 = vadd.f32 %v11952_v15, %v6139_v62  ;;  %vm6270_vm10 = vcmp.gt.f32.partialorder %v7207_v16, 0.0  ;;  %v8167_v16 = vld [vmem:[%s8291_s14 + $0x20] sm:$0xff]  ;;  %v8168_v62 = vld [vmem:[%s8291_s14 + $0x38] sm:$0xff] }
 0x66b   : > { %7916 = vmatprep.mubr.msk.bf16.mxu0 %vm1609_vm6, %v6382_v36  ;;  %v6334_v49 = vsel %vm6302_vm11, -1.0, %v13037_v31  ;;  %v6336_v33 = vsel %vm6304_vm9, -1.0, %v13037_v31 }
 0x66c   : > { %vm12179_vm2 = vcmp.gt.f32.partialorder %v7210_v23, 0.0  ;;  %vm6305_vm5 = vcmp.lt.f32.partialorder %v7210_v23, 0.0  ;;  %v7208_v35 = vclamps-f32 %v6175_v34, 1.0  ;;  %v6366_v25 = vsel %vm6270_vm10, 1.0, %v6334_v49 }
 0x66d   : > { %7917 = vmatmul.mubr.msk.bf16.gmra.mxu0 %vm1609_vm6, %v6383_v43  ;;  %v6337_v26 = vsel %vm6305_vm5, -1.0, %v13037_v31  ;;  %v6368_v59 = vsel %vm6272_vm3, 1.0, %v6336_v33  ;;  %v8169_v43 = vld [vmem:[%s8291_s14 + $0x28] sm:$0xff] }
 0x66e   : > { %vm6271_vm12 = vcmp.gt.f32.partialorder %v7208_v35, 0.0  ;;  %vm6303_vm13 = vcmp.lt.f32.partialorder %v7208_v35, 0.0  ;;  %v6369_v15 = vsel %vm12179_vm2, 1.0, %v6337_v26 }
 0x66f   : > { %v6335_v24 = vsel %vm6303_vm13, -1.0, %v13037_v31  ;;  %v6385_v55 = vpack.c.bf16 %v6369_v15, %v6368_v59  ;;  %v12199_v31 = vrot.slane %v6386_v37, %v13022_v48  ;;  %v8170_v59 = vld [vmem:[%s8291_s14 + $0x50] sm:$0xff] }
 0x670   : > { %v6367_v45 = vsel %vm6271_vm12, 1.0, %v6335_v24 }
 0x671   : > { %v6384_v44 = vpack.c.bf16 %v6367_v45, %v6366_v25 }
 0x673   : > { %7920 = vmatprep.mubr.msk.bf16.mxu0 %vm1609_vm6, %v6384_v44 }
 0x675   : > { %7921 = vmatmul.mubr.msk.bf16.gmra.mxu0 %vm1609_vm6, %v6385_v55 }
 0x6e8   : > { %v7894_v6 = vpop.f32.mrf.mxu0 }
 0x6e9   : > { %v6606_v41 = vmul.f32 %v7894_v6, %v12196_v4 }
 0x6ea   : > { %v6473_v40 = vpop.f32.mrf.mxu0 }
 0x6eb   : > { %v6642_v29 = vadd.f32 %v12199_v31, %v6606_v41  ;;  %v6604_v27 = vmul.f32 %v12196_v4, %v6473_v40  ;;  %v8171_v40 = vld [vmem:[%s8291_s14 + $0x40] sm:$0xff] }
 0x6ec   : > { %v7895_v60 = vpop.f32.mrf.mxu0 }
 0x6ed   : > { %v7229_v38 = vclamps-f32 %v6642_v29, 1.0  ;;  %v6640_v39 = vadd.f32 %v12199_v31, %v6604_v27  ;;  %v6607_v19 = vmul.f32 %v7895_v60, %v12196_v4 }
 0x6ee   : > { %v6476_v48 = vpop.f32.mrf.mxu0 }
 0x6ef   : > { %v6738_v47 = vadd.f32 %v8162_v56, %v7229_v38  ;;  %v7227_v28 = vclamps-f32 %v6640_v39, 1.0  ;;  %v6643_v42 = vadd.f32 %v12199_v31, %v6607_v19  ;;  %v6605_v30 = vmul.f32 %v12196_v4, %v6476_v48  ;;  %v8172_v19 = vld [vmem:[%s8291_s14 + $0x58] sm:$0xff] }
 0x6f1   : > { %6770 = vst.msk [vmem:[%s12211_s15 + $0x10] sm:$0xff] %vm477_vm0, %v6738_v47  ;;  %v6736_v13 = vadd.f32 %v8163_v8, %v7227_v28  ;;  %v7230_v18 = vclamps-f32 %v6643_v42, 1.0  ;;  %v6641_v22 = vadd.f32 %v12199_v31, %v6605_v30  ;;  %v8173_v30 = vld [vmem:[%s8291_s14 + $0x48] sm:$0xff] }
 0x6f3   : > { %6768 = vst.msk [vmem:[%s12211_s15] sm:$0xff] %vm477_vm0, %v6736_v13  ;;  %v6739_v11 = vadd.f32 %v8164_v14, %v7230_v18  ;;  %v7228_v51 = vclamps-f32 %v6641_v22, 1.0 }
 0x6f5   : > { %6771 = vst.msk [vmem:[%s12211_s15 + $0x18] sm:$0xff] %vm477_vm0, %v6739_v11  ;;  %v6737_v32 = vadd.f32 %v8165_v2, %v7228_v51  ;;  %v8174_v11 = vld [vmem:[%s8291_s14 + $0x70] sm:$0xff] }
 0x6f7   : > { %6769 = vst.msk [vmem:[%s12211_s15 + $0x8] sm:$0xff] %vm477_vm0, %v6737_v32 }
 0x6fa   : > { %v7898_v54 = vpop.f32.mrf.mxu0 }
 0x6fb   : > { %v6610_v52 = vmul.f32 %v7898_v54, %v12196_v4 }
 0x6fc   : > { %v6489_v0 = vpop.f32.mrf.mxu0 }
 0x6fd   : > { %v6646_v63 = vadd.f32 %v12199_v31, %v6610_v52  ;;  %v6608_v21 = vmul.f32 %v12196_v4, %v6489_v0  ;;  %v8175_v0 = vld [vmem:[%s8291_s14 + $0x60] sm:$0xff] }
 0x6fe   : > { %v7899_v57 = vpop.f32.mrf.mxu0 }
 0x6ff   : > { %v7233_v1 = vclamps-f32 %v6646_v63, 1.0  ;;  %v6644_v12 = vadd.f32 %v12199_v31, %v6608_v21  ;;  %v6611_v46 = vmul.f32 %v7899_v57, %v12196_v4 }
 0x700   : > { %v6492_v50 = vpop.f32.mrf.mxu0 }
 0x701   : > { %v6742_v7 = vadd.f32 %v8166_v53, %v7233_v1  ;;  %v7231_v58 = vclamps-f32 %v6644_v12, 1.0  ;;  %v6647_v20 = vadd.f32 %v12199_v31, %v6611_v46  ;;  %v6609_v17 = vmul.f32 %v12196_v4, %v6492_v50  ;;  %v8176_v46 = vld [vmem:[%s8291_s14 + $0x78] sm:$0xff] }
 0x703   : > { %6774 = vst.msk [vmem:[%s12211_s15 + $0x30] sm:$0xff] %vm477_vm0, %v6742_v7  ;;  %v6740_v10 = vadd.f32 %v8167_v16, %v7231_v58  ;;  %v7234_v5 = vclamps-f32 %v6647_v20, 1.0  ;;  %v6645_v9 = vadd.f32 %v12199_v31, %v6609_v17  ;;  %v8177_v17 = vld [vmem:[%s8291_s14 + $0x68] sm:$0xff] }
 0x705   : > { %6772 = vst.msk [vmem:[%s12211_s15 + $0x20] sm:$0xff] %vm477_vm0, %v6740_v10  ;;  %v6743_v61 = vadd.f32 %v8168_v62, %v7234_v5  ;;  %v7232_v36 = vclamps-f32 %v6645_v9, 1.0 }
 0x707   : > { %6775 = vst.msk [vmem:[%s12211_s15 + $0x38] sm:$0xff] %vm477_vm0, %v6743_v61  ;;  %v6741_v23 = vadd.f32 %v8169_v43, %v7232_v36  ;;  %v8178_v61 = vld [vmem:[%s8291_s14 + $0x90] sm:$0xff] }
 0x709   : > { %6773 = vst.msk [vmem:[%s12211_s15 + $0x28] sm:$0xff] %vm477_vm0, %v6741_v23 }
 0x70d   : > { %v7902_v34 = vpop.f32.mrf.mxu0 }
 0x70e   : > { %v6614_v3 = vmul.f32 %v7902_v34, %v12196_v4 }
 0x70f   : > { %v6505_v35 = vpop.f32.mrf.mxu0 }
 0x710   : > { %v6650_v49 = vadd.f32 %v12199_v31, %v6614_v3  ;;  %v6612_v26 = vmul.f32 %v12196_v4, %v6505_v35  ;;  %v8179_v35 = vld [vmem:[%s8291_s14 + $0x80] sm:$0xff] }
 0x711   : > { %v7903_v33 = vpop.f32.mrf.mxu0 }
 0x712   : > { %v7237_v15 = vclamps-f32 %v6650_v49, 1.0  ;;  %v6648_v24 = vadd.f32 %v12199_v31, %v6612_v26  ;;  %v6615_v25 = vmul.f32 %v7903_v33, %v12196_v4 }
 0x713   : > { %v6508_v45 = vpop.f32.mrf.mxu0 }
 0x714   : > { %v6746_v44 = vadd.f32 %v8170_v59, %v7237_v15  ;;  %v7235_v55 = vclamps-f32 %v6648_v24, 1.0  ;;  %v6651_v37 = vadd.f32 %v12199_v31, %v6615_v25  ;;  %v6613_v6 = vmul.f32 %v12196_v4, %v6508_v45  ;;  %v8180_v25 = vld [vmem:[%s8291_s14 + $0x98] sm:$0xff] }
 0x715   : > { %v7906_v41 = vpop.f32.mrf.mxu0 }
 0x716   : > { %6778 = vst.msk [vmem:[%s12211_s15 + $0x50] sm:$0xff] %vm477_vm0, %v6746_v44  ;;  %v6744_v29 = vadd.f32 %v8171_v40, %v7235_v55  ;;  %v7238_v27 = vclamps-f32 %v6651_v37, 1.0  ;;  %v6649_v60 = vadd.f32 %v12199_v31, %v6613_v6  ;;  %v6618_v38 = vmul.f32 %v7906_v41, %v12196_v4  ;;  %v8181_v6 = vld [vmem:[%s8291_s14 + $0x88] sm:$0xff] }
 0x717   : > { %v6521_v39 = vpop.f32.mrf.mxu0 }
 0x718   : > { %6776 = vst.msk [vmem:[%s12211_s15 + $0x40] sm:$0xff] %vm477_vm0, %v6744_v29  ;;  %v6747_v48 = vadd.f32 %v8172_v19, %v7238_v27  ;;  %v7236_v56 = vclamps-f32 %v6649_v60, 1.0  ;;  %v6654_v47 = vadd.f32 %v12199_v31, %v6618_v38  ;;  %v6616_v28 = vmul.f32 %v12196_v4, %v6521_v39  ;;  %v8182_v38 = vld [vmem:[%s8291_s14 + $0xb0] sm:$0xff] }
 0x719   : > { %v7907_v42 = vpop.f32.mrf.mxu0 }
 0x71a   : > { %6779 = vst.msk [vmem:[%s12211_s15 + $0x58] sm:$0xff] %vm477_vm0, %v6747_v48  ;;  %v6745_v8 = vadd.f32 %v8173_v30, %v7236_v56  ;;  %v7241_v13 = vclamps-f32 %v6654_v47, 1.0  ;;  %v6652_v18 = vadd.f32 %v12199_v31, %v6616_v28  ;;  %v6619_v22 = vmul.f32 %v7907_v42, %v12196_v4  ;;  %v8183_v28 = vld [vmem:[%s8291_s14 + $0xa0] sm:$0xff] }
 0x71b   : > { %v6524_v14 = vpop.f32.mrf.mxu0 }
 0x71c   : > { %6777 = vst.msk [vmem:[%s12211_s15 + $0x48] sm:$0xff] %vm477_vm0, %v6745_v8  ;;  %v6750_v51 = vadd.f32 %v8174_v11, %v7241_v13  ;;  %v7239_v2 = vclamps-f32 %v6652_v18, 1.0  ;;  %v6655_v32 = vadd.f32 %v12199_v31, %v6619_v22  ;;  %v6617_v54 = vmul.f32 %v12196_v4, %v6524_v14  ;;  %v8184_v22 = vld [vmem:[%s8291_s14 + $0xb8] sm:$0xff] }
 0x71d   : > { %v7910_v52 = vpop.f32.mrf.mxu0 }
 0x71e   : > { %6782 = vst.msk [vmem:[%s12211_s15 + $0x70] sm:$0xff] %vm477_vm0, %v6750_v51  ;;  %v6748_v63 = vadd.f32 %v8175_v0, %v7239_v2  ;;  %v7242_v21 = vclamps-f32 %v6655_v32, 1.0  ;;  %v6653_v57 = vadd.f32 %v12199_v31, %v6617_v54  ;;  %v6622_v1 = vmul.f32 %v7910_v52, %v12196_v4  ;;  %v8185_v54 = vld [vmem:[%s8291_s14 + $0xa8] sm:$0xff] }
 0x71f   : > { %v6537_v12 = vpop.f32.mrf.mxu0 }
 0x720   : > { %6780 = vst.msk [vmem:[%s12211_s15 + $0x60] sm:$0xff] %vm477_vm0, %v6748_v63  ;;  %v6751_v50 = vadd.f32 %v8176_v46, %v7242_v21  ;;  %v7240_v53 = vclamps-f32 %v6653_v57, 1.0  ;;  %v6658_v7 = vadd.f32 %v12199_v31, %v6622_v1  ;;  %v6620_v58 = vmul.f32 %v12196_v4, %v6537_v12  ;;  %v8186_v1 = vld [vmem:[%s8291_s14 + $0xd0] sm:$0xff] }
 0x721   : > { %v7911_v20 = vpop.f32.mrf.mxu0 }
 0x722   : > { %6783 = vst.msk [vmem:[%s12211_s15 + $0x78] sm:$0xff] %vm477_vm0, %v6751_v50  ;;  %v6749_v16 = vadd.f32 %v8177_v17, %v7240_v53  ;;  %v7245_v10 = vclamps-f32 %v6658_v7, 1.0  ;;  %v6656_v5 = vadd.f32 %v12199_v31, %v6620_v58  ;;  %v6623_v9 = vmul.f32 %v7911_v20, %v12196_v4  ;;  %v8187_v58 = vld [vmem:[%s8291_s14 + $0xc0] sm:$0xff] }
 0x723   : > { %v6540_v62 = vpop.f32.mrf.mxu0 }
 0x724   : > { %6781 = vst.msk [vmem:[%s12211_s15 + $0x68] sm:$0xff] %vm477_vm0, %v6749_v16  ;;  %v6754_v36 = vadd.f32 %v8178_v61, %v7245_v10  ;;  %v7243_v43 = vclamps-f32 %v6656_v5, 1.0  ;;  %v6659_v23 = vadd.f32 %v12199_v31, %v6623_v9  ;;  %v6621_v34 = vmul.f32 %v12196_v4, %v6540_v62  ;;  %v8188_v9 = vld [vmem:[%s8291_s14 + $0xd8] sm:$0xff] }
 0x725   : > { %v7914_v3 = vpop.f32.mrf.mxu0 }
 0x726   : > { %6786 = vst.msk [vmem:[%s12211_s15 + $0x90] sm:$0xff] %vm477_vm0, %v6754_v36  ;;  %v6752_v49 = vadd.f32 %v8179_v35, %v7243_v43  ;;  %v7246_v26 = vclamps-f32 %v6659_v23, 1.0  ;;  %v6657_v33 = vadd.f32 %v12199_v31, %v6621_v34  ;;  %v6626_v15 = vmul.f32 %v7914_v3, %v12196_v4  ;;  %v8189_v34 = vld [vmem:[%s8291_s14 + $0xc8] sm:$0xff] }
 0x727   : > { %v6553_v24 = vpop.f32.mrf.mxu0 }
 0x728   : > { %6784 = vst.msk [vmem:[%s12211_s15 + $0x80] sm:$0xff] %vm477_vm0, %v6752_v49  ;;  %v6755_v45 = vadd.f32 %v8180_v25, %v7246_v26  ;;  %v7244_v59 = vclamps-f32 %v6657_v33, 1.0  ;;  %v6662_v44 = vadd.f32 %v12199_v31, %v6626_v15  ;;  %v6624_v55 = vmul.f32 %v12196_v4, %v6553_v24  ;;  %v8190_v15 = vld [vmem:[%s8291_s14 + $0xf0] sm:$0xff] }
 0x729   : > { %v7915_v37 = vpop.f32.mrf.mxu0 }
 0x72a   : > { %6787 = vst.msk [vmem:[%s12211_s15 + $0x98] sm:$0xff] %vm477_vm0, %v6755_v45  ;;  %v6753_v41 = vadd.f32 %v8181_v6, %v7244_v59  ;;  %v7249_v40 = vclamps-f32 %v6662_v44, 1.0  ;;  %v6660_v29 = vadd.f32 %v12199_v31, %v6624_v55  ;;  %v6627_v27 = vmul.f32 %v7915_v37, %v12196_v4  ;;  %v8191_v44 = vld [vmem:[%s8291_s14 + $0xe0] sm:$0xff] }
 0x72b   : > { %v6556_v60 = vpop.f32.mrf.mxu0 }
 0x72c   : > { %6785 = vst.msk [vmem:[%s12211_s15 + $0x88] sm:$0xff] %vm477_vm0, %v6753_v41  ;;  %v6758_v39 = vadd.f32 %v8182_v38, %v7249_v40  ;;  %v7247_v19 = vclamps-f32 %v6660_v29, 1.0  ;;  %v6663_v48 = vadd.f32 %v12199_v31, %v6627_v27  ;;  %v6625_v56 = vmul.f32 %v12196_v4, %v6556_v60  ;;  %v8192_v41 = vld [vmem:[%s8291_s14 + $0xf8] sm:$0xff]  ;;  %v8193_v27 = vld [vmem:[%s8291_s14 + $0xe8] sm:$0xff] }
 0x72d   : > { %v7918_v47 = vpop.f32.mrf.mxu0 }
 0x72e   : > { %6790 = vst.msk [vmem:[%s12211_s15 + $0xb0] sm:$0xff] %vm477_vm0, %v6758_v39  ;;  %v6756_v42 = vadd.f32 %v8183_v28, %v7247_v19  ;;  %v7250_v30 = vclamps-f32 %v6663_v48, 1.0  ;;  %v6661_v8 = vadd.f32 %v12199_v31, %v6625_v56  ;;  %v6630_v13 = vmul.f32 %v7918_v47, %v12196_v4 }
 0x72f   : > { %v6569_v18 = vpop.f32.mrf.mxu0 }
 0x730   : > { %6788 = vst.msk [vmem:[%s12211_s15 + $0xa0] sm:$0xff] %vm477_vm0, %v6756_v42  ;;  %v6759_v14 = vadd.f32 %v8184_v22, %v7250_v30  ;;  %v7248_v11 = vclamps-f32 %v6661_v8, 1.0  ;;  %v6666_v51 = vadd.f32 %v12199_v31, %v6630_v13  ;;  %v6628_v2 = vmul.f32 %v12196_v4, %v6569_v18 }
 0x731   : > { %v7919_v32 = vpop.f32.mrf.mxu0 }
 0x732   : > { %6791 = vst.msk [vmem:[%s12211_s15 + $0xb8] sm:$0xff] %vm477_vm0, %v6759_v14  ;;  %v6757_v52 = vadd.f32 %v8185_v54, %v7248_v11  ;;  %v7253_v0 = vclamps-f32 %v6666_v51, 1.0  ;;  %v6664_v63 = vadd.f32 %v12199_v31, %v6628_v2  ;;  %v6631_v21 = vmul.f32 %v7919_v32, %v12196_v4 }
 0x733   : > { %v6572_v57 = vpop.f32.mrf.mxu0 }
 0x734   : > { %6789 = vst.msk [vmem:[%s12211_s15 + $0xa8] sm:$0xff] %vm477_vm0, %v6757_v52  ;;  %v6762_v12 = vadd.f32 %v8186_v1, %v7253_v0  ;;  %v7251_v46 = vclamps-f32 %v6664_v63, 1.0  ;;  %v6667_v50 = vadd.f32 %v12199_v31, %v6631_v21  ;;  %v6629_v53 = vmul.f32 %v12196_v4, %v6572_v57 }
 0x735   : > { %v7922_v7 = vpop.f32.mrf.mxu0 }
 0x736   : > { %6794 = vst.msk [vmem:[%s12211_s15 + $0xd0] sm:$0xff] %vm477_vm0, %v6762_v12  ;;  %v6760_v20 = vadd.f32 %v8187_v58, %v7251_v46  ;;  %v7254_v17 = vclamps-f32 %v6667_v50, 1.0  ;;  %v6665_v16 = vadd.f32 %v12199_v31, %v6629_v53  ;;  %v6634_v10 = vmul.f32 %v7922_v7, %v12196_v4 }
 0x737   : > { %v6585_v5 = vpop.f32.mrf.mxu0 }
 0x738   : > { %6792 = vst.msk [vmem:[%s12211_s15 + $0xc0] sm:$0xff] %vm477_vm0, %v6760_v20  ;;  %v6763_v62 = vadd.f32 %v8188_v9, %v7254_v17  ;;  %v7252_v61 = vclamps-f32 %v6665_v16, 1.0  ;;  %v6670_v36 = vadd.f32 %v12199_v31, %v6634_v10  ;;  %v6632_v43 = vmul.f32 %v12196_v4, %v6585_v5 }
 0x739   : > { %v7923_v23 = vpop.f32.mrf.mxu0 }
 0x73a   : > { %6795 = vst.msk [vmem:[%s12211_s15 + $0xd8] sm:$0xff] %vm477_vm0, %v6763_v62  ;;  %v6761_v3 = vadd.f32 %v8189_v34, %v7252_v61  ;;  %v7257_v35 = vclamps-f32 %v6670_v36, 1.0  ;;  %v6668_v49 = vadd.f32 %v12199_v31, %v6632_v43  ;;  %v6635_v26 = vmul.f32 %v7923_v23, %v12196_v4 }
 0x73b   : > { %v6588_v33 = vpop.f32.mrf.mxu0 }
 0x73c   : > { %6793 = vst.msk [vmem:[%s12211_s15 + $0xc8] sm:$0xff] %vm477_vm0, %v6761_v3  ;;  %v6766_v24 = vadd.f32 %v8190_v15, %v7257_v35  ;;  %v7255_v25 = vclamps-f32 %v6668_v49, 1.0  ;;  %v6671_v45 = vadd.f32 %v12199_v31, %v6635_v26  ;;  %v6633_v59 = vmul.f32 %v12196_v4, %v6588_v33 }
 0x73e   : > { %6798 = vst.msk [vmem:[%s12211_s15 + $0xf0] sm:$0xff] %vm477_vm0, %v6766_v24  ;;  %v6764_v55 = vadd.f32 %v8191_v44, %v7255_v25  ;;  %v7258_v37 = vclamps-f32 %v6671_v45, 1.0  ;;  %v6669_v6 = vadd.f32 %v12199_v31, %v6633_v59 }
 0x740   : > { %6796 = vst.msk [vmem:[%s12211_s15 + $0xe0] sm:$0xff] %vm477_vm0, %v6764_v55  ;;  %v6767_v40 = vadd.f32 %v8192_v41, %v7258_v37  ;;  %v7256_v29 = vclamps-f32 %v6669_v6, 1.0 }
 0x742   : > { %6799 = vst.msk [vmem:[%s12211_s15 + $0xf8] sm:$0xff] %vm477_vm0, %v6767_v40  ;;  %v6765_v60 = vadd.f32 %v8193_v27, %v7256_v29 }
 0x744   : > { %6797 = vst.msk [vmem:[%s12211_s15 + $0xe8] sm:$0xff] %vm477_vm0, %v6765_v60 }
 0x745 PF: > { %s23_s25 = sadd.s32 1, %s8200_s25  }
 0x746   : > { %p20_p4 = scmp.ge.s32.totalorder %s23_s25, 4  }
 0x748   :  { %22 = sbr.rel (!%p20_p4) target bundleno = 1 (0x1), region = 110 }

</bundles_post_ra>
